<compile_context>
chip_gen: v6e
topology: v6e:2x2x1
jax: 0.10.0
libtpu: 0.0.40
codegen_flags: <defaults>
</compile_context>

<pallas_src>
import jax
import jax.numpy as jnp
from jax.experimental import pallas as pl
from jax.experimental.pallas import tpu as pltpu

C_IN = 1536   # hardcoded in the module's __init__ (Conv2d(1536, 768, 1))
C_OUT = 768


def _fused_conv1x1_relu_kernel(x_ref, w_ref, b_ref, o_ref):
    """out = relu(W @ x + b) in a single MXU pass per tile (no K loop).

    x_ref : (1, C_in, ts)  f32   one batch, one spatial tile, NCHW order
    w_ref : (C_out, C_in)  bf16  full weight, VMEM-resident across the grid
    b_ref : (C_out, 1)     f32   broadcast over the lane (spatial) axis
    o_ref : (1, C_out, ts) f32
    """
    x = x_ref[0].astype(jnp.bfloat16)                                  # (C_in, ts)
    acc = jnp.dot(w_ref[...], x, preferred_element_type=jnp.float32)   # (C_out, ts)
    o_ref[0] = jnp.maximum(acc + b_ref[...], 0.0).astype(o_ref.dtype)


def fused_conv1x1_relu_nchw(x3d, w_bf16, b2d, *, ts):
    """x3d: (N, C_in, HW) f32, w_bf16: (C_out, C_in) bf16, b2d: (C_out, 1) f32."""
    n, c_in, hw = x3d.shape
    c_out = w_bf16.shape[0]
    num_s = pl.cdiv(hw, ts)

    cost = pl.CostEstimate(
        flops=2 * n * hw * c_in * c_out,
        transcendentals=0,
        bytes_accessed=(n * c_in * hw * 4          # X read (f32)
                        + c_out * c_in * 2         # W read (bf16), once
                        + n * c_out * hw * 4),     # O write (f32)
    )

    return pl.pallas_call(
        _fused_conv1x1_relu_kernel,
        out_shape=jax.ShapeDtypeStruct((n, c_out, hw), x3d.dtype),
        grid_spec=pltpu.PrefetchScalarGridSpec(
            num_scalar_prefetch=0,
            grid=(n, num_s),                                            # no reduction axis
            in_specs=[
                pl.BlockSpec((1, c_in, ts), lambda b, s: (b, 0, s)),    # X tile
                pl.BlockSpec((c_out, c_in), lambda b, s: (0, 0)),       # full W, loaded once
                pl.BlockSpec((c_out, 1), lambda b, s: (0, 0)),          # bias, loaded once
            ],
            out_specs=pl.BlockSpec((1, c_out, ts), lambda b, s: (b, 0, s)),
        ),
        compiler_params=pltpu.CompilerParams(
            dimension_semantics=("parallel", "parallel"),
            # Peak ~14 MiB (f32 X/O tiles double-buffered at ts=512 + bf16 W);
            # 32 MiB gives headroom over the v5e 16 MiB scoped default and
            # stays well under v7x's 64 MiB physical VMEM.
            vmem_limit_bytes=32 * 1024 * 1024,
        ),
        cost_estimate=cost,
    )(x3d, w_bf16, b2d)


def fusion_layer_forward(image_features, weight, bias):
    """Mirrors FusionLayer.forward.

    image_features : (N, 1536, H, W)  NCHW, float32
    weight         : (768, 1536, 1, 1)  PyTorch Conv2d weight layout
    bias           : (768,)
    returns        : (N, 768, H, W)  NCHW, float32
    """
    n, c_in, h, w = image_features.shape
    assert c_in == C_IN
    hw = h * w

    # Free reshapes only (contiguous), no layout transposes.
    x3d = image_features.reshape(n, c_in, hw)
    w2d = weight.reshape(C_OUT, C_IN).astype(jnp.bfloat16)   # (C_out, C_in), PyTorch order
    b2d = bias.astype(jnp.float32).reshape(C_OUT, 1)

    # Spatial (lane) tile: full extent for tiny H*W (block == full dim keeps the
    # (8,128) rule satisfied), otherwise a lane-aligned multiple of 128 up to
    # 512 so output stores are unmasked `vst`.  Ragged tails are handled by the
    # pl.cdiv grid + Pallas block padding, so no divisibility asserts.
    if hw < 128:
        ts = hw
    else:
        ts = min(512, (hw // 128) * 128)

    out3d = fused_conv1x1_relu_nchw(x3d, w2d, b2d, ts=ts)    # (N, C_out, HW)
    return out3d.reshape(n, C_OUT, h, w)


if __name__ == "__main__":
    key = jax.random.PRNGKey(0)
    k_x, k_w, k_b = jax.random.split(key, 3)

    # Small shapes consistent with the module: batch=2, spatial=8x8,
    # channels fixed by the module at 1536 -> 768.
    batch, hh, ww = 2, 8, 8
    x = jax.random.normal(k_x, (batch, C_IN, hh, ww), dtype=jnp.float32)

    # Deterministic synthetic Conv2d-shaped parameters, ~ 1/sqrt(fan_in).
    fan_in = float(C_IN)
    weight = jax.random.normal(k_w, (C_OUT, C_IN, 1, 1), dtype=jnp.float32) / jnp.sqrt(fan_in)
    bias = jax.random.normal(k_b, (C_OUT,), dtype=jnp.float32) * 0.01

    out = fusion_layer_forward(x, weight, bias)
    out = jax.block_until_ready(out)

    # Reference with the same bf16-operand / f32-accumulate numerics.
    w_bf = weight.reshape(C_OUT, C_IN).astype(jnp.bfloat16)
    ref = jnp.einsum(
        "oc,nchw->nohw", w_bf, x.astype(jnp.bfloat16),
        preferred_element_type=jnp.float32,
    ) + bias[None, :, None, None]
    ref = jnp.maximum(ref, 0.0)

    assert out.shape == (batch, C_OUT, hh, ww)
    assert jnp.allclose(out, ref, atol=1e-2, rtol=1e-2)

    print("KERNEL_OK")
</pallas_src>

<mosaic_0001>
module attributes {stable_mosaic.version = 11 : i64} {
  func.func @_fused_conv1x1_relu_kernel(%arg0: i32, %arg1: i32, %arg2: memref<1x1536x64xf32, #tpu.memory_space<vmem>>, %arg3: memref<768x1536xbf16, #tpu.memory_space<vmem>>, %arg4: memref<768x1xf32, #tpu.memory_space<vmem>>, %arg5: memref<1x768x64xf32, #tpu.memory_space<vmem>>) attributes {dimension_semantics = [#tpu.dimension_semantics<parallel>, #tpu.dimension_semantics<parallel>], iteration_bounds = array<i64: 2, 1>, scalar_prefetch = 0 : i64, scratch_operands = 0 : i64, tpu.core_type = #tpu.core_type<tc>, window_params = [{transform_indices = @transform_0, window_bounds = array<i64: 1, 1536, 64>}, {pipeline_mode = #tpu.pipeline_mode<synchronous>, transform_indices = @transform_1, window_bounds = array<i64: 768, 1536>}, {pipeline_mode = #tpu.pipeline_mode<synchronous>, transform_indices = @transform_2, window_bounds = array<i64: 768, 1>}, {transform_indices = @transform_3, window_bounds = array<i64: 1, 768, 64>}]} {
    %c0 = arith.constant 0 : index
    %c0_0 = arith.constant 0 : index
    %c0_1 = arith.constant 0 : index
    %0 = vector.load %arg2[%c0, %c0_0, %c0_1] : memref<1x1536x64xf32, #tpu.memory_space<vmem>>, vector<1x1536x64xf32>
    %1 = vector.shape_cast %0 : vector<1x1536x64xf32> to vector<1536x64xf32>
    %2 = arith.truncf %1 : vector<1536x64xf32> to vector<1536x64xbf16>
    %c0_2 = arith.constant 0 : index
    %c0_3 = arith.constant 0 : index
    %3 = vector.load %arg3[%c0_2, %c0_3] : memref<768x1536xbf16, #tpu.memory_space<vmem>>, vector<768x1536xbf16>
    %cst = arith.constant dense<0.000000e+00> : vector<768x64xf32>
    %4 = tpu.matmul %3, %2, %cst {dimension_numbers = #tpu.dot_dimension_numbers<[1], [0], [0], [1], [0, 0, 1, 1], [], []>} : vector<768x1536xbf16>, vector<1536x64xbf16>, vector<768x64xf32> -> vector<768x64xf32>
    %c0_4 = arith.constant 0 : index
    %c0_5 = arith.constant 0 : index
    %5 = vector.load %arg4[%c0_4, %c0_5] : memref<768x1xf32, #tpu.memory_space<vmem>>, vector<768x1xf32>
    %6 = vector.broadcast %5 : vector<768x1xf32> to vector<768x64xf32>
    %7 = arith.addf %4, %6 : vector<768x64xf32>
    %cst_6 = arith.constant 0.000000e+00 : f32
    %8 = vector.broadcast %cst_6 : f32 to vector<768x64xf32>
    %9 = arith.maximumf %7, %8 : vector<768x64xf32>
    %c0_7 = arith.constant 0 : index
    %c0_8 = arith.constant 0 : index
    %c0_9 = arith.constant 0 : index
    %10 = vector.load %arg5[%c0_7, %c0_8, %c0_9] : memref<1x768x64xf32, #tpu.memory_space<vmem>>, vector<1x768x64xf32>
    %11 = vector.shape_cast %10 : vector<1x768x64xf32> to vector<768x64xf32>
    %12 = vector.shape_cast %9 : vector<768x64xf32> to vector<1x768x64xf32>
    tpu.vector_store %arg5[%c0_7, %c0_8, %c0_9], %12 {strides = array<i32>} : memref<1x768x64xf32, #tpu.memory_space<vmem>>, vector<1x768x64xf32>,
    return
  }
  func.func @transform_0(%arg0: i32, %arg1: i32) -> (i32, i32, i32) {
    %c0_i32 = arith.constant 0 : i32
    %c0_i32_0 = arith.constant 0 : i32
    return %arg0, %c0_i32, %arg1 : i32, i32, i32
  }
  func.func @transform_1(%arg0: i32, %arg1: i32) -> (i32, i32) {
    %c0_i32 = arith.constant 0 : i32
    %c0_i32_0 = arith.constant 0 : i32
    %c0_i32_1 = arith.constant 0 : i32
    return %c0_i32, %c0_i32_0 : i32, i32
  }
  func.func @transform_2(%arg0: i32, %arg1: i32) -> (i32, i32) {
    %c0_i32 = arith.constant 0 : i32
    %c0_i32_0 = arith.constant 0 : i32
    %c0_i32_1 = arith.constant 0 : i32
    return %c0_i32, %c0_i32_0 : i32, i32
  }
  func.func @transform_3(%arg0: i32, %arg1: i32) -> (i32, i32, i32) {
    %c0_i32 = arith.constant 0 : i32
    %c0_i32_0 = arith.constant 0 : i32
    return %arg0, %c0_i32, %arg1 : i32, i32, i32
  }
}

</mosaic_0001>

<bundles_post_ra>
// kernel: tpu_custom_call.1
= control target key start
LH: loop header
LB: loop body
LE: loop exit
PB: predicated region body
PF: predicated region fallthrough
CT: control target
= control target key end

     0   :  { %s8824_s12 = smov 0   ;;  %s8826_s13 = smov 0   ;;  %s11939_s0 = inlined_call_operand.vmem [shape: f32[2,1536,64], index: 0, kind: input, shape index: {}]   ;;  %s11940_s1 = inlined_call_operand.vmem [shape: bf16[768,1536], index: 1, kind: input, shape index: {}]   ;;  %s11941_s2 = inlined_call_operand.vmem [shape: f32[768,1], index: 2, kind: input, shape index: {}]   ;;  %s11942_s3 = inlined_call_operand.vmem [shape: f32[2,768,64], index: 3, kind: output, shape index: {}]  }
   0x1   :  { %s8828_s14 = smov 0  }
   0x2 LB: > { %s25_s15 = sadd.s32 1, %s8797_s13  ;;  %p7305_p0 = scmp.ge.s32.totalorder %s8801_s14, 1  ;;  %s8801_s14 = sphi %s8828_s14, %s13_s14   ;;  %s8797_s13 = sphi %s8826_s13, %s12141_s13   ;;  %s8793_s12 = sphi %s8824_s12, %s12140_s12  }
   0x3   : > { %p27_p1 = scmp.ge.s32.totalorder %s25_s15, 2  ;;  %p156_p2 = scmp.lt.s32.totalorder %s8801_s14, 3 }
   0x5   : > { %s12143_s15 = smov (%p27_p1, %s25_s15), 0  ;;  %p157_p3 = pnand %p7305_p0, %p156_p2 }
   0x7   : > { %160 = sbr.rel (%p157_p3) target bundleno = 1432 (0x598), region = 32 }
   0xc   : > { %p186_p4 = scmp.lt.s32.totalorder %s8793_s12, 1  ;;  %v11943_v0 = vmov 0   ;;  %v7917_v1 = vld [vmem:[%s11940_s1 + $0x4] ss:$48 sps:$4 sm:$0xff]   ;;  %v7920_v2 = vld [vmem:[%s11940_s1 + $0xc] ss:$48 sps:$4 sm:$0xff]  }
   0xd   : > { %4523 = vmatprep.subr.bf16.mxu0 %v11943_v0  ;;  %4940 = vmatprep.subr.bf16.mxu1 %v11943_v0  ;;  %vm7121_vm0 = vcmask 523264  }
   0xe   : > { %s12145_s12 = smov (!%p186_p4, %s8793_s12), 1  ;;  %7913 = vset.pattern.permute.xlu0 %v11943_v0  ;;  %7914 = vset.pattern.permute.xlu1 %v11943_v0 }
   0xf   : > { %4555 = vmatprep.mubr.bf16.mxu0 %v7917_v1  ;;  %s7886_s20 = smul.u32 1536, %s12145_s12  ;;  %4972 = vmatprep.mubr.bf16.mxu1 %v7920_v2 }
  0x10   : > { %s7887_s25 = smul.u32 768, %s12145_s12 }
  0x11   : > { %s8858_s23 = scalar_lea.vmem %s11939_s0, %s7886_s20 }
  0x12   : > { %v217_v3 = vld [vmem:[%s8858_s23 + $0x70] sm:$0xff]  ;;  %v218_v4 = vld [vmem:[%s8858_s23 + $0x78] sm:$0xff]  ;;  %v215_v8 = vld [vmem:[%s8858_s23 + $0x60] sm:$0xff]  ;;  %s11371_s28 = scalar_lea.vmem %s11942_s3, %s7887_s25 }
  0x13   : > { %v249_v5 = vld [vmem:[%s8858_s23 + $0x170] sm:$0xff]  ;;  %v402_v6 = vpack.c.bf16 %v218_v4, %v217_v3  ;;  %v250_v7 = vld [vmem:[%s8858_s23 + $0x178] sm:$0xff]  ;;  %v216_v9 = vld [vmem:[%s8858_s23 + $0x68] sm:$0xff] }
  0x14   : > { %v418_v10 = vpack.c.bf16 %v250_v7, %v249_v5  ;;  %v247_v11 = vld [vmem:[%s8858_s23 + $0x160] sm:$0xff]  ;;  %v248_v12 = vld [vmem:[%s8858_s23 + $0x168] sm:$0xff]  ;;  %v401_v13 = vpack.c.bf16 %v216_v9, %v215_v8  ;;  %v213_v15 = vld [vmem:[%s8858_s23 + $0x50] sm:$0xff] }
  0x15   : > { %4524 = vmatpush1.bf16.msra.mxu0 %v402_v6  ;;  %v417_v14 = vpack.c.bf16 %v248_v12, %v247_v11  ;;  %v214_v16 = vld [vmem:[%s8858_s23 + $0x58] sm:$0xff]  ;;  %v245_v17 = vld [vmem:[%s8858_s23 + $0x150] sm:$0xff]  ;;  %v211_v21 = vld [vmem:[%s8858_s23 + $0x40] sm:$0xff] }
  0x16   : > { %4941 = vmatpush1.bf16.msra.mxu1 %v418_v10  ;;  %4525 = vmatprep.subr.bf16.mxu0 %v11943_v0  ;;  %v246_v18 = vld [vmem:[%s8858_s23 + $0x158] sm:$0xff]  ;;  %v400_v19 = vpack.c.bf16 %v214_v16, %v213_v15  ;;  %v212_v22 = vld [vmem:[%s8858_s23 + $0x48] sm:$0xff]  ;;  %v243_v23 = vld [vmem:[%s8858_s23 + $0x140] sm:$0xff] }
  0x17   : > { %4942 = vmatprep.subr.bf16.mxu1 %v11943_v0  ;;  %v416_v20 = vpack.c.bf16 %v246_v18, %v245_v17  ;;  %v244_v24 = vld [vmem:[%s8858_s23 + $0x148] sm:$0xff]  ;;  %v399_v25 = vpack.c.bf16 %v212_v22, %v211_v21  ;;  %v209_v27 = vld [vmem:[%s8858_s23 + $0x30] sm:$0xff]  ;;  %v210_v28 = vld [vmem:[%s8858_s23 + $0x38] sm:$0xff] }
  0x18   : > { %v415_v26 = vpack.c.bf16 %v244_v24, %v243_v23  ;;  %v241_v29 = vld [vmem:[%s8858_s23 + $0x130] sm:$0xff]  ;;  %v242_v30 = vld [vmem:[%s8858_s23 + $0x138] sm:$0xff]  ;;  %v398_v31 = vpack.c.bf16 %v210_v28, %v209_v27  ;;  %v207_v33 = vld [vmem:[%s8858_s23 + $0x20] sm:$0xff] }
  0x19   : > { %4526 = vmatpush1.bf16.msra.mxu0 %v401_v13  ;;  %v414_v32 = vpack.c.bf16 %v242_v30, %v241_v29  ;;  %v208_v34 = vld [vmem:[%s8858_s23 + $0x28] sm:$0xff]  ;;  %v239_v35 = vld [vmem:[%s8858_s23 + $0x120] sm:$0xff]  ;;  %v205_v39 = vld [vmem:[%s8858_s23 + $0x10] sm:$0xff] }
  0x1a   : > { %4943 = vmatpush1.bf16.msra.mxu1 %v417_v14  ;;  %4527 = vmatprep.subr.bf16.mxu0 %v11943_v0  ;;  %v240_v36 = vld [vmem:[%s8858_s23 + $0x128] sm:$0xff]  ;;  %v397_v37 = vpack.c.bf16 %v208_v34, %v207_v33  ;;  %v206_v40 = vld [vmem:[%s8858_s23 + $0x18] sm:$0xff]  ;;  %v237_v41 = vld [vmem:[%s8858_s23 + $0x110] sm:$0xff] }
  0x1b   : > { %4944 = vmatprep.subr.bf16.mxu1 %v11943_v0  ;;  %v413_v38 = vpack.c.bf16 %v240_v36, %v239_v35  ;;  %v238_v42 = vld [vmem:[%s8858_s23 + $0x118] sm:$0xff]  ;;  %v396_v43 = vpack.c.bf16 %v206_v40, %v205_v39  ;;  %v203_v44 = vld [vmem:[%s8858_s23] sm:$0xff]  ;;  %v204_v46 = vld [vmem:[%s8858_s23 + $0x8] sm:$0xff] }
  0x1c   : > { %v412_v45 = vpack.c.bf16 %v238_v42, %v237_v41  ;;  %v235_v47 = vld [vmem:[%s8858_s23 + $0x100] sm:$0xff]  ;;  %v236_v48 = vld [vmem:[%s8858_s23 + $0x108] sm:$0xff]  ;;  %v395_v49 = vpack.c.bf16 %v204_v46, %v203_v44  ;;  %v233_v50 = vld [vmem:[%s8858_s23 + $0xf0] sm:$0xff] }
  0x1d   : > { %4528 = vmatpush1.bf16.msra.mxu0 %v400_v19  ;;  %v411_v51 = vpack.c.bf16 %v236_v48, %v235_v47  ;;  %v234_v52 = vld [vmem:[%s8858_s23 + $0xf8] sm:$0xff]  ;;  %v265_v53 = vld [vmem:[%s8858_s23 + $0x1f0] sm:$0xff]  ;;  %v231_v57 = vld [vmem:[%s8858_s23 + $0xe0] sm:$0xff] }
  0x1e   : > { %4945 = vmatpush1.bf16.msra.mxu1 %v416_v20  ;;  %4529 = vmatprep.subr.bf16.mxu0 %v11943_v0  ;;  %v266_v54 = vld [vmem:[%s8858_s23 + $0x1f8] sm:$0xff]  ;;  %v410_v55 = vpack.c.bf16 %v234_v52, %v233_v50  ;;  %v232_v58 = vld [vmem:[%s8858_s23 + $0xe8] sm:$0xff]  ;;  %v263_v59 = vld [vmem:[%s8858_s23 + $0x1e0] sm:$0xff] }
  0x1f   : > { %4946 = vmatprep.subr.bf16.mxu1 %v11943_v0  ;;  %v426_v56 = vpack.c.bf16 %v266_v54, %v265_v53  ;;  %v264_v60 = vld [vmem:[%s8858_s23 + $0x1e8] sm:$0xff]  ;;  %v409_v61 = vpack.c.bf16 %v232_v58, %v231_v57  ;;  %v229_v63 = vld [vmem:[%s8858_s23 + $0xd0] sm:$0xff]  ;;  %v230_v1 = vld [vmem:[%s8858_s23 + $0xd8] sm:$0xff] }
  0x20   : > { %v425_v62 = vpack.c.bf16 %v264_v60, %v263_v59  ;;  %v261_v2 = vld [vmem:[%s8858_s23 + $0x1d0] sm:$0xff]  ;;  %v262_v3 = vld [vmem:[%s8858_s23 + $0x1d8] sm:$0xff]  ;;  %v408_v4 = vpack.c.bf16 %v230_v1, %v229_v63  ;;  %v227_v5 = vld [vmem:[%s8858_s23 + $0xc0] sm:$0xff] }
  0x21   : > { %4530 = vmatpush1.bf16.msra.mxu0 %v399_v25  ;;  %v424_v6 = vpack.c.bf16 %v262_v3, %v261_v2  ;;  %v228_v7 = vld [vmem:[%s8858_s23 + $0xc8] sm:$0xff]  ;;  %v259_v8 = vld [vmem:[%s8858_s23 + $0x1c0] sm:$0xff]  ;;  %v225_v13 = vld [vmem:[%s8858_s23 + $0xb0] sm:$0xff] }
  0x22   : > { %4947 = vmatpush1.bf16.msra.mxu1 %v415_v26  ;;  %4531 = vmatprep.subr.bf16.mxu0 %v11943_v0  ;;  %v260_v9 = vld [vmem:[%s8858_s23 + $0x1c8] sm:$0xff]  ;;  %v1067_v10 = vld [vmem:[%s11941_s2] sm:$0xff]  ;;  %v407_v11 = vpack.c.bf16 %v228_v7, %v227_v5  ;;  %v226_v14 = vld [vmem:[%s8858_s23 + $0xb8] sm:$0xff] }
  0x23   : > { %4948 = vmatprep.subr.bf16.mxu1 %v11943_v0  ;;  %1165 = vperm.xlu0 %7913, %v1067_v10   ;;  %v423_v12 = vpack.c.bf16 %v260_v9, %v259_v8  ;;  %v257_v15 = vld [vmem:[%s8858_s23 + $0x1b0] sm:$0xff]  ;;  %v258_v16 = vld [vmem:[%s8858_s23 + $0x1b8] sm:$0xff]  ;;  %v1068_v17 = vld [vmem:[%s11941_s2 + $0x8] sm:$0xff]  ;;  %v406_v19 = vpack.c.bf16 %v226_v14, %v225_v13 }
  0x24   : > { %v223_v18 = vld [vmem:[%s8858_s23 + $0xa0] sm:$0xff]  ;;  %v1069_v20 = vld [vmem:[%s11941_s2 + $0x10] sm:$0xff]  ;;  %v422_v21 = vpack.c.bf16 %v258_v16, %v257_v15  ;;  %v224_v22 = vld [vmem:[%s8858_s23 + $0xa8] sm:$0xff] }
  0x25   : > { %4532 = vmatpush1.bf16.msra.mxu0 %v398_v31  ;;  %v255_v23 = vld [vmem:[%s8858_s23 + $0x1a0] sm:$0xff]  ;;  %v256_v24 = vld [vmem:[%s8858_s23 + $0x1a8] sm:$0xff]  ;;  %1175 = vperm.xlu1 %7914, %v1069_v20   ;;  %v1070_v25 = vld [vmem:[%s11941_s2 + $0x18] sm:$0xff]  ;;  %v405_v27 = vpack.c.bf16 %v224_v22, %v223_v18 }
  0x26   : > { %4949 = vmatpush1.bf16.msra.mxu1 %v414_v32  ;;  %4533 = vmatprep.subr.bf16.mxu0 %v11943_v0  ;;  %v1071_v26 = vld [vmem:[%s11941_s2 + $0x20] sm:$0xff]  ;;  %v421_v28 = vpack.c.bf16 %v256_v24, %v255_v23  ;;  %v221_v29 = vld [vmem:[%s8858_s23 + $0x90] sm:$0xff]  ;;  %v222_v30 = vld [vmem:[%s8858_s23 + $0x98] sm:$0xff] }
  0x27   : > { %4950 = vmatprep.subr.bf16.mxu1 %v11943_v0  ;;  %1170 = vperm.xlu0 %7913, %v1068_v17   ;;  %v253_v31 = vld [vmem:[%s8858_s23 + $0x190] sm:$0xff]  ;;  %v254_v32 = vld [vmem:[%s8858_s23 + $0x198] sm:$0xff]  ;;  %v1072_v34 = vld [vmem:[%s11941_s2 + $0x28] sm:$0xff]  ;;  %v404_v35 = vpack.c.bf16 %v222_v30, %v221_v29 }
  0x28   : > { %v1073_v33 = vld [vmem:[%s11941_s2 + $0x30] sm:$0xff]  ;;  %v420_v36 = vpack.c.bf16 %v254_v32, %v253_v31  ;;  %v251_v39 = vld [vmem:[%s8858_s23 + $0x180] sm:$0xff]  ;;  %v252_v40 = vld [vmem:[%s8858_s23 + $0x188] sm:$0xff] }
  0x29   : > { %4534 = vmatpush1.bf16.msra.mxu0 %v397_v37  ;;  %1180 = vperm.xlu1 %7914, %v1070_v25   ;;  %v219_v37 = vld [vmem:[%s8858_s23 + $0x80] sm:$0xff]  ;;  %v1074_v41 = vld [vmem:[%s11941_s2 + $0x38] sm:$0xff]  ;;  %v419_v44 = vpack.c.bf16 %v252_v40, %v251_v39  ;;  %v281_v46 = vld [vmem:[%s8858_s23 + $0x270] sm:$0xff] }
  0x2a   : > { %4951 = vmatpush1.bf16.msra.mxu1 %v413_v38  ;;  %4535 = vmatprep.subr.bf16.mxu0 %v11943_v0  ;;  %v220_v38 = vld [vmem:[%s8858_s23 + $0x88] sm:$0xff]  ;;  %v1075_v42 = vld [vmem:[%s11941_s2 + $0x40] sm:$0xff]  ;;  %v282_v47 = vld [vmem:[%s8858_s23 + $0x278] sm:$0xff] }
  0x2b   : > { %4952 = vmatprep.subr.bf16.mxu1 %v11943_v0  ;;  %1185 = vperm.xlu0 %7913, %v1071_v26   ;;  %v7918_v48 = vld [vmem:[%s11940_s1 + $0x8] ss:$48 sps:$4 sm:$0xff]   ;;  %v7921_v52 = vld [vmem:[%s11940_s1 + $0x64] ss:$48 sps:$4 sm:$0xff]   ;;  %v434_v54 = vpack.c.bf16 %v282_v47, %v281_v46  ;;  %v7925_v63 = vld [vmem:[%s11940_s1 + $0x60] ss:$48 sps:$4 sm:$0xff]  }
  0x2c   : > { %v314_v50 = vld [vmem:[%s8858_s23 + $0x378] sm:$0xff]  ;;  %v1076_v53 = vld [vmem:[%s11941_s2 + $0x48] sm:$0xff]  ;;  %v279_v57 = vld [vmem:[%s8858_s23 + $0x260] sm:$0xff] }
  0x2d   : > { %4536 = vmatpush1.bf16.msra.mxu0 %v396_v43  ;;  %1190 = vperm.xlu1 %7914, %v1072_v34   ;;  %v403_v43 = vpack.c.bf16 %v220_v38, %v219_v37  ;;  %v280_v58 = vld [vmem:[%s8858_s23 + $0x268] sm:$0xff]  ;;  %v311_v59 = vld [vmem:[%s8858_s23 + $0x360] sm:$0xff]  ;;  %v277_v5 = vld [vmem:[%s8858_s23 + $0x250] sm:$0xff] }
  0x2e   : > { %4953 = vmatpush1.bf16.msra.mxu1 %v412_v45  ;;  %4537 = vmatprep.subr.bf16.mxu0 %v11943_v0  ;;  %v7915_v45 = vld [vmem:[%s11940_s1] ss:$48 sps:$4 sm:$0xff]   ;;  %v312_v60 = vld [vmem:[%s8858_s23 + $0x368] sm:$0xff]  ;;  %v310_v8 = vld [vmem:[%s8858_s23 + $0x358] sm:$0xff] }
  0x2f   : > { %4954 = vmatprep.subr.bf16.mxu1 %v11943_v0  ;;  %1195 = vperm.xlu0 %7913, %v1073_v33   ;;  %v449_v1 = vpack.c.bf16 %v312_v60, %v311_v59  ;;  %v1079_v2 = vld [vmem:[%s11941_s2 + $0x60] sm:$0xff]  ;;  %v7926_v3 = vld [vmem:[%s11940_s1 + $0x68] ss:$48 sps:$4 sm:$0xff]   ;;  %v309_v7 = vld [vmem:[%s8858_s23 + $0x350] sm:$0xff] }
  0x30   : > { %v1080_v9 = vld [vmem:[%s11941_s2 + $0x68] sm:$0xff]  ;;  %v448_v14 = vpack.c.bf16 %v310_v8, %v309_v7  ;;  %v307_v15 = vld [vmem:[%s8858_s23 + $0x340] sm:$0xff]  ;;  %v1081_v17 = vld [vmem:[%s11941_s2 + $0x70] sm:$0xff] }
  0x31   : > { %4538 = vmatpush1.bf16.msra.mxu0 %v395_v49  ;;  %v313_v49 = vld [vmem:[%s8858_s23 + $0x370] sm:$0xff]  ;;  %1200 = vperm.xlu1 %7914, %v1074_v41   ;;  %v7929_v10 = vld [vmem:[%s11940_s1 + $0xcc] ss:$48 sps:$4 sm:$0xff]   ;;  %v7932_v22 = vld [vmem:[%s11940_s1 + $0xc8] ss:$48 sps:$4 sm:$0xff]  }
  0x32   : > { %4955 = vmatpush1.bf16.msra.mxu1 %v411_v51  ;;  %4539 = vmatprep.subr.bf16.mxu0 %v11943_v0  ;;  %v1077_v51 = vld [vmem:[%s11941_s2 + $0x50] sm:$0xff]  ;;  %v276_v13 = vld [vmem:[%s8858_s23 + $0x248] sm:$0xff]  ;;  %v274_v25 = vld [vmem:[%s8858_s23 + $0x238] sm:$0xff] }
  0x33   : > { %4956 = vmatprep.subr.bf16.mxu1 %v11943_v0  ;;  %1205 = vperm.xlu0 %7913, %v1075_v42   ;;  %v308_v16 = vld [vmem:[%s8858_s23 + $0x348] sm:$0xff]  ;;  %v7931_v18 = vld [vmem:[%s11940_s1 + $0xc0] ss:$48 sps:$4 sm:$0xff]   ;;  %v7933_v23 = vld [vmem:[%s11940_s1 + $0x124] ss:$48 sps:$4 sm:$0xff]  }
  0x34   : > { %v273_v20 = vld [vmem:[%s8858_s23 + $0x230] sm:$0xff]  ;;  %v447_v24 = vpack.c.bf16 %v308_v16, %v307_v15  ;;  %v7935_v26 = vld [vmem:[%s11940_s1 + $0x12c] ss:$48 sps:$4 sm:$0xff]   ;;  %v271_v29 = vld [vmem:[%s8858_s23 + $0x220] sm:$0xff] }
  0x35   : > { %4540 = vmatpush2.bf16.msra.mxu0 %v410_v55  ;;  %v7923_v55 = vld [vmem:[%s11940_s1 + $0x6c] ss:$48 sps:$4 sm:$0xff]   ;;  %1210 = vperm.xlu1 %7914, %v1076_v53   ;;  %v430_v31 = vpack.c.bf16 %v274_v25, %v273_v20  ;;  %v303_v32 = vld [vmem:[%s8858_s23 + $0x320] sm:$0xff]  ;;  %v269_v39 = vld [vmem:[%s8858_s23 + $0x210] sm:$0xff] }
  0x36   : > { %4957 = vmatpush2.bf16.msra.mxu1 %v426_v56  ;;  %4541 = vmatprep.subr.bf16.mxu0 %v11943_v0  ;;  %v450_v56 = vpack.c.bf16 %v314_v50, %v313_v49  ;;  %v272_v30 = vld [vmem:[%s8858_s23 + $0x228] sm:$0xff]  ;;  %v7939_v41 = vld [vmem:[%s11940_s1 + $0x184] ss:$48 sps:$4 sm:$0xff]   ;;  %v302_v46 = vld [vmem:[%s8858_s23 + $0x318] sm:$0xff] }
  0x37   : > { %4958 = vmatprep.subr.bf16.mxu1 %v11943_v0  ;;  %1215 = vperm.xlu0 %7913, %v1077_v51   ;;  %v304_v34 = vld [vmem:[%s8858_s23 + $0x328] sm:$0xff]  ;;  %v429_v37 = vpack.c.bf16 %v272_v30, %v271_v29  ;;  %v1087_v51 = vld [vmem:[%s11941_s2 + $0xa0] sm:$0xff]  ;;  %v1093_v7 = vld [vmem:[%s11941_s2 + $0xd0] sm:$0xff] }
  0x38   : > { %v1084_v38 = vld [vmem:[%s11941_s2 + $0x88] sm:$0xff]  ;;  %v445_v42 = vpack.c.bf16 %v304_v34, %v303_v32  ;;  %v1091_v59 = vld [vmem:[%s11941_s2 + $0xc0] sm:$0xff]  ;;  %v1097_v20 = vld [vmem:[%s11941_s2 + $0xf0] sm:$0xff] }
  0x39   : > { %4542 = vmatpush2.bf16.msra.mxu0 %v409_v61  ;;  %v433_v61 = vpack.c.bf16 %v280_v58, %v279_v57  ;;  %v7938_v40 = vld [vmem:[%s11940_s1 + $0x128] ss:$48 sps:$4 sm:$0xff]   ;;  %v7941_v47 = vld [vmem:[%s11940_s1 + $0x18c] ss:$48 sps:$4 sm:$0xff]   ;;  %v7949_v60 = vld [vmem:[%s11940_s1 + $0x1e0] ss:$48 sps:$4 sm:$0xff]  }
  0x3a   : > { %4959 = vmatpush2.bf16.msra.mxu1 %v425_v62  ;;  %4543 = vmatprep.subr.bf16.mxu0 %v11943_v0  ;;  %v1078_v62 = vld [vmem:[%s11941_s2 + $0x58] sm:$0xff]  ;;  %v1088_v53 = vld [vmem:[%s11941_s2 + $0xa8] sm:$0xff]  ;;  %v7955_v8 = vld [vmem:[%s11940_s1 + $0x240] ss:$48 sps:$4 sm:$0xff]  }
  0x3b   : > { %4960 = vmatprep.subr.bf16.mxu1 %v11943_v0  ;;  %1220 = vperm.xlu1 %7914, %v1078_v62   ;;  %v7947_v57 = vld [vmem:[%s11940_s1 + $0x1ec] ss:$48 sps:$4 sm:$0xff]   ;;  %v7951_v62 = vld [vmem:[%s11940_s1 + $0x244] ss:$48 sps:$4 sm:$0xff]   ;;  %v7961_v15 = vld [vmem:[%s11940_s1 + $0x2a0] ss:$48 sps:$4 sm:$0xff]  }
  0x3c   : > { %1225 = vperm.xlu0 %7913, %v1079_v2   ;;  %v1090_v58 = vld [vmem:[%s11941_s2 + $0xb8] sm:$0xff]  ;;  %v267_v2 = vld [vmem:[%s8858_s23 + $0x200] sm:$0xff]  ;;  %v297_v29 = vld [vmem:[%s8858_s23 + $0x2f0] sm:$0xff] }
  0x3d   : > { %4544 = vmatpush2.bf16.msra.mxu0 %v408_v4  ;;  %v7927_v4 = vld [vmem:[%s11940_s1 + $0xc4] ss:$48 sps:$4 sm:$0xff]   ;;  %v7962_v16 = vld [vmem:[%s11940_s1 + $0x2a8] ss:$48 sps:$4 sm:$0xff]  }
  0x3e   : > { %4961 = vmatpush2.bf16.msra.mxu1 %v424_v6  ;;  %4545 = vmatprep.subr.bf16.mxu0 %v11943_v0  ;;  %v278_v6 = vld [vmem:[%s8858_s23 + $0x258] sm:$0xff] }
  0x3f   : > { %4962 = vmatprep.subr.bf16.mxu1 %v11943_v0  ;;  %1230 = vperm.xlu1 %7914, %v1080_v9   ;;  %v7956_v9 = vld [vmem:[%s11940_s1 + $0x248] ss:$48 sps:$4 sm:$0xff]  }
  0x40   : > { %1235 = vperm.xlu0 %7913, %v1081_v17   ;;  %v7963_v17 = vld [vmem:[%s11940_s1 + $0x304] ss:$48 sps:$4 sm:$0xff]   ;;  %v1098_v25 = vld [vmem:[%s11941_s2 + $0xf8] sm:$0xff] }
  0x41   : > { %4546 = vmatpush2.bf16.msra.mxu0 %v407_v11  ;;  %v432_v11 = vpack.c.bf16 %v278_v6, %v277_v5  ;;  %v299_v5 = vld [vmem:[%s8858_s23 + $0x300] sm:$0xff]  ;;  %v300_v6 = vld [vmem:[%s8858_s23 + $0x308] sm:$0xff]  ;;  %v298_v30 = vld [vmem:[%s8858_s23 + $0x2f8] sm:$0xff] }
  0x42   : > { %4963 = vmatpush2.bf16.msra.mxu1 %v423_v12  ;;  %4547 = vmatprep.subr.bf16.mxu0 %v11943_v0  ;;  %v275_v12 = vld [vmem:[%s8858_s23 + $0x240] sm:$0xff]  ;;  %v442_v32 = vpack.c.bf16 %v298_v30, %v297_v29  ;;  %v8022_v30 = vld [vmem:[%s11940_s1 + $0x668] ss:$48 sps:$4 sm:$0xff]  }
  0x43   : > { %4964 = vmatprep.subr.bf16.mxu1 %v11943_v0  ;;  %v8021_v29 = vld [vmem:[%s11940_s1 + $0x660] ss:$48 sps:$4 sm:$0xff]  }
  0x45   : > { %4548 = vmatpush2.bf16.msra.mxu0 %v406_v19  ;;  %v431_v19 = vpack.c.bf16 %v276_v13, %v275_v12  ;;  %v7959_v12 = vld [vmem:[%s11940_s1 + $0x2ac] ss:$48 sps:$4 sm:$0xff]  }
  0x46   : > { %4965 = vmatpush2.bf16.msra.mxu1 %v422_v21  ;;  %4549 = vmatprep.subr.bf16.mxu0 %v11943_v0  ;;  %v1082_v21 = vld [vmem:[%s11941_s2 + $0x78] sm:$0xff] }
  0x47   : > { %4966 = vmatprep.subr.bf16.mxu1 %v11943_v0  ;;  %1240 = vperm.xlu1 %7914, %v1082_v21   ;;  %v1094_v13 = vld [vmem:[%s11941_s2 + $0xd8] sm:$0xff]  ;;  %v7967_v21 = vld [vmem:[%s11940_s1 + $0x300] ss:$48 sps:$4 sm:$0xff]  }
  0x49   : > { %4550 = vmatpush2.bf16.msra.mxu0 %v405_v27  ;;  %v305_v27 = vld [vmem:[%s8858_s23 + $0x330] sm:$0xff] }
  0x4a   : > { %4967 = vmatpush2.bf16.msra.mxu1 %v421_v28  ;;  %4551 = vmatprep.subr.bf16.mxu0 %v11943_v0  ;;  %v306_v28 = vld [vmem:[%s8858_s23 + $0x338] sm:$0xff] }
  0x4b   : > { %4968 = vmatprep.subr.bf16.mxu1 %v11943_v0  ;;  %v446_v33 = vpack.c.bf16 %v306_v28, %v305_v27  ;;  %1250 = vperm.xlu1 %7914, %v1084_v38   ;;  %v7974_v27 = vld [vmem:[%s11940_s1 + $0x368] ss:$48 sps:$4 sm:$0xff]   ;;  %v7975_v28 = vld [vmem:[%s11940_s1 + $0x3c4] ss:$48 sps:$4 sm:$0xff]   ;;  %v7979_v38 = vld [vmem:[%s11940_s1 + $0x3c0] ss:$48 sps:$4 sm:$0xff]  }
  0x4d   : > { %4552 = vmatpush2.bf16.msra.mxu0 %v404_v35  ;;  %v1083_v35 = vld [vmem:[%s11941_s2 + $0x80] sm:$0xff] }
  0x4e   : > { %4969 = vmatpush2.bf16.msra.mxu1 %v420_v36  ;;  %4553 = vmatprep.subr.bf16.mxu0 %v11943_v0  ;;  %v7937_v36 = vld [vmem:[%s11940_s1 + $0x120] ss:$48 sps:$4 sm:$0xff]  }
  0x4f   : > { %4970 = vmatprep.subr.bf16.mxu1 %v11943_v0  ;;  %1245 = vperm.xlu0 %7913, %v1083_v35   ;;  %v1099_v35 = vld [vmem:[%s11941_s2 + $0x100] sm:$0xff] }
  0x51   : > { %4554 = vmatpush2.bf16.msra.mxu0 %v403_v43  ;;  %v1085_v43 = vld [vmem:[%s11941_s2 + $0x90] sm:$0xff] }
  0x52   : > { %4971 = vmatpush2.bf16.msra.mxu1 %v419_v44  ;;  %5357 = vmatprep.subr.bf16.mxu0 %v11943_v0  ;;  %v270_v44 = vld [vmem:[%s8858_s23 + $0x218] sm:$0xff] }
  0x53   : > { %5774 = vmatprep.subr.bf16.mxu1 %v11943_v0  ;;  %v428_v49 = vpack.c.bf16 %v270_v44, %v269_v39  ;;  %1255 = vperm.xlu0 %7913, %v1085_v43   ;;  %v7980_v39 = vld [vmem:[%s11940_s1 + $0x3c8] ss:$48 sps:$4 sm:$0xff]   ;;  %v7985_v44 = vld [vmem:[%s11940_s1 + $0x420] ss:$48 sps:$4 sm:$0xff]  }
  0x54   : > { %4556 = vmatmul.mubr.bf16.vlgmr.msra.gmra.mxu0 %v7915_v45  ;;  %v301_v45 = vld [vmem:[%s8858_s23 + $0x310] sm:$0xff]  ;;  %v1102_v43 = vld [vmem:[%s11941_s2 + $0x118] sm:$0xff] }
  0x55   : > { %4973 = vmatmul.mubr.bf16.vlgmr.msra.gmra.mxu1 %v7918_v48  ;;  %5358 = vmatpush1.bf16.msra.mxu0 %v434_v54  ;;  %v1086_v48 = vld [vmem:[%s11941_s2 + $0x98] sm:$0xff]  ;;  %v444_v50 = vpack.c.bf16 %v302_v46, %v301_v45  ;;  %v7987_v46 = vld [vmem:[%s11940_s1 + $0x484] ss:$48 sps:$4 sm:$0xff]  }
  0x56   : > { %5775 = vmatpush1.bf16.msra.mxu1 %v450_v56  ;;  %4563 = vmatprep.mubr.bf16.mxu0 %v7921_v52  ;;  %v7943_v52 = vld [vmem:[%s11940_s1 + $0x180] ss:$48 sps:$4 sm:$0xff]   ;;  %v7944_v54 = vld [vmem:[%s11940_s1 + $0x188] ss:$48 sps:$4 sm:$0xff]  }
  0x57   : > { %4980 = vmatprep.mubr.bf16.mxu1 %v7923_v55  ;;  %5359 = vmatprep.subr.bf16.mxu0 %v11943_v0  ;;  %v7945_v55 = vld [vmem:[%s11940_s1 + $0x1e4] ss:$48 sps:$4 sm:$0xff]   ;;  %v7986_v45 = vld [vmem:[%s11940_s1 + $0x428] ss:$48 sps:$4 sm:$0xff]  }
  0x58   : > { %5776 = vmatprep.subr.bf16.mxu1 %v11943_v0  ;;  %1260 = vperm.xlu1 %7914, %v1086_v48   ;;  %v1089_v56 = vld [vmem:[%s11941_s2 + $0xb0] sm:$0xff]  ;;  %v7989_v48 = vld [vmem:[%s11940_s1 + $0x48c] ss:$48 sps:$4 sm:$0xff]  }
  0x59   : > { %5360 = vmatpush1.bf16.msra.mxu0 %v433_v61  ;;  %1265 = vperm.xlu0 %7913, %v1087_v51   ;;  %v7950_v61 = vld [vmem:[%s11940_s1 + $0x1e8] ss:$48 sps:$4 sm:$0xff]  }
  0x5a   : > { %5777 = vmatpush1.bf16.msra.mxu1 %v449_v1  ;;  %5361 = vmatprep.subr.bf16.mxu0 %v11943_v0  ;;  %v1092_v1 = vld [vmem:[%s11941_s2 + $0xc8] sm:$0xff] }
  0x5b   : > { %5778 = vmatprep.subr.bf16.mxu1 %v11943_v0  ;;  %v296_v51 = vld [vmem:[%s8858_s23 + $0x2e8] sm:$0xff] }
  0x5c   : > { %4564 = vmatmul.mubr.bf16.gmra.mxu0 %v7925_v63  ;;  %1270 = vperm.xlu1 %7914, %v1088_v53   ;;  %v7953_v63 = vld [vmem:[%s11940_s1 + $0x24c] ss:$48 sps:$4 sm:$0xff]  }
  0x5d   : > { %4981 = vmatmul.mubr.bf16.gmra.mxu1 %v7926_v3  ;;  %4571 = vmatprep.mubr.bf16.mxu0 %v7927_v4  ;;  %v268_v3 = vld [vmem:[%s8858_s23 + $0x208] sm:$0xff] }
  0x5e   : > { %4988 = vmatprep.mubr.bf16.mxu1 %v7929_v10  ;;  %5362 = vmatpush1.bf16.msra.mxu0 %v432_v11  ;;  %v427_v4 = vpack.c.bf16 %v268_v3, %v267_v2  ;;  %v7957_v10 = vld [vmem:[%s11940_s1 + $0x2a4] ss:$48 sps:$4 sm:$0xff]   ;;  %v443_v11 = vpack.c.bf16 %v300_v6, %v299_v5  ;;  %v8001_v3 = vld [vmem:[%s11940_s1 + $0x54c] ss:$48 sps:$4 sm:$0xff]   ;;  %v8003_v5 = vld [vmem:[%s11940_s1 + $0x540] ss:$48 sps:$4 sm:$0xff]  }
  0x5f   : > { %5779 = vmatpush1.bf16.msra.mxu1 %v448_v14  ;;  %5363 = vmatprep.subr.bf16.mxu0 %v11943_v0  ;;  %v1095_v14 = vld [vmem:[%s11941_s2 + $0xe0] sm:$0xff]  ;;  %v8004_v6 = vld [vmem:[%s11940_s1 + $0x548] ss:$48 sps:$4 sm:$0xff]  }
  0x60   : > { %5780 = vmatprep.subr.bf16.mxu1 %v11943_v0  ;;  %1275 = vperm.xlu0 %7913, %v1089_v56   ;;  %v327_v56 = vld [vmem:[%s8858_s23 + $0x3e0] sm:$0xff] }
  0x61   : > { %1280 = vperm.xlu1 %7914, %v1090_v58   ;;  %v1107_v2 = vld [vmem:[%s11941_s2 + $0x140] sm:$0xff] }
  0x62   : > { %5364 = vmatpush1.bf16.msra.mxu0 %v431_v19  ;;  %v1096_v19 = vld [vmem:[%s11941_s2 + $0xe8] sm:$0xff] }
  0x63   : > { %5781 = vmatpush1.bf16.msra.mxu1 %v447_v24  ;;  %5365 = vmatprep.subr.bf16.mxu0 %v11943_v0  ;;  %v7971_v24 = vld [vmem:[%s11940_s1 + $0x36c] ss:$48 sps:$4 sm:$0xff]  }
  0x64   : > { %4572 = vmatmul.mubr.bf16.gmra.mxu0 %v7931_v18  ;;  %5782 = vmatprep.subr.bf16.mxu1 %v11943_v0  ;;  %v7965_v18 = vld [vmem:[%s11940_s1 + $0x30c] ss:$48 sps:$4 sm:$0xff]  }
  0x65   : > { %4989 = vmatmul.mubr.bf16.gmra.mxu1 %v7932_v22  ;;  %4579 = vmatprep.mubr.bf16.mxu0 %v7933_v23  ;;  %v7968_v22 = vld [vmem:[%s11940_s1 + $0x308] ss:$48 sps:$4 sm:$0xff]   ;;  %v7969_v23 = vld [vmem:[%s11940_s1 + $0x364] ss:$48 sps:$4 sm:$0xff]  }
  0x66   : > { %4996 = vmatprep.mubr.bf16.mxu1 %v7935_v26  ;;  %5366 = vmatpush1.bf16.msra.mxu0 %v430_v31  ;;  %v7973_v26 = vld [vmem:[%s11940_s1 + $0x360] ss:$48 sps:$4 sm:$0xff]  }
  0x67   : > { %5783 = vmatpush1.bf16.msra.mxu1 %v446_v33  ;;  %5367 = vmatprep.subr.bf16.mxu0 %v11943_v0  ;;  %v329_v31 = vld [vmem:[%s8858_s23 + $0x3f0] sm:$0xff]  ;;  %v330_v33 = vld [vmem:[%s8858_s23 + $0x3f8] sm:$0xff] }
  0x68   : > { %5784 = vmatprep.subr.bf16.mxu1 %v11943_v0  ;;  %1285 = vperm.xlu0 %7913, %v1091_v59   ;;  %v458_v34 = vpack.c.bf16 %v330_v33, %v329_v31  ;;  %v1105_v59 = vld [vmem:[%s11941_s2 + $0x130] sm:$0xff]  ;;  %v8025_v33 = vld [vmem:[%s11940_s1 + $0x6cc] ss:$48 sps:$4 sm:$0xff]  }
  0x69   : > { %1290 = vperm.xlu1 %7914, %v1092_v1   ;;  %v7999_v1 = vld [vmem:[%s11940_s1 + $0x544] ss:$48 sps:$4 sm:$0xff]  }
  0x6a   : > { %5368 = vmatpush1.bf16.msra.mxu0 %v429_v37  ;;  %v1100_v37 = vld [vmem:[%s11941_s2 + $0x108] sm:$0xff]  ;;  %v8023_v31 = vld [vmem:[%s11940_s1 + $0x6c4] ss:$48 sps:$4 sm:$0xff]  }
  0x6b   : > { %5785 = vmatpush1.bf16.msra.mxu1 %v445_v42  ;;  %5369 = vmatprep.subr.bf16.mxu0 %v11943_v0  ;;  %v7983_v42 = vld [vmem:[%s11940_s1 + $0x42c] ss:$48 sps:$4 sm:$0xff]  }
  0x6c   : > { %4580 = vmatmul.mubr.bf16.gmra.mxu0 %v7937_v36  ;;  %5786 = vmatprep.subr.bf16.mxu1 %v11943_v0  ;;  %v7977_v36 = vld [vmem:[%s11940_s1 + $0x3cc] ss:$48 sps:$4 sm:$0xff]  }
  0x6d   : > { %4997 = vmatmul.mubr.bf16.gmra.mxu1 %v7938_v40  ;;  %4587 = vmatprep.mubr.bf16.mxu0 %v7939_v41  ;;  %v7981_v40 = vld [vmem:[%s11940_s1 + $0x424] ss:$48 sps:$4 sm:$0xff]  }
  0x6e   : > { %5004 = vmatprep.mubr.bf16.mxu1 %v7941_v47  ;;  %5370 = vmatpush1.bf16.msra.mxu0 %v428_v49  ;;  %v1101_v41 = vld [vmem:[%s11941_s2 + $0x110] sm:$0xff]  ;;  %v1103_v47 = vld [vmem:[%s11941_s2 + $0x120] sm:$0xff]  ;;  %v1104_v49 = vld [vmem:[%s11941_s2 + $0x128] sm:$0xff] }
  0x6f   : > { %5787 = vmatpush1.bf16.msra.mxu1 %v444_v50  ;;  %5371 = vmatprep.subr.bf16.mxu0 %v11943_v0  ;;  %v295_v50 = vld [vmem:[%s8858_s23 + $0x2e0] sm:$0xff] }
  0x70   : > { %5788 = vmatprep.subr.bf16.mxu1 %v11943_v0  ;;  %1295 = vperm.xlu0 %7913, %v1093_v7   ;;  %v441_v53 = vpack.c.bf16 %v296_v51, %v295_v50  ;;  %v8005_v7 = vld [vmem:[%s11940_s1 + $0x5a4] ss:$48 sps:$4 sm:$0xff]   ;;  %v8037_v51 = vld [vmem:[%s11940_s1 + $0x78c] ss:$48 sps:$4 sm:$0xff]  }
  0x71   : > { %1300 = vperm.xlu1 %7914, %v1094_v13   ;;  %v8009_v13 = vld [vmem:[%s11940_s1 + $0x5a0] ss:$48 sps:$4 sm:$0xff]  }
  0x72   : > { %5372 = vmatpush1.bf16.msra.mxu0 %v427_v4  ;;  %v1108_v4 = vld [vmem:[%s11941_s2 + $0x148] sm:$0xff]  ;;  %v1119_v50 = vld [vmem:[%s11941_s2 + $0x1a0] sm:$0xff] }
  0x73   : > { %5789 = vmatpush1.bf16.msra.mxu1 %v443_v11  ;;  %5373 = vmatprep.subr.bf16.mxu0 %v11943_v0  ;;  %v293_v11 = vld [vmem:[%s8858_s23 + $0x2d0] sm:$0xff] }
  0x74   : > { %4588 = vmatmul.mubr.bf16.gmra.mxu0 %v7943_v52  ;;  %5790 = vmatprep.subr.bf16.mxu1 %v11943_v0  ;;  %v7991_v52 = vld [vmem:[%s11940_s1 + $0x480] ss:$48 sps:$4 sm:$0xff]  }
  0x75   : > { %5005 = vmatmul.mubr.bf16.gmra.mxu1 %v7944_v54  ;;  %4595 = vmatprep.mubr.bf16.mxu0 %v7945_v55  ;;  %v7992_v54 = vld [vmem:[%s11940_s1 + $0x488] ss:$48 sps:$4 sm:$0xff]   ;;  %v7993_v55 = vld [vmem:[%s11940_s1 + $0x4e4] ss:$48 sps:$4 sm:$0xff]  }
  0x76   : > { %5012 = vmatprep.mubr.bf16.mxu1 %v7947_v57  ;;  %1305 = vperm.xlu0 %7913, %v1095_v14   ;;  %v328_v57 = vld [vmem:[%s8858_s23 + $0x3e8] sm:$0xff] }
  0x77   : > { %1310 = vperm.xlu1 %7914, %v1096_v19   ;;  %5374 = vmatpush2.bf16.msra.mxu0 %v442_v32  ;;  %v457_v58 = vpack.c.bf16 %v328_v57, %v327_v56  ;;  %v1115_v32 = vld [vmem:[%s11941_s2 + $0x180] sm:$0xff]  ;;  %v1121_v56 = vld [vmem:[%s11941_s2 + $0x1b0] sm:$0xff]  ;;  %v8043_v57 = vld [vmem:[%s11940_s1 + $0x7ec] ss:$48 sps:$4 sm:$0xff]  }
  0x78   : > { %5791 = vmatpush2.bf16.msra.mxu1 %v458_v34  ;;  %5375 = vmatprep.subr.bf16.mxu0 %v11943_v0  ;;  %v1116_v34 = vld [vmem:[%s11941_s2 + $0x188] sm:$0xff] }
  0x79   : > { %5792 = vmatprep.subr.bf16.mxu1 %v11943_v0 }
  0x7a   : > { %1315 = vperm.xlu0 %7913, %v1097_v20   ;;  %v1111_v20 = vld [vmem:[%s11941_s2 + $0x160] sm:$0xff] }
  0x7b   : > { %1320 = vperm.xlu1 %7914, %v1098_v25   ;;  %5376 = vmatpush2.bf16.msra.mxu0 %v441_v53  ;;  %v8017_v25 = vld [vmem:[%s11940_s1 + $0x664] ss:$48 sps:$4 sm:$0xff]   ;;  %v8039_v53 = vld [vmem:[%s11940_s1 + $0x780] ss:$48 sps:$4 sm:$0xff]  }
  0x7c   : > { %4596 = vmatmul.mubr.bf16.gmra.mxu0 %v7949_v60  ;;  %5377 = vmatprep.subr.bf16.mxu0 %v11943_v0  ;;  %v7995_v60 = vld [vmem:[%s11940_s1 + $0x4ec] ss:$48 sps:$4 sm:$0xff]  }
  0x7d   : > { %5013 = vmatmul.mubr.bf16.gmra.mxu1 %v7950_v61  ;;  %4603 = vmatprep.mubr.bf16.mxu0 %v7951_v62  ;;  %v1106_v61 = vld [vmem:[%s11941_s2 + $0x138] sm:$0xff]  ;;  %v7997_v62 = vld [vmem:[%s11940_s1 + $0x4e0] ss:$48 sps:$4 sm:$0xff]  }
  0x7e   : > { %5020 = vmatprep.mubr.bf16.mxu1 %v7953_v63  ;;  %1325 = vperm.xlu0 %7913, %v1099_v35   ;;  %v7998_v63 = vld [vmem:[%s11940_s1 + $0x4e8] ss:$48 sps:$4 sm:$0xff]   ;;  %v291_v35 = vld [vmem:[%s8858_s23 + $0x2c0] sm:$0xff] }
  0x7f   : > { %1330 = vperm.xlu1 %7914, %v1100_v37   ;;  %5793 = vmatpush2.bf16.msra.mxu1 %v457_v58  ;;  %v8027_v37 = vld [vmem:[%s11940_s1 + $0x6c0] ss:$48 sps:$4 sm:$0xff]   ;;  %v1122_v58 = vld [vmem:[%s11941_s2 + $0x1b8] sm:$0xff] }
  0x80   : > { %5794 = vmatprep.subr.bf16.mxu1 %v11943_v0 }
  0x82   : > { %1335 = vperm.xlu0 %7913, %v1101_v41   ;;  %v323_v41 = vld [vmem:[%s8858_s23 + $0x3c0] sm:$0xff] }
  0x83   : > { %1340 = vperm.xlu1 %7914, %v1102_v43  }
  0x84   : > { %4604 = vmatmul.mubr.bf16.gmra.mxu0 %v7955_v8  ;;  %v1109_v8 = vld [vmem:[%s11941_s2 + $0x150] sm:$0xff] }
  0x85   : > { %5021 = vmatmul.mubr.bf16.gmra.mxu1 %v7956_v9  ;;  %4611 = vmatprep.mubr.bf16.mxu0 %v7957_v10  ;;  %v8007_v9 = vld [vmem:[%s11940_s1 + $0x5ac] ss:$48 sps:$4 sm:$0xff]  }
  0x86   : > { %5028 = vmatprep.mubr.bf16.mxu1 %v7959_v12  ;;  %1345 = vperm.xlu0 %7913, %v1103_v47   ;;  %v1110_v10 = vld [vmem:[%s11941_s2 + $0x158] sm:$0xff]  ;;  %v8033_v47 = vld [vmem:[%s11940_s1 + $0x720] ss:$48 sps:$4 sm:$0xff]  }
  0x87   : > { %1350 = vperm.xlu1 %7914, %v1104_v49   ;;  %v294_v12 = vld [vmem:[%s8858_s23 + $0x2d8] sm:$0xff]  ;;  %v8035_v49 = vld [vmem:[%s11940_s1 + $0x784] ss:$48 sps:$4 sm:$0xff]  }
  0x88   : > { %v440_v14 = vpack.c.bf16 %v294_v12, %v293_v11  ;;  %v1125_v11 = vld [vmem:[%s11941_s2 + $0x1d0] sm:$0xff]  ;;  %v8055_v12 = vld [vmem:[%s11940_s1 + $0x8ac] ss:$48 sps:$4 sm:$0xff]  }
  0x8a   : > { %1355 = vperm.xlu0 %7913, %v1105_v59   ;;  %5378 = vmatpush2.bf16.msra.mxu0 %v440_v14  ;;  %v289_v59 = vld [vmem:[%s8858_s23 + $0x2b0] sm:$0xff] }
  0x8b   : > { %1360 = vperm.xlu1 %7914, %v1106_v61   ;;  %5379 = vmatprep.subr.bf16.mxu0 %v11943_v0  ;;  %v8045_v61 = vld [vmem:[%s11940_s1 + $0x7e0] ss:$48 sps:$4 sm:$0xff]  }
  0x8c   : > { %4612 = vmatmul.mubr.bf16.gmra.mxu0 %v7961_v15  ;;  %v8010_v15 = vld [vmem:[%s11940_s1 + $0x5a8] ss:$48 sps:$4 sm:$0xff]   ;;  %v8057_v14 = vld [vmem:[%s11940_s1 + $0x8a0] ss:$48 sps:$4 sm:$0xff]  }
  0x8d   : > { %5029 = vmatmul.mubr.bf16.gmra.mxu1 %v7962_v16  ;;  %4619 = vmatprep.mubr.bf16.mxu0 %v7963_v17  ;;  %v8011_v16 = vld [vmem:[%s11940_s1 + $0x604] ss:$48 sps:$4 sm:$0xff]  }
  0x8e   : > { %5036 = vmatprep.mubr.bf16.mxu1 %v7965_v18  ;;  %1365 = vperm.xlu0 %7913, %v1107_v2   ;;  %v325_v17 = vld [vmem:[%s8858_s23 + $0x3d0] sm:$0xff]  ;;  %v326_v18 = vld [vmem:[%s8858_s23 + $0x3d8] sm:$0xff] }
  0x8f   : > { %1370 = vperm.xlu1 %7914, %v1108_v4   ;;  %v456_v19 = vpack.c.bf16 %v326_v18, %v325_v17  ;;  %v321_v2 = vld [vmem:[%s8858_s23 + $0x3b0] sm:$0xff]  ;;  %v1127_v17 = vld [vmem:[%s11941_s2 + $0x1e0] sm:$0xff]  ;;  %v8061_v18 = vld [vmem:[%s11940_s1 + $0x90c] ss:$48 sps:$4 sm:$0xff]  }
  0x91   : > { %5795 = vmatpush2.bf16.msra.mxu1 %v456_v19  ;;  %v1128_v19 = vld [vmem:[%s11941_s2 + $0x1e8] sm:$0xff] }
  0x92   : > { %1375 = vperm.xlu0 %7913, %v1109_v8   ;;  %5796 = vmatprep.subr.bf16.mxu1 %v11943_v0  ;;  %v8051_v8 = vld [vmem:[%s11940_s1 + $0x840] ss:$48 sps:$4 sm:$0xff]  }
  0x93   : > { %1380 = vperm.xlu1 %7914, %v1110_v10   ;;  %v8053_v10 = vld [vmem:[%s11940_s1 + $0x8a4] ss:$48 sps:$4 sm:$0xff]  }
  0x94   : > { %4620 = vmatmul.mubr.bf16.gmra.mxu0 %v7967_v21  ;;  %v8013_v21 = vld [vmem:[%s11940_s1 + $0x60c] ss:$48 sps:$4 sm:$0xff]  }
  0x95   : > { %5037 = vmatmul.mubr.bf16.gmra.mxu1 %v7968_v22  ;;  %4627 = vmatprep.mubr.bf16.mxu0 %v7969_v23  ;;  %v1112_v22 = vld [vmem:[%s11941_s2 + $0x168] sm:$0xff]  ;;  %v8015_v23 = vld [vmem:[%s11940_s1 + $0x600] ss:$48 sps:$4 sm:$0xff]  }
  0x96   : > { %5044 = vmatprep.mubr.bf16.mxu1 %v7971_v24  ;;  %1385 = vperm.xlu0 %7913, %v1111_v20   ;;  %v8016_v24 = vld [vmem:[%s11940_s1 + $0x608] ss:$48 sps:$4 sm:$0xff]   ;;  %v287_v20 = vld [vmem:[%s8858_s23 + $0x2a0] sm:$0xff] }
  0x97   : > { %1390 = vperm.xlu1 %7914, %v1112_v22   ;;  %v8063_v22 = vld [vmem:[%s11940_s1 + $0x900] ss:$48 sps:$4 sm:$0xff]  }
  0x9c   : > { %4628 = vmatmul.mubr.bf16.gmra.mxu0 %v7973_v26  ;;  %v1113_v26 = vld [vmem:[%s11941_s2 + $0x170] sm:$0xff] }
  0x9d   : > { %5045 = vmatmul.mubr.bf16.gmra.mxu1 %v7974_v27  ;;  %4635 = vmatprep.mubr.bf16.mxu0 %v7975_v28  ;;  %v8019_v27 = vld [vmem:[%s11940_s1 + $0x66c] ss:$48 sps:$4 sm:$0xff]  }
  0x9e   : > { %5052 = vmatprep.mubr.bf16.mxu1 %v7977_v36  ;;  %1395 = vperm.xlu0 %7913, %v1113_v26   ;;  %v1114_v28 = vld [vmem:[%s11941_s2 + $0x178] sm:$0xff]  ;;  %v292_v36 = vld [vmem:[%s8858_s23 + $0x2c8] sm:$0xff]  ;;  %v319_v26 = vld [vmem:[%s8858_s23 + $0x3a0] sm:$0xff] }
  0x9f   : > { %1400 = vperm.xlu1 %7914, %v1114_v28   ;;  %v1166_v28 = vpop.permute.xlu0 %1165 }
  0xa2   : > { %1405 = vperm.xlu0 %7913, %v1115_v32  }
  0xa3   : > { %1410 = vperm.xlu1 %7914, %v1116_v34  }
  0xa4   : > { %4636 = vmatmul.mubr.bf16.gmra.mxu0 %v7979_v38  ;;  %v439_v38 = vpack.c.bf16 %v292_v36, %v291_v35  ;;  %v1130_v35 = vld [vmem:[%s11941_s2 + $0x1f8] sm:$0xff] }
  0xa5   : > { %5053 = vmatmul.mubr.bf16.gmra.mxu1 %v7980_v39  ;;  %4643 = vmatprep.mubr.bf16.mxu0 %v7981_v40  ;;  %v8028_v39 = vld [vmem:[%s11940_s1 + $0x6c8] ss:$48 sps:$4 sm:$0xff]   ;;  %v8029_v40 = vld [vmem:[%s11940_s1 + $0x724] ss:$48 sps:$4 sm:$0xff]  }
  0xa6   : > { %5060 = vmatprep.mubr.bf16.mxu1 %v7983_v42  ;;  %v324_v42 = vld [vmem:[%s8858_s23 + $0x3c8] sm:$0xff]  ;;  %5380 = vmatpush2.bf16.msra.mxu0 %v439_v38  ;;  %v8069_v38 = vld [vmem:[%s11940_s1 + $0x960] ss:$48 sps:$4 sm:$0xff]  }
  0xa7   : > { %v455_v43 = vpack.c.bf16 %v324_v42, %v323_v41  ;;  %5381 = vmatprep.subr.bf16.mxu0 %v11943_v0  ;;  %v8070_v41 = vld [vmem:[%s11940_s1 + $0x968] ss:$48 sps:$4 sm:$0xff]   ;;  %v8071_v42 = vld [vmem:[%s11940_s1 + $0x9c4] ss:$48 sps:$4 sm:$0xff]  }
  0xa9   : > { %5797 = vmatpush2.bf16.msra.mxu1 %v455_v43 }
  0xaa   : > { %5798 = vmatprep.subr.bf16.mxu1 %v11943_v0 }
  0xac   : > { %4644 = vmatmul.mubr.bf16.gmra.mxu0 %v7985_v44  ;;  %v1117_v44 = vld [vmem:[%s11941_s2 + $0x190] sm:$0xff] }
  0xad   : > { %5061 = vmatmul.mubr.bf16.gmra.mxu1 %v7986_v45  ;;  %4651 = vmatprep.mubr.bf16.mxu0 %v7987_v46  ;;  %v8031_v45 = vld [vmem:[%s11940_s1 + $0x72c] ss:$48 sps:$4 sm:$0xff]  }
  0xae   : > { %5068 = vmatprep.mubr.bf16.mxu1 %v7989_v48  ;;  %1415 = vperm.xlu0 %7913, %v1117_v44   ;;  %v1118_v46 = vld [vmem:[%s11941_s2 + $0x198] sm:$0xff]  ;;  %v1176_v44 = vpop.permute.xlu1 %1175 }
  0xaf   : > { %1420 = vperm.xlu1 %7914, %v1118_v46   ;;  %v8034_v48 = vld [vmem:[%s11940_s1 + $0x728] ss:$48 sps:$4 sm:$0xff]  }
  0xb2   : > { %1425 = vperm.xlu0 %7913, %v1119_v50  }
  0xb4   : > { %4652 = vmatmul.mubr.bf16.gmra.mxu0 %v7991_v52  ;;  %v1120_v52 = vld [vmem:[%s11941_s2 + $0x1a8] sm:$0xff] }
  0xb5   : > { %5069 = vmatmul.mubr.bf16.gmra.mxu1 %v7992_v54  ;;  %4659 = vmatprep.mubr.bf16.mxu0 %v7993_v55  ;;  %v8040_v54 = vld [vmem:[%s11940_s1 + $0x788] ss:$48 sps:$4 sm:$0xff]   ;;  %v8041_v55 = vld [vmem:[%s11940_s1 + $0x7e4] ss:$48 sps:$4 sm:$0xff]  }
  0xb6   : > { %5076 = vmatprep.mubr.bf16.mxu1 %v7995_v60  ;;  %1430 = vperm.xlu1 %7914, %v1120_v52   ;;  %v290_v60 = vld [vmem:[%s8858_s23 + $0x2b8] sm:$0xff] }
  0xb7   : > { %1435 = vperm.xlu0 %7913, %v1121_v56  }
  0xba   : > { %1440 = vperm.xlu1 %7914, %v1122_v58   ;;  %v8075_v58 = vld [vmem:[%s11940_s1 + $0x9c0] ss:$48 sps:$4 sm:$0xff]  }
  0xbc   : > { %4660 = vmatmul.mubr.bf16.gmra.mxu0 %v7997_v62  ;;  %v438_v62 = vpack.c.bf16 %v290_v60, %v289_v59 }
  0xbd   : > { %5077 = vmatmul.mubr.bf16.gmra.mxu1 %v7998_v63  ;;  %4667 = vmatprep.mubr.bf16.mxu0 %v7999_v1  ;;  %v8046_v63 = vld [vmem:[%s11940_s1 + $0x7e8] ss:$48 sps:$4 sm:$0xff]   ;;  %v8047_v1 = vld [vmem:[%s11940_s1 + $0x844] ss:$48 sps:$4 sm:$0xff]  }
  0xbe   : > { %5084 = vmatprep.mubr.bf16.mxu1 %v8001_v3  ;;  %v322_v3 = vld [vmem:[%s8858_s23 + $0x3b8] sm:$0xff]  ;;  %5382 = vmatpush2.bf16.msra.mxu0 %v438_v62  ;;  %v8077_v62 = vld [vmem:[%s11940_s1 + $0xa24] ss:$48 sps:$4 sm:$0xff]  }
  0xbf   : > { %v454_v4 = vpack.c.bf16 %v322_v3, %v321_v2  ;;  %5383 = vmatprep.subr.bf16.mxu0 %v11943_v0  ;;  %v1133_v3 = vld [vmem:[%s11941_s2 + $0x210] sm:$0xff] }
  0xc1   : > { %5799 = vmatpush2.bf16.msra.mxu1 %v454_v4 }
  0xc2   : > { %5800 = vmatprep.subr.bf16.mxu1 %v11943_v0 }
  0xc4   : > { %4668 = vmatmul.mubr.bf16.gmra.mxu0 %v8003_v5  ;;  %v1123_v5 = vld [vmem:[%s11941_s2 + $0x1c0] sm:$0xff] }
  0xc5   : > { %5085 = vmatmul.mubr.bf16.gmra.mxu1 %v8004_v6  ;;  %4675 = vmatprep.mubr.bf16.mxu0 %v8005_v7  ;;  %v8049_v6 = vld [vmem:[%s11940_s1 + $0x84c] ss:$48 sps:$4 sm:$0xff]  }
  0xc6   : > { %5092 = vmatprep.mubr.bf16.mxu1 %v8007_v9  ;;  %1445 = vperm.xlu0 %7913, %v1123_v5   ;;  %v1124_v7 = vld [vmem:[%s11941_s2 + $0x1c8] sm:$0xff] }
  0xc7   : > { %1450 = vperm.xlu1 %7914, %v1124_v7   ;;  %v8052_v9 = vld [vmem:[%s11940_s1 + $0x848] ss:$48 sps:$4 sm:$0xff]  }
  0xca   : > { %1455 = vperm.xlu0 %7913, %v1125_v11  }
  0xcc   : > { %4676 = vmatmul.mubr.bf16.gmra.mxu0 %v8009_v13  ;;  %v1126_v13 = vld [vmem:[%s11941_s2 + $0x1d8] sm:$0xff] }
  0xcd   : > { %5093 = vmatmul.mubr.bf16.gmra.mxu1 %v8010_v15  ;;  %4683 = vmatprep.mubr.bf16.mxu0 %v8011_v16  ;;  %v8058_v15 = vld [vmem:[%s11940_s1 + $0x8a8] ss:$48 sps:$4 sm:$0xff]   ;;  %v8059_v16 = vld [vmem:[%s11940_s1 + $0x904] ss:$48 sps:$4 sm:$0xff]  }
  0xce   : > { %5100 = vmatprep.mubr.bf16.mxu1 %v8013_v21  ;;  %1460 = vperm.xlu1 %7914, %v1126_v13   ;;  %v288_v21 = vld [vmem:[%s8858_s23 + $0x2a8] sm:$0xff]  ;;  %v285_v13 = vld [vmem:[%s8858_s23 + $0x290] sm:$0xff] }
  0xcf   : > { %1465 = vperm.xlu0 %7913, %v1127_v17   ;;  %v8081_v17 = vld [vmem:[%s11940_s1 + $0xa20] ss:$48 sps:$4 sm:$0xff]  }
  0xd2   : > { %1470 = vperm.xlu1 %7914, %v1128_v19  }
  0xd4   : > { %4684 = vmatmul.mubr.bf16.gmra.mxu0 %v8015_v23  ;;  %v437_v23 = vpack.c.bf16 %v288_v21, %v287_v20  ;;  %v8082_v20 = vld [vmem:[%s11940_s1 + $0xa28] ss:$48 sps:$4 sm:$0xff]   ;;  %v8085_v21 = vld [vmem:[%s11940_s1 + $0xa84] ss:$48 sps:$4 sm:$0xff]  }
  0xd5   : > { %5101 = vmatmul.mubr.bf16.gmra.mxu1 %v8016_v24  ;;  %4691 = vmatprep.mubr.bf16.mxu0 %v8017_v25  ;;  %v8064_v24 = vld [vmem:[%s11940_s1 + $0x908] ss:$48 sps:$4 sm:$0xff]   ;;  %v8065_v25 = vld [vmem:[%s11940_s1 + $0x964] ss:$48 sps:$4 sm:$0xff]  }
  0xd6   : > { %5108 = vmatprep.mubr.bf16.mxu1 %v8019_v27  ;;  %v320_v27 = vld [vmem:[%s8858_s23 + $0x3a8] sm:$0xff]  ;;  %5384 = vmatpush2.bf16.msra.mxu0 %v437_v23  ;;  %v318_v23 = vld [vmem:[%s8858_s23 + $0x398] sm:$0xff] }
  0xd7   : > { %5385 = vmatprep.subr.bf16.mxu0 %v11943_v0  ;;  %1480 = vperm.xlu1 %7914, %v1130_v35  }
  0xdc   : > { %4692 = vmatmul.mubr.bf16.gmra.mxu0 %v8021_v29  ;;  %v453_v29 = vpack.c.bf16 %v320_v27, %v319_v26 }
  0xdd   : > { %5109 = vmatmul.mubr.bf16.gmra.mxu1 %v8022_v30  ;;  %4699 = vmatprep.mubr.bf16.mxu0 %v8023_v31  ;;  %v1129_v30 = vld [vmem:[%s11941_s2 + $0x1f0] sm:$0xff]  ;;  %v8067_v31 = vld [vmem:[%s11940_s1 + $0x96c] ss:$48 sps:$4 sm:$0xff]  }
  0xde   : > { %5116 = vmatprep.mubr.bf16.mxu1 %v8025_v33  ;;  %5801 = vmatpush2.bf16.msra.mxu1 %v453_v29  ;;  %v1135_v29 = vld [vmem:[%s11941_s2 + $0x220] sm:$0xff] }
  0xdf   : > { %1475 = vperm.xlu0 %7913, %v1129_v30   ;;  %5802 = vmatprep.subr.bf16.mxu1 %v11943_v0 }
  0xe4   : > { %4700 = vmatmul.mubr.bf16.gmra.mxu0 %v8027_v37  ;;  %v1171_v37 = vpop.permute.xlu0 %1170 }
  0xe5   : > { %5117 = vmatmul.mubr.bf16.gmra.mxu1 %v8028_v39  ;;  %4707 = vmatprep.mubr.bf16.mxu0 %v8029_v40 }
  0xe6   : > { %5124 = vmatprep.mubr.bf16.mxu1 %v8031_v45 }
  0xe8   : > { %v1186_v5 = vpop.permute.xlu0 %1185 }
  0xec   : > { %4708 = vmatmul.mubr.bf16.gmra.mxu0 %v8033_v47  ;;  %v1131_v47 = vld [vmem:[%s11941_s2 + $0x200] sm:$0xff] }
  0xed   : > { %5125 = vmatmul.mubr.bf16.gmra.mxu1 %v8034_v48  ;;  %4715 = vmatprep.mubr.bf16.mxu0 %v8035_v49  ;;  %v8073_v49 = vld [vmem:[%s11940_s1 + $0x9cc] ss:$48 sps:$4 sm:$0xff]  }
  0xee   : > { %5132 = vmatprep.mubr.bf16.mxu1 %v8037_v51  ;;  %1485 = vperm.xlu0 %7913, %v1131_v47  }
  0xf2   : > { %1495 = vperm.xlu0 %7913, %v1133_v3   ;;  %v8092_v3 = vld [vmem:[%s11940_s1 + $0xae8] ss:$48 sps:$4 sm:$0xff]  }
  0xf4   : > { %4716 = vmatmul.mubr.bf16.gmra.mxu0 %v8039_v53 }
  0xf5   : > { %5133 = vmatmul.mubr.bf16.gmra.mxu1 %v8040_v54  ;;  %4723 = vmatprep.mubr.bf16.mxu0 %v8041_v55  ;;  %v1132_v55 = vld [vmem:[%s11941_s2 + $0x208] sm:$0xff] }
  0xf6   : > { %5140 = vmatprep.mubr.bf16.mxu1 %v8043_v57  ;;  %v1181_v57 = vpop.permute.xlu1 %1180  ;;  %1490 = vperm.xlu1 %7914, %v1132_v55  }
  0xf7   : > { %1505 = vperm.xlu0 %7913, %v1135_v29   ;;  %v8103_v29 = vld [vmem:[%s11940_s1 + $0xba4] ss:$48 sps:$4 sm:$0xff]  }
  0xfc   : > { %4724 = vmatmul.mubr.bf16.gmra.mxu0 %v8045_v61  ;;  %v8076_v61 = vld [vmem:[%s11940_s1 + $0x9c8] ss:$48 sps:$4 sm:$0xff]  }
  0xfd   : > { %5141 = vmatmul.mubr.bf16.gmra.mxu1 %v8046_v63  ;;  %4731 = vmatprep.mubr.bf16.mxu0 %v8047_v1 }
  0xfe   : > { %5148 = vmatprep.mubr.bf16.mxu1 %v8049_v6  ;;  %v8079_v6 = vld [vmem:[%s11940_s1 + $0xa2c] ss:$48 sps:$4 sm:$0xff]  }
 0x104   : > { %4732 = vmatmul.mubr.bf16.gmra.mxu0 %v8051_v8 }
 0x105   : > { %5149 = vmatmul.mubr.bf16.gmra.mxu1 %v8052_v9  ;;  %4739 = vmatprep.mubr.bf16.mxu0 %v8053_v10 }
 0x106   : > { %5156 = vmatprep.mubr.bf16.mxu1 %v8055_v12  ;;  %v1134_v12 = vld [vmem:[%s11941_s2 + $0x218] sm:$0xff] }
 0x107   : > { %1500 = vperm.xlu1 %7914, %v1134_v12  }
 0x10c   : > { %4740 = vmatmul.mubr.bf16.gmra.mxu0 %v8057_v14  ;;  %v286_v14 = vld [vmem:[%s8858_s23 + $0x298] sm:$0xff] }
 0x10d   : > { %5157 = vmatmul.mubr.bf16.gmra.mxu1 %v8058_v15  ;;  %4747 = vmatprep.mubr.bf16.mxu0 %v8059_v16  ;;  %v1191_v16 = vpop.permute.xlu1 %1190 }
 0x10e   : > { %5164 = vmatprep.mubr.bf16.mxu1 %v8061_v18  ;;  %v436_v18 = vpack.c.bf16 %v286_v14, %v285_v13  ;;  %v8100_v13 = vld [vmem:[%s11940_s1 + $0xb4c] ss:$48 sps:$4 sm:$0xff]  }
 0x110   : > { %5386 = vmatpush2.bf16.msra.mxu0 %v436_v18 }
 0x111   : > { %5387 = vmatprep.subr.bf16.mxu0 %v11943_v0 }
 0x114   : > { %v4557_v32 = vpop.f32.mrf.mxu0  ;;  %4748 = vmatmul.mubr.bf16.gmra.mxu0 %v8063_v22  ;;  %v317_v22 = vld [vmem:[%s8858_s23 + $0x390] sm:$0xff] }
 0x115   : > { %v4558_v33 = vadd.f32 %v4557_v32, %v1166_v28  ;;  %v4974_v34 = vpop.f32.mrf.mxu1  ;;  %5165 = vmatmul.mubr.bf16.gmra.mxu1 %v8064_v24  ;;  %4755 = vmatprep.mubr.bf16.mxu0 %v8065_v25  ;;  %v452_v26 = vpack.c.bf16 %v318_v23, %v317_v22  ;;  %v8088_v32 = vld [vmem:[%s11940_s1 + $0xa8c] ss:$48 sps:$4 sm:$0xff]  }
 0x116   : > { %v4559_v36 = vpop.f32.mrf.mxu0  ;;  %5172 = vmatprep.mubr.bf16.mxu1 %v8067_v31  ;;  %v1196_v31 = vpop.permute.xlu0 %1195 }
 0x117   : > { %v9535_v39 = vadd.f32 %v4974_v34, %v4558_v33  ;;  %v4976_v40 = vpop.f32.mrf.mxu1  ;;  %5803 = vmatpush2.bf16.msra.mxu1 %v452_v26 }
 0x118   : > { %v4560_v43 = vpop.f32.mrf.mxu0  ;;  %5804 = vmatprep.subr.bf16.mxu1 %v11943_v0 }
 0x119   : > { %v4561_v45 = vadd.f32 %v4560_v43, %v1171_v37  ;;  %v4977_v46 = vpop.f32.mrf.mxu1 }
 0x11a   : > { %v4562_v48 = vpop.f32.mrf.mxu0 }
 0x11b   : > { %v9549_v50 = vadd.f32 %v4977_v46, %v4561_v45  ;;  %v4979_v51 = vpop.f32.mrf.mxu1  ;;  %v8091_v45 = vld [vmem:[%s11940_s1 + $0xae4] ss:$48 sps:$4 sm:$0xff]  }
 0x11c   : > { %v4565_v52 = vpop.f32.mrf.mxu0  ;;  %4756 = vmatmul.mubr.bf16.gmra.mxu0 %v8069_v38  ;;  %v1136_v38 = vld [vmem:[%s11941_s2 + $0x228] sm:$0xff]  ;;  %v1137_v51 = vld [vmem:[%s11941_s2 + $0x230] sm:$0xff] }
 0x11d   : > { %v4566_v53 = vadd.f32 %v4565_v52, %v1176_v44  ;;  %v4982_v54 = vpop.f32.mrf.mxu1  ;;  %5173 = vmatmul.mubr.bf16.gmra.mxu1 %v8070_v41  ;;  %4763 = vmatprep.mubr.bf16.mxu0 %v8071_v42  ;;  %v1201_v41 = vpop.permute.xlu1 %1200  ;;  %v8083_v42 = vld [vmem:[%s11940_s1 + $0xa80] ss:$48 sps:$4 sm:$0xff]   ;;  %v8086_v44 = vld [vmem:[%s11940_s1 + $0xa88] ss:$48 sps:$4 sm:$0xff]  }
 0x11e   : > { %v4567_v56 = vpop.f32.mrf.mxu0  ;;  %5180 = vmatprep.mubr.bf16.mxu1 %v8073_v49  ;;  %1510 = vperm.xlu1 %7914, %v1136_v38   ;;  %v1141_v38 = vld [vmem:[%s11941_s2 + $0x250] sm:$0xff] }
 0x11f   : > { %v9557_v59 = vadd.f32 %v4982_v54, %v4566_v53  ;;  %v4984_v60 = vpop.f32.mrf.mxu1  ;;  %v1206_v53 = vpop.permute.xlu0 %1205  ;;  %v8094_v54 = vld [vmem:[%s11940_s1 + $0xaec] ss:$48 sps:$4 sm:$0xff]   ;;  %1515 = vperm.xlu0 %7913, %v1137_v51  }
 0x120   : > { %v4568_v63 = vpop.f32.mrf.mxu0 }
 0x121   : > { %v4569_v1 = vadd.f32 %v4568_v63, %v1181_v57  ;;  %v4985_v2 = vpop.f32.mrf.mxu1  ;;  %v1211_v63 = vpop.permute.xlu1 %1210 }
 0x122   : > { %v4570_v4 = vpop.f32.mrf.mxu0 }
 0x123   : > { %v9571_v7 = vadd.f32 %v4985_v2, %v4569_v1  ;;  %v4987_v8 = vpop.f32.mrf.mxu1  ;;  %v8089_v1 = vld [vmem:[%s11940_s1 + $0xae0] ss:$48 sps:$4 sm:$0xff]   ;;  %v8097_v4 = vld [vmem:[%s11940_s1 + $0xb44] ss:$48 sps:$4 sm:$0xff]   ;;  %v1216_v12 = vpop.permute.xlu0 %1215 }
 0x124   : > { %v4573_v9 = vpop.f32.mrf.mxu0  ;;  %4764 = vmatmul.mubr.bf16.gmra.mxu0 %v8075_v58 }
 0x125   : > { %v4990_v10 = vpop.f32.mrf.mxu1  ;;  %5181 = vmatmul.mubr.bf16.gmra.mxu1 %v8076_v61  ;;  %v4574_v11 = vadd.f32 %v4573_v9, %v1186_v5  ;;  %4771 = vmatprep.mubr.bf16.mxu0 %v8077_v62  ;;  %v1138_v61 = vld [vmem:[%s11941_s2 + $0x238] sm:$0xff]  ;;  %v1221_v23 = vpop.permute.xlu1 %1220 }
 0x126   : > { %v4575_v15 = vpop.f32.mrf.mxu0  ;;  %5188 = vmatprep.mubr.bf16.mxu1 %v8079_v6  ;;  %1520 = vperm.xlu1 %7914, %v1138_v61  }
 0x127   : > { %v4992_v19 = vpop.f32.mrf.mxu1  ;;  %v9589_v24 = vadd.f32 %v4990_v10, %v4574_v11  ;;  %v1139_v10 = vld [vmem:[%s11941_s2 + $0x240] sm:$0xff] }
 0x128   : > { %v4576_v25 = vpop.f32.mrf.mxu0  ;;  %1525 = vperm.xlu0 %7913, %v1139_v10   ;;  %v1140_v19 = vld [vmem:[%s11941_s2 + $0x248] sm:$0xff] }
 0x129   : > { %v4577_v27 = vadd.f32 %v4576_v25, %v1191_v16  ;;  %v4993_v28 = vpop.f32.mrf.mxu1  ;;  %v8095_v25 = vld [vmem:[%s11940_s1 + $0xb40] ss:$48 sps:$4 sm:$0xff]  }
 0x12a   : > { %v4578_v30 = vpop.f32.mrf.mxu0  ;;  %1530 = vperm.xlu1 %7914, %v1140_v19  }
 0x12b   : > { %v9598_v33 = vadd.f32 %v4993_v28, %v4577_v27  ;;  %v4995_v34 = vpop.f32.mrf.mxu1  ;;  %v8098_v28 = vld [vmem:[%s11940_s1 + $0xb48] ss:$48 sps:$4 sm:$0xff]   ;;  %v315_v30 = vld [vmem:[%s8858_s23 + $0x380] sm:$0xff] }
 0x12c   : > { %v4581_v35 = vpop.f32.mrf.mxu0  ;;  %4772 = vmatmul.mubr.bf16.gmra.mxu0 %v8081_v17  ;;  %1535 = vperm.xlu0 %7913, %v1141_v38  }
 0x12d   : > { %v4998_v36 = vpop.f32.mrf.mxu1  ;;  %5189 = vmatmul.mubr.bf16.gmra.mxu1 %v8082_v20  ;;  %v4582_v37 = vadd.f32 %v4581_v35, %v1196_v31  ;;  %4779 = vmatprep.mubr.bf16.mxu0 %v8085_v21  ;;  %v283_v20 = vld [vmem:[%s8858_s23 + $0x280] sm:$0xff]  ;;  %v284_v21 = vld [vmem:[%s8858_s23 + $0x288] sm:$0xff] }
 0x12e   : > { %v4583_v40 = vpop.f32.mrf.mxu0  ;;  %5196 = vmatprep.mubr.bf16.mxu1 %v8088_v32  ;;  %v435_v26 = vpack.c.bf16 %v284_v21, %v283_v20  ;;  %v316_v31 = vld [vmem:[%s8858_s23 + $0x388] sm:$0xff] }
 0x12f   : > { %v5000_v43 = vpop.f32.mrf.mxu1  ;;  %v9613_v46 = vadd.f32 %v4998_v36, %v4582_v37  ;;  %v451_v35 = vpack.c.bf16 %v316_v31, %v315_v30  ;;  %v8110_v21 = vld [vmem:[%s11940_s1 + $0xc08] ss:$48 sps:$4 sm:$0xff]  }
 0x130   : > { %v4584_v47 = vpop.f32.mrf.mxu0  ;;  %5388 = vmatpush2.bf16.msra.mxu0 %v435_v26 }
 0x131   : > { %v4585_v48 = vadd.f32 %v4584_v47, %v1201_v41  ;;  %v5001_v49 = vpop.f32.mrf.mxu1  ;;  %6191 = vmatprep.subr.bf16.mxu0 %v11943_v0  ;;  %v1226_v41 = vpop.permute.xlu0 %1225  ;;  %5805 = vmatpush2.bf16.msra.mxu1 %v451_v35  ;;  %v1146_v35 = vld [vmem:[%s11941_s2 + $0x278] sm:$0xff] }
 0x132   : > { %v4586_v52 = vpop.f32.mrf.mxu0  ;;  %6608 = vmatprep.subr.bf16.mxu1 %v11943_v0  ;;  %v378_v0 = vld [vmem:[%s8858_s23 + $0x578] sm:$0xff] }
 0x133   : > { %v9621_v55 = vadd.f32 %v5001_v49, %v4585_v48  ;;  %v5003_v56 = vpop.f32.mrf.mxu1  ;;  %v1142_v49 = vld [vmem:[%s11941_s2 + $0x258] sm:$0xff]  ;;  %v1231_v52 = vpop.permute.xlu1 %1230 }
 0x134   : > { %v4589_v57 = vpop.f32.mrf.mxu0  ;;  %4780 = vmatmul.mubr.bf16.gmra.mxu0 %v8083_v42  ;;  %v8106_v42 = vld [vmem:[%s11940_s1 + $0xbac] ss:$48 sps:$4 sm:$0xff]   ;;  %1540 = vperm.xlu1 %7914, %v1142_v49   ;;  %v8104_v56 = vld [vmem:[%s11940_s1 + $0xba8] ss:$48 sps:$4 sm:$0xff]   ;;  %v1147_v49 = vld [vmem:[%s11941_s2 + $0x280] sm:$0xff] }
 0x135   : > { %v5006_v58 = vpop.f32.mrf.mxu1  ;;  %5197 = vmatmul.mubr.bf16.gmra.mxu1 %v8086_v44  ;;  %v4590_v60 = vadd.f32 %v4589_v57, %v1206_v53  ;;  %4787 = vmatprep.mubr.bf16.mxu0 %v8091_v45  ;;  %v8101_v53 = vld [vmem:[%s11940_s1 + $0xba0] ss:$48 sps:$4 sm:$0xff]   ;;  %v8109_v57 = vld [vmem:[%s11940_s1 + $0xc04] ss:$48 sps:$4 sm:$0xff]  }
 0x136   : > { %v4591_v62 = vpop.f32.mrf.mxu0  ;;  %5204 = vmatprep.mubr.bf16.mxu1 %v8094_v54 }
 0x137   : > { %v5008_v2 = vpop.f32.mrf.mxu1  ;;  %v9635_v5 = vadd.f32 %v5006_v58, %v4590_v60 }
 0x138   : > { %v4592_v6 = vpop.f32.mrf.mxu0  ;;  %v1236_v2 = vpop.permute.xlu0 %1235 }
 0x139   : > { %v4593_v8 = vadd.f32 %v4592_v6, %v1211_v63  ;;  %v5009_v9 = vpop.f32.mrf.mxu1  ;;  %v1143_v63 = vld [vmem:[%s11941_s2 + $0x260] sm:$0xff] }
 0x13a   : > { %v4594_v11 = vpop.f32.mrf.mxu0  ;;  %1545 = vperm.xlu0 %7913, %v1143_v63  }
 0x13b   : > { %v9643_v14 = vadd.f32 %v5009_v9, %v4593_v8  ;;  %v5011_v15 = vpop.f32.mrf.mxu1  ;;  %v1144_v11 = vld [vmem:[%s11941_s2 + $0x268] sm:$0xff] }
 0x13c   : > { %v4597_v16 = vpop.f32.mrf.mxu0  ;;  %4788 = vmatmul.mubr.bf16.gmra.mxu0 %v8089_v1  ;;  %1550 = vperm.xlu1 %7914, %v1144_v11   ;;  %v1246_v26 = vpop.permute.xlu0 %1245  ;;  %v8122_v11 = vld [vmem:[%s11940_s1 + $0xcc8] ss:$48 sps:$4 sm:$0xff]  }
 0x13d   : > { %v5014_v17 = vpop.f32.mrf.mxu1  ;;  %5205 = vmatmul.mubr.bf16.gmra.mxu1 %v8092_v3  ;;  %v4598_v18 = vadd.f32 %v4597_v16, %v1216_v12  ;;  %4795 = vmatprep.mubr.bf16.mxu0 %v8097_v4  ;;  %v8112_v3 = vld [vmem:[%s11940_s1 + $0xc0c] ss:$48 sps:$4 sm:$0xff]  }
 0x13e   : > { %v4599_v22 = vpop.f32.mrf.mxu0  ;;  %5212 = vmatprep.mubr.bf16.mxu1 %v8100_v13  ;;  %v1241_v13 = vpop.permute.xlu1 %1240 }
 0x13f   : > { %v5016_v27 = vpop.f32.mrf.mxu1  ;;  %v9661_v32 = vadd.f32 %v5014_v17, %v4598_v18  ;;  %v8107_v18 = vld [vmem:[%s11940_s1 + $0xc00] ss:$48 sps:$4 sm:$0xff]   ;;  %v8115_v22 = vld [vmem:[%s11940_s1 + $0xc64] ss:$48 sps:$4 sm:$0xff]  }
 0x140   : > { %v4600_v34 = vpop.f32.mrf.mxu0  ;;  %v8118_v27 = vld [vmem:[%s11940_s1 + $0xc6c] ss:$48 sps:$4 sm:$0xff]   ;;  %1560 = vperm.xlu1 %7914, %v1146_v35  }
 0x141   : > { %v4601_v36 = vadd.f32 %v4600_v34, %v1221_v23  ;;  %v5017_v37 = vpop.f32.mrf.mxu1  ;;  %v1145_v23 = vld [vmem:[%s11941_s2 + $0x270] sm:$0xff] }
 0x142   : > { %v4602_v40 = vpop.f32.mrf.mxu0  ;;  %1555 = vperm.xlu0 %7913, %v1145_v23  }
 0x143   : > { %v9670_v43 = vadd.f32 %v5017_v37, %v4601_v36  ;;  %v5019_v44 = vpop.f32.mrf.mxu1  ;;  %v1251_v37 = vpop.permute.xlu1 %1250 }
 0x144   : > { %v4605_v45 = vpop.f32.mrf.mxu0  ;;  %4796 = vmatmul.mubr.bf16.gmra.mxu0 %v8095_v25 }
 0x145   : > { %v5022_v47 = vpop.f32.mrf.mxu1  ;;  %5213 = vmatmul.mubr.bf16.gmra.mxu1 %v8098_v28  ;;  %v4606_v48 = vadd.f32 %v4605_v45, %v1226_v41  ;;  %4803 = vmatprep.mubr.bf16.mxu0 %v8103_v29 }
 0x146   : > { %v4607_v51 = vpop.f32.mrf.mxu0  ;;  %5220 = vmatprep.mubr.bf16.mxu1 %v8106_v42  ;;  %v8113_v42 = vld [vmem:[%s11940_s1 + $0xc60] ss:$48 sps:$4 sm:$0xff]   ;;  %1565 = vperm.xlu0 %7913, %v1147_v49  }
 0x147   : > { %v5024_v54 = vpop.f32.mrf.mxu1  ;;  %v9685_v58 = vadd.f32 %v5022_v47, %v4606_v48  ;;  %v8116_v47 = vld [vmem:[%s11940_s1 + $0xc68] ss:$48 sps:$4 sm:$0xff]   ;;  %v8121_v48 = vld [vmem:[%s11940_s1 + $0xcc4] ss:$48 sps:$4 sm:$0xff]  }
 0x148   : > { %v4608_v60 = vpop.f32.mrf.mxu0 }
 0x149   : > { %v4609_v61 = vadd.f32 %v4608_v60, %v1231_v52  ;;  %v5025_v62 = vpop.f32.mrf.mxu1  ;;  %v1256_v52 = vpop.permute.xlu0 %1255 }
 0x14a   : > { %v4610_v1 = vpop.f32.mrf.mxu0 }
 0x14b   : > { %v9693_v4 = vadd.f32 %v5025_v62, %v4609_v61  ;;  %v5027_v6 = vpop.f32.mrf.mxu1  ;;  %v1148_v62 = vld [vmem:[%s11941_s2 + $0x288] sm:$0xff]  ;;  %v1261_v1 = vpop.permute.xlu1 %1260 }
 0x14c   : > { %v4613_v8 = vpop.f32.mrf.mxu0  ;;  %4804 = vmatmul.mubr.bf16.gmra.mxu0 %v8101_v53  ;;  %v8124_v53 = vld [vmem:[%s11940_s1 + $0xccc] ss:$48 sps:$4 sm:$0xff]   ;;  %1570 = vperm.xlu1 %7914, %v1148_v62  }
 0x14d   : > { %v5030_v9 = vpop.f32.mrf.mxu1  ;;  %5221 = vmatmul.mubr.bf16.gmra.mxu1 %v8104_v56  ;;  %v4614_v10 = vadd.f32 %v4613_v8, %v1236_v2  ;;  %4811 = vmatprep.mubr.bf16.mxu0 %v8109_v57  ;;  %v8119_v8 = vld [vmem:[%s11940_s1 + $0xcc0] ss:$48 sps:$4 sm:$0xff]  }
 0x14e   : > { %v4615_v12 = vpop.f32.mrf.mxu0  ;;  %5228 = vmatprep.mubr.bf16.mxu1 %v8112_v3 }
 0x14f   : > { %v5032_v15 = vpop.f32.mrf.mxu1  ;;  %v9698_v16 = vadd.f32 %v5030_v9, %v4614_v10  ;;  %v8127_v12 = vld [vmem:[%s11940_s1 + $0xd24] ss:$48 sps:$4 sm:$0xff]  }
 0x150   : > { %v4616_v17 = vpop.f32.mrf.mxu0 }
 0x151   : > { %v4617_v19 = vadd.f32 %v4616_v17, %v1241_v13  ;;  %v5033_v20 = vpop.f32.mrf.mxu1  ;;  %v1149_v13 = vld [vmem:[%s11941_s2 + $0x290] sm:$0xff]  ;;  %v1266_v17 = vpop.permute.xlu0 %1265 }
 0x152   : > { %v4618_v25 = vpop.f32.mrf.mxu0  ;;  %1575 = vperm.xlu0 %7913, %v1149_v13  }
 0x153   : > { %v9715_v28 = vadd.f32 %v5033_v20, %v4617_v19  ;;  %v5035_v29 = vpop.f32.mrf.mxu1  ;;  %v1150_v25 = vld [vmem:[%s11941_s2 + $0x298] sm:$0xff] }
 0x154   : > { %v4621_v30 = vpop.f32.mrf.mxu0  ;;  %4812 = vmatmul.mubr.bf16.gmra.mxu0 %v8107_v18  ;;  %v8130_v18 = vld [vmem:[%s11940_s1 + $0xd2c] ss:$48 sps:$4 sm:$0xff]   ;;  %1580 = vperm.xlu1 %7914, %v1150_v25  }
 0x155   : > { %v5038_v31 = vpop.f32.mrf.mxu1  ;;  %5229 = vmatmul.mubr.bf16.gmra.mxu1 %v8110_v21  ;;  %v4622_v34 = vadd.f32 %v4621_v30, %v1246_v26  ;;  %4819 = vmatprep.mubr.bf16.mxu0 %v8115_v22 }
 0x156   : > { %v4623_v36 = vpop.f32.mrf.mxu0  ;;  %5236 = vmatprep.mubr.bf16.mxu1 %v8118_v27  ;;  %v1271_v27 = vpop.permute.xlu1 %1270 }
 0x157   : > { %v5040_v38 = vpop.f32.mrf.mxu1  ;;  %v9720_v40 = vadd.f32 %v5038_v31, %v4622_v34  ;;  %v8125_v34 = vld [vmem:[%s11940_s1 + $0xd20] ss:$48 sps:$4 sm:$0xff]  }
 0x158   : > { %v4624_v41 = vpop.f32.mrf.mxu0  ;;  %v8133_v38 = vld [vmem:[%s11940_s1 + $0xd84] ss:$48 sps:$4 sm:$0xff]  }
 0x159   : > { %v4625_v44 = vadd.f32 %v4624_v41, %v1251_v37  ;;  %v5041_v45 = vpop.f32.mrf.mxu1  ;;  %v8128_v37 = vld [vmem:[%s11940_s1 + $0xd28] ss:$48 sps:$4 sm:$0xff]   ;;  %v1151_v41 = vld [vmem:[%s11941_s2 + $0x2a0] sm:$0xff] }
 0x15a   : > { %v4626_v51 = vpop.f32.mrf.mxu0  ;;  %1585 = vperm.xlu0 %7913, %v1151_v41  }
 0x15b   : > { %v9737_v54 = vadd.f32 %v5041_v45, %v4625_v44  ;;  %v5043_v56 = vpop.f32.mrf.mxu1  ;;  %v1276_v44 = vpop.permute.xlu0 %1275  ;;  %v8136_v45 = vld [vmem:[%s11940_s1 + $0xd8c] ss:$48 sps:$4 sm:$0xff]  }
 0x15c   : > { %v4629_v57 = vpop.f32.mrf.mxu0  ;;  %4820 = vmatmul.mubr.bf16.gmra.mxu0 %v8113_v42 }
 0x15d   : > { %v5046_v60 = vpop.f32.mrf.mxu1  ;;  %5237 = vmatmul.mubr.bf16.gmra.mxu1 %v8116_v47  ;;  %v4630_v61 = vadd.f32 %v4629_v57, %v1256_v52  ;;  %4827 = vmatprep.mubr.bf16.mxu0 %v8121_v48  ;;  %v1281_v57 = vpop.permute.xlu1 %1280 }
 0x15e   : > { %v4631_v63 = vpop.f32.mrf.mxu0  ;;  %5244 = vmatprep.mubr.bf16.mxu1 %v8124_v53  ;;  %v1152_v53 = vld [vmem:[%s11941_s2 + $0x2a8] sm:$0xff] }
 0x15f   : > { %v5048_v2 = vpop.f32.mrf.mxu1  ;;  %v9742_v3 = vadd.f32 %v5046_v60, %v4630_v61  ;;  %1590 = vperm.xlu1 %7914, %v1152_v53   ;;  %v8131_v63 = vld [vmem:[%s11940_s1 + $0xd80] ss:$48 sps:$4 sm:$0xff]  }
 0x160   : > { %v4632_v6 = vpop.f32.mrf.mxu0 }
 0x161   : > { %v4633_v9 = vadd.f32 %v4632_v6, %v1261_v1  ;;  %v5049_v10 = vpop.f32.mrf.mxu1  ;;  %v8134_v6 = vld [vmem:[%s11940_s1 + $0xd88] ss:$48 sps:$4 sm:$0xff]  }
 0x162   : > { %v4634_v15 = vpop.f32.mrf.mxu0 }
 0x163   : > { %v9759_v19 = vadd.f32 %v5049_v10, %v4633_v9  ;;  %v5051_v20 = vpop.f32.mrf.mxu1  ;;  %v1153_v9 = vld [vmem:[%s11941_s2 + $0x2b0] sm:$0xff] }
 0x164   : > { %v4637_v21 = vpop.f32.mrf.mxu0  ;;  %4828 = vmatmul.mubr.bf16.gmra.mxu0 %v8119_v8  ;;  %v8139_v8 = vld [vmem:[%s11940_s1 + $0xde4] ss:$48 sps:$4 sm:$0xff]   ;;  %1595 = vperm.xlu0 %7913, %v1153_v9  }
 0x165   : > { %v5054_v22 = vpop.f32.mrf.mxu1  ;;  %5245 = vmatmul.mubr.bf16.gmra.mxu1 %v8122_v11  ;;  %v4638_v23 = vadd.f32 %v4637_v21, %v1266_v17  ;;  %4835 = vmatprep.mubr.bf16.mxu0 %v8127_v12  ;;  %v1286_v11 = vpop.permute.xlu0 %1285  ;;  %v8142_v12 = vld [vmem:[%s11940_s1 + $0xdec] ss:$48 sps:$4 sm:$0xff]   ;;  %v1157_v9 = vld [vmem:[%s11941_s2 + $0x2d0] sm:$0xff] }
 0x166   : > { %v4639_v26 = vpop.f32.mrf.mxu0  ;;  %5252 = vmatprep.mubr.bf16.mxu1 %v8130_v18  ;;  %v1154_v21 = vld [vmem:[%s11941_s2 + $0x2b8] sm:$0xff] }
 0x167   : > { %v5056_v29 = vpop.f32.mrf.mxu1  ;;  %v9764_v30 = vadd.f32 %v5054_v22, %v4638_v23  ;;  %v1291_v23 = vpop.permute.xlu1 %1290  ;;  %1600 = vperm.xlu1 %7914, %v1154_v21  }
 0x168   : > { %v4640_v31 = vpop.f32.mrf.mxu0  ;;  %v8137_v29 = vld [vmem:[%s11940_s1 + $0xde0] ss:$48 sps:$4 sm:$0xff]  }
 0x169   : > { %v4641_v35 = vadd.f32 %v4640_v31, %v1271_v27  ;;  %v5057_v36 = vpop.f32.mrf.mxu1  ;;  %v1296_v41 = vpop.permute.xlu0 %1295 }
 0x16a   : > { %v4642_v42 = vpop.f32.mrf.mxu0 }
 0x16b   : > { %v9781_v47 = vadd.f32 %v5057_v36, %v4641_v35  ;;  %v5059_v48 = vpop.f32.mrf.mxu1  ;;  %v8140_v35 = vld [vmem:[%s11940_s1 + $0xde8] ss:$48 sps:$4 sm:$0xff]   ;;  %v8145_v36 = vld [vmem:[%s11940_s1 + $0xe44] ss:$48 sps:$4 sm:$0xff]   ;;  %v8148_v42 = vld [vmem:[%s11940_s1 + $0xe4c] ss:$48 sps:$4 sm:$0xff]  }
 0x16c   : > { %v4645_v49 = vpop.f32.mrf.mxu0  ;;  %4836 = vmatmul.mubr.bf16.gmra.mxu0 %v8125_v34 }
 0x16d   : > { %v5062_v51 = vpop.f32.mrf.mxu1  ;;  %5253 = vmatmul.mubr.bf16.gmra.mxu1 %v8128_v37  ;;  %v4646_v52 = vadd.f32 %v4645_v49, %v1276_v44  ;;  %4843 = vmatprep.mubr.bf16.mxu0 %v8133_v38  ;;  %v1155_v37 = vld [vmem:[%s11941_s2 + $0x2c0] sm:$0xff] }
 0x16e   : > { %v4647_v56 = vpop.f32.mrf.mxu0  ;;  %5260 = vmatprep.mubr.bf16.mxu1 %v8136_v45  ;;  %1605 = vperm.xlu0 %7913, %v1155_v37   ;;  %v8152_v37 = vld [vmem:[%s11940_s1 + $0xea8] ss:$48 sps:$4 sm:$0xff]  }
 0x16f   : > { %v5064_v60 = vpop.f32.mrf.mxu1  ;;  %v9786_v61 = vadd.f32 %v5062_v51, %v4646_v52  ;;  %v1156_v52 = vld [vmem:[%s11941_s2 + $0x2c8] sm:$0xff]  ;;  %v1301_v56 = vpop.permute.xlu1 %1300 }
 0x170   : > { %v4648_v62 = vpop.f32.mrf.mxu0  ;;  %1610 = vperm.xlu1 %7914, %v1156_v52  }
 0x171   : > { %v4649_v1 = vadd.f32 %v4648_v62, %v1281_v57  ;;  %v5065_v2 = vpop.f32.mrf.mxu1 }
 0x172   : > { %v4650_v10 = vpop.f32.mrf.mxu0  ;;  %1615 = vperm.xlu0 %7913, %v1157_v9  }
 0x173   : > { %v9803_v13 = vadd.f32 %v5065_v2, %v4649_v1  ;;  %v5067_v15 = vpop.f32.mrf.mxu1 }
 0x174   : > { %v4653_v17 = vpop.f32.mrf.mxu0  ;;  %4844 = vmatmul.mubr.bf16.gmra.mxu0 %v8131_v63  ;;  %v8143_v63 = vld [vmem:[%s11940_s1 + $0xe40] ss:$48 sps:$4 sm:$0xff]  }
 0x175   : > { %v5070_v18 = vpop.f32.mrf.mxu1  ;;  %5261 = vmatmul.mubr.bf16.gmra.mxu1 %v8134_v6  ;;  %v4654_v20 = vadd.f32 %v4653_v17, %v1286_v11  ;;  %4851 = vmatprep.mubr.bf16.mxu0 %v8139_v8  ;;  %v8146_v6 = vld [vmem:[%s11940_s1 + $0xe48] ss:$48 sps:$4 sm:$0xff]   ;;  %v8151_v8 = vld [vmem:[%s11940_s1 + $0xea4] ss:$48 sps:$4 sm:$0xff]   ;;  %v1306_v11 = vpop.permute.xlu0 %1305 }
 0x176   : > { %v4655_v22 = vpop.f32.mrf.mxu0  ;;  %5268 = vmatprep.mubr.bf16.mxu1 %v8142_v12  ;;  %v8154_v12 = vld [vmem:[%s11940_s1 + $0xeac] ss:$48 sps:$4 sm:$0xff]  }
 0x177   : > { %v5072_v25 = vpop.f32.mrf.mxu1  ;;  %v9808_v26 = vadd.f32 %v5070_v18, %v4654_v20  ;;  %v1158_v22 = vld [vmem:[%s11941_s2 + $0x2d8] sm:$0xff] }
 0x178   : > { %v4656_v27 = vpop.f32.mrf.mxu0  ;;  %v1311_v25 = vpop.permute.xlu1 %1310  ;;  %1620 = vperm.xlu1 %7914, %v1158_v22  }
 0x179   : > { %v4657_v31 = vadd.f32 %v4656_v27, %v1291_v23  ;;  %v5073_v34 = vpop.f32.mrf.mxu1 }
 0x17a   : > { %v4658_v38 = vpop.f32.mrf.mxu0 }
 0x17b   : > { %v9825_v44 = vadd.f32 %v5073_v34, %v4657_v31  ;;  %v5075_v45 = vpop.f32.mrf.mxu1  ;;  %v8149_v34 = vld [vmem:[%s11940_s1 + $0xea0] ss:$48 sps:$4 sm:$0xff]   ;;  %v8157_v38 = vld [vmem:[%s11940_s1 + $0xf04] ss:$48 sps:$4 sm:$0xff]  }
 0x17c   : > { %v4661_v48 = vpop.f32.mrf.mxu0  ;;  %4852 = vmatmul.mubr.bf16.gmra.mxu0 %v8137_v29  ;;  %v1316_v45 = vpop.permute.xlu0 %1315 }
 0x17d   : > { %v5078_v49 = vpop.f32.mrf.mxu1  ;;  %5269 = vmatmul.mubr.bf16.gmra.mxu1 %v8140_v35  ;;  %v4662_v51 = vadd.f32 %v4661_v48, %v1296_v41  ;;  %4859 = vmatprep.mubr.bf16.mxu0 %v8145_v36  ;;  %v1159_v41 = vld [vmem:[%s11941_s2 + $0x2e0] sm:$0xff]  ;;  %v8160_v48 = vld [vmem:[%s11940_s1 + $0xf0c] ss:$48 sps:$4 sm:$0xff]  }
 0x17e   : > { %v4663_v53 = vpop.f32.mrf.mxu0  ;;  %5276 = vmatprep.mubr.bf16.mxu1 %v8148_v42  ;;  %1625 = vperm.xlu0 %7913, %v1159_v41  }
 0x17f   : > { %v5080_v57 = vpop.f32.mrf.mxu1  ;;  %v9830_v60 = vadd.f32 %v5078_v49, %v4662_v51 }
 0x180   : > { %v4664_v62 = vpop.f32.mrf.mxu0  ;;  %v1160_v57 = vld [vmem:[%s11941_s2 + $0x2e8] sm:$0xff] }
 0x181   : > { %v4665_v1 = vadd.f32 %v4664_v62, %v1301_v56  ;;  %v5081_v2 = vpop.f32.mrf.mxu1  ;;  %1630 = vperm.xlu1 %7914, %v1160_v57   ;;  %v8172_v57 = vld [vmem:[%s11940_s1 + $0xfcc] ss:$48 sps:$4 sm:$0xff]  }
 0x182   : > { %v4666_v10 = vpop.f32.mrf.mxu0 }
 0x183   : > { %v9847_v15 = vadd.f32 %v5081_v2, %v4665_v1  ;;  %v5083_v17 = vpop.f32.mrf.mxu1 }
 0x184   : > { %v4669_v18 = vpop.f32.mrf.mxu0  ;;  %4860 = vmatmul.mubr.bf16.gmra.mxu0 %v8143_v63  ;;  %v1321_v63 = vpop.permute.xlu1 %1320  ;;  %v1161_v17 = vld [vmem:[%s11941_s2 + $0x2f0] sm:$0xff] }
 0x185   : > { %v5086_v20 = vpop.f32.mrf.mxu1  ;;  %5277 = vmatmul.mubr.bf16.gmra.mxu1 %v8146_v6  ;;  %v4670_v21 = vadd.f32 %v4669_v18, %v1306_v11  ;;  %4867 = vmatprep.mubr.bf16.mxu0 %v8151_v8  ;;  %v8155_v8 = vld [vmem:[%s11940_s1 + $0xf00] ss:$48 sps:$4 sm:$0xff]   ;;  %v8158_v11 = vld [vmem:[%s11940_s1 + $0xf08] ss:$48 sps:$4 sm:$0xff]  }
 0x186   : > { %v4671_v23 = vpop.f32.mrf.mxu0  ;;  %5284 = vmatprep.mubr.bf16.mxu1 %v8154_v12  ;;  %v8163_v12 = vld [vmem:[%s11940_s1 + $0xf64] ss:$48 sps:$4 sm:$0xff]   ;;  %1635 = vperm.xlu0 %7913, %v1161_v17  }
 0x187   : > { %v5088_v27 = vpop.f32.mrf.mxu1  ;;  %v9852_v29 = vadd.f32 %v5086_v20, %v4670_v21  ;;  %v1326_v20 = vpop.permute.xlu0 %1325  ;;  %v8166_v21 = vld [vmem:[%s11940_s1 + $0xf6c] ss:$48 sps:$4 sm:$0xff]  }
 0x188   : > { %v4672_v31 = vpop.f32.mrf.mxu0 }
 0x189   : > { %v4673_v35 = vadd.f32 %v4672_v31, %v1311_v25  ;;  %v5089_v36 = vpop.f32.mrf.mxu1 }
 0x18a   : > { %v4674_v42 = vpop.f32.mrf.mxu0 }
 0x18b   : > { %v9869_v49 = vadd.f32 %v5089_v36, %v4673_v35  ;;  %v5091_v51 = vpop.f32.mrf.mxu1  ;;  %v1331_v36 = vpop.permute.xlu1 %1330  ;;  %v8161_v42 = vld [vmem:[%s11940_s1 + $0xf60] ss:$48 sps:$4 sm:$0xff]  }
 0x18c   : > { %v4677_v52 = vpop.f32.mrf.mxu0  ;;  %4868 = vmatmul.mubr.bf16.gmra.mxu0 %v8149_v34  ;;  %v1162_v34 = vld [vmem:[%s11941_s2 + $0x2f8] sm:$0xff] }
 0x18d   : > { %v5094_v53 = vpop.f32.mrf.mxu1  ;;  %5285 = vmatmul.mubr.bf16.gmra.mxu1 %v8152_v37  ;;  %v4678_v56 = vadd.f32 %v4677_v52, %v1316_v45  ;;  %4875 = vmatprep.mubr.bf16.mxu0 %v8157_v38  ;;  %v8164_v51 = vld [vmem:[%s11940_s1 + $0xf68] ss:$48 sps:$4 sm:$0xff]   ;;  %v8169_v52 = vld [vmem:[%s11940_s1 + $0xfc4] ss:$48 sps:$4 sm:$0xff]  }
 0x18e   : > { %v4679_v62 = vpop.f32.mrf.mxu0  ;;  %5292 = vmatprep.mubr.bf16.mxu1 %v8160_v48  ;;  %1640 = vperm.xlu1 %7914, %v1162_v34   ;;  %v8178_v34 = vld [vmem:[%s11940_s1 + $0x102c] ss:$48 sps:$4 sm:$0xff]  }
 0x18f   : > { %v5096_v1 = vpop.f32.mrf.mxu1  ;;  %v9874_v2 = vadd.f32 %v5094_v53, %v4678_v56  ;;  %v1336_v56 = vpop.permute.xlu0 %1335 }
 0x190   : > { %v4680_v6 = vpop.f32.mrf.mxu0 }
 0x191   : > { %v4681_v9 = vadd.f32 %v4680_v6, %v1321_v63  ;;  %v5097_v10 = vpop.f32.mrf.mxu1 }
 0x192   : > { %v4682_v18 = vpop.f32.mrf.mxu0 }
 0x193   : > { %v9891_v22 = vadd.f32 %v5097_v10, %v4681_v9  ;;  %v5099_v23 = vpop.f32.mrf.mxu1  ;;  %v1341_v10 = vpop.permute.xlu1 %1340  ;;  %v8167_v18 = vld [vmem:[%s11940_s1 + $0xfc0] ss:$48 sps:$4 sm:$0xff]  }
 0x194   : > { %v4685_v25 = vpop.f32.mrf.mxu0  ;;  %4876 = vmatmul.mubr.bf16.gmra.mxu0 %v8155_v8  ;;  %v8170_v23 = vld [vmem:[%s11940_s1 + $0xfc8] ss:$48 sps:$4 sm:$0xff]  }
 0x195   : > { %v5102_v27 = vpop.f32.mrf.mxu1  ;;  %5293 = vmatmul.mubr.bf16.gmra.mxu1 %v8158_v11  ;;  %v4686_v31 = vadd.f32 %v4685_v25, %v1326_v20  ;;  %4883 = vmatprep.mubr.bf16.mxu0 %v8163_v12  ;;  %v8175_v25 = vld [vmem:[%s11940_s1 + $0x1024] ss:$48 sps:$4 sm:$0xff]  }
 0x196   : > { %v4687_v35 = vpop.f32.mrf.mxu0  ;;  %5300 = vmatprep.mubr.bf16.mxu1 %v8166_v21 }
 0x197   : > { %v5104_v37 = vpop.f32.mrf.mxu1  ;;  %v9896_v38 = vadd.f32 %v5102_v27, %v4686_v31  ;;  %v1346_v31 = vpop.permute.xlu0 %1345 }
 0x198   : > { %v4688_v41 = vpop.f32.mrf.mxu0 }
 0x199   : > { %v4689_v45 = vadd.f32 %v4688_v41, %v1331_v36  ;;  %v5105_v48 = vpop.f32.mrf.mxu1 }
 0x19a   : > { %v4690_v53 = vpop.f32.mrf.mxu0 }
 0x19b   : > { %v9910_v62 = vadd.f32 %v5105_v48, %v4689_v45  ;;  %v5107_v63 = vpop.f32.mrf.mxu1  ;;  %v1351_v48 = vpop.permute.xlu1 %1350 }
 0x19c   : > { %v4693_v1 = vpop.f32.mrf.mxu0  ;;  %4884 = vmatmul.mubr.bf16.gmra.mxu0 %v8161_v42 }
 0x19d   : > { %v5110_v6 = vpop.f32.mrf.mxu1  ;;  %5301 = vmatmul.mubr.bf16.gmra.mxu1 %v8164_v51  ;;  %v4694_v8 = vadd.f32 %v4693_v1, %v1336_v56  ;;  %4891 = vmatprep.mubr.bf16.mxu0 %v8169_v52  ;;  %v8173_v56 = vld [vmem:[%s11940_s1 + $0x1020] ss:$48 sps:$4 sm:$0xff]   ;;  %v8176_v1 = vld [vmem:[%s11940_s1 + $0x1028] ss:$48 sps:$4 sm:$0xff]  }
 0x19e   : > { %v4695_v9 = vpop.f32.mrf.mxu0  ;;  %5308 = vmatprep.mubr.bf16.mxu1 %v8172_v57 }
 0x19f   : > { %v5112_v11 = vpop.f32.mrf.mxu1  ;;  %v9912_v12 = vadd.f32 %v5110_v6, %v4694_v8  ;;  %v8181_v6 = vld [vmem:[%s11940_s1 + $0x1084] ss:$48 sps:$4 sm:$0xff]   ;;  %v1356_v9 = vpop.permute.xlu0 %1355 }
 0x1a0   : > { %v4696_v17 = vpop.f32.mrf.mxu0 }
 0x1a1   : > { %v4697_v20 = vadd.f32 %v4696_v17, %v1341_v10  ;;  %v5113_v21 = vpop.f32.mrf.mxu1  ;;  %v8184_v10 = vld [vmem:[%s11940_s1 + $0x108c] ss:$48 sps:$4 sm:$0xff]  }
 0x1a2   : > { %v4698_v27 = vpop.f32.mrf.mxu0 }
 0x1a3   : > { %v9926_v35 = vadd.f32 %v5113_v21, %v4697_v20  ;;  %v5115_v36 = vpop.f32.mrf.mxu1 }
 0x1a4   : > { %v4701_v37 = vpop.f32.mrf.mxu0  ;;  %4892 = vmatmul.mubr.bf16.gmra.mxu0 %v8167_v18  ;;  %v8179_v36 = vld [vmem:[%s11940_s1 + $0x1080] ss:$48 sps:$4 sm:$0xff]  }
 0x1a5   : > { %v5118_v41 = vpop.f32.mrf.mxu1  ;;  %5309 = vmatmul.mubr.bf16.gmra.mxu1 %v8170_v23  ;;  %v4702_v42 = vadd.f32 %v4701_v37, %v1346_v31  ;;  %4899 = vmatprep.mubr.bf16.mxu0 %v8175_v25  ;;  %v1361_v25 = vpop.permute.xlu1 %1360 }
 0x1a6   : > { %v4703_v45 = vpop.f32.mrf.mxu0  ;;  %5316 = vmatprep.mubr.bf16.mxu1 %v8178_v34 }
 0x1a7   : > { %v5120_v51 = vpop.f32.mrf.mxu1  ;;  %v9928_v52 = vadd.f32 %v5118_v41, %v4702_v42  ;;  %v8182_v42 = vld [vmem:[%s11940_s1 + $0x1088] ss:$48 sps:$4 sm:$0xff]   ;;  %v8187_v45 = vld [vmem:[%s11940_s1 + $0x10e4] ss:$48 sps:$4 sm:$0xff]  }
 0x1a8   : > { %v4704_v53 = vpop.f32.mrf.mxu0  ;;  %v1366_v51 = vpop.permute.xlu0 %1365 }
 0x1a9   : > { %v4705_v57 = vadd.f32 %v4704_v53, %v1351_v48  ;;  %v5121_v63 = vpop.f32.mrf.mxu1  ;;  %v8190_v53 = vld [vmem:[%s11940_s1 + $0x10ec] ss:$48 sps:$4 sm:$0xff]  }
 0x1aa   : > { %v4706_v8 = vpop.f32.mrf.mxu0 }
 0x1ab   : > { %v9942_v11 = vadd.f32 %v5121_v63, %v4705_v57  ;;  %v5123_v17 = vpop.f32.mrf.mxu1 }
 0x1ac   : > { %v4709_v18 = vpop.f32.mrf.mxu0  ;;  %4900 = vmatmul.mubr.bf16.gmra.mxu0 %v8173_v56 }
 0x1ad   : > { %v5126_v20 = vpop.f32.mrf.mxu1  ;;  %5317 = vmatmul.mubr.bf16.gmra.mxu1 %v8176_v1  ;;  %v4710_v21 = vadd.f32 %v4709_v18, %v1356_v9  ;;  %4907 = vmatprep.mubr.bf16.mxu0 %v8181_v6  ;;  %v1371_v9 = vpop.permute.xlu1 %1370 }
 0x1ae   : > { %v4711_v23 = vpop.f32.mrf.mxu0  ;;  %5324 = vmatprep.mubr.bf16.mxu1 %v8184_v10 }
 0x1af   : > { %v5128_v27 = vpop.f32.mrf.mxu1  ;;  %v9944_v31 = vadd.f32 %v5126_v20, %v4710_v21  ;;  %v8185_v20 = vld [vmem:[%s11940_s1 + $0x10e0] ss:$48 sps:$4 sm:$0xff]  }
 0x1b0   : > { %v4712_v34 = vpop.f32.mrf.mxu0  ;;  %v8193_v27 = vld [vmem:[%s11940_s1 + $0x1144] ss:$48 sps:$4 sm:$0xff]  }
 0x1b1   : > { %v4713_v37 = vadd.f32 %v4712_v34, %v1361_v25  ;;  %v5129_v41 = vpop.f32.mrf.mxu1  ;;  %v8188_v25 = vld [vmem:[%s11940_s1 + $0x10e8] ss:$48 sps:$4 sm:$0xff]  }
 0x1b2   : > { %v4714_v48 = vpop.f32.mrf.mxu0 }
 0x1b3   : > { %v9958_v56 = vadd.f32 %v5129_v41, %v4713_v37  ;;  %v5131_v57 = vpop.f32.mrf.mxu1  ;;  %v8196_v37 = vld [vmem:[%s11940_s1 + $0x114c] ss:$48 sps:$4 sm:$0xff]  }
 0x1b4   : > { %v4717_v63 = vpop.f32.mrf.mxu0  ;;  %4908 = vmatmul.mubr.bf16.gmra.mxu0 %v8179_v36  ;;  %v1376_v36 = vpop.permute.xlu0 %1375 }
 0x1b5   : > { %v5134_v1 = vpop.f32.mrf.mxu1  ;;  %5325 = vmatmul.mubr.bf16.gmra.mxu1 %v8182_v42  ;;  %v4718_v6 = vadd.f32 %v4717_v63, %v1366_v51  ;;  %4915 = vmatprep.mubr.bf16.mxu0 %v8187_v45  ;;  %v1381_v57 = vpop.permute.xlu1 %1380 }
 0x1b6   : > { %v4719_v8 = vpop.f32.mrf.mxu0  ;;  %5332 = vmatprep.mubr.bf16.mxu1 %v8190_v53 }
 0x1b7   : > { %v5136_v10 = vpop.f32.mrf.mxu1  ;;  %v9960_v17 = vadd.f32 %v5134_v1, %v4718_v6  ;;  %v8191_v8 = vld [vmem:[%s11940_s1 + $0x1140] ss:$48 sps:$4 sm:$0xff]  }
 0x1b8   : > { %v4720_v18 = vpop.f32.mrf.mxu0 }
 0x1b9   : > { %11945 = vst [vmem:[#allocation2_spill] sm:$0xff] %v9960_v17  ;;  %v4721_v21 = vadd.f32 %v4720_v18, %v1371_v9  ;;  %v5137_v23 = vpop.f32.mrf.mxu1  ;;  %v8194_v18 = vld [vmem:[%s11940_s1 + $0x1148] ss:$48 sps:$4 sm:$0xff]  }
 0x1ba   : > { %v4722_v34 = vpop.f32.mrf.mxu0 }
 0x1bb   : > { %v9974_v41 = vadd.f32 %v5137_v23, %v4721_v21  ;;  %v5139_v42 = vpop.f32.mrf.mxu1  ;;  %v1386_v23 = vpop.permute.xlu0 %1385 }
 0x1bc   : > { %v4725_v45 = vpop.f32.mrf.mxu0  ;;  %4916 = vmatmul.mubr.bf16.gmra.mxu0 %v8185_v20  ;;  %v8199_v20 = vld [vmem:[%s11940_s1 + $0x11a4] ss:$48 sps:$4 sm:$0xff]  }
 0x1bd   : > { %11946 = vst [vmem:[#allocation3_spill] sm:$0xff] %v9974_v41  ;;  %v5142_v48 = vpop.f32.mrf.mxu1  ;;  %5333 = vmatmul.mubr.bf16.gmra.mxu1 %v8188_v25  ;;  %v4726_v51 = vadd.f32 %v4725_v45, %v1376_v36  ;;  %4923 = vmatprep.mubr.bf16.mxu0 %v8193_v27  ;;  %v8202_v25 = vld [vmem:[%s11940_s1 + $0x11ac] ss:$48 sps:$4 sm:$0xff]  }
 0x1be   : > { %v4727_v53 = vpop.f32.mrf.mxu0  ;;  %5340 = vmatprep.mubr.bf16.mxu1 %v8196_v37 }
 0x1bf   : > { %v5144_v63 = vpop.f32.mrf.mxu1  ;;  %v9976_v1 = vadd.f32 %v5142_v48, %v4726_v51  ;;  %v1391_v48 = vpop.permute.xlu1 %1390 }
 0x1c0   : > { %v4728_v6 = vpop.f32.mrf.mxu0  ;;  %v8197_v63 = vld [vmem:[%s11940_s1 + $0x11a0] ss:$48 sps:$4 sm:$0xff]  }
 0x1c1   : > { %11947 = vst [vmem:[#allocation4_spill] sm:$0xff] %v9976_v1  ;;  %v4729_v9 = vadd.f32 %v4728_v6, %v1381_v57  ;;  %v5145_v10 = vpop.f32.mrf.mxu1  ;;  %v342_v1 = vld [vmem:[%s8858_s23 + $0x458] sm:$0xff] }
 0x1c2   : > { %v4730_v21 = vpop.f32.mrf.mxu0 }
 0x1c3   : > { %v9990_v27 = vadd.f32 %v5145_v10, %v4729_v9  ;;  %v5147_v34 = vpop.f32.mrf.mxu1  ;;  %v8205_v10 = vld [vmem:[%s11940_s1 + $0x14] ss:$48 sps:$4 sm:$0xff]   ;;  %v8208_v21 = vld [vmem:[%s11940_s1 + $0x1c] ss:$48 sps:$4 sm:$0xff]  }
 0x1c4   : > { %v4733_v36 = vpop.f32.mrf.mxu0  ;;  %4924 = vmatmul.mubr.bf16.gmra.mxu0 %v8191_v8  ;;  %v8200_v8 = vld [vmem:[%s11940_s1 + $0x11a8] ss:$48 sps:$4 sm:$0xff]  }
 0x1c5   : > { %11948 = vst [vmem:[#allocation5_spill] sm:$0xff] %v9990_v27  ;;  %v5150_v37 = vpop.f32.mrf.mxu1  ;;  %5341 = vmatmul.mubr.bf16.gmra.mxu1 %v8194_v18  ;;  %v4734_v42 = vadd.f32 %v4733_v36, %v1386_v23  ;;  %4931 = vmatprep.mubr.bf16.mxu0 %v8199_v20  ;;  %v1396_v20 = vpop.permute.xlu0 %1395  ;;  %v341_v27 = vld [vmem:[%s8858_s23 + $0x450] sm:$0xff] }
 0x1c6   : > { %v4735_v45 = vpop.f32.mrf.mxu0  ;;  %5348 = vmatprep.mubr.bf16.mxu1 %v8202_v25 }
 0x1c7   : > { %v5152_v51 = vpop.f32.mrf.mxu1  ;;  %v9992_v53 = vadd.f32 %v5150_v37, %v4734_v42  ;;  %v1401_v45 = vpop.permute.xlu1 %1400 }
 0x1c8   : > { %v4736_v57 = vpop.f32.mrf.mxu0  ;;  %v346_v51 = vld [vmem:[%s8858_s23 + $0x478] sm:$0xff] }
 0x1c9   : > { %11949 = vst [vmem:[#allocation6_spill] sm:$0xff] %v9992_v53  ;;  %v4737_v6 = vadd.f32 %v4736_v57, %v1391_v48  ;;  %v5153_v9 = vpop.f32.mrf.mxu1  ;;  %v345_v48 = vld [vmem:[%s8858_s23 + $0x470] sm:$0xff] }
 0x1ca   : > { %v4738_v18 = vpop.f32.mrf.mxu0 }
 0x1cb   : > { %v10006_v23 = vadd.f32 %v5153_v9, %v4737_v6  ;;  %v5155_v25 = vpop.f32.mrf.mxu1  ;;  %v377_v18 = vld [vmem:[%s8858_s23 + $0x570] sm:$0xff] }
 0x1cc   : > { %v4741_v34 = vpop.f32.mrf.mxu0  ;;  %4932 = vmatmul.mubr.bf16.gmra.mxu0 %v8197_v63  ;;  %v8203_v63 = vld [vmem:[%s11940_s1 + $0x10] ss:$48 sps:$4 sm:$0xff]   ;;  %v1406_v25 = vpop.permute.xlu0 %1405 }
 0x1cd   : > { %11950 = vst [vmem:[#allocation7_spill] sm:$0xff] %v10006_v23  ;;  %v5158_v36 = vpop.f32.mrf.mxu1  ;;  %5349 = vmatmul.mubr.bf16.gmra.mxu1 %v8200_v8  ;;  %v4742_v37 = vadd.f32 %v4741_v34, %v1396_v20  ;;  %5389 = vmatprep.mubr.bf16.mxu0 %v8205_v10  ;;  %v8206_v10 = vld [vmem:[%s11940_s1 + $0x18] ss:$48 sps:$4 sm:$0xff]   ;;  %v466_v20 = vpack.c.bf16 %v346_v51, %v345_v48 }
 0x1ce   : > { %v4743_v42 = vpop.f32.mrf.mxu0  ;;  %5806 = vmatprep.mubr.bf16.mxu1 %v8208_v21  ;;  %v482_v34 = vpack.c.bf16 %v378_v0, %v377_v18  ;;  %v376_v23 = vld [vmem:[%s8858_s23 + $0x568] sm:$0xff] }
 0x1cf   : > { %v5160_v57 = vpop.f32.mrf.mxu1  ;;  %v10012_v53 = vadd.f32 %v5158_v36, %v4742_v37  ;;  %v8211_v36 = vld [vmem:[%s11940_s1 + $0x74] ss:$48 sps:$4 sm:$0xff]   ;;  %v344_v42 = vld [vmem:[%s8858_s23 + $0x468] sm:$0xff] }
 0x1d0   : > { %v4744_v6 = vpop.f32.mrf.mxu0  ;;  %v343_v37 = vld [vmem:[%s8858_s23 + $0x460] sm:$0xff] }
 0x1d1   : > { %11951 = vst [vmem:[#allocation8_spill] sm:$0xff] %v10012_v53  ;;  %v4745_v9 = vadd.f32 %v4744_v6, %v1401_v45  ;;  %v5161_v8 = vpop.f32.mrf.mxu1  ;;  %v8214_v45 = vld [vmem:[%s11940_s1 + $0x7c] ss:$48 sps:$4 sm:$0xff]   ;;  %v375_v6 = vld [vmem:[%s8858_s23 + $0x560] sm:$0xff]  ;;  %v465_v18 = vpack.c.bf16 %v344_v42, %v343_v37 }
 0x1d2   : > { %v4746_v21 = vpop.f32.mrf.mxu0  ;;  %v8217_v37 = vld [vmem:[%s11940_s1 + $0xd4] ss:$48 sps:$4 sm:$0xff]  }
 0x1d3   : > { %v10025_v57 = vadd.f32 %v5161_v8, %v4745_v9  ;;  %v5163_v53 = vpop.f32.mrf.mxu1  ;;  %v481_v8 = vpack.c.bf16 %v376_v23, %v375_v6  ;;  %v8220_v6 = vld [vmem:[%s11940_s1 + $0xdc] ss:$48 sps:$4 sm:$0xff]  }
 0x1d4   : > { %v4749_v48 = vpop.f32.mrf.mxu0  ;;  %5390 = vmatmul.mubr.bf16.vlgmr.msra.gmra.mxu0 %v8203_v63  ;;  %v1411_v53 = vpop.permute.xlu1 %1410 }
 0x1d5   : > { %11952 = vst [vmem:[#allocation9_spill] sm:$0xff] %v10025_v57  ;;  %v5166_v0 = vpop.f32.mrf.mxu1  ;;  %5807 = vmatmul.mubr.bf16.vlgmr.msra.gmra.mxu1 %v8206_v10  ;;  %v4750_v51 = vadd.f32 %v4749_v48, %v1406_v25  ;;  %6192 = vmatpush1.bf16.msra.mxu0 %v466_v20  ;;  %v11953_v57 = vmov 0   ;;  %v8209_v10 = vld [vmem:[%s11940_s1 + $0x70] ss:$48 sps:$4 sm:$0xff]   ;;  %v374_v25 = vld [vmem:[%s8858_s23 + $0x558] sm:$0xff]  ;;  %v464_v48 = vpack.c.bf16 %v342_v1, %v341_v27 }
 0x1d6   : > { %v4751_v9 = vpop.f32.mrf.mxu0  ;;  %6609 = vmatpush1.bf16.msra.mxu1 %v482_v34  ;;  %5397 = vmatprep.mubr.bf16.mxu0 %v8211_v36  ;;  %v373_v20 = vld [vmem:[%s8858_s23 + $0x550] sm:$0xff]  ;;  %v8212_v36 = vld [vmem:[%s11940_s1 + $0x78] ss:$48 sps:$4 sm:$0xff]  }
 0x1d7   : > { %v5168_v21 = vpop.f32.mrf.mxu1  ;;  %5814 = vmatprep.mubr.bf16.mxu1 %v8214_v45  ;;  %6193 = vmatprep.subr.bf16.mxu0 %v11953_v57  ;;  %v10035_v41 = vadd.f32 %v5166_v0, %v4750_v51  ;;  %v1416_v45 = vpop.permute.xlu0 %1415  ;;  %v480_v9 = vpack.c.bf16 %v374_v25, %v373_v20  ;;  %v337_v25 = vld [vmem:[%s8858_s23 + $0x430] sm:$0xff] }
 0x1d8   : > { %v4752_v63 = vpop.f32.mrf.mxu0  ;;  %6610 = vmatprep.subr.bf16.mxu1 %v11953_v57  ;;  %v340_v21 = vld [vmem:[%s8858_s23 + $0x448] sm:$0xff]  ;;  %v1421_v27 = vpop.permute.xlu1 %1420 }
 0x1d9   : > { %11954 = vst [vmem:[#allocation10_spill] sm:$0xff] %v10035_v41  ;;  %v4753_v34 = vadd.f32 %v4752_v63, %v1411_v53  ;;  %v5169_v23 = vpop.f32.mrf.mxu1  ;;  %6194 = vmatpush1.bf16.msra.mxu0 %v465_v18  ;;  %v339_v53 = vld [vmem:[%s8858_s23 + $0x440] sm:$0xff] }
 0x1da   : > { %v4754_v42 = vpop.f32.mrf.mxu0  ;;  %6611 = vmatpush1.bf16.msra.mxu1 %v481_v8  ;;  %6195 = vmatprep.subr.bf16.mxu0 %v11953_v57  ;;  %v371_v63 = vld [vmem:[%s8858_s23 + $0x540] sm:$0xff] }
 0x1db   : > { %v10053_v0 = vadd.f32 %v5169_v23, %v4753_v34  ;;  %v5171_v51 = vpop.f32.mrf.mxu1  ;;  %6612 = vmatprep.subr.bf16.mxu1 %v11953_v57  ;;  %v372_v42 = vld [vmem:[%s8858_s23 + $0x548] sm:$0xff]  ;;  %v463_v34 = vpack.c.bf16 %v340_v21, %v339_v53  ;;  %v338_v23 = vld [vmem:[%s8858_s23 + $0x438] sm:$0xff]  ;;  %v1426_v21 = vpop.permute.xlu0 %1425 }
 0x1dc   : > { %v4757_v18 = vpop.f32.mrf.mxu0  ;;  %5398 = vmatmul.mubr.bf16.gmra.mxu0 %v8209_v10  ;;  %v479_v10 = vpack.c.bf16 %v372_v42, %v371_v63  ;;  %v462_v63 = vpack.c.bf16 %v338_v23, %v337_v25 }
 0x1dd   : > { %11955 = vst [vmem:[#allocation11_spill] sm:$0xff] %v10053_v0  ;;  %v5174_v41 = vpop.f32.mrf.mxu1  ;;  %5815 = vmatmul.mubr.bf16.gmra.mxu1 %v8212_v36  ;;  %v4758_v8 = vadd.f32 %v4757_v18, %v1416_v45  ;;  %5405 = vmatprep.mubr.bf16.mxu0 %v8217_v37  ;;  %v8215_v36 = vld [vmem:[%s11940_s1 + $0xd0] ss:$48 sps:$4 sm:$0xff]   ;;  %v370_v45 = vld [vmem:[%s8858_s23 + $0x538] sm:$0xff] }
 0x1de   : > { %v4759_v1 = vpop.f32.mrf.mxu0  ;;  %5822 = vmatprep.mubr.bf16.mxu1 %v8220_v6  ;;  %6196 = vmatpush1.bf16.msra.mxu0 %v464_v48  ;;  %v369_v37 = vld [vmem:[%s8858_s23 + $0x530] sm:$0xff]  ;;  %v8226_v18 = vld [vmem:[%s11940_s1 + $0x13c] ss:$48 sps:$4 sm:$0xff]  }
 0x1df   : > { %v5176_v20 = vpop.f32.mrf.mxu1  ;;  %6613 = vmatpush1.bf16.msra.mxu1 %v480_v9  ;;  %6197 = vmatprep.subr.bf16.mxu0 %v11953_v57  ;;  %v10063_v51 = vadd.f32 %v5174_v41, %v4758_v8  ;;  %v8218_v9 = vld [vmem:[%s11940_s1 + $0xd8] ss:$48 sps:$4 sm:$0xff]   ;;  %v8223_v41 = vld [vmem:[%s11940_s1 + $0x134] ss:$48 sps:$4 sm:$0xff]   ;;  %v478_v8 = vpack.c.bf16 %v370_v45, %v369_v37 }
 0x1e0   : > { %v4760_v0 = vpop.f32.mrf.mxu0  ;;  %6614 = vmatprep.subr.bf16.mxu1 %v11953_v57  ;;  %v335_v1 = vld [vmem:[%s8858_s23 + $0x420] sm:$0xff]  ;;  %v333_v45 = vld [vmem:[%s8858_s23 + $0x410] sm:$0xff] }
 0x1e1   : > { %11956 = vst [vmem:[#allocation12_spill] sm:$0xff] %v10063_v51  ;;  %v4761_v6 = vadd.f32 %v4760_v0, %v1421_v27  ;;  %v5177_v48 = vpop.f32.mrf.mxu1  ;;  %v336_v27 = vld [vmem:[%s8858_s23 + $0x428] sm:$0xff] }
 0x1e2   : > { %v4762_v53 = vpop.f32.mrf.mxu0  ;;  %6198 = vmatpush1.bf16.msra.mxu0 %v463_v34  ;;  %v368_v51 = vld [vmem:[%s8858_s23 + $0x528] sm:$0xff]  ;;  %v461_v23 = vpack.c.bf16 %v336_v27, %v335_v1  ;;  %v1436_v1 = vpop.permute.xlu0 %1435 }
 0x1e3   : > { %v10080_v0 = vadd.f32 %v5177_v48, %v4761_v6  ;;  %v5179_v42 = vpop.f32.mrf.mxu1  ;;  %6615 = vmatpush1.bf16.msra.mxu1 %v479_v10  ;;  %6199 = vmatprep.subr.bf16.mxu0 %v11953_v57  ;;  %v367_v53 = vld [vmem:[%s8858_s23 + $0x520] sm:$0xff]  ;;  %v1431_v10 = vpop.permute.xlu1 %1430  ;;  %v334_v6 = vld [vmem:[%s8858_s23 + $0x418] sm:$0xff] }
 0x1e4   : > { %v4765_v20 = vpop.f32.mrf.mxu0  ;;  %5406 = vmatmul.mubr.bf16.gmra.mxu0 %v8215_v36  ;;  %6616 = vmatprep.subr.bf16.mxu1 %v11953_v57  ;;  %v477_v36 = vpack.c.bf16 %v368_v51, %v367_v53  ;;  %v8232_v27 = vld [vmem:[%s11940_s1 + $0x19c] ss:$48 sps:$4 sm:$0xff]  }
 0x1e5   : > { %v5182_v17 = vpop.f32.mrf.mxu1  ;;  %5823 = vmatmul.mubr.bf16.gmra.mxu1 %v8218_v9  ;;  %v4766_v34 = vadd.f32 %v4765_v20, %v1426_v21  ;;  %5413 = vmatprep.mubr.bf16.mxu0 %v8223_v41  ;;  %v8221_v9 = vld [vmem:[%s11940_s1 + $0x130] ss:$48 sps:$4 sm:$0xff]   ;;  %v366_v21 = vld [vmem:[%s8858_s23 + $0x518] sm:$0xff]  ;;  %v460_v20 = vpack.c.bf16 %v334_v6, %v333_v45 }
 0x1e6   : > { %v4767_v25 = vpop.f32.mrf.mxu0  ;;  %5830 = vmatprep.mubr.bf16.mxu1 %v8226_v18  ;;  %6200 = vmatpush1.bf16.msra.mxu0 %v462_v63  ;;  %v365_v41 = vld [vmem:[%s8858_s23 + $0x510] sm:$0xff] }
 0x1e7   : > { %v5184_v37 = vpop.f32.mrf.mxu1  ;;  %6617 = vmatpush1.bf16.msra.mxu1 %v478_v8  ;;  %6201 = vmatprep.subr.bf16.mxu0 %v11953_v57  ;;  %v10091_v48 = vadd.f32 %v5182_v17, %v4766_v34  ;;  %v8224_v8 = vld [vmem:[%s11940_s1 + $0x138] ss:$48 sps:$4 sm:$0xff]   ;;  %v8229_v17 = vld [vmem:[%s11940_s1 + $0x194] ss:$48 sps:$4 sm:$0xff]   ;;  %v476_v25 = vpack.c.bf16 %v366_v21, %v365_v41  ;;  %v8227_v6 = vld [vmem:[%s11940_s1 + $0x190] ss:$48 sps:$4 sm:$0xff]  }
 0x1e8   : > { %v4768_v42 = vpop.f32.mrf.mxu0  ;;  %6618 = vmatprep.subr.bf16.mxu1 %v11953_v57  ;;  %v8230_v21 = vld [vmem:[%s11940_s1 + $0x198] ss:$48 sps:$4 sm:$0xff]  }
 0x1e9   : > { %11957 = vst [vmem:[#allocation13_spill] sm:$0xff] %v10091_v48  ;;  %v4769_v18 = vadd.f32 %v4768_v42, %v1431_v10  ;;  %v5185_v63 = vpop.f32.mrf.mxu1  ;;  %v1441_v48 = vpop.permute.xlu1 %1440 }
 0x1ea   : > { %v4770_v51 = vpop.f32.mrf.mxu0  ;;  %6202 = vmatpush1.bf16.msra.mxu0 %v461_v23 }
 0x1eb   : > { %v10108_v53 = vadd.f32 %v5185_v63, %v4769_v18  ;;  %v5187_v34 = vpop.f32.mrf.mxu1  ;;  %6619 = vmatpush1.bf16.msra.mxu1 %v477_v36  ;;  %6203 = vmatprep.subr.bf16.mxu0 %v11953_v57  ;;  %v8235_v18 = vld [vmem:[%s11940_s1 + $0x1f4] ss:$48 sps:$4 sm:$0xff]  }
 0x1ec   : > { %v4773_v10 = vpop.f32.mrf.mxu0  ;;  %5414 = vmatmul.mubr.bf16.gmra.mxu0 %v8221_v9  ;;  %6620 = vmatprep.subr.bf16.mxu1 %v11953_v57 }
 0x1ed   : > { %v5190_v37 = vpop.f32.mrf.mxu1  ;;  %5831 = vmatmul.mubr.bf16.gmra.mxu1 %v8224_v8  ;;  %v4774_v42 = vadd.f32 %v4773_v10, %v1436_v1  ;;  %5421 = vmatprep.mubr.bf16.mxu0 %v8229_v17  ;;  %v1446_v8 = vpop.permute.xlu0 %1445  ;;  %v8238_v17 = vld [vmem:[%s11940_s1 + $0x1fc] ss:$48 sps:$4 sm:$0xff]  }
 0x1ee   : > { %v4775_v51 = vpop.f32.mrf.mxu0  ;;  %5838 = vmatprep.mubr.bf16.mxu1 %v8232_v27  ;;  %6204 = vmatpush1.bf16.msra.mxu0 %v460_v20  ;;  %v1451_v10 = vpop.permute.xlu1 %1450 }
 0x1ef   : > { %v5192_v23 = vpop.f32.mrf.mxu1  ;;  %6621 = vmatpush1.bf16.msra.mxu1 %v476_v25  ;;  %6205 = vmatprep.subr.bf16.mxu0 %v11953_v57  ;;  %v10113_v36 = vadd.f32 %v5190_v37, %v4774_v42 }
 0x1f0   : > { %v4776_v45 = vpop.f32.mrf.mxu0  ;;  %6622 = vmatprep.subr.bf16.mxu1 %v11953_v57  ;;  %v8233_v23 = vld [vmem:[%s11940_s1 + $0x1f0] ss:$48 sps:$4 sm:$0xff]  }
 0x1f1   : > { %11958 = vst [vmem:[#allocation14_spill] sm:$0xff] %v10113_v36  ;;  %v4777_v9 = vadd.f32 %v4776_v45, %v1441_v48  ;;  %v5193_v41 = vpop.f32.mrf.mxu1 }
 0x1f2   : > { %v4778_v63 = vpop.f32.mrf.mxu0 }
 0x1f3   : > { %v10128_v1 = vadd.f32 %v5193_v41, %v4777_v9  ;;  %v5195_v27 = vpop.f32.mrf.mxu1  ;;  %v8241_v41 = vld [vmem:[%s11940_s1 + $0x254] ss:$48 sps:$4 sm:$0xff]   ;;  %v8244_v63 = vld [vmem:[%s11940_s1 + $0x25c] ss:$48 sps:$4 sm:$0xff]  }
 0x1f4   : > { %v4781_v20 = vpop.f32.mrf.mxu0  ;;  %5422 = vmatmul.mubr.bf16.gmra.mxu0 %v8227_v6  ;;  %v8236_v6 = vld [vmem:[%s11940_s1 + $0x1f8] ss:$48 sps:$4 sm:$0xff]  }
 0x1f5   : > { %11959 = vst [vmem:[#allocation15_spill] sm:$0xff] %v10128_v1  ;;  %v5198_v48 = vpop.f32.mrf.mxu1  ;;  %5839 = vmatmul.mubr.bf16.gmra.mxu1 %v8230_v21  ;;  %v4782_v34 = vadd.f32 %v4781_v20, %v1446_v8  ;;  %5429 = vmatprep.mubr.bf16.mxu0 %v8235_v18  ;;  %v1456_v18 = vpop.permute.xlu0 %1455  ;;  %v364_v1 = vld [vmem:[%s8858_s23 + $0x508] sm:$0xff] }
 0x1f6   : > { %v4783_v25 = vpop.f32.mrf.mxu0  ;;  %5846 = vmatprep.mubr.bf16.mxu1 %v8238_v17 }
 0x1f7   : > { %v5200_v37 = vpop.f32.mrf.mxu1  ;;  %v10130_v42 = vadd.f32 %v5198_v48, %v4782_v34  ;;  %v331_v34 = vld [vmem:[%s8858_s23 + $0x400] sm:$0xff]  ;;  %v332_v25 = vld [vmem:[%s8858_s23 + $0x408] sm:$0xff] }
 0x1f8   : > { %v4784_v51 = vpop.f32.mrf.mxu0  ;;  %v1461_v37 = vpop.permute.xlu1 %1460 }
 0x1f9   : > { %11960 = vst [vmem:[#allocation16_spill] sm:$0xff] %v10130_v42  ;;  %v4785_v45 = vadd.f32 %v4784_v51, %v1451_v10  ;;  %v5201_v9 = vpop.f32.mrf.mxu1  ;;  %v459_v51 = vpack.c.bf16 %v332_v25, %v331_v34  ;;  %v363_v42 = vld [vmem:[%s8858_s23 + $0x500] sm:$0xff] }
 0x1fa   : > { %v4786_v21 = vpop.f32.mrf.mxu0 }
 0x1fb   : > { %v10144_v8 = vadd.f32 %v5201_v9, %v4785_v45  ;;  %v5203_v17 = vpop.f32.mrf.mxu1  ;;  %6206 = vmatpush1.bf16.msra.mxu0 %v459_v51  ;;  %v475_v9 = vpack.c.bf16 %v364_v1, %v363_v42 }
 0x1fc   : > { %v4789_v27 = vpop.f32.mrf.mxu0  ;;  %5430 = vmatmul.mubr.bf16.gmra.mxu0 %v8233_v23  ;;  %v8239_v23 = vld [vmem:[%s11940_s1 + $0x250] ss:$48 sps:$4 sm:$0xff]   ;;  %6207 = vmatprep.subr.bf16.mxu0 %v11953_v57 }
 0x1fd   : > { %v5206_v20 = vpop.f32.mrf.mxu1  ;;  %5847 = vmatmul.mubr.bf16.gmra.mxu1 %v8236_v6  ;;  %v4790_v48 = vadd.f32 %v4789_v27, %v1456_v18  ;;  %5437 = vmatprep.mubr.bf16.mxu0 %v8241_v41  ;;  %v8242_v18 = vld [vmem:[%s11940_s1 + $0x258] ss:$48 sps:$4 sm:$0xff]   ;;  %v1466_v27 = vpop.permute.xlu0 %1465 }
 0x1fe   : > { %v4791_v10 = vpop.f32.mrf.mxu0  ;;  %5854 = vmatprep.mubr.bf16.mxu1 %v8244_v63  ;;  %v8247_v63 = vld [vmem:[%s11940_s1 + $0x2b4] ss:$48 sps:$4 sm:$0xff]   ;;  %6623 = vmatpush1.bf16.msra.mxu1 %v475_v9  ;;  %v8245_v9 = vld [vmem:[%s11940_s1 + $0x2b0] ss:$48 sps:$4 sm:$0xff]  }
 0x1ff   : > { %v5208_v21 = vpop.f32.mrf.mxu1  ;;  %v10150_v36 = vadd.f32 %v5206_v20, %v4790_v48  ;;  %v8250_v20 = vld [vmem:[%s11940_s1 + $0x2bc] ss:$48 sps:$4 sm:$0xff]   ;;  %6624 = vmatprep.subr.bf16.mxu1 %v11953_v57 }
 0x200   : > { %v4792_v45 = vpop.f32.mrf.mxu0 }
 0x201   : > { %11961 = vst [vmem:[#allocation17_spill] sm:$0xff] %v10150_v36  ;;  %v4793_v6 = vadd.f32 %v4792_v45, %v1461_v37  ;;  %v5209_v41 = vpop.f32.mrf.mxu1  ;;  %v1471_v37 = vpop.permute.xlu1 %1470 }
 0x202   : > { %v4794_v17 = vpop.f32.mrf.mxu0 }
 0x203   : > { %v10165_v1 = vadd.f32 %v5209_v41, %v4793_v6  ;;  %v5211_v42 = vpop.f32.mrf.mxu1  ;;  %v1476_v17 = vpop.permute.xlu0 %1475 }
 0x204   : > { %v4797_v48 = vpop.f32.mrf.mxu0  ;;  %5438 = vmatmul.mubr.bf16.gmra.mxu0 %v8239_v23  ;;  %v8248_v23 = vld [vmem:[%s11940_s1 + $0x2b8] ss:$48 sps:$4 sm:$0xff]  }
 0x205   : > { %11962 = vst [vmem:[#allocation18_spill] sm:$0xff] %v10165_v1  ;;  %v5214_v34 = vpop.f32.mrf.mxu1  ;;  %5855 = vmatmul.mubr.bf16.gmra.mxu1 %v8242_v18  ;;  %v4798_v25 = vadd.f32 %v4797_v48, %v1466_v27  ;;  %5445 = vmatprep.mubr.bf16.mxu0 %v8247_v63  ;;  %v8253_v18 = vld [vmem:[%s11940_s1 + $0x314] ss:$48 sps:$4 sm:$0xff]   ;;  %v8256_v27 = vld [vmem:[%s11940_s1 + $0x31c] ss:$48 sps:$4 sm:$0xff]  }
 0x206   : > { %v4799_v10 = vpop.f32.mrf.mxu0  ;;  %5862 = vmatprep.mubr.bf16.mxu1 %v8250_v20 }
 0x207   : > { %v5216_v51 = vpop.f32.mrf.mxu1  ;;  %v10168_v21 = vadd.f32 %v5214_v34, %v4798_v25 }
 0x208   : > { %v4800_v45 = vpop.f32.mrf.mxu0 }
 0x209   : > { %11963 = vst [vmem:[#allocation19_spill] sm:$0xff] %v10168_v21  ;;  %v4801_v6 = vadd.f32 %v4800_v45, %v1471_v37  ;;  %v5217_v41 = vpop.f32.mrf.mxu1  ;;  %v1481_v37 = vpop.permute.xlu1 %1480  ;;  %v8251_v21 = vld [vmem:[%s11940_s1 + $0x310] ss:$48 sps:$4 sm:$0xff]  }
 0x20a   : > { %v4802_v63 = vpop.f32.mrf.mxu0 }
 0x20b   : > { %v10182_v20 = vadd.f32 %v5217_v41, %v4801_v6  ;;  %v5219_v42 = vpop.f32.mrf.mxu1 }
 0x20c   : > { %v4805_v48 = vpop.f32.mrf.mxu0  ;;  %5446 = vmatmul.mubr.bf16.gmra.mxu0 %v8245_v9  ;;  %v8254_v9 = vld [vmem:[%s11940_s1 + $0x318] ss:$48 sps:$4 sm:$0xff]  }
 0x20d   : > { %11964 = vst [vmem:[#allocation20_spill] sm:$0xff] %v10182_v20  ;;  %v5222_v34 = vpop.f32.mrf.mxu1  ;;  %5863 = vmatmul.mubr.bf16.gmra.mxu1 %v8248_v23  ;;  %v4806_v25 = vadd.f32 %v4805_v48, %v1476_v17  ;;  %5453 = vmatprep.mubr.bf16.mxu0 %v8253_v18  ;;  %v8259_v23 = vld [vmem:[%s11940_s1 + $0x374] ss:$48 sps:$4 sm:$0xff]   ;;  %v1486_v17 = vpop.permute.xlu0 %1485 }
 0x20e   : > { %v4807_v10 = vpop.f32.mrf.mxu0  ;;  %5870 = vmatprep.mubr.bf16.mxu1 %v8256_v27  ;;  %v8262_v27 = vld [vmem:[%s11940_s1 + $0x37c] ss:$48 sps:$4 sm:$0xff]   ;;  %v393_v20 = vld [vmem:[%s8858_s23 + $0x5f0] sm:$0xff] }
 0x20f   : > { %v5224_v51 = vpop.f32.mrf.mxu1  ;;  %v10184_v45 = vadd.f32 %v5222_v34, %v4806_v25 }
 0x210   : > { %v4808_v63 = vpop.f32.mrf.mxu0  ;;  %v1491_v51 = vpop.permute.xlu1 %1490 }
 0x211   : > { %11965 = vst [vmem:[#allocation21_spill] sm:$0xff] %v10184_v45  ;;  %v4809_v6 = vadd.f32 %v4808_v63, %v1481_v37  ;;  %v5225_v41 = vpop.f32.mrf.mxu1  ;;  %v362_v45 = vld [vmem:[%s8858_s23 + $0x4f8] sm:$0xff] }
 0x212   : > { %v4810_v18 = vpop.f32.mrf.mxu0 }
 0x213   : > { %v10198_v42 = vadd.f32 %v5225_v41, %v4809_v6  ;;  %v5227_v48 = vpop.f32.mrf.mxu1  ;;  %v361_v18 = vld [vmem:[%s8858_s23 + $0x4f0] sm:$0xff]  ;;  %v394_v41 = vld [vmem:[%s8858_s23 + $0x5f8] sm:$0xff] }
 0x214   : > { %v4813_v34 = vpop.f32.mrf.mxu0  ;;  %5454 = vmatmul.mubr.bf16.gmra.mxu0 %v8251_v21  ;;  %v8257_v6 = vld [vmem:[%s11940_s1 + $0x370] ss:$48 sps:$4 sm:$0xff]   ;;  %v474_v21 = vpack.c.bf16 %v362_v45, %v361_v18  ;;  %v1501_v18 = vpop.permute.xlu1 %1500 }
 0x215   : > { %11966 = vst [vmem:[#allocation22_spill] sm:$0xff] %v10198_v42  ;;  %v5230_v25 = vpop.f32.mrf.mxu1  ;;  %5871 = vmatmul.mubr.bf16.gmra.mxu1 %v8254_v9  ;;  %v4814_v10 = vadd.f32 %v4813_v34, %v1486_v17  ;;  %5461 = vmatprep.mubr.bf16.mxu0 %v8259_v23  ;;  %v8260_v23 = vld [vmem:[%s11940_s1 + $0x378] ss:$48 sps:$4 sm:$0xff]   ;;  %v8265_v17 = vld [vmem:[%s11940_s1 + $0x3d4] ss:$48 sps:$4 sm:$0xff]  }
 0x216   : > { %v4815_v37 = vpop.f32.mrf.mxu0  ;;  %5878 = vmatprep.mubr.bf16.mxu1 %v8262_v27  ;;  %v490_v27 = vpack.c.bf16 %v394_v41, %v393_v20  ;;  %6208 = vmatpush2.bf16.msra.mxu0 %v474_v21 }
 0x217   : > { %v5232_v63 = vpop.f32.mrf.mxu1  ;;  %v10203_v1 = vadd.f32 %v5230_v25, %v4814_v10  ;;  %v1496_v25 = vpop.permute.xlu0 %1495  ;;  %v8268_v10 = vld [vmem:[%s11940_s1 + $0x3dc] ss:$48 sps:$4 sm:$0xff]   ;;  %6209 = vmatprep.subr.bf16.mxu0 %v11953_v57 }
 0x218   : > { %v4816_v36 = vpop.f32.mrf.mxu0  ;;  %6625 = vmatpush2.bf16.msra.mxu1 %v490_v27 }
 0x219   : > { %11967 = vst [vmem:[#allocation23_spill] sm:$0xff] %v10203_v1  ;;  %v4817_v48 = vadd.f32 %v4816_v36, %v1491_v51  ;;  %v5233_v9 = vpop.f32.mrf.mxu1  ;;  %6626 = vmatprep.subr.bf16.mxu1 %v11953_v57 }
 0x21a   : > { %v4818_v34 = vpop.f32.mrf.mxu0 }
 0x21b   : > { %v10218_v45 = vadd.f32 %v5233_v9, %v4817_v48  ;;  %v5235_v36 = vpop.f32.mrf.mxu1  ;;  %v8263_v48 = vld [vmem:[%s11940_s1 + $0x3d0] ss:$48 sps:$4 sm:$0xff]  }
 0x21c   : > { %v4821_v37 = vpop.f32.mrf.mxu0  ;;  %5462 = vmatmul.mubr.bf16.gmra.mxu0 %v8257_v6  ;;  %v8266_v6 = vld [vmem:[%s11940_s1 + $0x3d8] ss:$48 sps:$4 sm:$0xff]  }
 0x21d   : > { %11968 = vst [vmem:[#allocation24_spill] sm:$0xff] %v10218_v45  ;;  %v5238_v51 = vpop.f32.mrf.mxu1  ;;  %5879 = vmatmul.mubr.bf16.gmra.mxu1 %v8260_v23  ;;  %v4822_v20 = vadd.f32 %v4821_v37, %v1496_v25  ;;  %5469 = vmatprep.mubr.bf16.mxu0 %v8265_v17  ;;  %v8271_v23 = vld [vmem:[%s11940_s1 + $0x434] ss:$48 sps:$4 sm:$0xff]   ;;  %v1506_v25 = vpop.permute.xlu0 %1505  ;;  %v8269_v45 = vld [vmem:[%s11940_s1 + $0x430] ss:$48 sps:$4 sm:$0xff]  }
 0x21e   : > { %v4823_v63 = vpop.f32.mrf.mxu0  ;;  %5886 = vmatprep.mubr.bf16.mxu1 %v8268_v10  ;;  %v8274_v10 = vld [vmem:[%s11940_s1 + $0x43c] ss:$48 sps:$4 sm:$0xff]  }
 0x21f   : > { %v5240_v41 = vpop.f32.mrf.mxu1  ;;  %v10222_v34 = vadd.f32 %v5238_v51, %v4822_v20 }
 0x220   : > { %v4824_v21 = vpop.f32.mrf.mxu0  ;;  %v1511_v41 = vpop.permute.xlu1 %1510 }
 0x221   : > { %11969 = vst [vmem:[#allocation25_spill] sm:$0xff] %v10222_v34  ;;  %v4825_v9 = vadd.f32 %v4824_v21, %v1501_v18  ;;  %v5241_v27 = vpop.f32.mrf.mxu1 }
 0x222   : > { %v4826_v17 = vpop.f32.mrf.mxu0 }
 0x223   : > { %v10236_v36 = vadd.f32 %v5241_v27, %v4825_v9  ;;  %v5243_v37 = vpop.f32.mrf.mxu1 }
 0x224   : > { %v4829_v51 = vpop.f32.mrf.mxu0  ;;  %5470 = vmatmul.mubr.bf16.gmra.mxu0 %v8263_v48  ;;  %v8272_v48 = vld [vmem:[%s11940_s1 + $0x438] ss:$48 sps:$4 sm:$0xff]  }
 0x225   : > { %11970 = vst [vmem:[#allocation26_spill] sm:$0xff] %v10236_v36  ;;  %v5246_v20 = vpop.f32.mrf.mxu1  ;;  %5887 = vmatmul.mubr.bf16.gmra.mxu1 %v8266_v6  ;;  %v4830_v63 = vadd.f32 %v4829_v51, %v1506_v25  ;;  %5477 = vmatprep.mubr.bf16.mxu0 %v8271_v23  ;;  %v8277_v6 = vld [vmem:[%s11940_s1 + $0x494] ss:$48 sps:$4 sm:$0xff]   ;;  %v1516_v25 = vpop.permute.xlu0 %1515 }
 0x226   : > { %v4831_v18 = vpop.f32.mrf.mxu0  ;;  %5894 = vmatprep.mubr.bf16.mxu1 %v8274_v10  ;;  %v8280_v10 = vld [vmem:[%s11940_s1 + $0x49c] ss:$48 sps:$4 sm:$0xff]   ;;  %v391_v36 = vld [vmem:[%s8858_s23 + $0x5e0] sm:$0xff] }
 0x227   : > { %v5248_v21 = vpop.f32.mrf.mxu1  ;;  %v10238_v34 = vadd.f32 %v5246_v20, %v4830_v63 }
 0x228   : > { %v4832_v17 = vpop.f32.mrf.mxu0  ;;  %v1521_v21 = vpop.permute.xlu1 %1520 }
 0x229   : > { %11971 = vst [vmem:[#allocation27_spill] sm:$0xff] %v10238_v34  ;;  %v4833_v9 = vadd.f32 %v4832_v17, %v1511_v41  ;;  %v5249_v27 = vpop.f32.mrf.mxu1  ;;  %v360_v34 = vld [vmem:[%s8858_s23 + $0x4e8] sm:$0xff] }
 0x22a   : > { %v4834_v23 = vpop.f32.mrf.mxu0 }
 0x22b   : > { %v10252_v37 = vadd.f32 %v5249_v27, %v4833_v9  ;;  %v5251_v51 = vpop.f32.mrf.mxu1  ;;  %v359_v23 = vld [vmem:[%s8858_s23 + $0x4e0] sm:$0xff]  ;;  %v392_v27 = vld [vmem:[%s8858_s23 + $0x5e8] sm:$0xff] }
 0x22c   : > { %v4837_v20 = vpop.f32.mrf.mxu0  ;;  %5478 = vmatmul.mubr.bf16.gmra.mxu0 %v8269_v45  ;;  %v8275_v9 = vld [vmem:[%s11940_s1 + $0x490] ss:$48 sps:$4 sm:$0xff]   ;;  %v473_v45 = vpack.c.bf16 %v360_v34, %v359_v23  ;;  %v1531_v23 = vpop.permute.xlu1 %1530 }
 0x22d   : > { %11972 = vst [vmem:[#allocation28_spill] sm:$0xff] %v10252_v37  ;;  %v5254_v63 = vpop.f32.mrf.mxu1  ;;  %5895 = vmatmul.mubr.bf16.gmra.mxu1 %v8272_v48  ;;  %v4838_v18 = vadd.f32 %v4837_v20, %v1516_v25  ;;  %5485 = vmatprep.mubr.bf16.mxu0 %v8277_v6  ;;  %v8278_v6 = vld [vmem:[%s11940_s1 + $0x498] ss:$48 sps:$4 sm:$0xff]   ;;  %v8283_v25 = vld [vmem:[%s11940_s1 + $0x4f4] ss:$48 sps:$4 sm:$0xff]  }
 0x22e   : > { %v4839_v41 = vpop.f32.mrf.mxu0  ;;  %5902 = vmatprep.mubr.bf16.mxu1 %v8280_v10  ;;  %v489_v10 = vpack.c.bf16 %v392_v27, %v391_v36  ;;  %6210 = vmatpush2.bf16.msra.mxu0 %v473_v45 }
 0x22f   : > { %v5256_v17 = vpop.f32.mrf.mxu1  ;;  %v10257_v1 = vadd.f32 %v5254_v63, %v4838_v18  ;;  %v1526_v63 = vpop.permute.xlu0 %1525  ;;  %v8286_v18 = vld [vmem:[%s11940_s1 + $0x4fc] ss:$48 sps:$4 sm:$0xff]   ;;  %6211 = vmatprep.subr.bf16.mxu0 %v11953_v57 }
 0x230   : > { %v4840_v42 = vpop.f32.mrf.mxu0  ;;  %6627 = vmatpush2.bf16.msra.mxu1 %v489_v10 }
 0x231   : > { %11973 = vst [vmem:[#allocation29_spill] sm:$0xff] %v10257_v1  ;;  %v4841_v51 = vadd.f32 %v4840_v42, %v1521_v21  ;;  %v5257_v48 = vpop.f32.mrf.mxu1  ;;  %6628 = vmatprep.subr.bf16.mxu1 %v11953_v57 }
 0x232   : > { %v4842_v20 = vpop.f32.mrf.mxu0 }
 0x233   : > { %v10272_v34 = vadd.f32 %v5257_v48, %v4841_v51  ;;  %v5259_v42 = vpop.f32.mrf.mxu1  ;;  %v8281_v51 = vld [vmem:[%s11940_s1 + $0x4f0] ss:$48 sps:$4 sm:$0xff]  }
 0x234   : > { %v4845_v41 = vpop.f32.mrf.mxu0  ;;  %5486 = vmatmul.mubr.bf16.gmra.mxu0 %v8275_v9  ;;  %v8284_v9 = vld [vmem:[%s11940_s1 + $0x4f8] ss:$48 sps:$4 sm:$0xff]  }
 0x235   : > { %11974 = vst [vmem:[#allocation30_spill] sm:$0xff] %v10272_v34  ;;  %v5262_v21 = vpop.f32.mrf.mxu1  ;;  %5903 = vmatmul.mubr.bf16.gmra.mxu1 %v8278_v6  ;;  %v4846_v36 = vadd.f32 %v4845_v41, %v1526_v63  ;;  %5493 = vmatprep.mubr.bf16.mxu0 %v8283_v25  ;;  %v8289_v6 = vld [vmem:[%s11940_s1 + $0x554] ss:$48 sps:$4 sm:$0xff]   ;;  %v1536_v63 = vpop.permute.xlu0 %1535  ;;  %v8287_v34 = vld [vmem:[%s11940_s1 + $0x550] ss:$48 sps:$4 sm:$0xff]  }
 0x236   : > { %v4847_v17 = vpop.f32.mrf.mxu0  ;;  %5910 = vmatprep.mubr.bf16.mxu1 %v8286_v18  ;;  %v8292_v18 = vld [vmem:[%s11940_s1 + $0x55c] ss:$48 sps:$4 sm:$0xff]  }
 0x237   : > { %v5264_v27 = vpop.f32.mrf.mxu1  ;;  %v10276_v20 = vadd.f32 %v5262_v21, %v4846_v36 }
 0x238   : > { %v4848_v45 = vpop.f32.mrf.mxu0  ;;  %v1541_v27 = vpop.permute.xlu1 %1540 }
 0x239   : > { %11975 = vst [vmem:[#allocation31_spill] sm:$0xff] %v10276_v20  ;;  %v4849_v48 = vadd.f32 %v4848_v45, %v1531_v23  ;;  %v5265_v10 = vpop.f32.mrf.mxu1 }
 0x23a   : > { %v4850_v25 = vpop.f32.mrf.mxu0 }
 0x23b   : > { %v10290_v42 = vadd.f32 %v5265_v10, %v4849_v48  ;;  %v5267_v41 = vpop.f32.mrf.mxu1 }
 0x23c   : > { %v4853_v21 = vpop.f32.mrf.mxu0  ;;  %5494 = vmatmul.mubr.bf16.gmra.mxu0 %v8281_v51  ;;  %v8290_v51 = vld [vmem:[%s11940_s1 + $0x558] ss:$48 sps:$4 sm:$0xff]  }
 0x23d   : > { %11976 = vst [vmem:[#allocation32_spill] sm:$0xff] %v10290_v42  ;;  %v5270_v36 = vpop.f32.mrf.mxu1  ;;  %5911 = vmatmul.mubr.bf16.gmra.mxu1 %v8284_v9  ;;  %v4854_v17 = vadd.f32 %v4853_v21, %v1536_v63  ;;  %5501 = vmatprep.mubr.bf16.mxu0 %v8289_v6  ;;  %v8295_v9 = vld [vmem:[%s11940_s1 + $0x5b4] ss:$48 sps:$4 sm:$0xff]   ;;  %v1546_v63 = vpop.permute.xlu0 %1545 }
 0x23e   : > { %v4855_v23 = vpop.f32.mrf.mxu0  ;;  %5918 = vmatprep.mubr.bf16.mxu1 %v8292_v18  ;;  %v8298_v18 = vld [vmem:[%s11940_s1 + $0x5bc] ss:$48 sps:$4 sm:$0xff]   ;;  %v389_v42 = vld [vmem:[%s8858_s23 + $0x5d0] sm:$0xff] }
 0x23f   : > { %v5272_v45 = vpop.f32.mrf.mxu1  ;;  %v10292_v20 = vadd.f32 %v5270_v36, %v4854_v17 }
 0x240   : > { %v4856_v25 = vpop.f32.mrf.mxu0  ;;  %v1551_v45 = vpop.permute.xlu1 %1550 }
 0x241   : > { %11977 = vst [vmem:[#allocation33_spill] sm:$0xff] %v10292_v20  ;;  %v4857_v48 = vadd.f32 %v4856_v25, %v1541_v27  ;;  %v5273_v10 = vpop.f32.mrf.mxu1  ;;  %v358_v20 = vld [vmem:[%s8858_s23 + $0x4d8] sm:$0xff] }
 0x242   : > { %v4858_v6 = vpop.f32.mrf.mxu0 }
 0x243   : > { %v10306_v41 = vadd.f32 %v5273_v10, %v4857_v48  ;;  %v5275_v21 = vpop.f32.mrf.mxu1  ;;  %v357_v6 = vld [vmem:[%s8858_s23 + $0x4d0] sm:$0xff]  ;;  %v390_v10 = vld [vmem:[%s8858_s23 + $0x5d8] sm:$0xff] }
 0x244   : > { %v4861_v36 = vpop.f32.mrf.mxu0  ;;  %5502 = vmatmul.mubr.bf16.gmra.mxu0 %v8287_v34  ;;  %v8293_v48 = vld [vmem:[%s11940_s1 + $0x5b0] ss:$48 sps:$4 sm:$0xff]   ;;  %v472_v34 = vpack.c.bf16 %v358_v20, %v357_v6  ;;  %v1561_v6 = vpop.permute.xlu1 %1560 }
 0x245   : > { %11978 = vst [vmem:[#allocation34_spill] sm:$0xff] %v10306_v41  ;;  %v5278_v17 = vpop.f32.mrf.mxu1  ;;  %5919 = vmatmul.mubr.bf16.gmra.mxu1 %v8290_v51  ;;  %v4862_v23 = vadd.f32 %v4861_v36, %v1546_v63  ;;  %5509 = vmatprep.mubr.bf16.mxu0 %v8295_v9  ;;  %v8296_v9 = vld [vmem:[%s11940_s1 + $0x5b8] ss:$48 sps:$4 sm:$0xff]   ;;  %v8301_v63 = vld [vmem:[%s11940_s1 + $0x614] ss:$48 sps:$4 sm:$0xff]  }
 0x246   : > { %v4863_v27 = vpop.f32.mrf.mxu0  ;;  %5926 = vmatprep.mubr.bf16.mxu1 %v8298_v18  ;;  %v488_v18 = vpack.c.bf16 %v390_v10, %v389_v42  ;;  %6212 = vmatpush2.bf16.msra.mxu0 %v472_v34 }
 0x247   : > { %v5280_v25 = vpop.f32.mrf.mxu1  ;;  %v10311_v1 = vadd.f32 %v5278_v17, %v4862_v23  ;;  %v1556_v17 = vpop.permute.xlu0 %1555  ;;  %v8304_v23 = vld [vmem:[%s11940_s1 + $0x61c] ss:$48 sps:$4 sm:$0xff]   ;;  %6213 = vmatprep.subr.bf16.mxu0 %v11953_v57 }
 0x248   : > { %v4864_v37 = vpop.f32.mrf.mxu0  ;;  %6629 = vmatpush2.bf16.msra.mxu1 %v488_v18 }
 0x249   : > { %11979 = vst [vmem:[#allocation35_spill] sm:$0xff] %v10311_v1  ;;  %v4865_v21 = vadd.f32 %v4864_v37, %v1551_v45  ;;  %v5281_v51 = vpop.f32.mrf.mxu1  ;;  %6630 = vmatprep.subr.bf16.mxu1 %v11953_v57 }
 0x24a   : > { %v4866_v36 = vpop.f32.mrf.mxu0 }
 0x24b   : > { %v10326_v20 = vadd.f32 %v5281_v51, %v4865_v21  ;;  %v5283_v37 = vpop.f32.mrf.mxu1  ;;  %v8299_v21 = vld [vmem:[%s11940_s1 + $0x610] ss:$48 sps:$4 sm:$0xff]  }
 0x24c   : > { %v4869_v27 = vpop.f32.mrf.mxu0  ;;  %5510 = vmatmul.mubr.bf16.gmra.mxu0 %v8293_v48  ;;  %v8302_v48 = vld [vmem:[%s11940_s1 + $0x618] ss:$48 sps:$4 sm:$0xff]  }
 0x24d   : > { %11980 = vst [vmem:[#allocation36_spill] sm:$0xff] %v10326_v20  ;;  %v5286_v45 = vpop.f32.mrf.mxu1  ;;  %5927 = vmatmul.mubr.bf16.gmra.mxu1 %v8296_v9  ;;  %v4870_v42 = vadd.f32 %v4869_v27, %v1556_v17  ;;  %5517 = vmatprep.mubr.bf16.mxu0 %v8301_v63  ;;  %v8307_v9 = vld [vmem:[%s11940_s1 + $0x674] ss:$48 sps:$4 sm:$0xff]   ;;  %v1566_v17 = vpop.permute.xlu0 %1565  ;;  %v8305_v20 = vld [vmem:[%s11940_s1 + $0x670] ss:$48 sps:$4 sm:$0xff]  }
 0x24e   : > { %v4871_v25 = vpop.f32.mrf.mxu0  ;;  %5934 = vmatprep.mubr.bf16.mxu1 %v8304_v23  ;;  %v8310_v23 = vld [vmem:[%s11940_s1 + $0x67c] ss:$48 sps:$4 sm:$0xff]  }
 0x24f   : > { %v5288_v10 = vpop.f32.mrf.mxu1  ;;  %v10330_v36 = vadd.f32 %v5286_v45, %v4870_v42 }
 0x250   : > { %v4872_v34 = vpop.f32.mrf.mxu0  ;;  %v1571_v10 = vpop.permute.xlu1 %1570 }
 0x251   : > { %11981 = vst [vmem:[#allocation37_spill] sm:$0xff] %v10330_v36  ;;  %v4873_v51 = vadd.f32 %v4872_v34, %v1561_v6  ;;  %v5289_v18 = vpop.f32.mrf.mxu1 }
 0x252   : > { %v4874_v63 = vpop.f32.mrf.mxu0 }
 0x253   : > { %v10344_v37 = vadd.f32 %v5289_v18, %v4873_v51  ;;  %v5291_v27 = vpop.f32.mrf.mxu1 }
 0x254   : > { %v4877_v45 = vpop.f32.mrf.mxu0  ;;  %5518 = vmatmul.mubr.bf16.gmra.mxu0 %v8299_v21  ;;  %v8308_v21 = vld [vmem:[%s11940_s1 + $0x678] ss:$48 sps:$4 sm:$0xff]  }
 0x255   : > { %11982 = vst [vmem:[#allocation38_spill] sm:$0xff] %v10344_v37  ;;  %v5294_v42 = vpop.f32.mrf.mxu1  ;;  %5935 = vmatmul.mubr.bf16.gmra.mxu1 %v8302_v48  ;;  %v4878_v25 = vadd.f32 %v4877_v45, %v1566_v17  ;;  %5525 = vmatprep.mubr.bf16.mxu0 %v8307_v9  ;;  %v8313_v48 = vld [vmem:[%s11940_s1 + $0x6d4] ss:$48 sps:$4 sm:$0xff]   ;;  %v1576_v17 = vpop.permute.xlu0 %1575 }
 0x256   : > { %v4879_v6 = vpop.f32.mrf.mxu0  ;;  %5942 = vmatprep.mubr.bf16.mxu1 %v8310_v23  ;;  %v8316_v23 = vld [vmem:[%s11940_s1 + $0x6dc] ss:$48 sps:$4 sm:$0xff]   ;;  %v387_v37 = vld [vmem:[%s8858_s23 + $0x5c0] sm:$0xff] }
 0x257   : > { %v5296_v34 = vpop.f32.mrf.mxu1  ;;  %v10346_v36 = vadd.f32 %v5294_v42, %v4878_v25 }
 0x258   : > { %v4880_v63 = vpop.f32.mrf.mxu0  ;;  %v1581_v34 = vpop.permute.xlu1 %1580 }
 0x259   : > { %11983 = vst [vmem:[#allocation39_spill] sm:$0xff] %v10346_v36  ;;  %v4881_v51 = vadd.f32 %v4880_v63, %v1571_v10  ;;  %v5297_v18 = vpop.f32.mrf.mxu1  ;;  %v356_v36 = vld [vmem:[%s8858_s23 + $0x4c8] sm:$0xff] }
 0x25a   : > { %v4882_v9 = vpop.f32.mrf.mxu0 }
 0x25b   : > { %v10360_v27 = vadd.f32 %v5297_v18, %v4881_v51  ;;  %v5299_v45 = vpop.f32.mrf.mxu1  ;;  %v355_v9 = vld [vmem:[%s8858_s23 + $0x4c0] sm:$0xff]  ;;  %v388_v18 = vld [vmem:[%s8858_s23 + $0x5c8] sm:$0xff] }
 0x25c   : > { %v4885_v42 = vpop.f32.mrf.mxu0  ;;  %5526 = vmatmul.mubr.bf16.gmra.mxu0 %v8305_v20  ;;  %v8311_v51 = vld [vmem:[%s11940_s1 + $0x6d0] ss:$48 sps:$4 sm:$0xff]   ;;  %v471_v20 = vpack.c.bf16 %v356_v36, %v355_v9  ;;  %v1591_v9 = vpop.permute.xlu1 %1590 }
 0x25d   : > { %11984 = vst [vmem:[#allocation40_spill] sm:$0xff] %v10360_v27  ;;  %v5302_v25 = vpop.f32.mrf.mxu1  ;;  %5943 = vmatmul.mubr.bf16.gmra.mxu1 %v8308_v21  ;;  %v4886_v6 = vadd.f32 %v4885_v42, %v1576_v17  ;;  %5533 = vmatprep.mubr.bf16.mxu0 %v8313_v48  ;;  %v8314_v48 = vld [vmem:[%s11940_s1 + $0x6d8] ss:$48 sps:$4 sm:$0xff]   ;;  %v8319_v17 = vld [vmem:[%s11940_s1 + $0x734] ss:$48 sps:$4 sm:$0xff]  }
 0x25e   : > { %v4887_v10 = vpop.f32.mrf.mxu0  ;;  %5950 = vmatprep.mubr.bf16.mxu1 %v8316_v23  ;;  %v487_v23 = vpack.c.bf16 %v388_v18, %v387_v37  ;;  %6214 = vmatpush2.bf16.msra.mxu0 %v471_v20 }
 0x25f   : > { %v5304_v63 = vpop.f32.mrf.mxu1  ;;  %v10365_v1 = vadd.f32 %v5302_v25, %v4886_v6  ;;  %v1586_v25 = vpop.permute.xlu0 %1585  ;;  %v8322_v6 = vld [vmem:[%s11940_s1 + $0x73c] ss:$48 sps:$4 sm:$0xff]   ;;  %6215 = vmatprep.subr.bf16.mxu0 %v11953_v57 }
 0x260   : > { %v4888_v41 = vpop.f32.mrf.mxu0  ;;  %6631 = vmatpush2.bf16.msra.mxu1 %v487_v23 }
 0x261   : > { %11985 = vst [vmem:[#allocation41_spill] sm:$0xff] %v10365_v1  ;;  %v4889_v45 = vadd.f32 %v4888_v41, %v1581_v34  ;;  %v5305_v21 = vpop.f32.mrf.mxu1  ;;  %6632 = vmatprep.subr.bf16.mxu1 %v11953_v57 }
 0x262   : > { %v4890_v42 = vpop.f32.mrf.mxu0 }
 0x263   : > { %v10380_v36 = vadd.f32 %v5305_v21, %v4889_v45  ;;  %v5307_v41 = vpop.f32.mrf.mxu1  ;;  %v8317_v45 = vld [vmem:[%s11940_s1 + $0x730] ss:$48 sps:$4 sm:$0xff]  }
 0x264   : > { %v4893_v10 = vpop.f32.mrf.mxu0  ;;  %5534 = vmatmul.mubr.bf16.gmra.mxu0 %v8311_v51  ;;  %v8320_v51 = vld [vmem:[%s11940_s1 + $0x738] ss:$48 sps:$4 sm:$0xff]  }
 0x265   : > { %11986 = vst [vmem:[#allocation42_spill] sm:$0xff] %v10380_v36  ;;  %v5310_v34 = vpop.f32.mrf.mxu1  ;;  %5951 = vmatmul.mubr.bf16.gmra.mxu1 %v8314_v48  ;;  %v4894_v37 = vadd.f32 %v4893_v10, %v1586_v25  ;;  %5541 = vmatprep.mubr.bf16.mxu0 %v8319_v17  ;;  %v8325_v48 = vld [vmem:[%s11940_s1 + $0x794] ss:$48 sps:$4 sm:$0xff]   ;;  %v1596_v25 = vpop.permute.xlu0 %1595  ;;  %v8323_v36 = vld [vmem:[%s11940_s1 + $0x790] ss:$48 sps:$4 sm:$0xff]  }
 0x266   : > { %v4895_v63 = vpop.f32.mrf.mxu0  ;;  %5958 = vmatprep.mubr.bf16.mxu1 %v8322_v6  ;;  %v8328_v6 = vld [vmem:[%s11940_s1 + $0x79c] ss:$48 sps:$4 sm:$0xff]  }
 0x267   : > { %v5312_v18 = vpop.f32.mrf.mxu1  ;;  %v10384_v42 = vadd.f32 %v5310_v34, %v4894_v37 }
 0x268   : > { %v4896_v20 = vpop.f32.mrf.mxu0  ;;  %v1601_v18 = vpop.permute.xlu1 %1600 }
 0x269   : > { %11987 = vst [vmem:[#allocation43_spill] sm:$0xff] %v10384_v42  ;;  %v4897_v21 = vadd.f32 %v4896_v20, %v1591_v9  ;;  %v5313_v23 = vpop.f32.mrf.mxu1 }
 0x26a   : > { %v4898_v17 = vpop.f32.mrf.mxu0 }
 0x26b   : > { %v10398_v41 = vadd.f32 %v5313_v23, %v4897_v21  ;;  %v5315_v10 = vpop.f32.mrf.mxu1 }
 0x26c   : > { %v4901_v34 = vpop.f32.mrf.mxu0  ;;  %5542 = vmatmul.mubr.bf16.gmra.mxu0 %v8317_v45  ;;  %v8326_v45 = vld [vmem:[%s11940_s1 + $0x798] ss:$48 sps:$4 sm:$0xff]  }
 0x26d   : > { %11988 = vst [vmem:[#allocation44_spill] sm:$0xff] %v10398_v41  ;;  %v5318_v37 = vpop.f32.mrf.mxu1  ;;  %5959 = vmatmul.mubr.bf16.gmra.mxu1 %v8320_v51  ;;  %v4902_v63 = vadd.f32 %v4901_v34, %v1596_v25  ;;  %5549 = vmatprep.mubr.bf16.mxu0 %v8325_v48  ;;  %v8331_v51 = vld [vmem:[%s11940_s1 + $0x7f4] ss:$48 sps:$4 sm:$0xff]   ;;  %v1606_v25 = vpop.permute.xlu0 %1605 }
 0x26e   : > { %v4903_v9 = vpop.f32.mrf.mxu0  ;;  %5966 = vmatprep.mubr.bf16.mxu1 %v8328_v6  ;;  %v8334_v6 = vld [vmem:[%s11940_s1 + $0x7fc] ss:$48 sps:$4 sm:$0xff]   ;;  %v385_v41 = vld [vmem:[%s8858_s23 + $0x5b0] sm:$0xff] }
 0x26f   : > { %v5320_v20 = vpop.f32.mrf.mxu1  ;;  %v10400_v42 = vadd.f32 %v5318_v37, %v4902_v63 }
 0x270   : > { %v4904_v17 = vpop.f32.mrf.mxu0  ;;  %v1611_v20 = vpop.permute.xlu1 %1610 }
 0x271   : > { %11989 = vst [vmem:[#allocation45_spill] sm:$0xff] %v10400_v42  ;;  %v4905_v21 = vadd.f32 %v4904_v17, %v1601_v18  ;;  %v5321_v23 = vpop.f32.mrf.mxu1  ;;  %v354_v42 = vld [vmem:[%s8858_s23 + $0x4b8] sm:$0xff] }
 0x272   : > { %v4906_v48 = vpop.f32.mrf.mxu0 }
 0x273   : > { %v10414_v10 = vadd.f32 %v5321_v23, %v4905_v21  ;;  %v5323_v34 = vpop.f32.mrf.mxu1  ;;  %v353_v48 = vld [vmem:[%s8858_s23 + $0x4b0] sm:$0xff]  ;;  %v386_v23 = vld [vmem:[%s8858_s23 + $0x5b8] sm:$0xff] }
 0x274   : > { %v4909_v37 = vpop.f32.mrf.mxu0  ;;  %5550 = vmatmul.mubr.bf16.gmra.mxu0 %v8323_v36  ;;  %v8329_v21 = vld [vmem:[%s11940_s1 + $0x7f0] ss:$48 sps:$4 sm:$0xff]   ;;  %v470_v36 = vpack.c.bf16 %v354_v42, %v353_v48  ;;  %v1621_v48 = vpop.permute.xlu1 %1620 }
 0x275   : > { %11990 = vst [vmem:[#allocation46_spill] sm:$0xff] %v10414_v10  ;;  %v5326_v63 = vpop.f32.mrf.mxu1  ;;  %5967 = vmatmul.mubr.bf16.gmra.mxu1 %v8326_v45  ;;  %v4910_v9 = vadd.f32 %v4909_v37, %v1606_v25  ;;  %5557 = vmatprep.mubr.bf16.mxu0 %v8331_v51  ;;  %v8332_v51 = vld [vmem:[%s11940_s1 + $0x7f8] ss:$48 sps:$4 sm:$0xff]   ;;  %v8337_v25 = vld [vmem:[%s11940_s1 + $0x854] ss:$48 sps:$4 sm:$0xff]  }
 0x276   : > { %v4911_v18 = vpop.f32.mrf.mxu0  ;;  %5974 = vmatprep.mubr.bf16.mxu1 %v8334_v6  ;;  %v486_v6 = vpack.c.bf16 %v386_v23, %v385_v41  ;;  %6216 = vmatpush2.bf16.msra.mxu0 %v470_v36 }
 0x277   : > { %v5328_v17 = vpop.f32.mrf.mxu1  ;;  %v10419_v1 = vadd.f32 %v5326_v63, %v4910_v9  ;;  %v1616_v63 = vpop.permute.xlu0 %1615  ;;  %v8340_v9 = vld [vmem:[%s11940_s1 + $0x85c] ss:$48 sps:$4 sm:$0xff]   ;;  %6217 = vmatprep.subr.bf16.mxu0 %v11953_v57 }
 0x278   : > { %v4912_v27 = vpop.f32.mrf.mxu0  ;;  %6633 = vmatpush2.bf16.msra.mxu1 %v486_v6 }
 0x279   : > { %11991 = vst [vmem:[#allocation47_spill] sm:$0xff] %v10419_v1  ;;  %v4913_v34 = vadd.f32 %v4912_v27, %v1611_v20  ;;  %v5329_v45 = vpop.f32.mrf.mxu1  ;;  %6634 = vmatprep.subr.bf16.mxu1 %v11953_v57 }
 0x27a   : > { %v4914_v37 = vpop.f32.mrf.mxu0 }
 0x27b   : > { %v10434_v42 = vadd.f32 %v5329_v45, %v4913_v34  ;;  %v5331_v27 = vpop.f32.mrf.mxu1  ;;  %v8335_v34 = vld [vmem:[%s11940_s1 + $0x850] ss:$48 sps:$4 sm:$0xff]  }
 0x27c   : > { %v4917_v18 = vpop.f32.mrf.mxu0  ;;  %5558 = vmatmul.mubr.bf16.gmra.mxu0 %v8329_v21  ;;  %v8338_v21 = vld [vmem:[%s11940_s1 + $0x858] ss:$48 sps:$4 sm:$0xff]  }
 0x27d   : > { %11992 = vst [vmem:[#allocation48_spill] sm:$0xff] %v10434_v42  ;;  %v5334_v20 = vpop.f32.mrf.mxu1  ;;  %5975 = vmatmul.mubr.bf16.gmra.mxu1 %v8332_v51  ;;  %v4918_v41 = vadd.f32 %v4917_v18, %v1616_v63  ;;  %5565 = vmatprep.mubr.bf16.mxu0 %v8337_v25  ;;  %v8343_v51 = vld [vmem:[%s11940_s1 + $0x8b4] ss:$48 sps:$4 sm:$0xff]   ;;  %v1626_v63 = vpop.permute.xlu0 %1625  ;;  %v8341_v42 = vld [vmem:[%s11940_s1 + $0x8b0] ss:$48 sps:$4 sm:$0xff]  }
 0x27e   : > { %v4919_v17 = vpop.f32.mrf.mxu0  ;;  %5982 = vmatprep.mubr.bf16.mxu1 %v8340_v9  ;;  %v8346_v9 = vld [vmem:[%s11940_s1 + $0x8bc] ss:$48 sps:$4 sm:$0xff]  }
 0x27f   : > { %v5336_v23 = vpop.f32.mrf.mxu1  ;;  %v10438_v37 = vadd.f32 %v5334_v20, %v4918_v41 }
 0x280   : > { %v4920_v36 = vpop.f32.mrf.mxu0  ;;  %v1631_v23 = vpop.permute.xlu1 %1630 }
 0x281   : > { %11993 = vst [vmem:[#allocation49_spill] sm:$0xff] %v10438_v37  ;;  %v4921_v45 = vadd.f32 %v4920_v36, %v1621_v48  ;;  %v5337_v6 = vpop.f32.mrf.mxu1 }
 0x282   : > { %v4922_v25 = vpop.f32.mrf.mxu0 }
 0x283   : > { %v10452_v27 = vadd.f32 %v5337_v6, %v4921_v45  ;;  %v5339_v18 = vpop.f32.mrf.mxu1 }
 0x284   : > { %v4925_v20 = vpop.f32.mrf.mxu0  ;;  %5566 = vmatmul.mubr.bf16.gmra.mxu0 %v8335_v34  ;;  %v8344_v34 = vld [vmem:[%s11940_s1 + $0x8b8] ss:$48 sps:$4 sm:$0xff]  }
 0x285   : > { %11994 = vst [vmem:[#allocation50_spill] sm:$0xff] %v10452_v27  ;;  %v5342_v41 = vpop.f32.mrf.mxu1  ;;  %5983 = vmatmul.mubr.bf16.gmra.mxu1 %v8338_v21  ;;  %v4926_v17 = vadd.f32 %v4925_v20, %v1626_v63  ;;  %5573 = vmatprep.mubr.bf16.mxu0 %v8343_v51  ;;  %v8349_v21 = vld [vmem:[%s11940_s1 + $0x914] ss:$48 sps:$4 sm:$0xff]   ;;  %v1636_v63 = vpop.permute.xlu0 %1635 }
 0x286   : > { %v4927_v48 = vpop.f32.mrf.mxu0  ;;  %5990 = vmatprep.mubr.bf16.mxu1 %v8346_v9  ;;  %v8352_v9 = vld [vmem:[%s11940_s1 + $0x91c] ss:$48 sps:$4 sm:$0xff]   ;;  %v383_v27 = vld [vmem:[%s8858_s23 + $0x5a0] sm:$0xff] }
 0x287   : > { %v5344_v36 = vpop.f32.mrf.mxu1  ;;  %v10454_v37 = vadd.f32 %v5342_v41, %v4926_v17 }
 0x288   : > { %v4928_v25 = vpop.f32.mrf.mxu0  ;;  %v1641_v36 = vpop.permute.xlu1 %1640 }
 0x289   : > { %11995 = vst [vmem:[#allocation51_spill] sm:$0xff] %v10454_v37  ;;  %v4929_v45 = vadd.f32 %v4928_v25, %v1631_v23  ;;  %v5345_v6 = vpop.f32.mrf.mxu1  ;;  %v352_v37 = vld [vmem:[%s8858_s23 + $0x4a8] sm:$0xff] }
 0x28a   : > { %v4930_v51 = vpop.f32.mrf.mxu0 }
 0x28b   : > { %v10468_v18 = vadd.f32 %v5345_v6, %v4929_v45  ;;  %v5347_v20 = vpop.f32.mrf.mxu1  ;;  %v351_v51 = vld [vmem:[%s8858_s23 + $0x4a0] sm:$0xff]  ;;  %v384_v6 = vld [vmem:[%s8858_s23 + $0x5a8] sm:$0xff] }
 0x28c   : > { %v4933_v41 = vpop.f32.mrf.mxu0  ;;  %5574 = vmatmul.mubr.bf16.gmra.mxu0 %v8341_v42  ;;  %v8347_v45 = vld [vmem:[%s11940_s1 + $0x910] ss:$48 sps:$4 sm:$0xff]   ;;  %v469_v42 = vpack.c.bf16 %v352_v37, %v351_v51 }
 0x28d   : > { %v5350_v17 = vpop.f32.mrf.mxu1  ;;  %5991 = vmatmul.mubr.bf16.gmra.mxu1 %v8344_v34  ;;  %v4934_v48 = vadd.f32 %v4933_v41, %v1636_v63  ;;  %5581 = vmatprep.mubr.bf16.mxu0 %v8349_v21  ;;  %v8350_v21 = vld [vmem:[%s11940_s1 + $0x918] ss:$48 sps:$4 sm:$0xff]   ;;  %v8355_v63 = vld [vmem:[%s11940_s1 + $0x974] ss:$48 sps:$4 sm:$0xff]  }
 0x28e   : > { %v4935_v23 = vpop.f32.mrf.mxu0  ;;  %5998 = vmatprep.mubr.bf16.mxu1 %v8352_v9  ;;  %v485_v9 = vpack.c.bf16 %v384_v6, %v383_v27  ;;  %6218 = vmatpush2.bf16.msra.mxu0 %v469_v42  ;;  %v8353_v6 = vld [vmem:[%s11940_s1 + $0x970] ss:$48 sps:$4 sm:$0xff]  }
 0x28f   : > { %v5352_v25 = vpop.f32.mrf.mxu1  ;;  %v10473_v1 = vadd.f32 %v5350_v17, %v4934_v48  ;;  %v8358_v17 = vld [vmem:[%s11940_s1 + $0x97c] ss:$48 sps:$4 sm:$0xff]   ;;  %6219 = vmatprep.subr.bf16.mxu0 %v11953_v57 }
 0x290   : > { %v4936_v10 = vpop.f32.mrf.mxu0  ;;  %6635 = vmatpush2.bf16.msra.mxu1 %v485_v9 }
 0x291   : > { %v4937_v20 = vadd.f32 %v4936_v10, %v1641_v36  ;;  %v5353_v34 = vpop.f32.mrf.mxu1  ;;  %6636 = vmatprep.subr.bf16.mxu1 %v11953_v57 }
 0x292   : > { %v4938_v41 = vpop.f32.mrf.mxu0 }
 0x293   : > { %v10488_v48 = vadd.f32 %v5353_v34, %v4937_v20  ;;  %v5355_v37 = vpop.f32.mrf.mxu1  ;;  %v8361_v34 = vld [vmem:[%s11940_s1 + $0x9d4] ss:$48 sps:$4 sm:$0xff]  }
 0x294   : > { %v5391_v10 = vpop.f32.mrf.mxu0  ;;  %5582 = vmatmul.mubr.bf16.gmra.mxu0 %v8347_v45 }
 0x295   : > { %v5392_v23 = vadd.f32 %v5391_v10, %v9535_v39  ;;  %v5808_v36 = vpop.f32.mrf.mxu1  ;;  %5999 = vmatmul.mubr.bf16.gmra.mxu1 %v8350_v21  ;;  %5589 = vmatprep.mubr.bf16.mxu0 %v8355_v63  ;;  %v8356_v39 = vld [vmem:[%s11940_s1 + $0x978] ss:$48 sps:$4 sm:$0xff]   ;;  %v8364_v63 = vld [vmem:[%s11940_s1 + $0x9dc] ss:$48 sps:$4 sm:$0xff]  }
 0x296   : > { %v5393_v27 = vpop.f32.mrf.mxu0  ;;  %6006 = vmatprep.mubr.bf16.mxu1 %v8358_v17 }
 0x297   : > { %v10493_v25 = vadd.f32 %v5808_v36, %v5392_v23  ;;  %v5810_v51 = vpop.f32.mrf.mxu1 }
 0x298   : > { %v5394_v42 = vpop.f32.mrf.mxu0  ;;  %v8359_v51 = vld [vmem:[%s11940_s1 + $0x9d0] ss:$48 sps:$4 sm:$0xff]  }
 0x299   : > { %v5395_v20 = vadd.f32 %v5394_v42, %v9549_v50  ;;  %v5811_v45 = vpop.f32.mrf.mxu1 }
 0x29a   : > { %v5396_v21 = vpop.f32.mrf.mxu0 }
 0x29b   : > { %v10508_v9 = vadd.f32 %v5811_v45, %v5395_v20  ;;  %v5813_v41 = vpop.f32.mrf.mxu1 }
 0x29c   : > { %v5399_v17 = vpop.f32.mrf.mxu0  ;;  %5590 = vmatmul.mubr.bf16.gmra.mxu0 %v8353_v6  ;;  %v8367_v6 = vld [vmem:[%s11940_s1 + $0xa34] ss:$48 sps:$4 sm:$0xff]  }
 0x29d   : > { %v5400_v50 = vadd.f32 %v5399_v17, %v9557_v59  ;;  %v5816_v37 = vpop.f32.mrf.mxu1  ;;  %6007 = vmatmul.mubr.bf16.gmra.mxu1 %v8356_v39  ;;  %5597 = vmatprep.mubr.bf16.mxu0 %v8361_v34  ;;  %v8362_v59 = vld [vmem:[%s11940_s1 + $0x9d8] ss:$48 sps:$4 sm:$0xff]   ;;  %v8370_v39 = vld [vmem:[%s11940_s1 + $0xa3c] ss:$48 sps:$4 sm:$0xff]  }
 0x29e   : > { %v5401_v10 = vpop.f32.mrf.mxu0  ;;  %6014 = vmatprep.mubr.bf16.mxu1 %v8364_v63 }
 0x29f   : > { %v10511_v23 = vadd.f32 %v5816_v37, %v5400_v50  ;;  %v5818_v36 = vpop.f32.mrf.mxu1  ;;  %v349_v10 = vld [vmem:[%s8858_s23 + $0x490] sm:$0xff] }
 0x2a0   : > { %v5402_v27 = vpop.f32.mrf.mxu0  ;;  %v350_v36 = vld [vmem:[%s8858_s23 + $0x498] sm:$0xff] }
 0x2a1   : > { %v5403_v42 = vadd.f32 %v5402_v27, %v9571_v7  ;;  %v5819_v20 = vpop.f32.mrf.mxu1  ;;  %v381_v27 = vld [vmem:[%s8858_s23 + $0x590] sm:$0xff] }
 0x2a2   : > { %v5404_v45 = vpop.f32.mrf.mxu0 }
 0x2a3   : > { %v10526_v34 = vadd.f32 %v5819_v20, %v5403_v42  ;;  %v5821_v7 = vpop.f32.mrf.mxu1  ;;  %v8365_v42 = vld [vmem:[%s11940_s1 + $0xa30] ss:$48 sps:$4 sm:$0xff]   ;;  %v468_v20 = vpack.c.bf16 %v350_v36, %v349_v10 }
 0x2a4   : > { %v5407_v21 = vpop.f32.mrf.mxu0  ;;  %5598 = vmatmul.mubr.bf16.gmra.mxu0 %v8359_v51  ;;  %v382_v51 = vld [vmem:[%s8858_s23 + $0x598] sm:$0xff] }
 0x2a5   : > { %v5408_v63 = vadd.f32 %v5407_v21, %v9589_v24  ;;  %v5824_v41 = vpop.f32.mrf.mxu1  ;;  %6015 = vmatmul.mubr.bf16.gmra.mxu1 %v8362_v59  ;;  %5605 = vmatprep.mubr.bf16.mxu0 %v8367_v6  ;;  %v8368_v59 = vld [vmem:[%s11940_s1 + $0xa38] ss:$48 sps:$4 sm:$0xff]   ;;  %v8373_v6 = vld [vmem:[%s11940_s1 + $0xa94] ss:$48 sps:$4 sm:$0xff]  }
 0x2a6   : > { %v5409_v17 = vpop.f32.mrf.mxu0  ;;  %6022 = vmatprep.mubr.bf16.mxu1 %v8370_v39  ;;  %v484_v39 = vpack.c.bf16 %v382_v51, %v381_v27  ;;  %6220 = vmatpush2.bf16.msra.mxu0 %v468_v20  ;;  %v8371_v51 = vld [vmem:[%s11940_s1 + $0xa90] ss:$48 sps:$4 sm:$0xff]  }
 0x2a7   : > { %v10529_v50 = vadd.f32 %v5824_v41, %v5408_v63  ;;  %v5826_v37 = vpop.f32.mrf.mxu1  ;;  %v8376_v63 = vld [vmem:[%s11940_s1 + $0xa9c] ss:$48 sps:$4 sm:$0xff]   ;;  %6221 = vmatprep.subr.bf16.mxu0 %v11953_v57 }
 0x2a8   : > { %v5410_v45 = vpop.f32.mrf.mxu0  ;;  %6637 = vmatpush2.bf16.msra.mxu1 %v484_v39 }
 0x2a9   : > { %v5411_v24 = vadd.f32 %v5410_v45, %v9598_v33  ;;  %v5827_v7 = vpop.f32.mrf.mxu1  ;;  %6638 = vmatprep.subr.bf16.mxu1 %v11953_v57  ;;  %v8379_v57 = vld [vmem:[%s11940_s1 + $0xaf4] ss:$48 sps:$4 sm:$0xff]  }
 0x2aa   : > { %v5412_v21 = vpop.f32.mrf.mxu0 }
 0x2ab   : > { %v10548_v41 = vadd.f32 %v5827_v7, %v5411_v24  ;;  %v5829_v17 = vpop.f32.mrf.mxu1 }
 0x2ac   : > { %v5415_v33 = vpop.f32.mrf.mxu0  ;;  %5606 = vmatmul.mubr.bf16.gmra.mxu0 %v8365_v42 }
 0x2ad   : > { %v5416_v37 = vadd.f32 %v5415_v33, %v9613_v46  ;;  %v5832_v10 = vpop.f32.mrf.mxu1  ;;  %6023 = vmatmul.mubr.bf16.gmra.mxu1 %v8368_v59  ;;  %5613 = vmatprep.mubr.bf16.mxu0 %v8373_v6  ;;  %v8374_v46 = vld [vmem:[%s11940_s1 + $0xa98] ss:$48 sps:$4 sm:$0xff]   ;;  %v8382_v59 = vld [vmem:[%s11940_s1 + $0xafc] ss:$48 sps:$4 sm:$0xff]  }
 0x2ae   : > { %v5417_v36 = vpop.f32.mrf.mxu0  ;;  %6030 = vmatprep.mubr.bf16.mxu1 %v8376_v63 }
 0x2af   : > { %v10553_v27 = vadd.f32 %v5832_v10, %v5416_v37  ;;  %v5834_v45 = vpop.f32.mrf.mxu1  ;;  %v8377_v36 = vld [vmem:[%s11940_s1 + $0xaf0] ss:$48 sps:$4 sm:$0xff]  }
 0x2b0   : > { %v5418_v20 = vpop.f32.mrf.mxu0 }
 0x2b1   : > { %v5419_v24 = vadd.f32 %v5418_v20, %v9621_v55  ;;  %v5835_v42 = vpop.f32.mrf.mxu1 }
 0x2b2   : > { %v5420_v7 = vpop.f32.mrf.mxu0 }
 0x2b3   : > { %v10568_v6 = vadd.f32 %v5835_v42, %v5419_v24  ;;  %v5837_v39 = vpop.f32.mrf.mxu1  ;;  %v8388_v42 = vld [vmem:[%s11940_s1 + $0xb5c] ss:$48 sps:$4 sm:$0xff]  }
 0x2b4   : > { %v5423_v21 = vpop.f32.mrf.mxu0  ;;  %5614 = vmatmul.mubr.bf16.gmra.mxu0 %v8371_v51  ;;  %v8385_v51 = vld [vmem:[%s11940_s1 + $0xb54] ss:$48 sps:$4 sm:$0xff]  }
 0x2b5   : > { %v5424_v55 = vadd.f32 %v5423_v21, %v9635_v5  ;;  %v5840_v63 = vpop.f32.mrf.mxu1  ;;  %6031 = vmatmul.mubr.bf16.gmra.mxu1 %v8374_v46  ;;  %5621 = vmatprep.mubr.bf16.mxu0 %v8379_v57  ;;  %v8380_v5 = vld [vmem:[%s11940_s1 + $0xaf8] ss:$48 sps:$4 sm:$0xff]  }
 0x2b6   : > { %v5425_v17 = vpop.f32.mrf.mxu0  ;;  %6038 = vmatprep.mubr.bf16.mxu1 %v8382_v59 }
 0x2b7   : > { %v10571_v33 = vadd.f32 %v5840_v63, %v5424_v55  ;;  %v5842_v37 = vpop.f32.mrf.mxu1  ;;  %v347_v63 = vld [vmem:[%s8858_s23 + $0x480] sm:$0xff]  ;;  %v348_v17 = vld [vmem:[%s8858_s23 + $0x488] sm:$0xff] }
 0x2b8   : > { %v5426_v10 = vpop.f32.mrf.mxu0  ;;  %v379_v37 = vld [vmem:[%s8858_s23 + $0x580] sm:$0xff] }
 0x2b9   : > { %v5427_v45 = vadd.f32 %v5426_v10, %v9643_v14  ;;  %v5843_v20 = vpop.f32.mrf.mxu1 }
 0x2ba   : > { %v5428_v24 = vpop.f32.mrf.mxu0 }
 0x2bb   : > { %v10586_v46 = vadd.f32 %v5843_v20, %v5427_v45  ;;  %v5845_v14 = vpop.f32.mrf.mxu1  ;;  %v8383_v45 = vld [vmem:[%s11940_s1 + $0xb50] ss:$48 sps:$4 sm:$0xff]   ;;  %v467_v20 = vpack.c.bf16 %v348_v17, %v347_v63 }
 0x2bc   : > { %v5431_v57 = vpop.f32.mrf.mxu0  ;;  %5622 = vmatmul.mubr.bf16.gmra.mxu0 %v8377_v36  ;;  %v380_v36 = vld [vmem:[%s8858_s23 + $0x588] sm:$0xff] }
 0x2bd   : > { %v5432_v7 = vadd.f32 %v5431_v57, %v9661_v32  ;;  %v5848_v59 = vpop.f32.mrf.mxu1  ;;  %6039 = vmatmul.mubr.bf16.gmra.mxu1 %v8380_v5  ;;  %5629 = vmatprep.mubr.bf16.mxu0 %v8385_v51  ;;  %v8386_v5 = vld [vmem:[%s11940_s1 + $0xb58] ss:$48 sps:$4 sm:$0xff]   ;;  %v8391_v51 = vld [vmem:[%s11940_s1 + $0xbb4] ss:$48 sps:$4 sm:$0xff]   ;;  %v8394_v57 = vld [vmem:[%s11940_s1 + $0xbbc] ss:$48 sps:$4 sm:$0xff]  }
 0x2be   : > { %v5433_v39 = vpop.f32.mrf.mxu0  ;;  %6046 = vmatprep.mubr.bf16.mxu1 %v8388_v42  ;;  %v483_v42 = vpack.c.bf16 %v380_v36, %v379_v37  ;;  %6222 = vmatpush2.bf16.msra.mxu0 %v467_v20  ;;  %v8389_v20 = vld [vmem:[%s11940_s1 + $0xbb0] ss:$48 sps:$4 sm:$0xff]  }
 0x2bf   : > { %v10589_v21 = vadd.f32 %v5848_v59, %v5432_v7  ;;  %v5850_v55 = vpop.f32.mrf.mxu1 }
 0x2c0   : > { %v5434_v10 = vpop.f32.mrf.mxu0  ;;  %6639 = vmatpush2.bf16.msra.mxu1 %v483_v42 }
 0x2c1   : > { %v5435_v32 = vadd.f32 %v5434_v10, %v9670_v43  ;;  %v5851_v24 = vpop.f32.mrf.mxu1 }
 0x2c2   : > { %v5436_v14 = vpop.f32.mrf.mxu0 }
 0x2c3   : > { %v10608_v7 = vadd.f32 %v5851_v24, %v5435_v32  ;;  %v5853_v59 = vpop.f32.mrf.mxu1 }
 0x2c4   : > { %v5439_v43 = vpop.f32.mrf.mxu0  ;;  %5630 = vmatmul.mubr.bf16.gmra.mxu0 %v8383_v45  ;;  %v8397_v45 = vld [vmem:[%s11940_s1 + $0xc14] ss:$48 sps:$4 sm:$0xff]  }
 0x2c5   : > { %v5440_v39 = vadd.f32 %v5439_v43, %v9685_v58  ;;  %v5856_v55 = vpop.f32.mrf.mxu1  ;;  %6047 = vmatmul.mubr.bf16.gmra.mxu1 %v8386_v5  ;;  %5637 = vmatprep.mubr.bf16.mxu0 %v8391_v51  ;;  %v8392_v58 = vld [vmem:[%s11940_s1 + $0xbb8] ss:$48 sps:$4 sm:$0xff]   ;;  %v8400_v5 = vld [vmem:[%s11940_s1 + $0xc1c] ss:$48 sps:$4 sm:$0xff]  }
 0x2c6   : > { %v5441_v63 = vpop.f32.mrf.mxu0  ;;  %6054 = vmatprep.mubr.bf16.mxu1 %v8394_v57 }
 0x2c7   : > { %v10611_v17 = vadd.f32 %v5856_v55, %v5440_v39  ;;  %v5858_v37 = vpop.f32.mrf.mxu1  ;;  %v8395_v63 = vld [vmem:[%s11940_s1 + $0xc10] ss:$48 sps:$4 sm:$0xff]  }
 0x2c8   : > { %v5442_v10 = vpop.f32.mrf.mxu0 }
 0x2c9   : > { %v5443_v36 = vadd.f32 %v5442_v10, %v9693_v4  ;;  %v5859_v32 = vpop.f32.mrf.mxu1 }
 0x2ca   : > { %v5444_v24 = vpop.f32.mrf.mxu0 }
 0x2cb   : > { %v10626_v51 = vadd.f32 %v5859_v32, %v5443_v36  ;;  %v5861_v42 = vpop.f32.mrf.mxu1  ;;  %v8406_v32 = vld [vmem:[%s11940_s1 + $0xc7c] ss:$48 sps:$4 sm:$0xff]  }
 0x2cc   : > { %v5447_v14 = vpop.f32.mrf.mxu0  ;;  %5638 = vmatmul.mubr.bf16.gmra.mxu0 %v8389_v20  ;;  %v8403_v20 = vld [vmem:[%s11940_s1 + $0xc74] ss:$48 sps:$4 sm:$0xff]  }
 0x2cd   : > { %v5448_v4 = vadd.f32 %v5447_v14, %v9698_v16  ;;  %v5864_v57 = vpop.f32.mrf.mxu1  ;;  %6055 = vmatmul.mubr.bf16.gmra.mxu1 %v8392_v58  ;;  %5645 = vmatprep.mubr.bf16.mxu0 %v8397_v45  ;;  %v8398_v16 = vld [vmem:[%s11940_s1 + $0xc18] ss:$48 sps:$4 sm:$0xff]  }
 0x2ce   : > { %v5449_v59 = vpop.f32.mrf.mxu0  ;;  %6062 = vmatprep.mubr.bf16.mxu1 %v8400_v5 }
 0x2cf   : > { %v10629_v43 = vadd.f32 %v5864_v57, %v5448_v4  ;;  %v5866_v39 = vpop.f32.mrf.mxu1  ;;  %v8401_v59 = vld [vmem:[%s11940_s1 + $0xc70] ss:$48 sps:$4 sm:$0xff]  }
 0x2d0   : > { %v5450_v55 = vpop.f32.mrf.mxu0 }
 0x2d1   : > { %v5451_v37 = vadd.f32 %v5450_v55, %v9715_v28  ;;  %v5867_v10 = vpop.f32.mrf.mxu1 }
 0x2d2   : > { %v5452_v36 = vpop.f32.mrf.mxu0 }
 0x2d3   : > { %v10644_v58 = vadd.f32 %v5867_v10, %v5451_v37  ;;  %v5869_v45 = vpop.f32.mrf.mxu1  ;;  %v8412_v10 = vld [vmem:[%s11940_s1 + $0xcdc] ss:$48 sps:$4 sm:$0xff]  }
 0x2d4   : > { %v5455_v24 = vpop.f32.mrf.mxu0  ;;  %5646 = vmatmul.mubr.bf16.gmra.mxu0 %v8395_v63  ;;  %v8409_v63 = vld [vmem:[%s11940_s1 + $0xcd4] ss:$48 sps:$4 sm:$0xff]  }
 0x2d5   : > { %v5456_v28 = vadd.f32 %v5455_v24, %v9720_v40  ;;  %v5872_v5 = vpop.f32.mrf.mxu1  ;;  %6063 = vmatmul.mubr.bf16.gmra.mxu1 %v8398_v16  ;;  %5653 = vmatprep.mubr.bf16.mxu0 %v8403_v20  ;;  %v8404_v40 = vld [vmem:[%s11940_s1 + $0xc78] ss:$48 sps:$4 sm:$0xff]  }
 0x2d6   : > { %v5457_v42 = vpop.f32.mrf.mxu0  ;;  %6070 = vmatprep.mubr.bf16.mxu1 %v8406_v32 }
 0x2d7   : > { %v10647_v14 = vadd.f32 %v5872_v5, %v5456_v28  ;;  %v5874_v4 = vpop.f32.mrf.mxu1  ;;  %v8407_v42 = vld [vmem:[%s11940_s1 + $0xcd0] ss:$48 sps:$4 sm:$0xff]  }
 0x2d8   : > { %v5458_v57 = vpop.f32.mrf.mxu0 }
 0x2d9   : > { %v5459_v39 = vadd.f32 %v5458_v57, %v9737_v54  ;;  %v5875_v55 = vpop.f32.mrf.mxu1 }
 0x2da   : > { %v5460_v37 = vpop.f32.mrf.mxu0 }
 0x2db   : > { %v10662_v16 = vadd.f32 %v5875_v55, %v5459_v39  ;;  %v5877_v20 = vpop.f32.mrf.mxu1  ;;  %v8418_v55 = vld [vmem:[%s11940_s1 + $0xd3c] ss:$48 sps:$4 sm:$0xff]  }
 0x2dc   : > { %v5463_v36 = vpop.f32.mrf.mxu0  ;;  %5654 = vmatmul.mubr.bf16.gmra.mxu0 %v8401_v59  ;;  %v8415_v59 = vld [vmem:[%s11940_s1 + $0xd34] ss:$48 sps:$4 sm:$0xff]  }
 0x2dd   : > { %v5464_v54 = vadd.f32 %v5463_v36, %v9742_v3  ;;  %v5880_v32 = vpop.f32.mrf.mxu1  ;;  %6071 = vmatmul.mubr.bf16.gmra.mxu1 %v8404_v40  ;;  %5661 = vmatprep.mubr.bf16.mxu0 %v8409_v63  ;;  %v8410_v3 = vld [vmem:[%s11940_s1 + $0xcd8] ss:$48 sps:$4 sm:$0xff]  }
 0x2de   : > { %v5465_v45 = vpop.f32.mrf.mxu0  ;;  %6078 = vmatprep.mubr.bf16.mxu1 %v8412_v10 }
 0x2df   : > { %v10665_v24 = vadd.f32 %v5880_v32, %v5464_v54  ;;  %v5882_v28 = vpop.f32.mrf.mxu1  ;;  %v8413_v45 = vld [vmem:[%s11940_s1 + $0xd30] ss:$48 sps:$4 sm:$0xff]  }
 0x2e0   : > { %v5466_v5 = vpop.f32.mrf.mxu0 }
 0x2e1   : > { %v5467_v4 = vadd.f32 %v5466_v5, %v9759_v19  ;;  %v5883_v57 = vpop.f32.mrf.mxu1 }
 0x2e2   : > { %v5468_v39 = vpop.f32.mrf.mxu0 }
 0x2e3   : > { %v10680_v40 = vadd.f32 %v5883_v57, %v5467_v4  ;;  %v5885_v63 = vpop.f32.mrf.mxu1  ;;  %v8424_v57 = vld [vmem:[%s11940_s1 + $0xd9c] ss:$48 sps:$4 sm:$0xff]  }
 0x2e4   : > { %v5471_v37 = vpop.f32.mrf.mxu0  ;;  %5662 = vmatmul.mubr.bf16.gmra.mxu0 %v8407_v42  ;;  %v8421_v42 = vld [vmem:[%s11940_s1 + $0xd94] ss:$48 sps:$4 sm:$0xff]  }
 0x2e5   : > { %v5472_v19 = vadd.f32 %v5471_v37, %v9764_v30  ;;  %v5888_v10 = vpop.f32.mrf.mxu1  ;;  %6079 = vmatmul.mubr.bf16.gmra.mxu1 %v8410_v3  ;;  %5669 = vmatprep.mubr.bf16.mxu0 %v8415_v59  ;;  %v8416_v30 = vld [vmem:[%s11940_s1 + $0xd38] ss:$48 sps:$4 sm:$0xff]  }
 0x2e6   : > { %v5473_v20 = vpop.f32.mrf.mxu0  ;;  %6086 = vmatprep.mubr.bf16.mxu1 %v8418_v55 }
 0x2e7   : > { %v10683_v36 = vadd.f32 %v5888_v10, %v5472_v19  ;;  %v5890_v54 = vpop.f32.mrf.mxu1  ;;  %v8419_v20 = vld [vmem:[%s11940_s1 + $0xd90] ss:$48 sps:$4 sm:$0xff]  }
 0x2e8   : > { %v5474_v32 = vpop.f32.mrf.mxu0 }
 0x2e9   : > { %v5475_v28 = vadd.f32 %v5474_v32, %v9781_v47  ;;  %v5891_v5 = vpop.f32.mrf.mxu1 }
 0x2ea   : > { %v5476_v4 = vpop.f32.mrf.mxu0 }
 0x2eb   : > { %v10698_v3 = vadd.f32 %v5891_v5, %v5475_v28  ;;  %v5893_v59 = vpop.f32.mrf.mxu1  ;;  %v8430_v5 = vld [vmem:[%s11940_s1 + $0xdfc] ss:$48 sps:$4 sm:$0xff]  }
 0x2ec   : > { %v5479_v39 = vpop.f32.mrf.mxu0  ;;  %5670 = vmatmul.mubr.bf16.gmra.mxu0 %v8413_v45  ;;  %v8427_v45 = vld [vmem:[%s11940_s1 + $0xdf4] ss:$48 sps:$4 sm:$0xff]  }
 0x2ed   : > { %v5480_v47 = vadd.f32 %v5479_v39, %v9786_v61  ;;  %v5896_v55 = vpop.f32.mrf.mxu1  ;;  %6087 = vmatmul.mubr.bf16.gmra.mxu1 %v8416_v30  ;;  %5677 = vmatprep.mubr.bf16.mxu0 %v8421_v42  ;;  %v8422_v61 = vld [vmem:[%s11940_s1 + $0xd98] ss:$48 sps:$4 sm:$0xff]  }
 0x2ee   : > { %v5481_v63 = vpop.f32.mrf.mxu0  ;;  %6094 = vmatprep.mubr.bf16.mxu1 %v8424_v57 }
 0x2ef   : > { %v10701_v37 = vadd.f32 %v5896_v55, %v5480_v47  ;;  %v5898_v19 = vpop.f32.mrf.mxu1  ;;  %v8425_v63 = vld [vmem:[%s11940_s1 + $0xdf0] ss:$48 sps:$4 sm:$0xff]  }
 0x2f0   : > { %v5482_v10 = vpop.f32.mrf.mxu0 }
 0x2f1   : > { %v5483_v54 = vadd.f32 %v5482_v10, %v9803_v13  ;;  %v5899_v32 = vpop.f32.mrf.mxu1 }
 0x2f2   : > { %v5484_v28 = vpop.f32.mrf.mxu0 }
 0x2f3   : > { %v10716_v30 = vadd.f32 %v5899_v32, %v5483_v54  ;;  %v5901_v42 = vpop.f32.mrf.mxu1  ;;  %v8436_v32 = vld [vmem:[%s11940_s1 + $0xe5c] ss:$48 sps:$4 sm:$0xff]  }
 0x2f4   : > { %v5487_v4 = vpop.f32.mrf.mxu0  ;;  %5678 = vmatmul.mubr.bf16.gmra.mxu0 %v8419_v20  ;;  %v8433_v20 = vld [vmem:[%s11940_s1 + $0xe54] ss:$48 sps:$4 sm:$0xff]  }
 0x2f5   : > { %v5488_v13 = vadd.f32 %v5487_v4, %v9808_v26  ;;  %v5904_v57 = vpop.f32.mrf.mxu1  ;;  %6095 = vmatmul.mubr.bf16.gmra.mxu1 %v8422_v61  ;;  %5685 = vmatprep.mubr.bf16.mxu0 %v8427_v45  ;;  %v8428_v26 = vld [vmem:[%s11940_s1 + $0xdf8] ss:$48 sps:$4 sm:$0xff]  }
 0x2f6   : > { %v5489_v59 = vpop.f32.mrf.mxu0  ;;  %6102 = vmatprep.mubr.bf16.mxu1 %v8430_v5 }
 0x2f7   : > { %v10719_v39 = vadd.f32 %v5904_v57, %v5488_v13  ;;  %v5906_v47 = vpop.f32.mrf.mxu1  ;;  %v8431_v59 = vld [vmem:[%s11940_s1 + $0xe50] ss:$48 sps:$4 sm:$0xff]  }
 0x2f8   : > { %v5490_v55 = vpop.f32.mrf.mxu0 }
 0x2f9   : > { %v5491_v19 = vadd.f32 %v5490_v55, %v9825_v44  ;;  %v5907_v10 = vpop.f32.mrf.mxu1 }
 0x2fa   : > { %v5492_v54 = vpop.f32.mrf.mxu0 }
 0x2fb   : > { %v10734_v61 = vadd.f32 %v5907_v10, %v5491_v19  ;;  %v5909_v45 = vpop.f32.mrf.mxu1  ;;  %v8442_v10 = vld [vmem:[%s11940_s1 + $0xebc] ss:$48 sps:$4 sm:$0xff]  }
 0x2fc   : > { %v5495_v28 = vpop.f32.mrf.mxu0  ;;  %5686 = vmatmul.mubr.bf16.gmra.mxu0 %v8425_v63  ;;  %v8439_v63 = vld [vmem:[%s11940_s1 + $0xeb4] ss:$48 sps:$4 sm:$0xff]  }
 0x2fd   : > { %v5496_v44 = vadd.f32 %v5495_v28, %v9830_v60  ;;  %v5912_v5 = vpop.f32.mrf.mxu1  ;;  %6103 = vmatmul.mubr.bf16.gmra.mxu1 %v8428_v26  ;;  %5693 = vmatprep.mubr.bf16.mxu0 %v8433_v20  ;;  %v8434_v60 = vld [vmem:[%s11940_s1 + $0xe58] ss:$48 sps:$4 sm:$0xff]  }
 0x2fe   : > { %v5497_v42 = vpop.f32.mrf.mxu0  ;;  %6110 = vmatprep.mubr.bf16.mxu1 %v8436_v32 }
 0x2ff   : > { %v10737_v4 = vadd.f32 %v5912_v5, %v5496_v44  ;;  %v5914_v13 = vpop.f32.mrf.mxu1  ;;  %v8437_v42 = vld [vmem:[%s11940_s1 + $0xeb0] ss:$48 sps:$4 sm:$0xff]  }
 0x300   : > { %v5498_v57 = vpop.f32.mrf.mxu0 }
 0x301   : > { %v5499_v47 = vadd.f32 %v5498_v57, %v9847_v15  ;;  %v5915_v55 = vpop.f32.mrf.mxu1 }
 0x302   : > { %v5500_v19 = vpop.f32.mrf.mxu0 }
 0x303   : > { %v10752_v26 = vadd.f32 %v5915_v55, %v5499_v47  ;;  %v5917_v20 = vpop.f32.mrf.mxu1  ;;  %v8448_v55 = vld [vmem:[%s11940_s1 + $0xf1c] ss:$48 sps:$4 sm:$0xff]  }
 0x304   : > { %v5503_v54 = vpop.f32.mrf.mxu0  ;;  %5694 = vmatmul.mubr.bf16.gmra.mxu0 %v8431_v59  ;;  %v8445_v59 = vld [vmem:[%s11940_s1 + $0xf14] ss:$48 sps:$4 sm:$0xff]  }
 0x305   : > { %v5504_v15 = vadd.f32 %v5503_v54, %v9852_v29  ;;  %v5920_v32 = vpop.f32.mrf.mxu1  ;;  %6111 = vmatmul.mubr.bf16.gmra.mxu1 %v8434_v60  ;;  %5701 = vmatprep.mubr.bf16.mxu0 %v8439_v63  ;;  %v8440_v29 = vld [vmem:[%s11940_s1 + $0xeb8] ss:$48 sps:$4 sm:$0xff]  }
 0x306   : > { %v5505_v45 = vpop.f32.mrf.mxu0  ;;  %6118 = vmatprep.mubr.bf16.mxu1 %v8442_v10 }
 0x307   : > { %v10755_v28 = vadd.f32 %v5920_v32, %v5504_v15  ;;  %v5922_v44 = vpop.f32.mrf.mxu1  ;;  %v8443_v45 = vld [vmem:[%s11940_s1 + $0xf10] ss:$48 sps:$4 sm:$0xff]  }
 0x308   : > { %v5506_v5 = vpop.f32.mrf.mxu0 }
 0x309   : > { %v5507_v13 = vadd.f32 %v5506_v5, %v9869_v49  ;;  %v5923_v57 = vpop.f32.mrf.mxu1 }
 0x30a   : > { %v5508_v47 = vpop.f32.mrf.mxu0 }
 0x30b   : > { %v10770_v60 = vadd.f32 %v5923_v57, %v5507_v13  ;;  %v5925_v63 = vpop.f32.mrf.mxu1  ;;  %v8454_v57 = vld [vmem:[%s11940_s1 + $0xf7c] ss:$48 sps:$4 sm:$0xff]  }
 0x30c   : > { %v5511_v19 = vpop.f32.mrf.mxu0  ;;  %5702 = vmatmul.mubr.bf16.gmra.mxu0 %v8437_v42  ;;  %v8451_v42 = vld [vmem:[%s11940_s1 + $0xf74] ss:$48 sps:$4 sm:$0xff]  }
 0x30d   : > { %v5512_v49 = vadd.f32 %v5511_v19, %v9874_v2  ;;  %v5928_v10 = vpop.f32.mrf.mxu1  ;;  %6119 = vmatmul.mubr.bf16.gmra.mxu1 %v8440_v29  ;;  %5709 = vmatprep.mubr.bf16.mxu0 %v8445_v59  ;;  %v8446_v2 = vld [vmem:[%s11940_s1 + $0xf18] ss:$48 sps:$4 sm:$0xff]  }
 0x30e   : > { %v5513_v20 = vpop.f32.mrf.mxu0  ;;  %6126 = vmatprep.mubr.bf16.mxu1 %v8448_v55 }
 0x30f   : > { %v10773_v54 = vadd.f32 %v5928_v10, %v5512_v49  ;;  %v5930_v15 = vpop.f32.mrf.mxu1  ;;  %v8449_v20 = vld [vmem:[%s11940_s1 + $0xf70] ss:$48 sps:$4 sm:$0xff]  }
 0x310   : > { %v5514_v32 = vpop.f32.mrf.mxu0 }
 0x311   : > { %v5515_v44 = vadd.f32 %v5514_v32, %v9891_v22  ;;  %v5931_v5 = vpop.f32.mrf.mxu1 }
 0x312   : > { %v5516_v13 = vpop.f32.mrf.mxu0 }
 0x313   : > { %v10788_v29 = vadd.f32 %v5931_v5, %v5515_v44  ;;  %v5933_v59 = vpop.f32.mrf.mxu1  ;;  %v8460_v5 = vld [vmem:[%s11940_s1 + $0xfdc] ss:$48 sps:$4 sm:$0xff]  }
 0x314   : > { %v5519_v47 = vpop.f32.mrf.mxu0  ;;  %5710 = vmatmul.mubr.bf16.gmra.mxu0 %v8443_v45  ;;  %v8457_v45 = vld [vmem:[%s11940_s1 + $0xfd4] ss:$48 sps:$4 sm:$0xff]  }
 0x315   : > { %v5520_v22 = vadd.f32 %v5519_v47, %v9896_v38  ;;  %v5936_v55 = vpop.f32.mrf.mxu1  ;;  %6127 = vmatmul.mubr.bf16.gmra.mxu1 %v8446_v2  ;;  %5717 = vmatprep.mubr.bf16.mxu0 %v8451_v42  ;;  %v8452_v38 = vld [vmem:[%s11940_s1 + $0xf78] ss:$48 sps:$4 sm:$0xff]  }
 0x316   : > { %v5521_v63 = vpop.f32.mrf.mxu0  ;;  %6134 = vmatprep.mubr.bf16.mxu1 %v8454_v57 }
 0x317   : > { %v10791_v19 = vadd.f32 %v5936_v55, %v5520_v22  ;;  %v5938_v49 = vpop.f32.mrf.mxu1  ;;  %v8455_v63 = vld [vmem:[%s11940_s1 + $0xfd0] ss:$48 sps:$4 sm:$0xff]  }
 0x318   : > { %v5522_v10 = vpop.f32.mrf.mxu0 }
 0x319   : > { %v5523_v15 = vadd.f32 %v5522_v10, %v9910_v62  ;;  %v5939_v32 = vpop.f32.mrf.mxu1 }
 0x31a   : > { %v5524_v44 = vpop.f32.mrf.mxu0 }
 0x31b   : > { %v10806_v2 = vadd.f32 %v5939_v32, %v5523_v15  ;;  %v5941_v42 = vpop.f32.mrf.mxu1  ;;  %v8466_v32 = vld [vmem:[%s11940_s1 + $0x103c] ss:$48 sps:$4 sm:$0xff]  }
 0x31c   : > { %v5527_v13 = vpop.f32.mrf.mxu0  ;;  %5718 = vmatmul.mubr.bf16.gmra.mxu0 %v8449_v20  ;;  %v8463_v20 = vld [vmem:[%s11940_s1 + $0x1034] ss:$48 sps:$4 sm:$0xff]  }
 0x31d   : > { %v5528_v62 = vadd.f32 %v5527_v13, %v9912_v12  ;;  %v5944_v57 = vpop.f32.mrf.mxu1  ;;  %6135 = vmatmul.mubr.bf16.gmra.mxu1 %v8452_v38  ;;  %5725 = vmatprep.mubr.bf16.mxu0 %v8457_v45  ;;  %v8458_v12 = vld [vmem:[%s11940_s1 + $0xfd8] ss:$48 sps:$4 sm:$0xff]  }
 0x31e   : > { %v5529_v59 = vpop.f32.mrf.mxu0  ;;  %6142 = vmatprep.mubr.bf16.mxu1 %v8460_v5 }
 0x31f   : > { %v10809_v47 = vadd.f32 %v5944_v57, %v5528_v62  ;;  %v5946_v22 = vpop.f32.mrf.mxu1  ;;  %v8461_v59 = vld [vmem:[%s11940_s1 + $0x1030] ss:$48 sps:$4 sm:$0xff]  }
 0x320   : > { %v5530_v55 = vpop.f32.mrf.mxu0 }
 0x321   : > { %v5531_v49 = vadd.f32 %v5530_v55, %v9926_v35  ;;  %v5947_v10 = vpop.f32.mrf.mxu1 }
 0x322   : > { %v5532_v15 = vpop.f32.mrf.mxu0 }
 0x323   : > { %v10824_v38 = vadd.f32 %v5947_v10, %v5531_v49  ;;  %v5949_v45 = vpop.f32.mrf.mxu1  ;;  %v8472_v10 = vld [vmem:[%s11940_s1 + $0x109c] ss:$48 sps:$4 sm:$0xff]  }
 0x324   : > { %v5535_v44 = vpop.f32.mrf.mxu0  ;;  %5726 = vmatmul.mubr.bf16.gmra.mxu0 %v8455_v63  ;;  %v8469_v63 = vld [vmem:[%s11940_s1 + $0x1094] ss:$48 sps:$4 sm:$0xff]  }
 0x325   : > { %v5536_v35 = vadd.f32 %v5535_v44, %v9928_v52  ;;  %v5952_v5 = vpop.f32.mrf.mxu1  ;;  %6143 = vmatmul.mubr.bf16.gmra.mxu1 %v8458_v12  ;;  %5733 = vmatprep.mubr.bf16.mxu0 %v8463_v20  ;;  %v8464_v52 = vld [vmem:[%s11940_s1 + $0x1038] ss:$48 sps:$4 sm:$0xff]  }
 0x326   : > { %v5537_v42 = vpop.f32.mrf.mxu0  ;;  %6150 = vmatprep.mubr.bf16.mxu1 %v8466_v32 }
 0x327   : > { %v10827_v13 = vadd.f32 %v5952_v5, %v5536_v35  ;;  %v5954_v62 = vpop.f32.mrf.mxu1  ;;  %v8467_v42 = vld [vmem:[%s11940_s1 + $0x1090] ss:$48 sps:$4 sm:$0xff]  }
 0x328   : > { %v5538_v57 = vpop.f32.mrf.mxu0 }
 0x329   : > { %v5539_v22 = vadd.f32 %v5538_v57, %v9942_v11  ;;  %v5955_v55 = vpop.f32.mrf.mxu1 }
 0x32a   : > { %v5540_v49 = vpop.f32.mrf.mxu0 }
 0x32b   : > { %v10842_v12 = vadd.f32 %v5955_v55, %v5539_v22  ;;  %v5957_v20 = vpop.f32.mrf.mxu1  ;;  %v8478_v55 = vld [vmem:[%s11940_s1 + $0x10fc] ss:$48 sps:$4 sm:$0xff]  }
 0x32c   : > { %v5543_v15 = vpop.f32.mrf.mxu0  ;;  %5734 = vmatmul.mubr.bf16.gmra.mxu0 %v8461_v59  ;;  %v8475_v59 = vld [vmem:[%s11940_s1 + $0x10f4] ss:$48 sps:$4 sm:$0xff]  }
 0x32d   : > { %v5544_v11 = vadd.f32 %v5543_v15, %v9944_v31  ;;  %v5960_v32 = vpop.f32.mrf.mxu1  ;;  %6151 = vmatmul.mubr.bf16.gmra.mxu1 %v8464_v52  ;;  %5741 = vmatprep.mubr.bf16.mxu0 %v8469_v63  ;;  %v8470_v31 = vld [vmem:[%s11940_s1 + $0x1098] ss:$48 sps:$4 sm:$0xff]  }
 0x32e   : > { %v5545_v45 = vpop.f32.mrf.mxu0  ;;  %6158 = vmatprep.mubr.bf16.mxu1 %v8472_v10 }
 0x32f   : > { %v10845_v44 = vadd.f32 %v5960_v32, %v5544_v11  ;;  %v5962_v35 = vpop.f32.mrf.mxu1 }
 0x330   : > { %v5546_v5 = vpop.f32.mrf.mxu0  ;;  %v8473_v35 = vld [vmem:[%s11940_s1 + $0x10f0] ss:$48 sps:$4 sm:$0xff]  }
 0x331   : > { %v5547_v62 = vadd.f32 %v5546_v5, %v9958_v56  ;;  %v5963_v57 = vpop.f32.mrf.mxu1  ;;  %v11996_v56 = vld [vmem:[#allocation2_spill] sm:$0xff]  ;;  %v11997_v5 = vld [vmem:[#allocation3_spill] sm:$0xff] }
 0x332   : > { %v5548_v22 = vpop.f32.mrf.mxu0 }
 0x333   : > { %v10860_v52 = vadd.f32 %v5963_v57, %v5547_v62  ;;  %v5965_v63 = vpop.f32.mrf.mxu1  ;;  %v8484_v22 = vld [vmem:[%s11940_s1 + $0x115c] ss:$48 sps:$4 sm:$0xff]  }
 0x334   : > { %v5551_v49 = vpop.f32.mrf.mxu0  ;;  %5742 = vmatmul.mubr.bf16.gmra.mxu0 %v8467_v42  ;;  %v8476_v42 = vld [vmem:[%s11940_s1 + $0x10f8] ss:$48 sps:$4 sm:$0xff]  }
 0x335   : > { %v5552_v10 = vadd.f32 %v5551_v49, %v11996_v56  ;;  %v5968_v20 = vpop.f32.mrf.mxu1  ;;  %6159 = vmatmul.mubr.bf16.gmra.mxu1 %v8470_v31  ;;  %5749 = vmatprep.mubr.bf16.mxu0 %v8475_v59  ;;  %v8481_v31 = vld [vmem:[%s11940_s1 + $0x1154] ss:$48 sps:$4 sm:$0xff]  }
 0x336   : > { %v5553_v15 = vpop.f32.mrf.mxu0  ;;  %6166 = vmatprep.mubr.bf16.mxu1 %v8478_v55  ;;  %v11999_v56 = vld [vmem:[#allocation4_spill] sm:$0xff] }
 0x337   : > { %v10863_v11 = vadd.f32 %v5968_v20, %v5552_v10  ;;  %v5970_v32 = vpop.f32.mrf.mxu1 }
 0x338   : > { %v5554_v45 = vpop.f32.mrf.mxu0 }
 0x339   : > { %v5555_v62 = vadd.f32 %v5554_v45, %v11997_v5  ;;  %v5971_v57 = vpop.f32.mrf.mxu1 }
 0x33a   : > { %v5556_v59 = vpop.f32.mrf.mxu0 }
 0x33b   : > { %v10878_v55 = vadd.f32 %v5971_v57, %v5555_v62  ;;  %v5973_v63 = vpop.f32.mrf.mxu1  ;;  %v8479_v59 = vld [vmem:[%s11940_s1 + $0x1150] ss:$48 sps:$4 sm:$0xff]   ;;  %v12001_v62 = vld [vmem:[#allocation5_spill] sm:$0xff] }
 0x33c   : > { %v5559_v49 = vpop.f32.mrf.mxu0  ;;  %5750 = vmatmul.mubr.bf16.gmra.mxu0 %v8473_v35  ;;  %v8482_v35 = vld [vmem:[%s11940_s1 + $0x1158] ss:$48 sps:$4 sm:$0xff]  }
 0x33d   : > { %11998 = vst [vmem:[#allocation2_spill] sm:$0xff] %v10878_v55  ;;  %v5560_v10 = vadd.f32 %v5559_v49, %v11999_v56  ;;  %v5976_v20 = vpop.f32.mrf.mxu1  ;;  %6167 = vmatmul.mubr.bf16.gmra.mxu1 %v8476_v42  ;;  %5757 = vmatprep.mubr.bf16.mxu0 %v8481_v31  ;;  %v8487_v42 = vld [vmem:[%s11940_s1 + $0x11b4] ss:$48 sps:$4 sm:$0xff]   ;;  %v8485_v55 = vld [vmem:[%s11940_s1 + $0x11b0] ss:$48 sps:$4 sm:$0xff]  }
 0x33e   : > { %v5561_v15 = vpop.f32.mrf.mxu0  ;;  %6174 = vmatprep.mubr.bf16.mxu1 %v8484_v22  ;;  %v8490_v22 = vld [vmem:[%s11940_s1 + $0x11bc] ss:$48 sps:$4 sm:$0xff]  }
 0x33f   : > { %v10881_v32 = vadd.f32 %v5976_v20, %v5560_v10  ;;  %v5978_v45 = vpop.f32.mrf.mxu1  ;;  %v12003_v20 = vld [vmem:[#allocation6_spill] sm:$0xff] }
 0x340   : > { %v5562_v5 = vpop.f32.mrf.mxu0 }
 0x341   : > { %12000 = vst [vmem:[#allocation3_spill] sm:$0xff] %v10881_v32  ;;  %v5563_v57 = vadd.f32 %v5562_v5, %v12001_v62  ;;  %v5979_v63 = vpop.f32.mrf.mxu1 }
 0x342   : > { %v5564_v31 = vpop.f32.mrf.mxu0 }
 0x343   : > { %v10896_v49 = vadd.f32 %v5979_v63, %v5563_v57  ;;  %v5981_v56 = vpop.f32.mrf.mxu1  ;;  %v12005_v57 = vld [vmem:[#allocation7_spill] sm:$0xff] }
 0x344   : > { %v5567_v10 = vpop.f32.mrf.mxu0  ;;  %5758 = vmatmul.mubr.bf16.gmra.mxu0 %v8479_v59  ;;  %v8488_v59 = vld [vmem:[%s11940_s1 + $0x11b8] ss:$48 sps:$4 sm:$0xff]  }
 0x345   : > { %12002 = vst [vmem:[#allocation4_spill] sm:$0xff] %v10896_v49  ;;  %v5568_v15 = vadd.f32 %v5567_v10, %v12003_v20  ;;  %v5984_v45 = vpop.f32.mrf.mxu1  ;;  %6175 = vmatmul.mubr.bf16.gmra.mxu1 %v8482_v35  ;;  %5765 = vmatprep.mubr.bf16.mxu0 %v8487_v42  ;;  %v8493_v35 = vld [vmem:[%s11940_s1 + $0x24] ss:$48 sps:$4 sm:$0xff]   ;;  %v8491_v49 = vld [vmem:[%s11940_s1 + $0x20] ss:$48 sps:$4 sm:$0xff]  }
 0x346   : > { %v5569_v5 = vpop.f32.mrf.mxu0  ;;  %6182 = vmatprep.mubr.bf16.mxu1 %v8490_v22 }
 0x347   : > { %v10899_v62 = vadd.f32 %v5984_v45, %v5568_v15  ;;  %v5986_v32 = vpop.f32.mrf.mxu1  ;;  %v12007_v15 = vld [vmem:[#allocation8_spill] sm:$0xff] }
 0x348   : > { %v5570_v31 = vpop.f32.mrf.mxu0  ;;  %v8496_v32 = vld [vmem:[%s11940_s1 + $0x2c] ss:$48 sps:$4 sm:$0xff]  }
 0x349   : > { %12004 = vst [vmem:[#allocation5_spill] sm:$0xff] %v10899_v62  ;;  %v5571_v63 = vadd.f32 %v5570_v31, %v12005_v57  ;;  %v5987_v56 = vpop.f32.mrf.mxu1 }
 0x34a   : > { %v5572_v42 = vpop.f32.mrf.mxu0 }
 0x34b   : > { %v10914_v22 = vadd.f32 %v5987_v56, %v5571_v63  ;;  %v5989_v10 = vpop.f32.mrf.mxu1  ;;  %v12009_v63 = vld [vmem:[#allocation9_spill] sm:$0xff] }
 0x34c   : > { %v5575_v20 = vpop.f32.mrf.mxu0  ;;  %5766 = vmatmul.mubr.bf16.gmra.mxu0 %v8485_v55  ;;  %v8494_v55 = vld [vmem:[%s11940_s1 + $0x28] ss:$48 sps:$4 sm:$0xff]  }
 0x34d   : > { %12006 = vst [vmem:[#allocation6_spill] sm:$0xff] %v10914_v22  ;;  %v5576_v45 = vadd.f32 %v5575_v20, %v12007_v15  ;;  %v5992_v5 = vpop.f32.mrf.mxu1  ;;  %6183 = vmatmul.mubr.bf16.gmra.mxu1 %v8488_v59  ;;  %6223 = vmatprep.mubr.bf16.mxu0 %v8493_v35  ;;  %v8499_v59 = vld [vmem:[%s11940_s1 + $0x84] ss:$48 sps:$4 sm:$0xff]   ;;  %v8497_v22 = vld [vmem:[%s11940_s1 + $0x80] ss:$48 sps:$4 sm:$0xff]  }
 0x34e   : > { %v5577_v31 = vpop.f32.mrf.mxu0  ;;  %6640 = vmatprep.mubr.bf16.mxu1 %v8496_v32 }
 0x34f   : > { %v10917_v57 = vadd.f32 %v5992_v5, %v5576_v45  ;;  %v5994_v62 = vpop.f32.mrf.mxu1  ;;  %v12011_v45 = vld [vmem:[#allocation10_spill] sm:$0xff] }
 0x350   : > { %v5578_v42 = vpop.f32.mrf.mxu0  ;;  %v8502_v62 = vld [vmem:[%s11940_s1 + $0x8c] ss:$48 sps:$4 sm:$0xff]  }
 0x351   : > { %12008 = vst [vmem:[#allocation7_spill] sm:$0xff] %v10917_v57  ;;  %v5579_v56 = vadd.f32 %v5578_v42, %v12009_v63  ;;  %v5995_v10 = vpop.f32.mrf.mxu1 }
 0x352   : > { %v5580_v35 = vpop.f32.mrf.mxu0 }
 0x353   : > { %v10932_v32 = vadd.f32 %v5995_v10, %v5579_v56  ;;  %v5997_v20 = vpop.f32.mrf.mxu1  ;;  %v12013_v56 = vld [vmem:[#allocation11_spill] sm:$0xff] }
 0x354   : > { %v5583_v15 = vpop.f32.mrf.mxu0  ;;  %6224 = vmatmul.mubr.bf16.vlgmr.msra.gmra.mxu0 %v8491_v49  ;;  %v8500_v49 = vld [vmem:[%s11940_s1 + $0x88] ss:$48 sps:$4 sm:$0xff]  }
 0x355   : > { %12010 = vst [vmem:[#allocation8_spill] sm:$0xff] %v10932_v32  ;;  %v5584_v5 = vadd.f32 %v5583_v15, %v12011_v45  ;;  %v6000_v31 = vpop.f32.mrf.mxu1  ;;  %6641 = vmatmul.mubr.bf16.vlgmr.msra.gmra.mxu1 %v8494_v55  ;;  %6231 = vmatprep.mubr.bf16.mxu0 %v8499_v59  ;;  %v8505_v55 = vld [vmem:[%s11940_s1 + $0xe4] ss:$48 sps:$4 sm:$0xff]   ;;  %v8503_v32 = vld [vmem:[%s11940_s1 + $0xe0] ss:$48 sps:$4 sm:$0xff]  }
 0x356   : > { %v5585_v42 = vpop.f32.mrf.mxu0  ;;  %6648 = vmatprep.mubr.bf16.mxu1 %v8502_v62 }
 0x357   : > { %v10935_v63 = vadd.f32 %v6000_v31, %v5584_v5  ;;  %v6002_v57 = vpop.f32.mrf.mxu1  ;;  %v12014_v5 = vld [vmem:[#allocation12_spill] sm:$0xff] }
 0x358   : > { %v5586_v35 = vpop.f32.mrf.mxu0  ;;  %v8508_v57 = vld [vmem:[%s11940_s1 + $0xec] ss:$48 sps:$4 sm:$0xff]  }
 0x359   : > { %12012 = vst [vmem:[#allocation9_spill] sm:$0xff] %v10935_v63  ;;  %v5587_v10 = vadd.f32 %v5586_v35, %v12013_v56  ;;  %v6003_v20 = vpop.f32.mrf.mxu1 }
 0x35a   : > { %v5588_v59 = vpop.f32.mrf.mxu0 }
 0x35b   : > { %v10950_v62 = vadd.f32 %v6003_v20, %v5587_v10  ;;  %v6005_v15 = vpop.f32.mrf.mxu1 }
 0x35c   : > { %v5591_v45 = vpop.f32.mrf.mxu0  ;;  %6232 = vmatmul.mubr.bf16.gmra.mxu0 %v8497_v22  ;;  %v8506_v22 = vld [vmem:[%s11940_s1 + $0xe8] ss:$48 sps:$4 sm:$0xff]  }
 0x35d   : > { %v5592_v31 = vadd.f32 %v5591_v45, %v12014_v5  ;;  %v6008_v42 = vpop.f32.mrf.mxu1  ;;  %6649 = vmatmul.mubr.bf16.gmra.mxu1 %v8500_v49  ;;  %6239 = vmatprep.mubr.bf16.mxu0 %v8505_v55  ;;  %v8511_v49 = vld [vmem:[%s11940_s1 + $0x144] ss:$48 sps:$4 sm:$0xff]  }
 0x35e   : > { %v5593_v35 = vpop.f32.mrf.mxu0  ;;  %6656 = vmatprep.mubr.bf16.mxu1 %v8508_v57 }
 0x35f   : > { %v10953_v56 = vadd.f32 %v6008_v42, %v5592_v31  ;;  %v6010_v63 = vpop.f32.mrf.mxu1 }
 0x360   : > { %v5594_v59 = vpop.f32.mrf.mxu0  ;;  %v8514_v63 = vld [vmem:[%s11940_s1 + $0x14c] ss:$48 sps:$4 sm:$0xff]  }
 0x361   : > { %12015 = vst [vmem:[#allocation10_spill] sm:$0xff] %v10953_v56  ;;  %v5595_v10 = vadd.f32 %v5594_v59, %v10080_v0  ;;  %v6011_v20 = vpop.f32.mrf.mxu1  ;;  %v12016_v0 = vld [vmem:[#allocation13_spill] sm:$0xff]  ;;  %v8509_v56 = vld [vmem:[%s11940_s1 + $0x140] ss:$48 sps:$4 sm:$0xff]  }
 0x362   : > { %v5596_v55 = vpop.f32.mrf.mxu0 }
 0x363   : > { %v10968_v57 = vadd.f32 %v6011_v20, %v5595_v10  ;;  %v6013_v15 = vpop.f32.mrf.mxu1 }
 0x364   : > { %v5599_v45 = vpop.f32.mrf.mxu0  ;;  %6240 = vmatmul.mubr.bf16.gmra.mxu0 %v8503_v32  ;;  %v8512_v32 = vld [vmem:[%s11940_s1 + $0x148] ss:$48 sps:$4 sm:$0xff]  }
 0x365   : > { %v5600_v5 = vadd.f32 %v5599_v45, %v12016_v0  ;;  %v6016_v31 = vpop.f32.mrf.mxu1  ;;  %6657 = vmatmul.mubr.bf16.gmra.mxu1 %v8506_v22  ;;  %6247 = vmatprep.mubr.bf16.mxu0 %v8511_v49  ;;  %v8517_v22 = vld [vmem:[%s11940_s1 + $0x1a4] ss:$48 sps:$4 sm:$0xff]  }
 0x366   : > { %v5601_v42 = vpop.f32.mrf.mxu0  ;;  %6664 = vmatprep.mubr.bf16.mxu1 %v8514_v63  ;;  %v8520_v63 = vld [vmem:[%s11940_s1 + $0x1ac] ss:$48 sps:$4 sm:$0xff]  }
 0x367   : > { %v10971_v35 = vadd.f32 %v6016_v31, %v5600_v5  ;;  %v6018_v59 = vpop.f32.mrf.mxu1 }
 0x368   : > { %v5602_v55 = vpop.f32.mrf.mxu0 }
 0x369   : > { %12017 = vst [vmem:[#allocation11_spill] sm:$0xff] %v10971_v35  ;;  %v5603_v10 = vadd.f32 %v5602_v55, %v10108_v53  ;;  %v6019_v20 = vpop.f32.mrf.mxu1  ;;  %v12019_v53 = vld [vmem:[#allocation14_spill] sm:$0xff] }
 0x36a   : > { %v5604_v49 = vpop.f32.mrf.mxu0  ;;  %v8515_v35 = vld [vmem:[%s11940_s1 + $0x1a0] ss:$48 sps:$4 sm:$0xff]  }
 0x36b   : > { %v10986_v15 = vadd.f32 %v6019_v20, %v5603_v10  ;;  %v6021_v45 = vpop.f32.mrf.mxu1  ;;  %v12021_v10 = vld [vmem:[#allocation15_spill] sm:$0xff] }
 0x36c   : > { %v5607_v0 = vpop.f32.mrf.mxu0  ;;  %6248 = vmatmul.mubr.bf16.gmra.mxu0 %v8509_v56  ;;  %v8518_v56 = vld [vmem:[%s11940_s1 + $0x1a8] ss:$48 sps:$4 sm:$0xff]  }
 0x36d   : > { %12018 = vst [vmem:[#allocation12_spill] sm:$0xff] %v10986_v15  ;;  %v5608_v5 = vadd.f32 %v5607_v0, %v12019_v53  ;;  %v6024_v31 = vpop.f32.mrf.mxu1  ;;  %6665 = vmatmul.mubr.bf16.gmra.mxu1 %v8512_v32  ;;  %6255 = vmatprep.mubr.bf16.mxu0 %v8517_v22  ;;  %v8523_v32 = vld [vmem:[%s11940_s1 + $0x204] ss:$48 sps:$4 sm:$0xff]   ;;  %v8521_v15 = vld [vmem:[%s11940_s1 + $0x200] ss:$48 sps:$4 sm:$0xff]  }
 0x36e   : > { %v5609_v42 = vpop.f32.mrf.mxu0  ;;  %6672 = vmatprep.mubr.bf16.mxu1 %v8520_v63  ;;  %v8526_v63 = vld [vmem:[%s11940_s1 + $0x20c] ss:$48 sps:$4 sm:$0xff]  }
 0x36f   : > { %v10989_v59 = vadd.f32 %v6024_v31, %v5608_v5  ;;  %v6026_v55 = vpop.f32.mrf.mxu1  ;;  %v12022_v31 = vld [vmem:[#allocation16_spill] sm:$0xff] }
 0x370   : > { %v5610_v49 = vpop.f32.mrf.mxu0 }
 0x371   : > { %12020 = vst [vmem:[#allocation13_spill] sm:$0xff] %v10989_v59  ;;  %v5611_v20 = vadd.f32 %v5610_v49, %v12021_v10  ;;  %v6027_v45 = vpop.f32.mrf.mxu1 }
 0x372   : > { %v5612_v22 = vpop.f32.mrf.mxu0 }
 0x373   : > { %v11004_v0 = vadd.f32 %v6027_v45, %v5611_v20  ;;  %v6029_v53 = vpop.f32.mrf.mxu1 }
 0x374   : > { %v5615_v5 = vpop.f32.mrf.mxu0  ;;  %6256 = vmatmul.mubr.bf16.gmra.mxu0 %v8515_v35  ;;  %v8524_v35 = vld [vmem:[%s11940_s1 + $0x208] ss:$48 sps:$4 sm:$0xff]  }
 0x375   : > { %v5616_v42 = vadd.f32 %v5615_v5, %v12022_v31  ;;  %v6032_v55 = vpop.f32.mrf.mxu1  ;;  %6673 = vmatmul.mubr.bf16.gmra.mxu1 %v8518_v56  ;;  %6263 = vmatprep.mubr.bf16.mxu0 %v8523_v32  ;;  %v8529_v56 = vld [vmem:[%s11940_s1 + $0x264] ss:$48 sps:$4 sm:$0xff]  }
 0x376   : > { %v5617_v49 = vpop.f32.mrf.mxu0  ;;  %6680 = vmatprep.mubr.bf16.mxu1 %v8526_v63 }
 0x377   : > { %v11007_v10 = vadd.f32 %v6032_v55, %v5616_v42  ;;  %v6034_v59 = vpop.f32.mrf.mxu1 }
 0x378   : > { %v5618_v22 = vpop.f32.mrf.mxu0  ;;  %v8532_v59 = vld [vmem:[%s11940_s1 + $0x26c] ss:$48 sps:$4 sm:$0xff]  }
 0x379   : > { %12023 = vst [vmem:[#allocation14_spill] sm:$0xff] %v11007_v10  ;;  %v5619_v20 = vadd.f32 %v5618_v22, %v10144_v8  ;;  %v6035_v45 = vpop.f32.mrf.mxu1  ;;  %v12025_v8 = vld [vmem:[#allocation17_spill] sm:$0xff]  ;;  %v8527_v10 = vld [vmem:[%s11940_s1 + $0x260] ss:$48 sps:$4 sm:$0xff]  }
 0x37a   : > { %v5620_v32 = vpop.f32.mrf.mxu0 }
 0x37b   : > { %v11022_v63 = vadd.f32 %v6035_v45, %v5619_v20  ;;  %v6037_v53 = vpop.f32.mrf.mxu1  ;;  %v12027_v20 = vld [vmem:[#allocation18_spill] sm:$0xff] }
 0x37c   : > { %v5623_v5 = vpop.f32.mrf.mxu0  ;;  %6264 = vmatmul.mubr.bf16.gmra.mxu0 %v8521_v15  ;;  %v8530_v15 = vld [vmem:[%s11940_s1 + $0x268] ss:$48 sps:$4 sm:$0xff]  }
 0x37d   : > { %12024 = vst [vmem:[#allocation15_spill] sm:$0xff] %v11022_v63  ;;  %v5624_v31 = vadd.f32 %v5623_v5, %v12025_v8  ;;  %v6040_v42 = vpop.f32.mrf.mxu1  ;;  %6681 = vmatmul.mubr.bf16.gmra.mxu1 %v8524_v35  ;;  %6271 = vmatprep.mubr.bf16.mxu0 %v8529_v56  ;;  %v8535_v35 = vld [vmem:[%s11940_s1 + $0x2c4] ss:$48 sps:$4 sm:$0xff]   ;;  %v8533_v63 = vld [vmem:[%s11940_s1 + $0x2c0] ss:$48 sps:$4 sm:$0xff]  }
 0x37e   : > { %v5625_v55 = vpop.f32.mrf.mxu0  ;;  %6688 = vmatprep.mubr.bf16.mxu1 %v8532_v59  ;;  %v8538_v59 = vld [vmem:[%s11940_s1 + $0x2cc] ss:$48 sps:$4 sm:$0xff]  }
 0x37f   : > { %v11025_v49 = vadd.f32 %v6040_v42, %v5624_v31  ;;  %v6042_v22 = vpop.f32.mrf.mxu1  ;;  %v12029_v42 = vld [vmem:[#allocation19_spill] sm:$0xff] }
 0x380   : > { %v5626_v32 = vpop.f32.mrf.mxu0 }
 0x381   : > { %12026 = vst [vmem:[#allocation16_spill] sm:$0xff] %v11025_v49  ;;  %v5627_v45 = vadd.f32 %v5626_v32, %v12027_v20  ;;  %v6043_v53 = vpop.f32.mrf.mxu1 }
 0x382   : > { %v5628_v56 = vpop.f32.mrf.mxu0 }
 0x383   : > { %v11040_v5 = vadd.f32 %v6043_v53, %v5627_v45  ;;  %v6045_v8 = vpop.f32.mrf.mxu1  ;;  %v12031_v45 = vld [vmem:[#allocation20_spill] sm:$0xff] }
 0x384   : > { %v5631_v31 = vpop.f32.mrf.mxu0  ;;  %6272 = vmatmul.mubr.bf16.gmra.mxu0 %v8527_v10  ;;  %v8536_v10 = vld [vmem:[%s11940_s1 + $0x2c8] ss:$48 sps:$4 sm:$0xff]  }
 0x385   : > { %12028 = vst [vmem:[#allocation17_spill] sm:$0xff] %v11040_v5  ;;  %v5632_v55 = vadd.f32 %v5631_v31, %v12029_v42  ;;  %v6048_v22 = vpop.f32.mrf.mxu1  ;;  %6689 = vmatmul.mubr.bf16.gmra.mxu1 %v8530_v15  ;;  %6279 = vmatprep.mubr.bf16.mxu0 %v8535_v35  ;;  %v8541_v15 = vld [vmem:[%s11940_s1 + $0x324] ss:$48 sps:$4 sm:$0xff]   ;;  %v8539_v5 = vld [vmem:[%s11940_s1 + $0x320] ss:$48 sps:$4 sm:$0xff]  }
 0x386   : > { %v5633_v32 = vpop.f32.mrf.mxu0  ;;  %6696 = vmatprep.mubr.bf16.mxu1 %v8538_v59 }
 0x387   : > { %v11043_v20 = vadd.f32 %v6048_v22, %v5632_v55  ;;  %v6050_v49 = vpop.f32.mrf.mxu1  ;;  %v12033_v55 = vld [vmem:[#allocation21_spill] sm:$0xff] }
 0x388   : > { %v5634_v56 = vpop.f32.mrf.mxu0  ;;  %v8544_v49 = vld [vmem:[%s11940_s1 + $0x32c] ss:$48 sps:$4 sm:$0xff]  }
 0x389   : > { %12030 = vst [vmem:[#allocation18_spill] sm:$0xff] %v11043_v20  ;;  %v5635_v53 = vadd.f32 %v5634_v56, %v12031_v45  ;;  %v6051_v8 = vpop.f32.mrf.mxu1 }
 0x38a   : > { %v5636_v35 = vpop.f32.mrf.mxu0 }
 0x38b   : > { %v11058_v59 = vadd.f32 %v6051_v8, %v5635_v53  ;;  %v6053_v31 = vpop.f32.mrf.mxu1  ;;  %v12035_v53 = vld [vmem:[#allocation22_spill] sm:$0xff] }
 0x38c   : > { %v5639_v42 = vpop.f32.mrf.mxu0  ;;  %6280 = vmatmul.mubr.bf16.gmra.mxu0 %v8533_v63  ;;  %v8542_v63 = vld [vmem:[%s11940_s1 + $0x328] ss:$48 sps:$4 sm:$0xff]  }
 0x38d   : > { %12032 = vst [vmem:[#allocation19_spill] sm:$0xff] %v11058_v59  ;;  %v5640_v22 = vadd.f32 %v5639_v42, %v12033_v55  ;;  %v6056_v32 = vpop.f32.mrf.mxu1  ;;  %6697 = vmatmul.mubr.bf16.gmra.mxu1 %v8536_v10  ;;  %6287 = vmatprep.mubr.bf16.mxu0 %v8541_v15  ;;  %v8547_v10 = vld [vmem:[%s11940_s1 + $0x384] ss:$48 sps:$4 sm:$0xff]   ;;  %v8545_v59 = vld [vmem:[%s11940_s1 + $0x380] ss:$48 sps:$4 sm:$0xff]  }
 0x38e   : > { %v5641_v56 = vpop.f32.mrf.mxu0  ;;  %6704 = vmatprep.mubr.bf16.mxu1 %v8544_v49 }
 0x38f   : > { %v11061_v45 = vadd.f32 %v6056_v32, %v5640_v22  ;;  %v6058_v20 = vpop.f32.mrf.mxu1  ;;  %v12037_v22 = vld [vmem:[#allocation23_spill] sm:$0xff] }
 0x390   : > { %v5642_v35 = vpop.f32.mrf.mxu0  ;;  %v8550_v20 = vld [vmem:[%s11940_s1 + $0x38c] ss:$48 sps:$4 sm:$0xff]  }
 0x391   : > { %12034 = vst [vmem:[#allocation20_spill] sm:$0xff] %v11061_v45  ;;  %v5643_v8 = vadd.f32 %v5642_v35, %v12035_v53  ;;  %v6059_v31 = vpop.f32.mrf.mxu1 }
 0x392   : > { %v5644_v15 = vpop.f32.mrf.mxu0 }
 0x393   : > { %v11076_v49 = vadd.f32 %v6059_v31, %v5643_v8  ;;  %v6061_v42 = vpop.f32.mrf.mxu1  ;;  %v12039_v8 = vld [vmem:[#allocation24_spill] sm:$0xff] }
 0x394   : > { %v5647_v55 = vpop.f32.mrf.mxu0  ;;  %6288 = vmatmul.mubr.bf16.gmra.mxu0 %v8539_v5  ;;  %v8548_v5 = vld [vmem:[%s11940_s1 + $0x388] ss:$48 sps:$4 sm:$0xff]  }
 0x395   : > { %12036 = vst [vmem:[#allocation21_spill] sm:$0xff] %v11076_v49  ;;  %v5648_v32 = vadd.f32 %v5647_v55, %v12037_v22  ;;  %v6064_v56 = vpop.f32.mrf.mxu1  ;;  %6705 = vmatmul.mubr.bf16.gmra.mxu1 %v8542_v63  ;;  %6295 = vmatprep.mubr.bf16.mxu0 %v8547_v10  ;;  %v8553_v63 = vld [vmem:[%s11940_s1 + $0x3e4] ss:$48 sps:$4 sm:$0xff]   ;;  %v8551_v49 = vld [vmem:[%s11940_s1 + $0x3e0] ss:$48 sps:$4 sm:$0xff]  }
 0x396   : > { %v5649_v35 = vpop.f32.mrf.mxu0  ;;  %6712 = vmatprep.mubr.bf16.mxu1 %v8550_v20 }
 0x397   : > { %v11079_v53 = vadd.f32 %v6064_v56, %v5648_v32  ;;  %v6066_v45 = vpop.f32.mrf.mxu1  ;;  %v12041_v32 = vld [vmem:[#allocation25_spill] sm:$0xff] }
 0x398   : > { %v5650_v15 = vpop.f32.mrf.mxu0  ;;  %v8556_v45 = vld [vmem:[%s11940_s1 + $0x3ec] ss:$48 sps:$4 sm:$0xff]  }
 0x399   : > { %12038 = vst [vmem:[#allocation22_spill] sm:$0xff] %v11079_v53  ;;  %v5651_v31 = vadd.f32 %v5650_v15, %v12039_v8  ;;  %v6067_v42 = vpop.f32.mrf.mxu1 }
 0x39a   : > { %v5652_v10 = vpop.f32.mrf.mxu0 }
 0x39b   : > { %v11094_v20 = vadd.f32 %v6067_v42, %v5651_v31  ;;  %v6069_v55 = vpop.f32.mrf.mxu1  ;;  %v12043_v31 = vld [vmem:[#allocation26_spill] sm:$0xff] }
 0x39c   : > { %v5655_v22 = vpop.f32.mrf.mxu0  ;;  %6296 = vmatmul.mubr.bf16.gmra.mxu0 %v8545_v59  ;;  %v8554_v59 = vld [vmem:[%s11940_s1 + $0x3e8] ss:$48 sps:$4 sm:$0xff]  }
 0x39d   : > { %12040 = vst [vmem:[#allocation23_spill] sm:$0xff] %v11094_v20  ;;  %v5656_v56 = vadd.f32 %v5655_v22, %v12041_v32  ;;  %v6072_v35 = vpop.f32.mrf.mxu1  ;;  %6713 = vmatmul.mubr.bf16.gmra.mxu1 %v8548_v5  ;;  %6303 = vmatprep.mubr.bf16.mxu0 %v8553_v63  ;;  %v8559_v5 = vld [vmem:[%s11940_s1 + $0x444] ss:$48 sps:$4 sm:$0xff]   ;;  %v8557_v20 = vld [vmem:[%s11940_s1 + $0x440] ss:$48 sps:$4 sm:$0xff]  }
 0x39e   : > { %v5657_v15 = vpop.f32.mrf.mxu0  ;;  %6720 = vmatprep.mubr.bf16.mxu1 %v8556_v45 }
 0x39f   : > { %v11097_v8 = vadd.f32 %v6072_v35, %v5656_v56  ;;  %v6074_v53 = vpop.f32.mrf.mxu1  ;;  %v12045_v56 = vld [vmem:[#allocation27_spill] sm:$0xff] }
 0x3a0   : > { %v5658_v10 = vpop.f32.mrf.mxu0  ;;  %v8562_v53 = vld [vmem:[%s11940_s1 + $0x44c] ss:$48 sps:$4 sm:$0xff]  }
 0x3a1   : > { %12042 = vst [vmem:[#allocation24_spill] sm:$0xff] %v11097_v8  ;;  %v5659_v42 = vadd.f32 %v5658_v10, %v12043_v31  ;;  %v6075_v55 = vpop.f32.mrf.mxu1 }
 0x3a2   : > { %v5660_v63 = vpop.f32.mrf.mxu0 }
 0x3a3   : > { %v11112_v45 = vadd.f32 %v6075_v55, %v5659_v42  ;;  %v6077_v22 = vpop.f32.mrf.mxu1  ;;  %v12047_v42 = vld [vmem:[#allocation28_spill] sm:$0xff] }
 0x3a4   : > { %v5663_v32 = vpop.f32.mrf.mxu0  ;;  %6304 = vmatmul.mubr.bf16.gmra.mxu0 %v8551_v49  ;;  %v8560_v49 = vld [vmem:[%s11940_s1 + $0x448] ss:$48 sps:$4 sm:$0xff]  }
 0x3a5   : > { %12044 = vst [vmem:[#allocation25_spill] sm:$0xff] %v11112_v45  ;;  %v5664_v35 = vadd.f32 %v5663_v32, %v12045_v56  ;;  %v6080_v15 = vpop.f32.mrf.mxu1  ;;  %6721 = vmatmul.mubr.bf16.gmra.mxu1 %v8554_v59  ;;  %6311 = vmatprep.mubr.bf16.mxu0 %v8559_v5  ;;  %v8565_v59 = vld [vmem:[%s11940_s1 + $0x4a4] ss:$48 sps:$4 sm:$0xff]   ;;  %v8563_v45 = vld [vmem:[%s11940_s1 + $0x4a0] ss:$48 sps:$4 sm:$0xff]  }
 0x3a6   : > { %v5665_v10 = vpop.f32.mrf.mxu0  ;;  %6728 = vmatprep.mubr.bf16.mxu1 %v8562_v53 }
 0x3a7   : > { %v11115_v31 = vadd.f32 %v6080_v15, %v5664_v35  ;;  %v6082_v8 = vpop.f32.mrf.mxu1  ;;  %v12049_v35 = vld [vmem:[#allocation29_spill] sm:$0xff] }
 0x3a8   : > { %v5666_v63 = vpop.f32.mrf.mxu0  ;;  %v8568_v8 = vld [vmem:[%s11940_s1 + $0x4ac] ss:$48 sps:$4 sm:$0xff]  }
 0x3a9   : > { %12046 = vst [vmem:[#allocation26_spill] sm:$0xff] %v11115_v31  ;;  %v5667_v55 = vadd.f32 %v5666_v63, %v12047_v42  ;;  %v6083_v22 = vpop.f32.mrf.mxu1 }
 0x3aa   : > { %v5668_v5 = vpop.f32.mrf.mxu0 }
 0x3ab   : > { %v11130_v53 = vadd.f32 %v6083_v22, %v5667_v55  ;;  %v6085_v32 = vpop.f32.mrf.mxu1  ;;  %v12051_v55 = vld [vmem:[#allocation30_spill] sm:$0xff] }
 0x3ac   : > { %v5671_v56 = vpop.f32.mrf.mxu0  ;;  %6312 = vmatmul.mubr.bf16.gmra.mxu0 %v8557_v20  ;;  %v8566_v20 = vld [vmem:[%s11940_s1 + $0x4a8] ss:$48 sps:$4 sm:$0xff]  }
 0x3ad   : > { %12048 = vst [vmem:[#allocation27_spill] sm:$0xff] %v11130_v53  ;;  %v5672_v15 = vadd.f32 %v5671_v56, %v12049_v35  ;;  %v6088_v10 = vpop.f32.mrf.mxu1  ;;  %6729 = vmatmul.mubr.bf16.gmra.mxu1 %v8560_v49  ;;  %6319 = vmatprep.mubr.bf16.mxu0 %v8565_v59  ;;  %v8571_v49 = vld [vmem:[%s11940_s1 + $0x504] ss:$48 sps:$4 sm:$0xff]   ;;  %v8569_v53 = vld [vmem:[%s11940_s1 + $0x500] ss:$48 sps:$4 sm:$0xff]  }
 0x3ae   : > { %v5673_v63 = vpop.f32.mrf.mxu0  ;;  %6736 = vmatprep.mubr.bf16.mxu1 %v8568_v8 }
 0x3af   : > { %v11133_v42 = vadd.f32 %v6088_v10, %v5672_v15  ;;  %v6090_v31 = vpop.f32.mrf.mxu1  ;;  %v12053_v15 = vld [vmem:[#allocation31_spill] sm:$0xff] }
 0x3b0   : > { %v5674_v5 = vpop.f32.mrf.mxu0  ;;  %v8574_v31 = vld [vmem:[%s11940_s1 + $0x50c] ss:$48 sps:$4 sm:$0xff]  }
 0x3b1   : > { %12050 = vst [vmem:[#allocation28_spill] sm:$0xff] %v11133_v42  ;;  %v5675_v22 = vadd.f32 %v5674_v5, %v12051_v55  ;;  %v6091_v32 = vpop.f32.mrf.mxu1 }
 0x3b2   : > { %v5676_v59 = vpop.f32.mrf.mxu0 }
 0x3b3   : > { %v11148_v8 = vadd.f32 %v6091_v32, %v5675_v22  ;;  %v6093_v56 = vpop.f32.mrf.mxu1  ;;  %v12055_v22 = vld [vmem:[#allocation32_spill] sm:$0xff] }
 0x3b4   : > { %v5679_v35 = vpop.f32.mrf.mxu0  ;;  %6320 = vmatmul.mubr.bf16.gmra.mxu0 %v8563_v45  ;;  %v8572_v45 = vld [vmem:[%s11940_s1 + $0x508] ss:$48 sps:$4 sm:$0xff]  }
 0x3b5   : > { %12052 = vst [vmem:[#allocation29_spill] sm:$0xff] %v11148_v8  ;;  %v5680_v10 = vadd.f32 %v5679_v35, %v12053_v15  ;;  %v6096_v63 = vpop.f32.mrf.mxu1  ;;  %6737 = vmatmul.mubr.bf16.gmra.mxu1 %v8566_v20  ;;  %6327 = vmatprep.mubr.bf16.mxu0 %v8571_v49  ;;  %v8577_v20 = vld [vmem:[%s11940_s1 + $0x564] ss:$48 sps:$4 sm:$0xff]   ;;  %v8575_v8 = vld [vmem:[%s11940_s1 + $0x560] ss:$48 sps:$4 sm:$0xff]  }
 0x3b6   : > { %v5681_v5 = vpop.f32.mrf.mxu0  ;;  %6744 = vmatprep.mubr.bf16.mxu1 %v8574_v31 }
 0x3b7   : > { %v11151_v55 = vadd.f32 %v6096_v63, %v5680_v10  ;;  %v6098_v42 = vpop.f32.mrf.mxu1  ;;  %v12057_v10 = vld [vmem:[#allocation33_spill] sm:$0xff] }
 0x3b8   : > { %v5682_v59 = vpop.f32.mrf.mxu0  ;;  %v8580_v42 = vld [vmem:[%s11940_s1 + $0x56c] ss:$48 sps:$4 sm:$0xff]  }
 0x3b9   : > { %12054 = vst [vmem:[#allocation30_spill] sm:$0xff] %v11151_v55  ;;  %v5683_v32 = vadd.f32 %v5682_v59, %v12055_v22  ;;  %v6099_v56 = vpop.f32.mrf.mxu1 }
 0x3ba   : > { %v5684_v49 = vpop.f32.mrf.mxu0 }
 0x3bb   : > { %v11166_v31 = vadd.f32 %v6099_v56, %v5683_v32  ;;  %v6101_v35 = vpop.f32.mrf.mxu1  ;;  %v12059_v32 = vld [vmem:[#allocation34_spill] sm:$0xff] }
 0x3bc   : > { %v5687_v15 = vpop.f32.mrf.mxu0  ;;  %6328 = vmatmul.mubr.bf16.gmra.mxu0 %v8569_v53  ;;  %v8578_v53 = vld [vmem:[%s11940_s1 + $0x568] ss:$48 sps:$4 sm:$0xff]  }
 0x3bd   : > { %12056 = vst [vmem:[#allocation31_spill] sm:$0xff] %v11166_v31  ;;  %v5688_v63 = vadd.f32 %v5687_v15, %v12057_v10  ;;  %v6104_v5 = vpop.f32.mrf.mxu1  ;;  %6745 = vmatmul.mubr.bf16.gmra.mxu1 %v8572_v45  ;;  %6335 = vmatprep.mubr.bf16.mxu0 %v8577_v20  ;;  %v8583_v45 = vld [vmem:[%s11940_s1 + $0x5c4] ss:$48 sps:$4 sm:$0xff]   ;;  %v8581_v31 = vld [vmem:[%s11940_s1 + $0x5c0] ss:$48 sps:$4 sm:$0xff]  }
 0x3be   : > { %v5689_v59 = vpop.f32.mrf.mxu0  ;;  %6752 = vmatprep.mubr.bf16.mxu1 %v8580_v42 }
 0x3bf   : > { %v11169_v22 = vadd.f32 %v6104_v5, %v5688_v63  ;;  %v6106_v55 = vpop.f32.mrf.mxu1  ;;  %v12061_v63 = vld [vmem:[#allocation35_spill] sm:$0xff] }
 0x3c0   : > { %v5690_v49 = vpop.f32.mrf.mxu0  ;;  %v8586_v55 = vld [vmem:[%s11940_s1 + $0x5cc] ss:$48 sps:$4 sm:$0xff]  }
 0x3c1   : > { %12058 = vst [vmem:[#allocation32_spill] sm:$0xff] %v11169_v22  ;;  %v5691_v56 = vadd.f32 %v5690_v49, %v12059_v32  ;;  %v6107_v35 = vpop.f32.mrf.mxu1 }
 0x3c2   : > { %v5692_v20 = vpop.f32.mrf.mxu0 }
 0x3c3   : > { %v11184_v42 = vadd.f32 %v6107_v35, %v5691_v56  ;;  %v6109_v15 = vpop.f32.mrf.mxu1  ;;  %v12063_v56 = vld [vmem:[#allocation36_spill] sm:$0xff] }
 0x3c4   : > { %v5695_v10 = vpop.f32.mrf.mxu0  ;;  %6336 = vmatmul.mubr.bf16.gmra.mxu0 %v8575_v8  ;;  %v8584_v8 = vld [vmem:[%s11940_s1 + $0x5c8] ss:$48 sps:$4 sm:$0xff]  }
 0x3c5   : > { %12060 = vst [vmem:[#allocation33_spill] sm:$0xff] %v11184_v42  ;;  %v5696_v5 = vadd.f32 %v5695_v10, %v12061_v63  ;;  %v6112_v59 = vpop.f32.mrf.mxu1  ;;  %6753 = vmatmul.mubr.bf16.gmra.mxu1 %v8578_v53  ;;  %6343 = vmatprep.mubr.bf16.mxu0 %v8583_v45  ;;  %v8589_v53 = vld [vmem:[%s11940_s1 + $0x624] ss:$48 sps:$4 sm:$0xff]   ;;  %v8587_v42 = vld [vmem:[%s11940_s1 + $0x620] ss:$48 sps:$4 sm:$0xff]  }
 0x3c6   : > { %v5697_v49 = vpop.f32.mrf.mxu0  ;;  %6760 = vmatprep.mubr.bf16.mxu1 %v8586_v55 }
 0x3c7   : > { %v11187_v32 = vadd.f32 %v6112_v59, %v5696_v5  ;;  %v6114_v22 = vpop.f32.mrf.mxu1  ;;  %v12065_v5 = vld [vmem:[#allocation37_spill] sm:$0xff] }
 0x3c8   : > { %v5698_v20 = vpop.f32.mrf.mxu0  ;;  %v8592_v22 = vld [vmem:[%s11940_s1 + $0x62c] ss:$48 sps:$4 sm:$0xff]  }
 0x3c9   : > { %12062 = vst [vmem:[#allocation34_spill] sm:$0xff] %v11187_v32  ;;  %v5699_v35 = vadd.f32 %v5698_v20, %v12063_v56  ;;  %v6115_v15 = vpop.f32.mrf.mxu1 }
 0x3ca   : > { %v5700_v45 = vpop.f32.mrf.mxu0 }
 0x3cb   : > { %v11202_v55 = vadd.f32 %v6115_v15, %v5699_v35  ;;  %v6117_v10 = vpop.f32.mrf.mxu1  ;;  %v12067_v35 = vld [vmem:[#allocation38_spill] sm:$0xff] }
 0x3cc   : > { %v5703_v63 = vpop.f32.mrf.mxu0  ;;  %6344 = vmatmul.mubr.bf16.gmra.mxu0 %v8581_v31  ;;  %v8590_v31 = vld [vmem:[%s11940_s1 + $0x628] ss:$48 sps:$4 sm:$0xff]  }
 0x3cd   : > { %12064 = vst [vmem:[#allocation35_spill] sm:$0xff] %v11202_v55  ;;  %v5704_v59 = vadd.f32 %v5703_v63, %v12065_v5  ;;  %v6120_v49 = vpop.f32.mrf.mxu1  ;;  %6761 = vmatmul.mubr.bf16.gmra.mxu1 %v8584_v8  ;;  %6351 = vmatprep.mubr.bf16.mxu0 %v8589_v53  ;;  %v8595_v8 = vld [vmem:[%s11940_s1 + $0x684] ss:$48 sps:$4 sm:$0xff]   ;;  %v8593_v55 = vld [vmem:[%s11940_s1 + $0x680] ss:$48 sps:$4 sm:$0xff]  }
 0x3ce   : > { %v5705_v20 = vpop.f32.mrf.mxu0  ;;  %6768 = vmatprep.mubr.bf16.mxu1 %v8592_v22 }
 0x3cf   : > { %v11205_v56 = vadd.f32 %v6120_v49, %v5704_v59  ;;  %v6122_v32 = vpop.f32.mrf.mxu1  ;;  %v12069_v59 = vld [vmem:[#allocation39_spill] sm:$0xff] }
 0x3d0   : > { %v5706_v45 = vpop.f32.mrf.mxu0  ;;  %v8598_v32 = vld [vmem:[%s11940_s1 + $0x68c] ss:$48 sps:$4 sm:$0xff]  }
 0x3d1   : > { %12066 = vst [vmem:[#allocation36_spill] sm:$0xff] %v11205_v56  ;;  %v5707_v15 = vadd.f32 %v5706_v45, %v12067_v35  ;;  %v6123_v10 = vpop.f32.mrf.mxu1 }
 0x3d2   : > { %v5708_v53 = vpop.f32.mrf.mxu0 }
 0x3d3   : > { %v11220_v22 = vadd.f32 %v6123_v10, %v5707_v15  ;;  %v6125_v63 = vpop.f32.mrf.mxu1  ;;  %v12071_v15 = vld [vmem:[#allocation40_spill] sm:$0xff] }
 0x3d4   : > { %v5711_v5 = vpop.f32.mrf.mxu0  ;;  %6352 = vmatmul.mubr.bf16.gmra.mxu0 %v8587_v42  ;;  %v8596_v42 = vld [vmem:[%s11940_s1 + $0x688] ss:$48 sps:$4 sm:$0xff]  }
 0x3d5   : > { %12068 = vst [vmem:[#allocation37_spill] sm:$0xff] %v11220_v22  ;;  %v5712_v49 = vadd.f32 %v5711_v5, %v12069_v59  ;;  %v6128_v20 = vpop.f32.mrf.mxu1  ;;  %6769 = vmatmul.mubr.bf16.gmra.mxu1 %v8590_v31  ;;  %6359 = vmatprep.mubr.bf16.mxu0 %v8595_v8  ;;  %v8601_v31 = vld [vmem:[%s11940_s1 + $0x6e4] ss:$48 sps:$4 sm:$0xff]   ;;  %v8599_v22 = vld [vmem:[%s11940_s1 + $0x6e0] ss:$48 sps:$4 sm:$0xff]  }
 0x3d6   : > { %v5713_v45 = vpop.f32.mrf.mxu0  ;;  %6776 = vmatprep.mubr.bf16.mxu1 %v8598_v32 }
 0x3d7   : > { %v11223_v35 = vadd.f32 %v6128_v20, %v5712_v49  ;;  %v6130_v56 = vpop.f32.mrf.mxu1  ;;  %v12073_v49 = vld [vmem:[#allocation41_spill] sm:$0xff] }
 0x3d8   : > { %v5714_v53 = vpop.f32.mrf.mxu0  ;;  %v8604_v56 = vld [vmem:[%s11940_s1 + $0x6ec] ss:$48 sps:$4 sm:$0xff]  }
 0x3d9   : > { %12070 = vst [vmem:[#allocation38_spill] sm:$0xff] %v11223_v35  ;;  %v5715_v10 = vadd.f32 %v5714_v53, %v12071_v15  ;;  %v6131_v63 = vpop.f32.mrf.mxu1 }
 0x3da   : > { %v5716_v8 = vpop.f32.mrf.mxu0 }
 0x3db   : > { %v11238_v32 = vadd.f32 %v6131_v63, %v5715_v10  ;;  %v6133_v5 = vpop.f32.mrf.mxu1  ;;  %v12075_v10 = vld [vmem:[#allocation42_spill] sm:$0xff] }
 0x3dc   : > { %v5719_v59 = vpop.f32.mrf.mxu0  ;;  %6360 = vmatmul.mubr.bf16.gmra.mxu0 %v8593_v55  ;;  %v8602_v55 = vld [vmem:[%s11940_s1 + $0x6e8] ss:$48 sps:$4 sm:$0xff]  }
 0x3dd   : > { %12072 = vst [vmem:[#allocation39_spill] sm:$0xff] %v11238_v32  ;;  %v5720_v20 = vadd.f32 %v5719_v59, %v12073_v49  ;;  %v6136_v45 = vpop.f32.mrf.mxu1  ;;  %6777 = vmatmul.mubr.bf16.gmra.mxu1 %v8596_v42  ;;  %6367 = vmatprep.mubr.bf16.mxu0 %v8601_v31  ;;  %v8607_v42 = vld [vmem:[%s11940_s1 + $0x744] ss:$48 sps:$4 sm:$0xff]   ;;  %v8605_v32 = vld [vmem:[%s11940_s1 + $0x740] ss:$48 sps:$4 sm:$0xff]  }
 0x3de   : > { %v5721_v53 = vpop.f32.mrf.mxu0  ;;  %6784 = vmatprep.mubr.bf16.mxu1 %v8604_v56 }
 0x3df   : > { %v11241_v15 = vadd.f32 %v6136_v45, %v5720_v20  ;;  %v6138_v35 = vpop.f32.mrf.mxu1  ;;  %v12077_v20 = vld [vmem:[#allocation43_spill] sm:$0xff] }
 0x3e0   : > { %v5722_v8 = vpop.f32.mrf.mxu0  ;;  %v8610_v35 = vld [vmem:[%s11940_s1 + $0x74c] ss:$48 sps:$4 sm:$0xff]  }
 0x3e1   : > { %12074 = vst [vmem:[#allocation40_spill] sm:$0xff] %v11241_v15  ;;  %v5723_v63 = vadd.f32 %v5722_v8, %v12075_v10  ;;  %v6139_v5 = vpop.f32.mrf.mxu1 }
 0x3e2   : > { %v5724_v31 = vpop.f32.mrf.mxu0 }
 0x3e3   : > { %v11256_v56 = vadd.f32 %v6139_v5, %v5723_v63  ;;  %v6141_v59 = vpop.f32.mrf.mxu1  ;;  %v12079_v63 = vld [vmem:[#allocation44_spill] sm:$0xff] }
 0x3e4   : > { %v5727_v49 = vpop.f32.mrf.mxu0  ;;  %6368 = vmatmul.mubr.bf16.gmra.mxu0 %v8599_v22  ;;  %v8608_v22 = vld [vmem:[%s11940_s1 + $0x748] ss:$48 sps:$4 sm:$0xff]  }
 0x3e5   : > { %12076 = vst [vmem:[#allocation41_spill] sm:$0xff] %v11256_v56  ;;  %v5728_v45 = vadd.f32 %v5727_v49, %v12077_v20  ;;  %v6144_v53 = vpop.f32.mrf.mxu1  ;;  %6785 = vmatmul.mubr.bf16.gmra.mxu1 %v8602_v55  ;;  %6375 = vmatprep.mubr.bf16.mxu0 %v8607_v42  ;;  %v8613_v55 = vld [vmem:[%s11940_s1 + $0x7a4] ss:$48 sps:$4 sm:$0xff]   ;;  %v8611_v56 = vld [vmem:[%s11940_s1 + $0x7a0] ss:$48 sps:$4 sm:$0xff]  }
 0x3e6   : > { %v5729_v8 = vpop.f32.mrf.mxu0  ;;  %6792 = vmatprep.mubr.bf16.mxu1 %v8610_v35 }
 0x3e7   : > { %v11259_v10 = vadd.f32 %v6144_v53, %v5728_v45  ;;  %v6146_v15 = vpop.f32.mrf.mxu1  ;;  %v12081_v45 = vld [vmem:[#allocation45_spill] sm:$0xff] }
 0x3e8   : > { %v5730_v31 = vpop.f32.mrf.mxu0  ;;  %v8616_v15 = vld [vmem:[%s11940_s1 + $0x7ac] ss:$48 sps:$4 sm:$0xff]  }
 0x3e9   : > { %12078 = vst [vmem:[#allocation42_spill] sm:$0xff] %v11259_v10  ;;  %v5731_v5 = vadd.f32 %v5730_v31, %v12079_v63  ;;  %v6147_v59 = vpop.f32.mrf.mxu1 }
 0x3ea   : > { %v5732_v42 = vpop.f32.mrf.mxu0 }
 0x3eb   : > { %v11274_v35 = vadd.f32 %v6147_v59, %v5731_v5  ;;  %v6149_v49 = vpop.f32.mrf.mxu1  ;;  %v12083_v5 = vld [vmem:[#allocation46_spill] sm:$0xff] }
 0x3ec   : > { %v5735_v20 = vpop.f32.mrf.mxu0  ;;  %6376 = vmatmul.mubr.bf16.gmra.mxu0 %v8605_v32  ;;  %v8614_v32 = vld [vmem:[%s11940_s1 + $0x7a8] ss:$48 sps:$4 sm:$0xff]  }
 0x3ed   : > { %12080 = vst [vmem:[#allocation43_spill] sm:$0xff] %v11274_v35  ;;  %v5736_v53 = vadd.f32 %v5735_v20, %v12081_v45  ;;  %v6152_v8 = vpop.f32.mrf.mxu1  ;;  %6793 = vmatmul.mubr.bf16.gmra.mxu1 %v8608_v22  ;;  %6383 = vmatprep.mubr.bf16.mxu0 %v8613_v55  ;;  %v8619_v22 = vld [vmem:[%s11940_s1 + $0x804] ss:$48 sps:$4 sm:$0xff]   ;;  %v8617_v35 = vld [vmem:[%s11940_s1 + $0x800] ss:$48 sps:$4 sm:$0xff]  }
 0x3ee   : > { %v5737_v31 = vpop.f32.mrf.mxu0  ;;  %6800 = vmatprep.mubr.bf16.mxu1 %v8616_v15 }
 0x3ef   : > { %v11277_v63 = vadd.f32 %v6152_v8, %v5736_v53  ;;  %v6154_v10 = vpop.f32.mrf.mxu1  ;;  %v12085_v53 = vld [vmem:[#allocation47_spill] sm:$0xff] }
 0x3f0   : > { %v5738_v42 = vpop.f32.mrf.mxu0  ;;  %v8622_v10 = vld [vmem:[%s11940_s1 + $0x80c] ss:$48 sps:$4 sm:$0xff]  }
 0x3f1   : > { %12082 = vst [vmem:[#allocation44_spill] sm:$0xff] %v11277_v63  ;;  %v5739_v59 = vadd.f32 %v5738_v42, %v12083_v5  ;;  %v6155_v49 = vpop.f32.mrf.mxu1 }
 0x3f2   : > { %v5740_v55 = vpop.f32.mrf.mxu0 }
 0x3f3   : > { %v11292_v15 = vadd.f32 %v6155_v49, %v5739_v59  ;;  %v6157_v20 = vpop.f32.mrf.mxu1  ;;  %v12087_v59 = vld [vmem:[#allocation48_spill] sm:$0xff] }
 0x3f4   : > { %v5743_v45 = vpop.f32.mrf.mxu0  ;;  %6384 = vmatmul.mubr.bf16.gmra.mxu0 %v8611_v56  ;;  %v8620_v56 = vld [vmem:[%s11940_s1 + $0x808] ss:$48 sps:$4 sm:$0xff]  }
 0x3f5   : > { %12084 = vst [vmem:[#allocation45_spill] sm:$0xff] %v11292_v15  ;;  %v5744_v8 = vadd.f32 %v5743_v45, %v12085_v53  ;;  %v6160_v31 = vpop.f32.mrf.mxu1  ;;  %6801 = vmatmul.mubr.bf16.gmra.mxu1 %v8614_v32  ;;  %6391 = vmatprep.mubr.bf16.mxu0 %v8619_v22  ;;  %v8625_v32 = vld [vmem:[%s11940_s1 + $0x864] ss:$48 sps:$4 sm:$0xff]   ;;  %v8623_v15 = vld [vmem:[%s11940_s1 + $0x860] ss:$48 sps:$4 sm:$0xff]  }
 0x3f6   : > { %v5745_v42 = vpop.f32.mrf.mxu0  ;;  %6808 = vmatprep.mubr.bf16.mxu1 %v8622_v10 }
 0x3f7   : > { %v11295_v5 = vadd.f32 %v6160_v31, %v5744_v8  ;;  %v6162_v63 = vpop.f32.mrf.mxu1  ;;  %v12089_v8 = vld [vmem:[#allocation49_spill] sm:$0xff] }
 0x3f8   : > { %v5746_v55 = vpop.f32.mrf.mxu0  ;;  %v8628_v63 = vld [vmem:[%s11940_s1 + $0x86c] ss:$48 sps:$4 sm:$0xff]  }
 0x3f9   : > { %12086 = vst [vmem:[#allocation46_spill] sm:$0xff] %v11295_v5  ;;  %v5747_v49 = vadd.f32 %v5746_v55, %v12087_v59  ;;  %v6163_v20 = vpop.f32.mrf.mxu1 }
 0x3fa   : > { %v5748_v22 = vpop.f32.mrf.mxu0 }
 0x3fb   : > { %v11310_v10 = vadd.f32 %v6163_v20, %v5747_v49  ;;  %v6165_v45 = vpop.f32.mrf.mxu1  ;;  %v12091_v49 = vld [vmem:[#allocation50_spill] sm:$0xff] }
 0x3fc   : > { %v5751_v53 = vpop.f32.mrf.mxu0  ;;  %6392 = vmatmul.mubr.bf16.gmra.mxu0 %v8617_v35  ;;  %v8626_v35 = vld [vmem:[%s11940_s1 + $0x868] ss:$48 sps:$4 sm:$0xff]  }
 0x3fd   : > { %12088 = vst [vmem:[#allocation47_spill] sm:$0xff] %v11310_v10  ;;  %v5752_v31 = vadd.f32 %v5751_v53, %v12089_v8  ;;  %v6168_v42 = vpop.f32.mrf.mxu1  ;;  %6809 = vmatmul.mubr.bf16.gmra.mxu1 %v8620_v56  ;;  %6399 = vmatprep.mubr.bf16.mxu0 %v8625_v32  ;;  %v8631_v56 = vld [vmem:[%s11940_s1 + $0x8c4] ss:$48 sps:$4 sm:$0xff]   ;;  %v8629_v10 = vld [vmem:[%s11940_s1 + $0x8c0] ss:$48 sps:$4 sm:$0xff]  }
 0x3fe   : > { %v5753_v55 = vpop.f32.mrf.mxu0  ;;  %6816 = vmatprep.mubr.bf16.mxu1 %v8628_v63 }
 0x3ff   : > { %v11313_v59 = vadd.f32 %v6168_v42, %v5752_v31  ;;  %v6170_v5 = vpop.f32.mrf.mxu1  ;;  %v12092_v31 = vld [vmem:[#allocation51_spill] sm:$0xff] }
 0x400   : > { %v5754_v22 = vpop.f32.mrf.mxu0  ;;  %v8634_v5 = vld [vmem:[%s11940_s1 + $0x8cc] ss:$48 sps:$4 sm:$0xff]  }
 0x401   : > { %12090 = vst [vmem:[#allocation48_spill] sm:$0xff] %v11313_v59  ;;  %v5755_v20 = vadd.f32 %v5754_v22, %v12091_v49  ;;  %v6171_v45 = vpop.f32.mrf.mxu1 }
 0x402   : > { %v5756_v32 = vpop.f32.mrf.mxu0 }
 0x403   : > { %v11328_v63 = vadd.f32 %v6171_v45, %v5755_v20  ;;  %v6173_v53 = vpop.f32.mrf.mxu1 }
 0x404   : > { %v5759_v8 = vpop.f32.mrf.mxu0  ;;  %6400 = vmatmul.mubr.bf16.gmra.mxu0 %v8623_v15  ;;  %v8632_v15 = vld [vmem:[%s11940_s1 + $0x8c8] ss:$48 sps:$4 sm:$0xff]  }
 0x405   : > { %v5760_v42 = vadd.f32 %v5759_v8, %v12092_v31  ;;  %v6176_v55 = vpop.f32.mrf.mxu1  ;;  %6817 = vmatmul.mubr.bf16.gmra.mxu1 %v8626_v35  ;;  %6407 = vmatprep.mubr.bf16.mxu0 %v8631_v56  ;;  %v8637_v35 = vld [vmem:[%s11940_s1 + $0x924] ss:$48 sps:$4 sm:$0xff]  }
 0x406   : > { %v5761_v22 = vpop.f32.mrf.mxu0  ;;  %6824 = vmatprep.mubr.bf16.mxu1 %v8634_v5 }
 0x407   : > { %v11331_v49 = vadd.f32 %v6176_v55, %v5760_v42  ;;  %v6178_v59 = vpop.f32.mrf.mxu1 }
 0x408   : > { %v5762_v32 = vpop.f32.mrf.mxu0  ;;  %v8640_v59 = vld [vmem:[%s11940_s1 + $0x92c] ss:$48 sps:$4 sm:$0xff]  }
 0x409   : > { %v5763_v20 = vadd.f32 %v5762_v32, %v10468_v18  ;;  %v6179_v45 = vpop.f32.mrf.mxu1 }
 0x40a   : > { %v5764_v56 = vpop.f32.mrf.mxu0 }
 0x40b   : > { %v11346_v5 = vadd.f32 %v6179_v45, %v5763_v20  ;;  %v6181_v53 = vpop.f32.mrf.mxu1  ;;  %v8635_v20 = vld [vmem:[%s11940_s1 + $0x920] ss:$48 sps:$4 sm:$0xff]  }
 0x40c   : > { %v5767_v8 = vpop.f32.mrf.mxu0  ;;  %6408 = vmatmul.mubr.bf16.gmra.mxu0 %v8629_v10  ;;  %v8643_v10 = vld [vmem:[%s11940_s1 + $0x984] ss:$48 sps:$4 sm:$0xff]  }
 0x40d   : > { %v5768_v18 = vadd.f32 %v5767_v8, %v10473_v1  ;;  %v6184_v31 = vpop.f32.mrf.mxu1  ;;  %6825 = vmatmul.mubr.bf16.gmra.mxu1 %v8632_v15  ;;  %6415 = vmatprep.mubr.bf16.mxu0 %v8637_v35  ;;  %v8638_v1 = vld [vmem:[%s11940_s1 + $0x928] ss:$48 sps:$4 sm:$0xff]   ;;  %v8646_v35 = vld [vmem:[%s11940_s1 + $0x98c] ss:$48 sps:$4 sm:$0xff]  }
 0x40e   : > { %v5769_v42 = vpop.f32.mrf.mxu0  ;;  %6832 = vmatprep.mubr.bf16.mxu1 %v8640_v59 }
 0x40f   : > { %v11349_v55 = vadd.f32 %v6184_v31, %v5768_v18  ;;  %v6186_v22 = vpop.f32.mrf.mxu1 }
 0x410   : > { %v5770_v32 = vpop.f32.mrf.mxu0 }
 0x411   : > { %v5771_v45 = vadd.f32 %v5770_v32, %v10488_v48  ;;  %v6187_v56 = vpop.f32.mrf.mxu1 }
 0x412   : > { %v5772_v15 = vpop.f32.mrf.mxu0 }
 0x413   : > { %v11364_v59 = vadd.f32 %v6187_v56, %v5771_v45  ;;  %v6189_v53 = vpop.f32.mrf.mxu1 }
 0x414   : > { %v6225_v8 = vpop.f32.mrf.mxu0  ;;  %6416 = vmatmul.mubr.bf16.gmra.mxu0 %v8635_v20  ;;  %v8641_v20 = vld [vmem:[%s11940_s1 + $0x980] ss:$48 sps:$4 sm:$0xff]  }
 0x415   : > { %v6226_v48 = vadd.f32 %v6225_v8, %v10493_v25  ;;  %v6642_v18 = vpop.f32.mrf.mxu1  ;;  %6833 = vmatmul.mubr.bf16.gmra.mxu1 %v8638_v1  ;;  %6423 = vmatprep.mubr.bf16.mxu0 %v8643_v10  ;;  %v8644_v1 = vld [vmem:[%s11940_s1 + $0x988] ss:$48 sps:$4 sm:$0xff]   ;;  %v8649_v10 = vld [vmem:[%s11940_s1 + $0x9e4] ss:$48 sps:$4 sm:$0xff]  }
 0x416   : > { %v6227_v31 = vpop.f32.mrf.mxu0  ;;  %6840 = vmatprep.mubr.bf16.mxu1 %v8646_v35  ;;  %v8652_v35 = vld [vmem:[%s11940_s1 + $0x9ec] ss:$48 sps:$4 sm:$0xff]  }
 0x417   : > { %v6643_v42 = vadd.f32 %v6642_v18, %v6226_v48  ;;  %v6644_v22 = vpop.f32.mrf.mxu1 }
 0x418   : > { %v6228_v32 = vpop.f32.mrf.mxu0 }
 0x419   : > { %v7025_v25 = vmax.f32 %v6643_v42, 0.0  ;;  %v6229_v45 = vadd.f32 %v6228_v32, %v10508_v9  ;;  %v6645_v56 = vpop.f32.mrf.mxu1 }
 0x41a   : > { %v6230_v15 = vpop.f32.mrf.mxu0 }
 0x41b   : > { %7122 = vst.msk [vmem:[%s11371_s28] sm:$0xff] %vm7121_vm0, %v7025_v25  ;;  %v6646_v53 = vadd.f32 %v6645_v56, %v6229_v45  ;;  %v6647_v8 = vpop.f32.mrf.mxu1  ;;  %v8647_v25 = vld [vmem:[%s11940_s1 + $0x9e0] ss:$48 sps:$4 sm:$0xff]  }
 0x41c   : > { %v6233_v9 = vpop.f32.mrf.mxu0  ;;  %6424 = vmatmul.mubr.bf16.gmra.mxu0 %v8641_v20 }
 0x41d   : > { %v7026_v48 = vmax.f32 %v6646_v53, 0.0  ;;  %v6234_v18 = vadd.f32 %v6233_v9, %v10511_v23  ;;  %v6650_v31 = vpop.f32.mrf.mxu1  ;;  %6841 = vmatmul.mubr.bf16.gmra.mxu1 %v8644_v1  ;;  %6431 = vmatprep.mubr.bf16.mxu0 %v8649_v10  ;;  %v8650_v23 = vld [vmem:[%s11940_s1 + $0x9e8] ss:$48 sps:$4 sm:$0xff]   ;;  %v8655_v1 = vld [vmem:[%s11940_s1 + $0xa44] ss:$48 sps:$4 sm:$0xff]  }
 0x41e   : > { %v6235_v42 = vpop.f32.mrf.mxu0  ;;  %6848 = vmatprep.mubr.bf16.mxu1 %v8652_v35  ;;  %v8658_v35 = vld [vmem:[%s11940_s1 + $0xa4c] ss:$48 sps:$4 sm:$0xff]  }
 0x41f   : > { %7123 = vst.msk [vmem:[%s11371_s28 + $0x8] sm:$0xff] %vm7121_vm0, %v7026_v48  ;;  %v6651_v22 = vadd.f32 %v6650_v31, %v6234_v18  ;;  %v6652_v32 = vpop.f32.mrf.mxu1 }
 0x420   : > { %v6236_v15 = vpop.f32.mrf.mxu0 }
 0x421   : > { %v7027_v45 = vmax.f32 %v6651_v22, 0.0  ;;  %v6237_v20 = vadd.f32 %v6236_v15, %v10526_v34  ;;  %v6653_v56 = vpop.f32.mrf.mxu1  ;;  %v8653_v15 = vld [vmem:[%s11940_s1 + $0xa40] ss:$48 sps:$4 sm:$0xff]  }
 0x422   : > { %v6238_v10 = vpop.f32.mrf.mxu0 }
 0x423   : > { %7124 = vst.msk [vmem:[%s11371_s28 + $0x10] sm:$0xff] %vm7121_vm0, %v7027_v45  ;;  %v6654_v53 = vadd.f32 %v6653_v56, %v6237_v20  ;;  %v6655_v8 = vpop.f32.mrf.mxu1  ;;  %v8661_v56 = vld [vmem:[%s11940_s1 + $0xaa4] ss:$48 sps:$4 sm:$0xff]  }
 0x424   : > { %v6241_v34 = vpop.f32.mrf.mxu0  ;;  %6432 = vmatmul.mubr.bf16.gmra.mxu0 %v8647_v25 }
 0x425   : > { %v7028_v9 = vmax.f32 %v6654_v53, 0.0  ;;  %v6242_v48 = vadd.f32 %v6241_v34, %v10529_v50  ;;  %v6658_v18 = vpop.f32.mrf.mxu1  ;;  %6849 = vmatmul.mubr.bf16.gmra.mxu1 %v8650_v23  ;;  %6439 = vmatprep.mubr.bf16.mxu0 %v8655_v1  ;;  %v8656_v50 = vld [vmem:[%s11940_s1 + $0xa48] ss:$48 sps:$4 sm:$0xff]   ;;  %v8664_v1 = vld [vmem:[%s11940_s1 + $0xaac] ss:$48 sps:$4 sm:$0xff]  }
 0x426   : > { %v6243_v31 = vpop.f32.mrf.mxu0  ;;  %6856 = vmatprep.mubr.bf16.mxu1 %v8658_v35 }
 0x427   : > { %7125 = vst.msk [vmem:[%s11371_s28 + $0x18] sm:$0xff] %vm7121_vm0, %v7028_v9  ;;  %v6659_v42 = vadd.f32 %v6658_v18, %v6242_v48  ;;  %v6660_v22 = vpop.f32.mrf.mxu1 }
 0x428   : > { %v6244_v32 = vpop.f32.mrf.mxu0 }
 0x429   : > { %v7029_v45 = vmax.f32 %v6659_v42, 0.0  ;;  %v6245_v25 = vadd.f32 %v6244_v32, %v10548_v41  ;;  %v6661_v20 = vpop.f32.mrf.mxu1  ;;  %v8659_v42 = vld [vmem:[%s11940_s1 + $0xaa0] ss:$48 sps:$4 sm:$0xff]  }
 0x42a   : > { %v6246_v23 = vpop.f32.mrf.mxu0 }
 0x42b   : > { %7126 = vst.msk [vmem:[%s11371_s28 + $0x20] sm:$0xff] %vm7121_vm0, %v7029_v45  ;;  %v6662_v10 = vadd.f32 %v6661_v20, %v6245_v25  ;;  %v6663_v35 = vpop.f32.mrf.mxu1  ;;  %v8667_v45 = vld [vmem:[%s11940_s1 + $0xb04] ss:$48 sps:$4 sm:$0xff]   ;;  %v8670_v20 = vld [vmem:[%s11940_s1 + $0xb0c] ss:$48 sps:$4 sm:$0xff]  }
 0x42c   : > { %v6249_v41 = vpop.f32.mrf.mxu0  ;;  %6440 = vmatmul.mubr.bf16.gmra.mxu0 %v8653_v15 }
 0x42d   : > { %v7030_v53 = vmax.f32 %v6662_v10, 0.0  ;;  %v6250_v8 = vadd.f32 %v6249_v41, %v10553_v27  ;;  %v6666_v34 = vpop.f32.mrf.mxu1  ;;  %6857 = vmatmul.mubr.bf16.gmra.mxu1 %v8656_v50  ;;  %6447 = vmatprep.mubr.bf16.mxu0 %v8661_v56  ;;  %v8662_v27 = vld [vmem:[%s11940_s1 + $0xaa8] ss:$48 sps:$4 sm:$0xff]  }
 0x42e   : > { %v6251_v9 = vpop.f32.mrf.mxu0  ;;  %6864 = vmatprep.mubr.bf16.mxu1 %v8664_v1 }
 0x42f   : > { %7127 = vst.msk [vmem:[%s11371_s28 + $0x28] sm:$0xff] %vm7121_vm0, %v7030_v53  ;;  %v6667_v48 = vadd.f32 %v6666_v34, %v6250_v8  ;;  %v6668_v18 = vpop.f32.mrf.mxu1  ;;  %v8665_v34 = vld [vmem:[%s11940_s1 + $0xb00] ss:$48 sps:$4 sm:$0xff]  }
 0x430   : > { %v6252_v31 = vpop.f32.mrf.mxu0 }
 0x431   : > { %v7031_v22 = vmax.f32 %v6667_v48, 0.0  ;;  %v6253_v32 = vadd.f32 %v6252_v31, %v10568_v6  ;;  %v6669_v15 = vpop.f32.mrf.mxu1  ;;  %v8673_v31 = vld [vmem:[%s11940_s1 + $0xb64] ss:$48 sps:$4 sm:$0xff]  }
 0x432   : > { %v6254_v25 = vpop.f32.mrf.mxu0 }
 0x433   : > { %7128 = vst.msk [vmem:[%s11371_s28 + $0x30] sm:$0xff] %vm7121_vm0, %v7031_v22  ;;  %v6670_v50 = vadd.f32 %v6669_v15, %v6253_v32  ;;  %v6671_v56 = vpop.f32.mrf.mxu1  ;;  %v8676_v22 = vld [vmem:[%s11940_s1 + $0xb6c] ss:$48 sps:$4 sm:$0xff]  }
 0x434   : > { %v6257_v6 = vpop.f32.mrf.mxu0  ;;  %6448 = vmatmul.mubr.bf16.gmra.mxu0 %v8659_v42 }
 0x435   : > { %v7032_v23 = vmax.f32 %v6670_v50, 0.0  ;;  %v6258_v1 = vadd.f32 %v6257_v6, %v10571_v33  ;;  %v6674_v10 = vpop.f32.mrf.mxu1  ;;  %6865 = vmatmul.mubr.bf16.gmra.mxu1 %v8662_v27  ;;  %6455 = vmatprep.mubr.bf16.mxu0 %v8667_v45  ;;  %v8668_v33 = vld [vmem:[%s11940_s1 + $0xb08] ss:$48 sps:$4 sm:$0xff]  }
 0x436   : > { %v6259_v35 = vpop.f32.mrf.mxu0  ;;  %6872 = vmatprep.mubr.bf16.mxu1 %v8670_v20 }
 0x437   : > { %7129 = vst.msk [vmem:[%s11371_s28 + $0x38] sm:$0xff] %vm7121_vm0, %v7032_v23  ;;  %v6675_v41 = vadd.f32 %v6674_v10, %v6258_v1  ;;  %v6676_v53 = vpop.f32.mrf.mxu1  ;;  %v8671_v23 = vld [vmem:[%s11940_s1 + $0xb60] ss:$48 sps:$4 sm:$0xff]  }
 0x438   : > { %v6260_v8 = vpop.f32.mrf.mxu0 }
 0x439   : > { %v7033_v9 = vmax.f32 %v6675_v41, 0.0  ;;  %v6261_v48 = vadd.f32 %v6260_v8, %v10586_v46  ;;  %v6677_v18 = vpop.f32.mrf.mxu1  ;;  %v8679_v41 = vld [vmem:[%s11940_s1 + $0xbc4] ss:$48 sps:$4 sm:$0xff]   ;;  %v8682_v8 = vld [vmem:[%s11940_s1 + $0xbcc] ss:$48 sps:$4 sm:$0xff]  }
 0x43a   : > { %v6262_v42 = vpop.f32.mrf.mxu0 }
 0x43b   : > { %7130 = vst.msk [vmem:[%s11371_s28 + $0x40] sm:$0xff] %vm7121_vm0, %v7033_v9  ;;  %v6678_v32 = vadd.f32 %v6677_v18, %v6261_v48  ;;  %v6679_v15 = vpop.f32.mrf.mxu1 }
 0x43c   : > { %v6265_v46 = vpop.f32.mrf.mxu0  ;;  %6456 = vmatmul.mubr.bf16.gmra.mxu0 %v8665_v34  ;;  %v8677_v15 = vld [vmem:[%s11940_s1 + $0xbc0] ss:$48 sps:$4 sm:$0xff]  }
 0x43d   : > { %v7034_v27 = vmax.f32 %v6678_v32, 0.0  ;;  %v6266_v45 = vadd.f32 %v6265_v46, %v10589_v21  ;;  %v6682_v25 = vpop.f32.mrf.mxu1  ;;  %6873 = vmatmul.mubr.bf16.gmra.mxu1 %v8668_v33  ;;  %6463 = vmatprep.mubr.bf16.mxu0 %v8673_v31  ;;  %v8674_v21 = vld [vmem:[%s11940_s1 + $0xb68] ss:$48 sps:$4 sm:$0xff]  }
 0x43e   : > { %v6267_v20 = vpop.f32.mrf.mxu0  ;;  %6880 = vmatprep.mubr.bf16.mxu1 %v8676_v22 }
 0x43f   : > { %7131 = vst.msk [vmem:[%s11371_s28 + $0x48] sm:$0xff] %vm7121_vm0, %v7034_v27  ;;  %v6683_v50 = vadd.f32 %v6682_v25, %v6266_v45  ;;  %v6684_v56 = vpop.f32.mrf.mxu1  ;;  %v8685_v25 = vld [vmem:[%s11940_s1 + $0xc24] ss:$48 sps:$4 sm:$0xff]  }
 0x440   : > { %v6268_v6 = vpop.f32.mrf.mxu0 }
 0x441   : > { %v7035_v1 = vmax.f32 %v6683_v50, 0.0  ;;  %v6269_v10 = vadd.f32 %v6268_v6, %v10608_v7  ;;  %v6685_v35 = vpop.f32.mrf.mxu1  ;;  %v8688_v50 = vld [vmem:[%s11940_s1 + $0xc2c] ss:$48 sps:$4 sm:$0xff]  }
 0x442   : > { %v6270_v53 = vpop.f32.mrf.mxu0 }
 0x443   : > { %7132 = vst.msk [vmem:[%s11371_s28 + $0x50] sm:$0xff] %vm7121_vm0, %v7035_v1  ;;  %v6686_v34 = vadd.f32 %v6685_v35, %v6269_v10  ;;  %v6687_v9 = vpop.f32.mrf.mxu1 }
 0x444   : > { %v6273_v7 = vpop.f32.mrf.mxu0  ;;  %6464 = vmatmul.mubr.bf16.gmra.mxu0 %v8671_v23 }
 0x445   : > { %v7036_v48 = vmax.f32 %v6686_v34, 0.0  ;;  %v6274_v18 = vadd.f32 %v6273_v7, %v10611_v17  ;;  %v6690_v33 = vpop.f32.mrf.mxu1  ;;  %6881 = vmatmul.mubr.bf16.gmra.mxu1 %v8674_v21  ;;  %6471 = vmatprep.mubr.bf16.mxu0 %v8679_v41  ;;  %v8680_v17 = vld [vmem:[%s11940_s1 + $0xbc8] ss:$48 sps:$4 sm:$0xff]  }
 0x446   : > { %v6275_v31 = vpop.f32.mrf.mxu0  ;;  %6888 = vmatprep.mubr.bf16.mxu1 %v8682_v8  ;;  %v8683_v8 = vld [vmem:[%s11940_s1 + $0xc20] ss:$48 sps:$4 sm:$0xff]  }
 0x447   : > { %7133 = vst.msk [vmem:[%s11371_s28 + $0x58] sm:$0xff] %vm7121_vm0, %v7036_v48  ;;  %v6691_v42 = vadd.f32 %v6690_v33, %v6274_v18  ;;  %v6692_v22 = vpop.f32.mrf.mxu1  ;;  %v8691_v48 = vld [vmem:[%s11940_s1 + $0xc84] ss:$48 sps:$4 sm:$0xff]   ;;  %v8694_v33 = vld [vmem:[%s11940_s1 + $0xc8c] ss:$48 sps:$4 sm:$0xff]  }
 0x448   : > { %v6276_v32 = vpop.f32.mrf.mxu0 }
 0x449   : > { %v7037_v46 = vmax.f32 %v6691_v42, 0.0  ;;  %v6277_v27 = vadd.f32 %v6276_v32, %v10626_v51  ;;  %v6693_v45 = vpop.f32.mrf.mxu1 }
 0x44a   : > { %v6278_v20 = vpop.f32.mrf.mxu0 }
 0x44b   : > { %7134 = vst.msk [vmem:[%s11371_s28 + $0x60] sm:$0xff] %vm7121_vm0, %v7037_v46  ;;  %v6694_v56 = vadd.f32 %v6693_v45, %v6277_v27  ;;  %v6695_v6 = vpop.f32.mrf.mxu1 }
 0x44c   : > { %v6281_v51 = vpop.f32.mrf.mxu0  ;;  %6472 = vmatmul.mubr.bf16.gmra.mxu0 %v8677_v15  ;;  %v8697_v6 = vld [vmem:[%s11940_s1 + $0xce4] ss:$48 sps:$4 sm:$0xff]  }
 0x44d   : > { %v7038_v23 = vmax.f32 %v6694_v56, 0.0  ;;  %v6282_v1 = vadd.f32 %v6281_v51, %v10629_v43  ;;  %v6698_v10 = vpop.f32.mrf.mxu1  ;;  %6889 = vmatmul.mubr.bf16.gmra.mxu1 %v8680_v17  ;;  %6479 = vmatprep.mubr.bf16.mxu0 %v8685_v25  ;;  %v8686_v43 = vld [vmem:[%s11940_s1 + $0xc28] ss:$48 sps:$4 sm:$0xff]   ;;  %v8689_v25 = vld [vmem:[%s11940_s1 + $0xc80] ss:$48 sps:$4 sm:$0xff]  }
 0x44e   : > { %v6283_v35 = vpop.f32.mrf.mxu0  ;;  %6896 = vmatprep.mubr.bf16.mxu1 %v8688_v50 }
 0x44f   : > { %7135 = vst.msk [vmem:[%s11371_s28 + $0x68] sm:$0xff] %vm7121_vm0, %v7038_v23  ;;  %v6699_v21 = vadd.f32 %v6698_v10, %v6282_v1  ;;  %v6700_v41 = vpop.f32.mrf.mxu1  ;;  %v8700_v23 = vld [vmem:[%s11940_s1 + $0xcec] ss:$48 sps:$4 sm:$0xff]  }
 0x450   : > { %v6284_v53 = vpop.f32.mrf.mxu0 }
 0x451   : > { %v7039_v34 = vmax.f32 %v6699_v21, 0.0  ;;  %v6285_v9 = vadd.f32 %v6284_v53, %v10644_v58  ;;  %v6701_v7 = vpop.f32.mrf.mxu1 }
 0x452   : > { %v6286_v18 = vpop.f32.mrf.mxu0 }
 0x453   : > { %7136 = vst.msk [vmem:[%s11371_s28 + $0x70] sm:$0xff] %vm7121_vm0, %v7039_v34  ;;  %v6702_v31 = vadd.f32 %v6701_v7, %v6285_v9  ;;  %v6703_v42 = vpop.f32.mrf.mxu1  ;;  %v8695_v7 = vld [vmem:[%s11940_s1 + $0xce0] ss:$48 sps:$4 sm:$0xff]  }
 0x454   : > { %v6289_v58 = vpop.f32.mrf.mxu0  ;;  %6480 = vmatmul.mubr.bf16.gmra.mxu0 %v8683_v8  ;;  %v8706_v42 = vld [vmem:[%s11940_s1 + $0xd4c] ss:$48 sps:$4 sm:$0xff]  }
 0x455   : > { %v7040_v22 = vmax.f32 %v6702_v31, 0.0  ;;  %v6290_v32 = vadd.f32 %v6289_v58, %v10647_v14  ;;  %v6706_v15 = vpop.f32.mrf.mxu1  ;;  %6897 = vmatmul.mubr.bf16.gmra.mxu1 %v8686_v43  ;;  %6487 = vmatprep.mubr.bf16.mxu0 %v8691_v48  ;;  %v8692_v14 = vld [vmem:[%s11940_s1 + $0xc88] ss:$48 sps:$4 sm:$0xff]  }
 0x456   : > { %v6291_v46 = vpop.f32.mrf.mxu0  ;;  %6904 = vmatprep.mubr.bf16.mxu1 %v8694_v33  ;;  %v8703_v33 = vld [vmem:[%s11940_s1 + $0xd44] ss:$48 sps:$4 sm:$0xff]  }
 0x457   : > { %7137 = vst.msk [vmem:[%s11371_s28 + $0x78] sm:$0xff] %vm7121_vm0, %v7040_v22  ;;  %v6707_v27 = vadd.f32 %v6706_v15, %v6290_v32  ;;  %v6708_v45 = vpop.f32.mrf.mxu1 }
 0x458   : > { %v6292_v17 = vpop.f32.mrf.mxu0 }
 0x459   : > { %v7041_v20 = vmax.f32 %v6707_v27, 0.0  ;;  %v6293_v50 = vadd.f32 %v6292_v17, %v10662_v16  ;;  %v6709_v56 = vpop.f32.mrf.mxu1 }
 0x45a   : > { %v6294_v51 = vpop.f32.mrf.mxu0 }
 0x45b   : > { %7138 = vst.msk [vmem:[%s11371_s28 + $0x80] sm:$0xff] %vm7121_vm0, %v7041_v20  ;;  %v6710_v1 = vadd.f32 %v6709_v56, %v6293_v50  ;;  %v6711_v10 = vpop.f32.mrf.mxu1  ;;  %v8701_v20 = vld [vmem:[%s11940_s1 + $0xd40] ss:$48 sps:$4 sm:$0xff]  }
 0x45c   : > { %v6297_v16 = vpop.f32.mrf.mxu0  ;;  %6488 = vmatmul.mubr.bf16.gmra.mxu0 %v8689_v25 }
 0x45d   : > { %v7042_v35 = vmax.f32 %v6710_v1, 0.0  ;;  %v6298_v21 = vadd.f32 %v6297_v16, %v10665_v24  ;;  %v6714_v41 = vpop.f32.mrf.mxu1  ;;  %6905 = vmatmul.mubr.bf16.gmra.mxu1 %v8692_v14  ;;  %6495 = vmatprep.mubr.bf16.mxu0 %v8697_v6  ;;  %v8698_v24 = vld [vmem:[%s11940_s1 + $0xce8] ss:$48 sps:$4 sm:$0xff]   ;;  %v8709_v6 = vld [vmem:[%s11940_s1 + $0xda4] ss:$48 sps:$4 sm:$0xff]  }
 0x45e   : > { %v6299_v53 = vpop.f32.mrf.mxu0  ;;  %6912 = vmatprep.mubr.bf16.mxu1 %v8700_v23  ;;  %v8712_v23 = vld [vmem:[%s11940_s1 + $0xdac] ss:$48 sps:$4 sm:$0xff]  }
 0x45f   : > { %7139 = vst.msk [vmem:[%s11371_s28 + $0x88] sm:$0xff] %vm7121_vm0, %v7042_v35  ;;  %v6715_v8 = vadd.f32 %v6714_v41, %v6298_v21  ;;  %v6716_v34 = vpop.f32.mrf.mxu1 }
 0x460   : > { %v6300_v9 = vpop.f32.mrf.mxu0 }
 0x461   : > { %v7043_v43 = vmax.f32 %v6715_v8, 0.0  ;;  %v6301_v48 = vadd.f32 %v6300_v9, %v10680_v40  ;;  %v6717_v18 = vpop.f32.mrf.mxu1  ;;  %v8707_v9 = vld [vmem:[%s11940_s1 + $0xda0] ss:$48 sps:$4 sm:$0xff]  }
 0x462   : > { %v6302_v31 = vpop.f32.mrf.mxu0 }
 0x463   : > { %7140 = vst.msk [vmem:[%s11371_s28 + $0x90] sm:$0xff] %vm7121_vm0, %v7043_v43  ;;  %v6718_v58 = vadd.f32 %v6717_v18, %v6301_v48  ;;  %v6719_v22 = vpop.f32.mrf.mxu1  ;;  %v8715_v18 = vld [vmem:[%s11940_s1 + $0xe04] ss:$48 sps:$4 sm:$0xff]  }
 0x464   : > { %v6305_v40 = vpop.f32.mrf.mxu0  ;;  %6496 = vmatmul.mubr.bf16.gmra.mxu0 %v8695_v7 }
 0x465   : > { %v7044_v32 = vmax.f32 %v6718_v58, 0.0  ;;  %v6306_v15 = vadd.f32 %v6305_v40, %v10683_v36  ;;  %v6722_v46 = vpop.f32.mrf.mxu1  ;;  %6913 = vmatmul.mubr.bf16.gmra.mxu1 %v8698_v24  ;;  %6503 = vmatprep.mubr.bf16.mxu0 %v8703_v33  ;;  %v8704_v36 = vld [vmem:[%s11940_s1 + $0xd48] ss:$48 sps:$4 sm:$0xff]   ;;  %v8718_v33 = vld [vmem:[%s11940_s1 + $0xe0c] ss:$48 sps:$4 sm:$0xff]  }
 0x466   : > { %v6307_v27 = vpop.f32.mrf.mxu0  ;;  %6920 = vmatprep.mubr.bf16.mxu1 %v8706_v42 }
 0x467   : > { %7141 = vst.msk [vmem:[%s11371_s28 + $0x98] sm:$0xff] %vm7121_vm0, %v7044_v32  ;;  %v6723_v45 = vadd.f32 %v6722_v46, %v6306_v15  ;;  %v6724_v17 = vpop.f32.mrf.mxu1 }
 0x468   : > { %v6308_v25 = vpop.f32.mrf.mxu0 }
 0x469   : > { %v7045_v50 = vmax.f32 %v6723_v45, 0.0  ;;  %v6309_v56 = vadd.f32 %v6308_v25, %v10698_v3  ;;  %v6725_v14 = vpop.f32.mrf.mxu1  ;;  %v8713_v45 = vld [vmem:[%s11940_s1 + $0xe00] ss:$48 sps:$4 sm:$0xff]  }
 0x46a   : > { %v6310_v51 = vpop.f32.mrf.mxu0 }
 0x46b   : > { %7142 = vst.msk [vmem:[%s11371_s28 + $0xa0] sm:$0xff] %vm7121_vm0, %v7045_v50  ;;  %v6726_v1 = vadd.f32 %v6725_v14, %v6309_v56  ;;  %v6727_v10 = vpop.f32.mrf.mxu1  ;;  %v8721_v50 = vld [vmem:[%s11940_s1 + $0xe64] ss:$48 sps:$4 sm:$0xff]   ;;  %v8724_v14 = vld [vmem:[%s11940_s1 + $0xe6c] ss:$48 sps:$4 sm:$0xff]  }
 0x46c   : > { %v6313_v3 = vpop.f32.mrf.mxu0  ;;  %6504 = vmatmul.mubr.bf16.gmra.mxu0 %v8701_v20 }
 0x46d   : > { %v7046_v16 = vmax.f32 %v6726_v1, 0.0  ;;  %v6314_v35 = vadd.f32 %v6313_v3, %v10701_v37  ;;  %v6730_v21 = vpop.f32.mrf.mxu1  ;;  %6921 = vmatmul.mubr.bf16.gmra.mxu1 %v8704_v36  ;;  %6511 = vmatprep.mubr.bf16.mxu0 %v8709_v6  ;;  %v8710_v37 = vld [vmem:[%s11940_s1 + $0xda8] ss:$48 sps:$4 sm:$0xff]  }
 0x46e   : > { %v6315_v41 = vpop.f32.mrf.mxu0  ;;  %6928 = vmatprep.mubr.bf16.mxu1 %v8712_v23 }
 0x46f   : > { %7143 = vst.msk [vmem:[%s11371_s28 + $0xa8] sm:$0xff] %vm7121_vm0, %v7046_v16  ;;  %v6731_v53 = vadd.f32 %v6730_v21, %v6314_v35  ;;  %v6732_v8 = vpop.f32.mrf.mxu1  ;;  %v8719_v21 = vld [vmem:[%s11940_s1 + $0xe60] ss:$48 sps:$4 sm:$0xff]  }
 0x470   : > { %v6316_v34 = vpop.f32.mrf.mxu0 }
 0x471   : > { %v7047_v7 = vmax.f32 %v6731_v53, 0.0  ;;  %v6317_v43 = vadd.f32 %v6316_v34, %v10716_v30  ;;  %v6733_v48 = vpop.f32.mrf.mxu1  ;;  %v8727_v34 = vld [vmem:[%s11940_s1 + $0xec4] ss:$48 sps:$4 sm:$0xff]  }
 0x472   : > { %v6318_v24 = vpop.f32.mrf.mxu0 }
 0x473   : > { %7144 = vst.msk [vmem:[%s11371_s28 + $0xb0] sm:$0xff] %vm7121_vm0, %v7047_v7  ;;  %v6734_v31 = vadd.f32 %v6733_v48, %v6317_v43  ;;  %v6735_v42 = vpop.f32.mrf.mxu1  ;;  %v8730_v7 = vld [vmem:[%s11940_s1 + $0xecc] ss:$48 sps:$4 sm:$0xff]  }
 0x474   : > { %v6321_v30 = vpop.f32.mrf.mxu0  ;;  %6512 = vmatmul.mubr.bf16.gmra.mxu0 %v8707_v9 }
 0x475   : > { %v7048_v58 = vmax.f32 %v6734_v31, 0.0  ;;  %v6322_v22 = vadd.f32 %v6321_v30, %v10719_v39  ;;  %v6738_v40 = vpop.f32.mrf.mxu1  ;;  %6929 = vmatmul.mubr.bf16.gmra.mxu1 %v8710_v37  ;;  %6519 = vmatprep.mubr.bf16.mxu0 %v8715_v18  ;;  %v8716_v39 = vld [vmem:[%s11940_s1 + $0xe08] ss:$48 sps:$4 sm:$0xff]  }
 0x476   : > { %v6323_v32 = vpop.f32.mrf.mxu0  ;;  %6936 = vmatprep.mubr.bf16.mxu1 %v8718_v33 }
 0x477   : > { %7145 = vst.msk [vmem:[%s11371_s28 + $0xb8] sm:$0xff] %vm7121_vm0, %v7048_v58  ;;  %v6739_v15 = vadd.f32 %v6738_v40, %v6322_v22  ;;  %v6740_v46 = vpop.f32.mrf.mxu1  ;;  %v8725_v58 = vld [vmem:[%s11940_s1 + $0xec0] ss:$48 sps:$4 sm:$0xff]  }
 0x478   : > { %v6324_v27 = vpop.f32.mrf.mxu0 }
 0x479   : > { %v7049_v17 = vmax.f32 %v6739_v15, 0.0  ;;  %v6325_v25 = vadd.f32 %v6324_v27, %v10734_v61  ;;  %v6741_v20 = vpop.f32.mrf.mxu1  ;;  %v8733_v15 = vld [vmem:[%s11940_s1 + $0xf24] ss:$48 sps:$4 sm:$0xff]   ;;  %v8736_v27 = vld [vmem:[%s11940_s1 + $0xf2c] ss:$48 sps:$4 sm:$0xff]  }
 0x47a   : > { %v6326_v56 = vpop.f32.mrf.mxu0 }
 0x47b   : > { %7146 = vst.msk [vmem:[%s11371_s28 + $0xc0] sm:$0xff] %vm7121_vm0, %v7049_v17  ;;  %v6742_v36 = vadd.f32 %v6741_v20, %v6325_v25  ;;  %v6743_v6 = vpop.f32.mrf.mxu1 }
 0x47c   : > { %v6329_v61 = vpop.f32.mrf.mxu0  ;;  %6520 = vmatmul.mubr.bf16.gmra.mxu0 %v8713_v45  ;;  %v8731_v6 = vld [vmem:[%s11940_s1 + $0xf20] ss:$48 sps:$4 sm:$0xff]  }
 0x47d   : > { %v7050_v51 = vmax.f32 %v6742_v36, 0.0  ;;  %v6330_v23 = vadd.f32 %v6329_v61, %v10737_v4  ;;  %v6746_v1 = vpop.f32.mrf.mxu1  ;;  %6937 = vmatmul.mubr.bf16.gmra.mxu1 %v8716_v39  ;;  %6527 = vmatprep.mubr.bf16.mxu0 %v8721_v50  ;;  %v8722_v4 = vld [vmem:[%s11940_s1 + $0xe68] ss:$48 sps:$4 sm:$0xff]  }
 0x47e   : > { %v6331_v10 = vpop.f32.mrf.mxu0  ;;  %6944 = vmatprep.mubr.bf16.mxu1 %v8724_v14 }
 0x47f   : > { %7147 = vst.msk [vmem:[%s11371_s28 + $0xc8] sm:$0xff] %vm7121_vm0, %v7050_v51  ;;  %v6747_v3 = vadd.f32 %v6746_v1, %v6330_v23  ;;  %v6748_v16 = vpop.f32.mrf.mxu1  ;;  %v8739_v1 = vld [vmem:[%s11940_s1 + $0xf84] ss:$48 sps:$4 sm:$0xff]  }
 0x480   : > { %v6332_v35 = vpop.f32.mrf.mxu0 }
 0x481   : > { %v7051_v41 = vmax.f32 %v6747_v3, 0.0  ;;  %v6333_v53 = vadd.f32 %v6332_v35, %v10752_v26  ;;  %v6749_v8 = vpop.f32.mrf.mxu1  ;;  %v8742_v3 = vld [vmem:[%s11940_s1 + $0xf8c] ss:$48 sps:$4 sm:$0xff]  }
 0x482   : > { %v6334_v9 = vpop.f32.mrf.mxu0 }
 0x483   : > { %7148 = vst.msk [vmem:[%s11371_s28 + $0xd0] sm:$0xff] %vm7121_vm0, %v7051_v41  ;;  %v6750_v43 = vadd.f32 %v6749_v8, %v6333_v53  ;;  %v6751_v48 = vpop.f32.mrf.mxu1 }
 0x484   : > { %v6337_v26 = vpop.f32.mrf.mxu0  ;;  %6528 = vmatmul.mubr.bf16.gmra.mxu0 %v8719_v21 }
 0x485   : > { %v7052_v37 = vmax.f32 %v6750_v43, 0.0  ;;  %v6338_v18 = vadd.f32 %v6337_v26, %v10755_v28  ;;  %v6754_v24 = vpop.f32.mrf.mxu1  ;;  %6945 = vmatmul.mubr.bf16.gmra.mxu1 %v8722_v4  ;;  %6535 = vmatprep.mubr.bf16.mxu0 %v8727_v34  ;;  %v8728_v28 = vld [vmem:[%s11940_s1 + $0xec8] ss:$48 sps:$4 sm:$0xff]  }
 0x486   : > { %v6339_v33 = vpop.f32.mrf.mxu0  ;;  %6952 = vmatprep.mubr.bf16.mxu1 %v8730_v7  ;;  %v8737_v7 = vld [vmem:[%s11940_s1 + $0xf80] ss:$48 sps:$4 sm:$0xff]  }
 0x487   : > { %7149 = vst.msk [vmem:[%s11371_s28 + $0xd8] sm:$0xff] %vm7121_vm0, %v7052_v37  ;;  %v6755_v31 = vadd.f32 %v6754_v24, %v6338_v18  ;;  %v6756_v42 = vpop.f32.mrf.mxu1  ;;  %v8745_v37 = vld [vmem:[%s11940_s1 + $0xfe4] ss:$48 sps:$4 sm:$0xff]   ;;  %v8748_v24 = vld [vmem:[%s11940_s1 + $0xfec] ss:$48 sps:$4 sm:$0xff]  }
 0x488   : > { %v6340_v30 = vpop.f32.mrf.mxu0 }
 0x489   : > { %v7053_v22 = vmax.f32 %v6755_v31, 0.0  ;;  %v6341_v40 = vadd.f32 %v6340_v30, %v10770_v60  ;;  %v6757_v32 = vpop.f32.mrf.mxu1 }
 0x48a   : > { %v6342_v46 = vpop.f32.mrf.mxu0 }
 0x48b   : > { %7150 = vst.msk [vmem:[%s11371_s28 + $0xe0] sm:$0xff] %vm7121_vm0, %v7053_v22  ;;  %v6758_v45 = vadd.f32 %v6757_v32, %v6341_v40  ;;  %v6759_v17 = vpop.f32.mrf.mxu1 }
 0x48c   : > { %v6345_v60 = vpop.f32.mrf.mxu0  ;;  %6536 = vmatmul.mubr.bf16.gmra.mxu0 %v8725_v58  ;;  %v8751_v17 = vld [vmem:[%s11940_s1 + $0x1044] ss:$48 sps:$4 sm:$0xff]  }
 0x48d   : > { %v7054_v25 = vmax.f32 %v6758_v45, 0.0  ;;  %v6346_v20 = vadd.f32 %v6345_v60, %v10773_v54  ;;  %v6762_v39 = vpop.f32.mrf.mxu1  ;;  %6953 = vmatmul.mubr.bf16.gmra.mxu1 %v8728_v28  ;;  %6543 = vmatprep.mubr.bf16.mxu0 %v8733_v15  ;;  %v8734_v54 = vld [vmem:[%s11940_s1 + $0xf28] ss:$48 sps:$4 sm:$0xff]   ;;  %v8743_v15 = vld [vmem:[%s11940_s1 + $0xfe0] ss:$48 sps:$4 sm:$0xff]  }
 0x48e   : > { %v6347_v50 = vpop.f32.mrf.mxu0  ;;  %6960 = vmatprep.mubr.bf16.mxu1 %v8736_v27 }
 0x48f   : > { %7151 = vst.msk [vmem:[%s11371_s28 + $0xe8] sm:$0xff] %vm7121_vm0, %v7054_v25  ;;  %v6763_v56 = vadd.f32 %v6762_v39, %v6346_v20  ;;  %v6764_v14 = vpop.f32.mrf.mxu1  ;;  %v8754_v25 = vld [vmem:[%s11940_s1 + $0x104c] ss:$48 sps:$4 sm:$0xff]  }
 0x490   : > { %v6348_v36 = vpop.f32.mrf.mxu0 }
 0x491   : > { %v7055_v61 = vmax.f32 %v6763_v56, 0.0  ;;  %v6349_v51 = vadd.f32 %v6348_v36, %v10788_v29  ;;  %v6765_v23 = vpop.f32.mrf.mxu1 }
 0x492   : > { %v6350_v10 = vpop.f32.mrf.mxu0 }
 0x493   : > { %7152 = vst.msk [vmem:[%s11371_s28 + $0xf0] sm:$0xff] %vm7121_vm0, %v7055_v61  ;;  %v6766_v16 = vadd.f32 %v6765_v23, %v6349_v51  ;;  %v6767_v35 = vpop.f32.mrf.mxu1  ;;  %v8749_v23 = vld [vmem:[%s11940_s1 + $0x1040] ss:$48 sps:$4 sm:$0xff]  }
 0x494   : > { %v6353_v29 = vpop.f32.mrf.mxu0  ;;  %6544 = vmatmul.mubr.bf16.gmra.mxu0 %v8731_v6  ;;  %v8760_v35 = vld [vmem:[%s11940_s1 + $0x10ac] ss:$48 sps:$4 sm:$0xff]  }
 0x495   : > { %v7056_v21 = vmax.f32 %v6766_v16, 0.0  ;;  %v6354_v41 = vadd.f32 %v6353_v29, %v10791_v19  ;;  %v6770_v53 = vpop.f32.mrf.mxu1  ;;  %6961 = vmatmul.mubr.bf16.gmra.mxu1 %v8734_v54  ;;  %6551 = vmatprep.mubr.bf16.mxu0 %v8739_v1  ;;  %v8740_v19 = vld [vmem:[%s11940_s1 + $0xf88] ss:$48 sps:$4 sm:$0xff]  }
 0x496   : > { %v6355_v8 = vpop.f32.mrf.mxu0  ;;  %6968 = vmatprep.mubr.bf16.mxu1 %v8742_v3  ;;  %v8757_v3 = vld [vmem:[%s11940_s1 + $0x10a4] ss:$48 sps:$4 sm:$0xff]  }
 0x497   : > { %7153 = vst.msk [vmem:[%s11371_s28 + $0xf8] sm:$0xff] %vm7121_vm0, %v7056_v21  ;;  %v6771_v4 = vadd.f32 %v6770_v53, %v6354_v41  ;;  %v6772_v34 = vpop.f32.mrf.mxu1 }
 0x498   : > { %v6356_v9 = vpop.f32.mrf.mxu0 }
 0x499   : > { %v7057_v43 = vmax.f32 %v6771_v4, 0.0  ;;  %v6357_v48 = vadd.f32 %v6356_v9, %v10806_v2  ;;  %v6773_v26 = vpop.f32.mrf.mxu1 }
 0x49a   : > { %v6358_v18 = vpop.f32.mrf.mxu0 }
 0x49b   : > { %7154 = vst.msk [vmem:[%s11371_s28 + $0x100] sm:$0xff] %vm7121_vm0, %v7057_v43  ;;  %v6774_v33 = vadd.f32 %v6773_v26, %v6357_v48  ;;  %v6775_v31 = vpop.f32.mrf.mxu1  ;;  %v8755_v43 = vld [vmem:[%s11940_s1 + $0x10a0] ss:$48 sps:$4 sm:$0xff]  }
 0x49c   : > { %v6361_v2 = vpop.f32.mrf.mxu0  ;;  %6552 = vmatmul.mubr.bf16.gmra.mxu0 %v8737_v7 }
 0x49d   : > { %v7058_v42 = vmax.f32 %v6774_v33, 0.0  ;;  %v6362_v30 = vadd.f32 %v6361_v2, %v10809_v47  ;;  %v6778_v58 = vpop.f32.mrf.mxu1  ;;  %6969 = vmatmul.mubr.bf16.gmra.mxu1 %v8740_v19  ;;  %6559 = vmatprep.mubr.bf16.mxu0 %v8745_v37  ;;  %v8746_v47 = vld [vmem:[%s11940_s1 + $0xfe8] ss:$48 sps:$4 sm:$0xff]   ;;  %v8763_v37 = vld [vmem:[%s11940_s1 + $0x1104] ss:$48 sps:$4 sm:$0xff]  }
 0x49e   : > { %v6363_v22 = vpop.f32.mrf.mxu0  ;;  %6976 = vmatprep.mubr.bf16.mxu1 %v8748_v24  ;;  %v8766_v24 = vld [vmem:[%s11940_s1 + $0x110c] ss:$48 sps:$4 sm:$0xff]  }
 0x49f   : > { %7155 = vst.msk [vmem:[%s11371_s28 + $0x108] sm:$0xff] %vm7121_vm0, %v7058_v42  ;;  %v6779_v40 = vadd.f32 %v6778_v58, %v6362_v30  ;;  %v6780_v32 = vpop.f32.mrf.mxu1 }
 0x4a0   : > { %v6364_v28 = vpop.f32.mrf.mxu0 }
 0x4a1   : > { %v7059_v46 = vmax.f32 %v6779_v40, 0.0  ;;  %v6365_v27 = vadd.f32 %v6364_v28, %v10824_v38  ;;  %v6781_v45 = vpop.f32.mrf.mxu1  ;;  %v8761_v28 = vld [vmem:[%s11940_s1 + $0x1100] ss:$48 sps:$4 sm:$0xff]  }
 0x4a2   : > { %v6366_v60 = vpop.f32.mrf.mxu0 }
 0x4a3   : > { %7156 = vst.msk [vmem:[%s11371_s28 + $0x110] sm:$0xff] %vm7121_vm0, %v7059_v46  ;;  %v6782_v20 = vadd.f32 %v6781_v45, %v6365_v27  ;;  %v6783_v39 = vpop.f32.mrf.mxu1  ;;  %v12093_v46 = vld [vmem:[#allocation2_spill] sm:$0xff]  ;;  %v8772_v60 = vld [vmem:[%s11940_s1 + $0x116c] ss:$48 sps:$4 sm:$0xff]  }
 0x4a4   : > { %v6369_v38 = vpop.f32.mrf.mxu0  ;;  %6560 = vmatmul.mubr.bf16.gmra.mxu0 %v8743_v15 }
 0x4a5   : > { %v7060_v50 = vmax.f32 %v6782_v20, 0.0  ;;  %v6370_v56 = vadd.f32 %v6369_v38, %v10827_v13  ;;  %v6786_v14 = vpop.f32.mrf.mxu1  ;;  %6977 = vmatmul.mubr.bf16.gmra.mxu1 %v8746_v47  ;;  %6567 = vmatprep.mubr.bf16.mxu0 %v8751_v17  ;;  %v8752_v13 = vld [vmem:[%s11940_s1 + $0x1048] ss:$48 sps:$4 sm:$0xff]   ;;  %v8769_v47 = vld [vmem:[%s11940_s1 + $0x1164] ss:$48 sps:$4 sm:$0xff]  }
 0x4a6   : > { %v6371_v36 = vpop.f32.mrf.mxu0  ;;  %6984 = vmatprep.mubr.bf16.mxu1 %v8754_v25 }
 0x4a7   : > { %7157 = vst.msk [vmem:[%s11371_s28 + $0x118] sm:$0xff] %vm7121_vm0, %v7060_v50  ;;  %v6787_v6 = vadd.f32 %v6786_v14, %v6370_v56  ;;  %v6788_v61 = vpop.f32.mrf.mxu1  ;;  %v12094_v50 = vld [vmem:[#allocation3_spill] sm:$0xff] }
 0x4a8   : > { %v6372_v51 = vpop.f32.mrf.mxu0 }
 0x4a9   : > { %v7061_v54 = vmax.f32 %v6787_v6, 0.0  ;;  %v6373_v1 = vadd.f32 %v6372_v51, %v10842_v12  ;;  %v6789_v10 = vpop.f32.mrf.mxu1 }
 0x4aa   : > { %v6374_v16 = vpop.f32.mrf.mxu0 }
 0x4ab   : > { %7158 = vst.msk [vmem:[%s11371_s28 + $0x120] sm:$0xff] %vm7121_vm0, %v7061_v54  ;;  %v6790_v29 = vadd.f32 %v6789_v10, %v6373_v1  ;;  %v6791_v21 = vpop.f32.mrf.mxu1  ;;  %v12095_v1 = vld [vmem:[#allocation4_spill] sm:$0xff] }
 0x4ac   : > { %v6377_v12 = vpop.f32.mrf.mxu0  ;;  %6568 = vmatmul.mubr.bf16.gmra.mxu0 %v8749_v23  ;;  %v8767_v23 = vld [vmem:[%s11940_s1 + $0x1160] ss:$48 sps:$4 sm:$0xff]   ;;  %v8775_v16 = vld [vmem:[%s11940_s1 + $0x11c4] ss:$48 sps:$4 sm:$0xff]  }
 0x4ad   : > { %v7062_v41 = vmax.f32 %v6790_v29, 0.0  ;;  %v6378_v53 = vadd.f32 %v6377_v12, %v10845_v44  ;;  %v6794_v8 = vpop.f32.mrf.mxu1  ;;  %6985 = vmatmul.mubr.bf16.gmra.mxu1 %v8752_v13  ;;  %6575 = vmatprep.mubr.bf16.mxu0 %v8757_v3  ;;  %v8758_v44 = vld [vmem:[%s11940_s1 + $0x10a8] ss:$48 sps:$4 sm:$0xff]   ;;  %v8778_v29 = vld [vmem:[%s11940_s1 + $0x11cc] ss:$48 sps:$4 sm:$0xff]  }
 0x4ae   : > { %v6379_v4 = vpop.f32.mrf.mxu0  ;;  %6992 = vmatprep.mubr.bf16.mxu1 %v8760_v35  ;;  %v8770_v3 = vld [vmem:[%s11940_s1 + $0x1168] ss:$48 sps:$4 sm:$0xff]  }
 0x4af   : > { %7159 = vst.msk [vmem:[%s11371_s28 + $0x128] sm:$0xff] %vm7121_vm0, %v7062_v41  ;;  %v6795_v34 = vadd.f32 %v6794_v8, %v6378_v53  ;;  %v6796_v9 = vpop.f32.mrf.mxu1  ;;  %v12096_v8 = vld [vmem:[#allocation5_spill] sm:$0xff] }
 0x4b0   : > { %v6380_v7 = vpop.f32.mrf.mxu0 }
 0x4b1   : > { %v7063_v48 = vmax.f32 %v6795_v34, 0.0  ;;  %v6381_v26 = vadd.f32 %v6380_v7, %v10860_v52  ;;  %v6797_v19 = vpop.f32.mrf.mxu1 }
 0x4b2   : > { %v6382_v18 = vpop.f32.mrf.mxu0 }
 0x4b3   : > { %7160 = vst.msk [vmem:[%s11371_s28 + $0x130] sm:$0xff] %vm7121_vm0, %v7063_v48  ;;  %v6798_v33 = vadd.f32 %v6797_v19, %v6381_v26  ;;  %v6799_v31 = vpop.f32.mrf.mxu1  ;;  %v8773_v26 = vld [vmem:[%s11940_s1 + $0x11c0] ss:$48 sps:$4 sm:$0xff]  }
 0x4b4   : > { %v6385_v52 = vpop.f32.mrf.mxu0  ;;  %6576 = vmatmul.mubr.bf16.gmra.mxu0 %v8755_v43 }
 0x4b5   : > { %v7064_v2 = vmax.f32 %v6798_v33, 0.0  ;;  %v6386_v42 = vadd.f32 %v6385_v52, %v10863_v11  ;;  %v6802_v30 = vpop.f32.mrf.mxu1  ;;  %6993 = vmatmul.mubr.bf16.gmra.mxu1 %v8758_v44  ;;  %6583 = vmatprep.mubr.bf16.mxu0 %v8763_v37  ;;  %v8764_v11 = vld [vmem:[%s11940_s1 + $0x1108] ss:$48 sps:$4 sm:$0xff]   ;;  %v12097_v44 = vld [vmem:[#allocation6_spill] sm:$0xff] }
 0x4b6   : > { %v6387_v58 = vpop.f32.mrf.mxu0  ;;  %7000 = vmatprep.mubr.bf16.mxu1 %v8766_v24  ;;  %v8776_v24 = vld [vmem:[%s11940_s1 + $0x11c8] ss:$48 sps:$4 sm:$0xff]  }
 0x4b7   : > { %7161 = vst.msk [vmem:[%s11371_s28 + $0x138] sm:$0xff] %vm7121_vm0, %v7064_v2  ;;  %v6803_v22 = vadd.f32 %v6802_v30, %v6386_v42  ;;  %v6804_v40 = vpop.f32.mrf.mxu1  ;;  %v12098_v30 = vld [vmem:[#allocation7_spill] sm:$0xff] }
 0x4b8   : > { %v6388_v32 = vpop.f32.mrf.mxu0 }
 0x4b9   : > { %v7065_v15 = vmax.f32 %v6803_v22, 0.0  ;;  %v6389_v27 = vadd.f32 %v6388_v32, %v12093_v46  ;;  %v6805_v45 = vpop.f32.mrf.mxu1 }
 0x4ba   : > { %v6390_v17 = vpop.f32.mrf.mxu0 }
 0x4bb   : > { %7162 = vst.msk [vmem:[%s11371_s28 + $0x140] sm:$0xff] %vm7121_vm0, %v7065_v15  ;;  %v6806_v25 = vadd.f32 %v6805_v45, %v6389_v27  ;;  %v6807_v20 = vpop.f32.mrf.mxu1  ;;  %v12099_v27 = vld [vmem:[#allocation8_spill] sm:$0xff] }
 0x4bc   : > { %v6393_v39 = vpop.f32.mrf.mxu0  ;;  %6584 = vmatmul.mubr.bf16.gmra.mxu0 %v8761_v28 }
 0x4bd   : > { %v7066_v38 = vmax.f32 %v6806_v25, 0.0  ;;  %v6394_v56 = vadd.f32 %v6393_v39, %v12094_v50  ;;  %v6810_v14 = vpop.f32.mrf.mxu1  ;;  %7001 = vmatmul.mubr.bf16.gmra.mxu1 %v8764_v11  ;;  %6591 = vmatprep.mubr.bf16.mxu0 %v8769_v47  ;;  %v12100_v39 = vld [vmem:[#allocation9_spill] sm:$0xff] }
 0x4be   : > { %v6395_v36 = vpop.f32.mrf.mxu0  ;;  %7008 = vmatprep.mubr.bf16.mxu1 %v8772_v60 }
 0x4bf   : > { %7163 = vst.msk [vmem:[%s11371_s28 + $0x148] sm:$0xff] %vm7121_vm0, %v7066_v38  ;;  %v6811_v6 = vadd.f32 %v6810_v14, %v6394_v56  ;;  %v6812_v61 = vpop.f32.mrf.mxu1 }
 0x4c0   : > { %v6396_v51 = vpop.f32.mrf.mxu0 }
 0x4c1   : > { %v7067_v54 = vmax.f32 %v6811_v6, 0.0  ;;  %v6397_v10 = vadd.f32 %v6396_v51, %v12095_v1  ;;  %v6813_v13 = vpop.f32.mrf.mxu1 }
 0x4c2   : > { %v6398_v35 = vpop.f32.mrf.mxu0 }
 0x4c3   : > { %7164 = vst.msk [vmem:[%s11371_s28 + $0x150] sm:$0xff] %vm7121_vm0, %v7067_v54  ;;  %v6814_v21 = vadd.f32 %v6813_v13, %v6397_v10  ;;  %v6815_v12 = vpop.f32.mrf.mxu1 }
 0x4c4   : > { %v6401_v41 = vpop.f32.mrf.mxu0  ;;  %6592 = vmatmul.mubr.bf16.gmra.mxu0 %v8767_v23 }
 0x4c5   : > { %v7068_v53 = vmax.f32 %v6814_v21, 0.0  ;;  %v6402_v4 = vadd.f32 %v6401_v41, %v12096_v8  ;;  %v6818_v34 = vpop.f32.mrf.mxu1  ;;  %7009 = vmatmul.mubr.bf16.gmra.mxu1 %v8770_v3  ;;  %6599 = vmatprep.mubr.bf16.mxu0 %v8775_v16  ;;  %v12101_v16 = vld [vmem:[#allocation10_spill] sm:$0xff] }
 0x4c6   : > { %v6403_v9 = vpop.f32.mrf.mxu0  ;;  %7016 = vmatprep.mubr.bf16.mxu1 %v8778_v29 }
 0x4c7   : > { %7165 = vst.msk [vmem:[%s11371_s28 + $0x158] sm:$0xff] %vm7121_vm0, %v7068_v53  ;;  %v6819_v7 = vadd.f32 %v6818_v34, %v6402_v4  ;;  %v6820_v43 = vpop.f32.mrf.mxu1 }
 0x4c8   : > { %v6404_v48 = vpop.f32.mrf.mxu0 }
 0x4c9   : > { %v7069_v19 = vmax.f32 %v6819_v7, 0.0  ;;  %v6405_v37 = vadd.f32 %v6404_v48, %v12097_v44  ;;  %v6821_v18 = vpop.f32.mrf.mxu1 }
 0x4ca   : > { %v6406_v33 = vpop.f32.mrf.mxu0 }
 0x4cb   : > { %7166 = vst.msk [vmem:[%s11371_s28 + $0x160] sm:$0xff] %vm7121_vm0, %v7069_v19  ;;  %v6822_v31 = vadd.f32 %v6821_v18, %v6405_v37  ;;  %v6823_v52 = vpop.f32.mrf.mxu1 }
 0x4cc   : > { %v6409_v2 = vpop.f32.mrf.mxu0  ;;  %6600 = vmatmul.mubr.bf16.gmra.mxu0 %v8773_v26  ;;  %v12102_v26 = vld [vmem:[#allocation11_spill] sm:$0xff] }
 0x4cd   : > { %v7070_v42 = vmax.f32 %v6822_v31, 0.0  ;;  %v6410_v58 = vadd.f32 %v6409_v2, %v12098_v30  ;;  %v6826_v22 = vpop.f32.mrf.mxu1  ;;  %7017 = vmatmul.mubr.bf16.gmra.mxu1 %v8776_v24  ;;  %v12103_v31 = vld [vmem:[#allocation12_spill] sm:$0xff] }
 0x4ce   : > { %v6411_v40 = vpop.f32.mrf.mxu0 }
 0x4cf   : > { %7167 = vst.msk [vmem:[%s11371_s28 + $0x168] sm:$0xff] %vm7121_vm0, %v7070_v42  ;;  %v6827_v32 = vadd.f32 %v6826_v22, %v6410_v58  ;;  %v6828_v28 = vpop.f32.mrf.mxu1 }
 0x4d0   : > { %v6412_v15 = vpop.f32.mrf.mxu0 }
 0x4d1   : > { %v7071_v46 = vmax.f32 %v6827_v32, 0.0  ;;  %v6413_v45 = vadd.f32 %v6412_v15, %v12099_v27  ;;  %v6829_v11 = vpop.f32.mrf.mxu1  ;;  %v12104_v32 = vld [vmem:[#allocation13_spill] sm:$0xff] }
 0x4d2   : > { %v6414_v47 = vpop.f32.mrf.mxu0 }
 0x4d3   : > { %7168 = vst.msk [vmem:[%s11371_s28 + $0x170] sm:$0xff] %vm7121_vm0, %v7071_v46  ;;  %v6830_v17 = vadd.f32 %v6829_v11, %v6413_v45  ;;  %v6831_v60 = vpop.f32.mrf.mxu1 }
 0x4d4   : > { %v6417_v25 = vpop.f32.mrf.mxu0 }
 0x4d5   : > { %v7072_v20 = vmax.f32 %v6830_v17, 0.0  ;;  %v6418_v38 = vadd.f32 %v6417_v25, %v12100_v39  ;;  %v6834_v50 = vpop.f32.mrf.mxu1 }
 0x4d6   : > { %v6419_v56 = vpop.f32.mrf.mxu0 }
 0x4d7   : > { %7169 = vst.msk [vmem:[%s11371_s28 + $0x178] sm:$0xff] %vm7121_vm0, %v7072_v20  ;;  %v6835_v14 = vadd.f32 %v6834_v50, %v6418_v38  ;;  %v6836_v36 = vpop.f32.mrf.mxu1  ;;  %v12105_v56 = vld [vmem:[#allocation14_spill] sm:$0xff] }
 0x4d8   : > { %v6420_v6 = vpop.f32.mrf.mxu0 }
 0x4d9   : > { %v7073_v61 = vmax.f32 %v6835_v14, 0.0  ;;  %v6421_v51 = vadd.f32 %v6420_v6, %v10950_v62  ;;  %v6837_v23 = vpop.f32.mrf.mxu1 }
 0x4da   : > { %v6422_v54 = vpop.f32.mrf.mxu0 }
 0x4db   : > { %7170 = vst.msk [vmem:[%s11371_s28 + $0x180] sm:$0xff] %vm7121_vm0, %v7073_v61  ;;  %v6838_v1 = vadd.f32 %v6837_v23, %v6421_v51  ;;  %v6839_v10 = vpop.f32.mrf.mxu1  ;;  %v12106_v54 = vld [vmem:[#allocation15_spill] sm:$0xff] }
 0x4dc   : > { %v6425_v13 = vpop.f32.mrf.mxu0 }
 0x4dd   : > { %v7074_v3 = vmax.f32 %v6838_v1, 0.0  ;;  %v6426_v35 = vadd.f32 %v6425_v13, %v12101_v16  ;;  %v6842_v29 = vpop.f32.mrf.mxu1 }
 0x4de   : > { %v6427_v21 = vpop.f32.mrf.mxu0 }
 0x4df   : > { %7171 = vst.msk [vmem:[%s11371_s28 + $0x188] sm:$0xff] %vm7121_vm0, %v7074_v3  ;;  %v6843_v12 = vadd.f32 %v6842_v29, %v6426_v35  ;;  %v6844_v41 = vpop.f32.mrf.mxu1  ;;  %v12107_v21 = vld [vmem:[#allocation16_spill] sm:$0xff] }
 0x4e0   : > { %v6428_v53 = vpop.f32.mrf.mxu0 }
 0x4e1   : > { %v7075_v62 = vmax.f32 %v6843_v12, 0.0  ;;  %v6429_v8 = vadd.f32 %v6428_v53, %v10968_v57  ;;  %v6845_v4 = vpop.f32.mrf.mxu1 }
 0x4e2   : > { %v6430_v34 = vpop.f32.mrf.mxu0 }
 0x4e3   : > { %7172 = vst.msk [vmem:[%s11371_s28 + $0x190] sm:$0xff] %vm7121_vm0, %v7075_v62  ;;  %v6846_v9 = vadd.f32 %v6845_v4, %v6429_v8  ;;  %v6847_v7 = vpop.f32.mrf.mxu1 }
 0x4e4   : > { %v6433_v43 = vpop.f32.mrf.mxu0 }
 0x4e5   : > { %v7076_v48 = vmax.f32 %v6846_v9, 0.0  ;;  %v6434_v19 = vadd.f32 %v6433_v43, %v12102_v26  ;;  %v6850_v44 = vpop.f32.mrf.mxu1  ;;  %v12108_v9 = vld [vmem:[#allocation17_spill] sm:$0xff] }
 0x4e6   : > { %v6435_v37 = vpop.f32.mrf.mxu0 }
 0x4e7   : > { %7173 = vst.msk [vmem:[%s11371_s28 + $0x198] sm:$0xff] %vm7121_vm0, %v7076_v48  ;;  %v6851_v18 = vadd.f32 %v6850_v44, %v6434_v19  ;;  %v6852_v24 = vpop.f32.mrf.mxu1 }
 0x4e8   : > { %v6436_v33 = vpop.f32.mrf.mxu0 }
 0x4e9   : > { %v7077_v57 = vmax.f32 %v6851_v18, 0.0  ;;  %v6437_v52 = vadd.f32 %v6436_v33, %v12103_v31  ;;  %v6853_v2 = vpop.f32.mrf.mxu1  ;;  %v12109_v18 = vld [vmem:[#allocation18_spill] sm:$0xff] }
 0x4ea   : > { %v6438_v42 = vpop.f32.mrf.mxu0 }
 0x4eb   : > { %7174 = vst.msk [vmem:[%s11371_s28 + $0x1a0] sm:$0xff] %vm7121_vm0, %v7077_v57  ;;  %v6854_v30 = vadd.f32 %v6853_v2, %v6437_v52  ;;  %v6855_v58 = vpop.f32.mrf.mxu1 }
 0x4ec   : > { %v6441_v22 = vpop.f32.mrf.mxu0 }
 0x4ed   : > { %v7078_v40 = vmax.f32 %v6854_v30, 0.0  ;;  %v6442_v28 = vadd.f32 %v6441_v22, %v12104_v32  ;;  %v6858_v15 = vpop.f32.mrf.mxu1  ;;  %v12110_v30 = vld [vmem:[#allocation19_spill] sm:$0xff] }
 0x4ee   : > { %v6443_v46 = vpop.f32.mrf.mxu0 }
 0x4ef   : > { %7175 = vst.msk [vmem:[%s11371_s28 + $0x1a8] sm:$0xff] %vm7121_vm0, %v7078_v40  ;;  %v6859_v27 = vadd.f32 %v6858_v15, %v6442_v28  ;;  %v6860_v45 = vpop.f32.mrf.mxu1 }
 0x4f0   : > { %v6444_v11 = vpop.f32.mrf.mxu0 }
 0x4f1   : > { %v7079_v47 = vmax.f32 %v6859_v27, 0.0  ;;  %v6445_v17 = vadd.f32 %v6444_v11, %v11004_v0  ;;  %v6861_v60 = vpop.f32.mrf.mxu1  ;;  %v12111_v27 = vld [vmem:[#allocation20_spill] sm:$0xff] }
 0x4f2   : > { %v6446_v25 = vpop.f32.mrf.mxu0 }
 0x4f3   : > { %7176 = vst.msk [vmem:[%s11371_s28 + $0x1b0] sm:$0xff] %vm7121_vm0, %v7079_v47  ;;  %v6862_v20 = vadd.f32 %v6861_v60, %v6445_v17  ;;  %v6863_v39 = vpop.f32.mrf.mxu1 }
 0x4f4   : > { %v6449_v38 = vpop.f32.mrf.mxu0  ;;  %v12112_v39 = vld [vmem:[#allocation21_spill] sm:$0xff] }
 0x4f5   : > { %v7080_v50 = vmax.f32 %v6862_v20, 0.0  ;;  %v6450_v14 = vadd.f32 %v6449_v38, %v12105_v56  ;;  %v6866_v36 = vpop.f32.mrf.mxu1 }
 0x4f6   : > { %v6451_v6 = vpop.f32.mrf.mxu0 }
 0x4f7   : > { %7177 = vst.msk [vmem:[%s11371_s28 + $0x1b8] sm:$0xff] %vm7121_vm0, %v7080_v50  ;;  %v6867_v61 = vadd.f32 %v6866_v36, %v6450_v14  ;;  %v6868_v51 = vpop.f32.mrf.mxu1 }
 0x4f8   : > { %v6452_v23 = vpop.f32.mrf.mxu0  ;;  %v12113_v51 = vld [vmem:[#allocation22_spill] sm:$0xff] }
 0x4f9   : > { %v7081_v0 = vmax.f32 %v6867_v61, 0.0  ;;  %v6453_v1 = vadd.f32 %v6452_v23, %v12106_v54  ;;  %v6869_v10 = vpop.f32.mrf.mxu1 }
 0x4fa   : > { %v6454_v13 = vpop.f32.mrf.mxu0 }
 0x4fb   : > { %7178 = vst.msk [vmem:[%s11371_s28 + $0x1c0] sm:$0xff] %vm7121_vm0, %v7081_v0  ;;  %v6870_v3 = vadd.f32 %v6869_v10, %v6453_v1  ;;  %v6871_v16 = vpop.f32.mrf.mxu1 }
 0x4fc   : > { %v6457_v35 = vpop.f32.mrf.mxu0  ;;  %v12114_v16 = vld [vmem:[#allocation23_spill] sm:$0xff] }
 0x4fd   : > { %v7082_v29 = vmax.f32 %v6870_v3, 0.0  ;;  %v6458_v12 = vadd.f32 %v6457_v35, %v12107_v21  ;;  %v6874_v41 = vpop.f32.mrf.mxu1 }
 0x4fe   : > { %v6459_v53 = vpop.f32.mrf.mxu0 }
 0x4ff   : > { %7179 = vst.msk [vmem:[%s11371_s28 + $0x1c8] sm:$0xff] %vm7121_vm0, %v7082_v29  ;;  %v6875_v62 = vadd.f32 %v6874_v41, %v6458_v12  ;;  %v6876_v8 = vpop.f32.mrf.mxu1 }
 0x500   : > { %v6460_v4 = vpop.f32.mrf.mxu0  ;;  %v12115_v8 = vld [vmem:[#allocation24_spill] sm:$0xff] }
 0x501   : > { %v7083_v34 = vmax.f32 %v6875_v62, 0.0  ;;  %v6461_v7 = vadd.f32 %v6460_v4, %v12108_v9  ;;  %v6877_v43 = vpop.f32.mrf.mxu1 }
 0x502   : > { %v6462_v48 = vpop.f32.mrf.mxu0 }
 0x503   : > { %7180 = vst.msk [vmem:[%s11371_s28 + $0x1d0] sm:$0xff] %vm7121_vm0, %v7083_v34  ;;  %v6878_v26 = vadd.f32 %v6877_v43, %v6461_v7  ;;  %v6879_v19 = vpop.f32.mrf.mxu1 }
 0x504   : > { %v6465_v44 = vpop.f32.mrf.mxu0  ;;  %v12116_v19 = vld [vmem:[#allocation25_spill] sm:$0xff] }
 0x505   : > { %v7084_v37 = vmax.f32 %v6878_v26, 0.0  ;;  %v6466_v24 = vadd.f32 %v6465_v44, %v12109_v18  ;;  %v6882_v33 = vpop.f32.mrf.mxu1 }
 0x506   : > { %v6467_v57 = vpop.f32.mrf.mxu0 }
 0x507   : > { %7181 = vst.msk [vmem:[%s11371_s28 + $0x1d8] sm:$0xff] %vm7121_vm0, %v7084_v37  ;;  %v6883_v31 = vadd.f32 %v6882_v33, %v6466_v24  ;;  %v6884_v52 = vpop.f32.mrf.mxu1 }
 0x508   : > { %v6468_v2 = vpop.f32.mrf.mxu0  ;;  %v12117_v52 = vld [vmem:[#allocation26_spill] sm:$0xff] }
 0x509   : > { %v7085_v42 = vmax.f32 %v6883_v31, 0.0  ;;  %v6469_v58 = vadd.f32 %v6468_v2, %v12110_v30  ;;  %v6885_v22 = vpop.f32.mrf.mxu1 }
 0x50a   : > { %v6470_v40 = vpop.f32.mrf.mxu0 }
 0x50b   : > { %7182 = vst.msk [vmem:[%s11371_s28 + $0x1e0] sm:$0xff] %vm7121_vm0, %v7085_v42  ;;  %v6886_v32 = vadd.f32 %v6885_v22, %v6469_v58  ;;  %v6887_v28 = vpop.f32.mrf.mxu1 }
 0x50c   : > { %v6473_v15 = vpop.f32.mrf.mxu0  ;;  %v12118_v28 = vld [vmem:[#allocation27_spill] sm:$0xff] }
 0x50d   : > { %v7086_v46 = vmax.f32 %v6886_v32, 0.0  ;;  %v6474_v45 = vadd.f32 %v6473_v15, %v12111_v27  ;;  %v6890_v11 = vpop.f32.mrf.mxu1 }
 0x50e   : > { %v6475_v47 = vpop.f32.mrf.mxu0 }
 0x50f   : > { %7183 = vst.msk [vmem:[%s11371_s28 + $0x1e8] sm:$0xff] %vm7121_vm0, %v7086_v46  ;;  %v6891_v17 = vadd.f32 %v6890_v11, %v6474_v45  ;;  %v6892_v60 = vpop.f32.mrf.mxu1 }
 0x510   : > { %v6476_v25 = vpop.f32.mrf.mxu0  ;;  %v12119_v60 = vld [vmem:[#allocation28_spill] sm:$0xff] }
 0x511   : > { %v7087_v20 = vmax.f32 %v6891_v17, 0.0  ;;  %v6477_v38 = vadd.f32 %v6476_v25, %v12112_v39  ;;  %v6893_v50 = vpop.f32.mrf.mxu1 }
 0x512   : > { %v6478_v56 = vpop.f32.mrf.mxu0 }
 0x513   : > { %7184 = vst.msk [vmem:[%s11371_s28 + $0x1f0] sm:$0xff] %vm7121_vm0, %v7087_v20  ;;  %v6894_v14 = vadd.f32 %v6893_v50, %v6477_v38  ;;  %v6895_v36 = vpop.f32.mrf.mxu1 }
 0x514   : > { %v6481_v6 = vpop.f32.mrf.mxu0  ;;  %v12120_v36 = vld [vmem:[#allocation29_spill] sm:$0xff] }
 0x515   : > { %v7088_v61 = vmax.f32 %v6894_v14, 0.0  ;;  %v6482_v23 = vadd.f32 %v6481_v6, %v12113_v51  ;;  %v6898_v0 = vpop.f32.mrf.mxu1 }
 0x516   : > { %v6483_v54 = vpop.f32.mrf.mxu0 }
 0x517   : > { %7185 = vst.msk [vmem:[%s11371_s28 + $0x1f8] sm:$0xff] %vm7121_vm0, %v7088_v61  ;;  %v6899_v1 = vadd.f32 %v6898_v0, %v6482_v23  ;;  %v6900_v10 = vpop.f32.mrf.mxu1 }
 0x518   : > { %v6484_v13 = vpop.f32.mrf.mxu0  ;;  %v12121_v10 = vld [vmem:[#allocation30_spill] sm:$0xff] }
 0x519   : > { %v7089_v3 = vmax.f32 %v6899_v1, 0.0  ;;  %v6485_v35 = vadd.f32 %v6484_v13, %v12114_v16  ;;  %v6901_v29 = vpop.f32.mrf.mxu1 }
 0x51a   : > { %v6486_v21 = vpop.f32.mrf.mxu0 }
 0x51b   : > { %7186 = vst.msk [vmem:[%s11371_s28 + $0x200] sm:$0xff] %vm7121_vm0, %v7089_v3  ;;  %v6902_v12 = vadd.f32 %v6901_v29, %v6485_v35  ;;  %v6903_v41 = vpop.f32.mrf.mxu1 }
 0x51c   : > { %v6489_v53 = vpop.f32.mrf.mxu0  ;;  %v12122_v41 = vld [vmem:[#allocation31_spill] sm:$0xff] }
 0x51d   : > { %v7090_v62 = vmax.f32 %v6902_v12, 0.0  ;;  %v6490_v4 = vadd.f32 %v6489_v53, %v12115_v8  ;;  %v6906_v34 = vpop.f32.mrf.mxu1 }
 0x51e   : > { %v6491_v9 = vpop.f32.mrf.mxu0 }
 0x51f   : > { %7187 = vst.msk [vmem:[%s11371_s28 + $0x208] sm:$0xff] %vm7121_vm0, %v7090_v62  ;;  %v6907_v7 = vadd.f32 %v6906_v34, %v6490_v4  ;;  %v6908_v43 = vpop.f32.mrf.mxu1 }
 0x520   : > { %v6492_v48 = vpop.f32.mrf.mxu0  ;;  %v12123_v43 = vld [vmem:[#allocation32_spill] sm:$0xff] }
 0x521   : > { %v7091_v26 = vmax.f32 %v6907_v7, 0.0  ;;  %v6493_v44 = vadd.f32 %v6492_v48, %v12116_v19  ;;  %v6909_v37 = vpop.f32.mrf.mxu1 }
 0x522   : > { %v6494_v18 = vpop.f32.mrf.mxu0 }
 0x523   : > { %7188 = vst.msk [vmem:[%s11371_s28 + $0x210] sm:$0xff] %vm7121_vm0, %v7091_v26  ;;  %v6910_v24 = vadd.f32 %v6909_v37, %v6493_v44  ;;  %v6911_v33 = vpop.f32.mrf.mxu1 }
 0x524   : > { %v6497_v57 = vpop.f32.mrf.mxu0  ;;  %v12124_v33 = vld [vmem:[#allocation33_spill] sm:$0xff] }
 0x525   : > { %v7092_v31 = vmax.f32 %v6910_v24, 0.0  ;;  %v6498_v2 = vadd.f32 %v6497_v57, %v12117_v52  ;;  %v6914_v42 = vpop.f32.mrf.mxu1 }
 0x526   : > { %v6499_v30 = vpop.f32.mrf.mxu0 }
 0x527   : > { %7189 = vst.msk [vmem:[%s11371_s28 + $0x218] sm:$0xff] %vm7121_vm0, %v7092_v31  ;;  %v6915_v58 = vadd.f32 %v6914_v42, %v6498_v2  ;;  %v6916_v22 = vpop.f32.mrf.mxu1 }
 0x528   : > { %v6500_v40 = vpop.f32.mrf.mxu0  ;;  %v12125_v22 = vld [vmem:[#allocation34_spill] sm:$0xff] }
 0x529   : > { %v7093_v32 = vmax.f32 %v6915_v58, 0.0  ;;  %v6501_v15 = vadd.f32 %v6500_v40, %v12118_v28  ;;  %v6917_v46 = vpop.f32.mrf.mxu1 }
 0x52a   : > { %v6502_v27 = vpop.f32.mrf.mxu0 }
 0x52b   : > { %7190 = vst.msk [vmem:[%s11371_s28 + $0x220] sm:$0xff] %vm7121_vm0, %v7093_v32  ;;  %v6918_v45 = vadd.f32 %v6917_v46, %v6501_v15  ;;  %v6919_v11 = vpop.f32.mrf.mxu1 }
 0x52c   : > { %v6505_v47 = vpop.f32.mrf.mxu0  ;;  %v12126_v11 = vld [vmem:[#allocation35_spill] sm:$0xff] }
 0x52d   : > { %v7094_v17 = vmax.f32 %v6918_v45, 0.0  ;;  %v6506_v25 = vadd.f32 %v6505_v47, %v12119_v60  ;;  %v6922_v20 = vpop.f32.mrf.mxu1 }
 0x52e   : > { %v6507_v39 = vpop.f32.mrf.mxu0 }
 0x52f   : > { %7191 = vst.msk [vmem:[%s11371_s28 + $0x228] sm:$0xff] %vm7121_vm0, %v7094_v17  ;;  %v6923_v38 = vadd.f32 %v6922_v20, %v6506_v25  ;;  %v6924_v50 = vpop.f32.mrf.mxu1 }
 0x530   : > { %v6508_v56 = vpop.f32.mrf.mxu0  ;;  %v12127_v50 = vld [vmem:[#allocation36_spill] sm:$0xff] }
 0x531   : > { %v7095_v14 = vmax.f32 %v6923_v38, 0.0  ;;  %v6509_v6 = vadd.f32 %v6508_v56, %v12120_v36  ;;  %v6925_v61 = vpop.f32.mrf.mxu1 }
 0x532   : > { %v6510_v51 = vpop.f32.mrf.mxu0 }
 0x533   : > { %7192 = vst.msk [vmem:[%s11371_s28 + $0x230] sm:$0xff] %vm7121_vm0, %v7095_v14  ;;  %v6926_v23 = vadd.f32 %v6925_v61, %v6509_v6  ;;  %v6927_v0 = vpop.f32.mrf.mxu1 }
 0x534   : > { %v6513_v54 = vpop.f32.mrf.mxu0  ;;  %v12128_v0 = vld [vmem:[#allocation37_spill] sm:$0xff] }
 0x535   : > { %v7096_v1 = vmax.f32 %v6926_v23, 0.0  ;;  %v6514_v13 = vadd.f32 %v6513_v54, %v12121_v10  ;;  %v6930_v3 = vpop.f32.mrf.mxu1 }
 0x536   : > { %v6515_v16 = vpop.f32.mrf.mxu0 }
 0x537   : > { %7193 = vst.msk [vmem:[%s11371_s28 + $0x238] sm:$0xff] %vm7121_vm0, %v7096_v1  ;;  %v6931_v35 = vadd.f32 %v6930_v3, %v6514_v13  ;;  %v6932_v29 = vpop.f32.mrf.mxu1 }
 0x538   : > { %v6516_v21 = vpop.f32.mrf.mxu0  ;;  %v12129_v29 = vld [vmem:[#allocation38_spill] sm:$0xff] }
 0x539   : > { %v7097_v12 = vmax.f32 %v6931_v35, 0.0  ;;  %v6517_v53 = vadd.f32 %v6516_v21, %v12122_v41  ;;  %v6933_v62 = vpop.f32.mrf.mxu1 }
 0x53a   : > { %v6518_v8 = vpop.f32.mrf.mxu0 }
 0x53b   : > { %7194 = vst.msk [vmem:[%s11371_s28 + $0x240] sm:$0xff] %vm7121_vm0, %v7097_v12  ;;  %v6934_v4 = vadd.f32 %v6933_v62, %v6517_v53  ;;  %v6935_v34 = vpop.f32.mrf.mxu1 }
 0x53c   : > { %v6521_v9 = vpop.f32.mrf.mxu0  ;;  %v12130_v34 = vld [vmem:[#allocation39_spill] sm:$0xff] }
 0x53d   : > { %v7098_v7 = vmax.f32 %v6934_v4, 0.0  ;;  %v6522_v48 = vadd.f32 %v6521_v9, %v12123_v43  ;;  %v6938_v26 = vpop.f32.mrf.mxu1 }
 0x53e   : > { %v6523_v19 = vpop.f32.mrf.mxu0 }
 0x53f   : > { %7195 = vst.msk [vmem:[%s11371_s28 + $0x248] sm:$0xff] %vm7121_vm0, %v7098_v7  ;;  %v6939_v44 = vadd.f32 %v6938_v26, %v6522_v48  ;;  %v6940_v37 = vpop.f32.mrf.mxu1 }
 0x540   : > { %v6524_v18 = vpop.f32.mrf.mxu0  ;;  %v12131_v37 = vld [vmem:[#allocation40_spill] sm:$0xff] }
 0x541   : > { %v7099_v24 = vmax.f32 %v6939_v44, 0.0  ;;  %v6525_v57 = vadd.f32 %v6524_v18, %v12124_v33  ;;  %v6941_v31 = vpop.f32.mrf.mxu1 }
 0x542   : > { %v6526_v52 = vpop.f32.mrf.mxu0 }
 0x543   : > { %7196 = vst.msk [vmem:[%s11371_s28 + $0x250] sm:$0xff] %vm7121_vm0, %v7099_v24  ;;  %v6942_v2 = vadd.f32 %v6941_v31, %v6525_v57  ;;  %v6943_v42 = vpop.f32.mrf.mxu1 }
 0x544   : > { %v6529_v30 = vpop.f32.mrf.mxu0  ;;  %v12132_v42 = vld [vmem:[#allocation41_spill] sm:$0xff] }
 0x545   : > { %v7100_v58 = vmax.f32 %v6942_v2, 0.0  ;;  %v6530_v40 = vadd.f32 %v6529_v30, %v12125_v22  ;;  %v6946_v32 = vpop.f32.mrf.mxu1 }
 0x546   : > { %v6531_v28 = vpop.f32.mrf.mxu0 }
 0x547   : > { %7197 = vst.msk [vmem:[%s11371_s28 + $0x258] sm:$0xff] %vm7121_vm0, %v7100_v58  ;;  %v6947_v15 = vadd.f32 %v6946_v32, %v6530_v40  ;;  %v6948_v46 = vpop.f32.mrf.mxu1 }
 0x548   : > { %v6532_v27 = vpop.f32.mrf.mxu0  ;;  %v12133_v46 = vld [vmem:[#allocation42_spill] sm:$0xff] }
 0x549   : > { %v7101_v45 = vmax.f32 %v6947_v15, 0.0  ;;  %v6533_v47 = vadd.f32 %v6532_v27, %v12126_v11  ;;  %v6949_v17 = vpop.f32.mrf.mxu1 }
 0x54a   : > { %v6534_v60 = vpop.f32.mrf.mxu0 }
 0x54b   : > { %7198 = vst.msk [vmem:[%s11371_s28 + $0x260] sm:$0xff] %vm7121_vm0, %v7101_v45  ;;  %v6950_v25 = vadd.f32 %v6949_v17, %v6533_v47  ;;  %v6951_v20 = vpop.f32.mrf.mxu1 }
 0x54c   : > { %v6537_v39 = vpop.f32.mrf.mxu0  ;;  %v12134_v20 = vld [vmem:[#allocation43_spill] sm:$0xff] }
 0x54d   : > { %v7102_v38 = vmax.f32 %v6950_v25, 0.0  ;;  %v6538_v56 = vadd.f32 %v6537_v39, %v12127_v50  ;;  %v6954_v14 = vpop.f32.mrf.mxu1 }
 0x54e   : > { %v6539_v36 = vpop.f32.mrf.mxu0 }
 0x54f   : > { %7199 = vst.msk [vmem:[%s11371_s28 + $0x268] sm:$0xff] %vm7121_vm0, %v7102_v38  ;;  %v6955_v6 = vadd.f32 %v6954_v14, %v6538_v56  ;;  %v6956_v61 = vpop.f32.mrf.mxu1 }
 0x550   : > { %v6540_v51 = vpop.f32.mrf.mxu0  ;;  %v12135_v61 = vld [vmem:[#allocation44_spill] sm:$0xff] }
 0x551   : > { %v7103_v23 = vmax.f32 %v6955_v6, 0.0  ;;  %v6541_v54 = vadd.f32 %v6540_v51, %v12128_v0  ;;  %v6957_v1 = vpop.f32.mrf.mxu1 }
 0x552   : > { %v6542_v10 = vpop.f32.mrf.mxu0 }
 0x553   : > { %7200 = vst.msk [vmem:[%s11371_s28 + $0x270] sm:$0xff] %vm7121_vm0, %v7103_v23  ;;  %v6958_v13 = vadd.f32 %v6957_v1, %v6541_v54  ;;  %v6959_v3 = vpop.f32.mrf.mxu1 }
 0x554   : > { %v6545_v16 = vpop.f32.mrf.mxu0  ;;  %v12136_v3 = vld [vmem:[#allocation45_spill] sm:$0xff] }
 0x555   : > { %v7104_v35 = vmax.f32 %v6958_v13, 0.0  ;;  %v6546_v21 = vadd.f32 %v6545_v16, %v12129_v29  ;;  %v6962_v12 = vpop.f32.mrf.mxu1 }
 0x556   : > { %v6547_v41 = vpop.f32.mrf.mxu0 }
 0x557   : > { %7201 = vst.msk [vmem:[%s11371_s28 + $0x278] sm:$0xff] %vm7121_vm0, %v7104_v35  ;;  %v6963_v53 = vadd.f32 %v6962_v12, %v6546_v21  ;;  %v6964_v62 = vpop.f32.mrf.mxu1 }
 0x558   : > { %v6548_v8 = vpop.f32.mrf.mxu0  ;;  %v12137_v62 = vld [vmem:[#allocation46_spill] sm:$0xff] }
 0x559   : > { %v7105_v4 = vmax.f32 %v6963_v53, 0.0  ;;  %v6549_v9 = vadd.f32 %v6548_v8, %v12130_v34  ;;  %v6965_v7 = vpop.f32.mrf.mxu1 }
 0x55a   : > { %v6550_v43 = vpop.f32.mrf.mxu0 }
 0x55b   : > { %7202 = vst.msk [vmem:[%s11371_s28 + $0x280] sm:$0xff] %vm7121_vm0, %v7105_v4  ;;  %v6966_v48 = vadd.f32 %v6965_v7, %v6549_v9  ;;  %v6967_v26 = vpop.f32.mrf.mxu1 }
 0x55c   : > { %v6553_v19 = vpop.f32.mrf.mxu0  ;;  %v12138_v26 = vld [vmem:[#allocation47_spill] sm:$0xff] }
 0x55d   : > { %v7106_v44 = vmax.f32 %v6966_v48, 0.0  ;;  %v6554_v18 = vadd.f32 %v6553_v19, %v12131_v37  ;;  %v6970_v24 = vpop.f32.mrf.mxu1 }
 0x55e   : > { %v6555_v33 = vpop.f32.mrf.mxu0 }
 0x55f   : > { %7203 = vst.msk [vmem:[%s11371_s28 + $0x288] sm:$0xff] %vm7121_vm0, %v7106_v44  ;;  %v6971_v57 = vadd.f32 %v6970_v24, %v6554_v18  ;;  %v6972_v31 = vpop.f32.mrf.mxu1 }
 0x560   : > { %v6556_v52 = vpop.f32.mrf.mxu0  ;;  %v12139_v31 = vld [vmem:[#allocation48_spill] sm:$0xff] }
 0x561   : > { %v7107_v2 = vmax.f32 %v6971_v57, 0.0  ;;  %v6557_v30 = vadd.f32 %v6556_v52, %v12132_v42  ;;  %v6973_v58 = vpop.f32.mrf.mxu1 }
 0x562   : > { %v6558_v22 = vpop.f32.mrf.mxu0 }
 0x563   : > { %7204 = vst.msk [vmem:[%s11371_s28 + $0x290] sm:$0xff] %vm7121_vm0, %v7107_v2  ;;  %v6974_v40 = vadd.f32 %v6973_v58, %v6557_v30  ;;  %v6975_v32 = vpop.f32.mrf.mxu1 }
 0x564   : > { %v6561_v28 = vpop.f32.mrf.mxu0 }
 0x565   : > { %v7108_v15 = vmax.f32 %v6974_v40, 0.0  ;;  %v6562_v27 = vadd.f32 %v6561_v28, %v12133_v46  ;;  %v6978_v45 = vpop.f32.mrf.mxu1 }
 0x566   : > { %v6563_v11 = vpop.f32.mrf.mxu0 }
 0x567   : > { %7205 = vst.msk [vmem:[%s11371_s28 + $0x298] sm:$0xff] %vm7121_vm0, %v7108_v15  ;;  %v6979_v47 = vadd.f32 %v6978_v45, %v6562_v27  ;;  %v6980_v17 = vpop.f32.mrf.mxu1 }
 0x568   : > { %v6564_v60 = vpop.f32.mrf.mxu0 }
 0x569   : > { %v7109_v25 = vmax.f32 %v6979_v47, 0.0  ;;  %v6565_v39 = vadd.f32 %v6564_v60, %v12134_v20  ;;  %v6981_v38 = vpop.f32.mrf.mxu1 }
 0x56a   : > { %v6566_v50 = vpop.f32.mrf.mxu0 }
 0x56b   : > { %7206 = vst.msk [vmem:[%s11371_s28 + $0x2a0] sm:$0xff] %vm7121_vm0, %v7109_v25  ;;  %v6982_v56 = vadd.f32 %v6981_v38, %v6565_v39  ;;  %v6983_v14 = vpop.f32.mrf.mxu1 }
 0x56c   : > { %v6569_v36 = vpop.f32.mrf.mxu0 }
 0x56d   : > { %v7110_v6 = vmax.f32 %v6982_v56, 0.0  ;;  %v6570_v51 = vadd.f32 %v6569_v36, %v12135_v61  ;;  %v6986_v23 = vpop.f32.mrf.mxu1 }
 0x56e   : > { %v6571_v0 = vpop.f32.mrf.mxu0 }
 0x56f   : > { %7207 = vst.msk [vmem:[%s11371_s28 + $0x2a8] sm:$0xff] %vm7121_vm0, %v7110_v6  ;;  %v6987_v54 = vadd.f32 %v6986_v23, %v6570_v51  ;;  %v6988_v1 = vpop.f32.mrf.mxu1 }
 0x570   : > { %v6572_v10 = vpop.f32.mrf.mxu0 }
 0x571   : > { %v7111_v13 = vmax.f32 %v6987_v54, 0.0  ;;  %v6573_v16 = vadd.f32 %v6572_v10, %v12136_v3  ;;  %v6989_v35 = vpop.f32.mrf.mxu1 }
 0x572   : > { %v6574_v29 = vpop.f32.mrf.mxu0 }
 0x573   : > { %7208 = vst.msk [vmem:[%s11371_s28 + $0x2b0] sm:$0xff] %vm7121_vm0, %v7111_v13  ;;  %v6990_v21 = vadd.f32 %v6989_v35, %v6573_v16  ;;  %v6991_v12 = vpop.f32.mrf.mxu1 }
 0x574   : > { %v6577_v41 = vpop.f32.mrf.mxu0 }
 0x575   : > { %v7112_v53 = vmax.f32 %v6990_v21, 0.0  ;;  %v6578_v8 = vadd.f32 %v6577_v41, %v12137_v62  ;;  %v6994_v4 = vpop.f32.mrf.mxu1 }
 0x576   : > { %v6579_v34 = vpop.f32.mrf.mxu0 }
 0x577   : > { %7209 = vst.msk [vmem:[%s11371_s28 + $0x2b8] sm:$0xff] %vm7121_vm0, %v7112_v53  ;;  %v6995_v9 = vadd.f32 %v6994_v4, %v6578_v8  ;;  %v6996_v7 = vpop.f32.mrf.mxu1 }
 0x578   : > { %v6580_v43 = vpop.f32.mrf.mxu0 }
 0x579   : > { %v7113_v48 = vmax.f32 %v6995_v9, 0.0  ;;  %v6581_v19 = vadd.f32 %v6580_v43, %v12138_v26  ;;  %v6997_v44 = vpop.f32.mrf.mxu1 }
 0x57a   : > { %v6582_v37 = vpop.f32.mrf.mxu0 }
 0x57b   : > { %7210 = vst.msk [vmem:[%s11371_s28 + $0x2c0] sm:$0xff] %vm7121_vm0, %v7113_v48  ;;  %v6998_v18 = vadd.f32 %v6997_v44, %v6581_v19  ;;  %v6999_v24 = vpop.f32.mrf.mxu1 }
 0x57c   : > { %v6585_v33 = vpop.f32.mrf.mxu0 }
 0x57d   : > { %v7114_v57 = vmax.f32 %v6998_v18, 0.0  ;;  %v6586_v52 = vadd.f32 %v6585_v33, %v12139_v31  ;;  %v7002_v2 = vpop.f32.mrf.mxu1 }
 0x57e   : > { %v6587_v42 = vpop.f32.mrf.mxu0 }
 0x57f   : > { %7211 = vst.msk [vmem:[%s11371_s28 + $0x2c8] sm:$0xff] %vm7121_vm0, %v7114_v57  ;;  %v7003_v30 = vadd.f32 %v7002_v2, %v6586_v52  ;;  %v7004_v58 = vpop.f32.mrf.mxu1 }
 0x580   : > { %v6588_v22 = vpop.f32.mrf.mxu0 }
 0x581   : > { %v7115_v40 = vmax.f32 %v7003_v30, 0.0  ;;  %v6589_v32 = vadd.f32 %v6588_v22, %v11328_v63  ;;  %v7005_v28 = vpop.f32.mrf.mxu1 }
 0x582   : > { %v6590_v15 = vpop.f32.mrf.mxu0 }
 0x583   : > { %7212 = vst.msk [vmem:[%s11371_s28 + $0x2d0] sm:$0xff] %vm7121_vm0, %v7115_v40  ;;  %v7006_v46 = vadd.f32 %v7005_v28, %v6589_v32  ;;  %v7007_v27 = vpop.f32.mrf.mxu1 }
 0x584   : > { %v6593_v45 = vpop.f32.mrf.mxu0 }
 0x585   : > { %v7116_v11 = vmax.f32 %v7006_v46, 0.0  ;;  %v6594_v47 = vadd.f32 %v6593_v45, %v11331_v49  ;;  %v7010_v17 = vpop.f32.mrf.mxu1 }
 0x586   : > { %v6595_v60 = vpop.f32.mrf.mxu0 }
 0x587   : > { %7213 = vst.msk [vmem:[%s11371_s28 + $0x2d8] sm:$0xff] %vm7121_vm0, %v7116_v11  ;;  %v7011_v25 = vadd.f32 %v7010_v17, %v6594_v47  ;;  %v7012_v20 = vpop.f32.mrf.mxu1 }
 0x588   : > { %v6596_v39 = vpop.f32.mrf.mxu0 }
 0x589   : > { %v7117_v63 = vmax.f32 %v7011_v25, 0.0  ;;  %v6597_v38 = vadd.f32 %v6596_v39, %v11346_v5  ;;  %v7013_v50 = vpop.f32.mrf.mxu1 }
 0x58a   : > { %v6598_v56 = vpop.f32.mrf.mxu0 }
 0x58b   : > { %7214 = vst.msk [vmem:[%s11371_s28 + $0x2e0] sm:$0xff] %vm7121_vm0, %v7117_v63  ;;  %v7014_v14 = vadd.f32 %v7013_v50, %v6597_v38  ;;  %v7015_v36 = vpop.f32.mrf.mxu1 }
 0x58c   : > { %v6601_v6 = vpop.f32.mrf.mxu0 }
 0x58d   : > { %v7118_v49 = vmax.f32 %v7014_v14, 0.0  ;;  %v6602_v61 = vadd.f32 %v6601_v6, %v11349_v55  ;;  %v7018_v51 = vpop.f32.mrf.mxu1 }
 0x58e   : > { %v6603_v23 = vpop.f32.mrf.mxu0 }
 0x58f   : > { %7215 = vst.msk [vmem:[%s11371_s28 + $0x2e8] sm:$0xff] %vm7121_vm0, %v7118_v49  ;;  %v7019_v0 = vadd.f32 %v7018_v51, %v6602_v61  ;;  %v7020_v54 = vpop.f32.mrf.mxu1 }
 0x590   : > { %v6604_v1 = vpop.f32.mrf.mxu0 }
 0x591   : > { %v7119_v5 = vmax.f32 %v7019_v0, 0.0  ;;  %v6605_v10 = vadd.f32 %v6604_v1, %v11364_v59  ;;  %v7021_v13 = vpop.f32.mrf.mxu1 }
 0x592   : > { %v6606_v3 = vpop.f32.mrf.mxu0 }
 0x593   : > { %7216 = vst.msk [vmem:[%s11371_s28 + $0x2f0] sm:$0xff] %vm7121_vm0, %v7119_v5  ;;  %v7022_v16 = vadd.f32 %v7021_v13, %v6605_v10  ;;  %v7023_v35 = vpop.f32.mrf.mxu1 }
 0x595   : > { %v7120_v29 = vmax.f32 %v7022_v16, 0.0 }
 0x597   : > { %7217 = vst.msk [vmem:[%s11371_s28 + $0x2f8] sm:$0xff] %vm7121_vm0, %v7120_v29 }
 0x598 PF: > { %s13_s14 = sadd.s32 1, %s8801_s14   ;;  %s12140_s12 = smov %s8797_s13 }
 0x599   : > { %p10_p5 = scmp.ge.s32.totalorder %s13_s14, 4   ;;  %s12141_s13 = smov %s12143_s15 }
 0x59b   :  { %12 = sbr.rel (!%p10_p5) target bundleno = 2 (0x2), region = 62 }

</bundles_post_ra>
